<compile_context>
chip_gen: v7x
topology: tpu7x:2x2x1
jax: 0.10.0
libtpu: 0.0.40
codegen_flags: <defaults>
</compile_context>

<pallas_src>
import functools
import math

import jax
import jax.numpy as jnp
from jax.experimental import pallas as pl
from jax.experimental.pallas import tpu as pltpu


def _round_up(n, m):
    return ((n + m - 1) // m) * m


# ----------------------------------------------------------------------------
# Kernel 1: patch-embed matmul + bias + positional embedding + LayerNorm
# ----------------------------------------------------------------------------
def _embed_ln_kernel(p_ref, w_ref, b_ref, pos_ref, g_ref, beta_ref, o_ref):
    # p_ref: [TN, Kp] bf16, w_ref: [Kp, E] bf16, pos: [TN, E] f32, b/g/beta: [1, E]
    y = jnp.dot(p_ref[...], w_ref[...], preferred_element_type=jnp.float32)
    y = y + b_ref[...] + pos_ref[...]
    mu = jnp.mean(y, axis=-1, keepdims=True)
    var = jnp.mean(jnp.square(y - mu), axis=-1, keepdims=True)
    # Note: eps=1e-6 (ViT convention) vs nn.LayerNorm default 1e-5.
    y = (y - mu) * jax.lax.rsqrt(var + 1e-6)
    o_ref[...] = (y * g_ref[...] + beta_ref[...]).astype(o_ref.dtype)


def patch_embed_ln(patches, w, b, pos, gamma, beta, *, batch, tokens):
    M, kp = patches.shape
    e = w.shape[1]
    tn = tokens
    for cand in (256, 128, 64):                  # token tile (multiple of 8)
        if tokens % cand == 0:
            tn = cand
            break
    nt = tokens // tn
    return pl.pallas_call(
        _embed_ln_kernel,
        grid=(batch, nt),
        in_specs=[
            pl.BlockSpec((tn, kp), lambda bi, ti: (bi * nt + ti, 0)),
            pl.BlockSpec((kp, e), lambda bi, ti: (0, 0)),
            pl.BlockSpec((1, e), lambda bi, ti: (0, 0)),
            pl.BlockSpec((tn, e), lambda bi, ti: (ti, 0)),   # pos: shared across batch
            pl.BlockSpec((1, e), lambda bi, ti: (0, 0)),
            pl.BlockSpec((1, e), lambda bi, ti: (0, 0)),
        ],
        out_specs=pl.BlockSpec((tn, e), lambda bi, ti: (bi * nt + ti, 0)),
        out_shape=jax.ShapeDtypeStruct((M, e), jnp.bfloat16),
        compiler_params=pltpu.CompilerParams(
            dimension_semantics=("parallel", "parallel")),
    )(patches, w, b, pos, gamma, beta)


# ----------------------------------------------------------------------------
# Kernel 2: fused Upsample2x(bilinear) + Conv3x3(pad=1) + folded BN + ReLU
# ----------------------------------------------------------------------------
def _stage_kernel(x_ref, w_ref, t_ref, o_ref, lcat_ref, acc_ref, *, H, W, Cin, relu):
    # x_ref: [1, H, W, Cin] bf16      w_ref: [3, 4*Cin, 2*Cout] bf16
    # t_ref: [1, 2*Cout] f32          o_ref: [1, 2*H*W, 2*Cout]
    # lcat_ref: VMEM [2H+2, W, 4*Cin] f32 (row-zero-padded conv operands)
    # acc_ref : VMEM [2H*W, 2*Cout] f32
    x = x_ref[0].astype(jnp.float32)                               # [H, W, Cin]

    # ---- bilinear 2x rows (align_corners=False): clamp via edge replication ----
    xm = jnp.concatenate([x[:1], x[:-1]], axis=0)                  # x[i-1]
    xp = jnp.concatenate([x[1:], x[-1:]], axis=0)                  # x[i+1]
    r_even = 0.75 * x + 0.25 * xm
    r_odd = 0.75 * x + 0.25 * xp
    # row interleave = leading-dim merge (layout-free reshape, last 2 dims untouched)
    z = jnp.stack([r_even, r_odd], axis=1).reshape(2 * H, W, Cin)  # [2H, W, Cin]

    # ---- bilinear 2x columns: keep the two column phases separated ----
    zl = jnp.concatenate([z[:, :1, :], z[:, :-1, :]], axis=1)      # z[:, j-1] clamped
    zr = jnp.concatenate([z[:, 1:, :], z[:, -1:, :]], axis=1)      # z[:, j+1] clamped
    ye = 0.75 * z + 0.25 * zl                                      # Y[:, 2j]
    yo = 0.75 * z + 0.25 * zr                                      # Y[:, 2j+1]
    zero_col = jnp.zeros((2 * H, 1, Cin), jnp.float32)
    yom = jnp.concatenate([zero_col, yo[:, :-1, :]], axis=1)       # Y[:, 2j-1] (0 @ j=0)
    yep = jnp.concatenate([ye[:, 1:, :], zero_col], axis=1)        # Y[:, 2j+2] (0 @ j=W-1)

    # ---- stage row-zero-padded conv operands in VMEM (single lane-dense store) ----
    # Halo rows are re-zeroed every grid step on purpose: with "parallel" batch
    # semantics each core owns its own scratch, so a program_id==0 guard is unsafe.
    lcat_ref[0:1, :, :] = jnp.zeros((1, W, 4 * Cin), jnp.float32)
    lcat_ref[2 * H + 1:2 * H + 2, :, :] = jnp.zeros((1, W, 4 * Cin), jnp.float32)
    lcat_ref[1:2 * H + 1, :, :] = jnp.concatenate([ye, yo, yom, yep], axis=-1)

    # ---- 3x3 conv as 3 row-tap MXU matmuls, accumulated in VMEM scratch ----
    m2 = 2 * H * W
    for dy in range(3):
        rows = lcat_ref[dy:dy + 2 * H, :, :]                       # leading-axis slice
        lhs = rows.reshape(m2, 4 * Cin).astype(jnp.bfloat16)       # layout-trivial (W%8==0)
        t = jnp.dot(lhs, w_ref[dy], preferred_element_type=jnp.float32)
        if dy == 0:
            acc_ref[...] = t
        else:
            acc_ref[...] += t

    # ---- epilogue: folded bias/BN shift (+ ReLU), lane-dense store ----
    out = acc_ref[...] + t_ref[...]
    if relu:
        out = jnp.maximum(out, 0.0)
    o_ref[0] = out.astype(o_ref.dtype)


def head_stage(x, stage):
    # x: [B, H, W, Cin] (channels padded to a multiple of 128)
    B, H, W, Cin = x.shape
    cout2 = stage["w_cat"].shape[-1]           # 2 * padded Cout
    coutp = cout2 // 2
    out_dtype = jnp.bfloat16 if stage["relu"] else jnp.float32
    kern = functools.partial(_stage_kernel, H=H, W=W, Cin=Cin, relu=stage["relu"])
    out2 = pl.pallas_call(
        kern,
        grid=(B,),
        in_specs=[
            pl.BlockSpec((1, H, W, Cin), lambda b: (b, 0, 0, 0)),
            pl.BlockSpec((3, 4 * Cin, cout2), lambda b: (0, 0, 0)),
            pl.BlockSpec((1, cout2), lambda b: (0, 0)),
        ],
        out_specs=pl.BlockSpec((1, 2 * H * W, cout2), lambda b: (b, 0, 0)),
        out_shape=jax.ShapeDtypeStruct((B, 2 * H * W, cout2), out_dtype),
        scratch_shapes=[
            pltpu.VMEM((2 * H + 2, W, 4 * Cin), jnp.float32),
            pltpu.VMEM((2 * H * W, cout2), jnp.float32),
        ],
        compiler_params=pltpu.CompilerParams(
            dimension_semantics=("parallel",)),
    )(x, stage["w_cat"], stage["t2"])
    # Free (contiguity-preserving) reshape: [B, 2H*W, 2*Cout] row-major is exactly
    # [B, 2H, W, 2, Cout] -> interleaved [B, 2H, 2W, Cout].  No transpose pass.
    return out2.reshape(B, 2 * H, 2 * W, coutp)


# ----------------------------------------------------------------------------
# Glue: patchify, parameter init, full forward
# ----------------------------------------------------------------------------
def patchify(x, p):
    # x: [B, C, H, W] NCHW -> [B*N, C*p*p] (same ordering as Conv2d patch embed)
    B, C, H, W = x.shape
    Hp, Wp = H // p, W // p
    x = x.reshape(B, C, Hp, p, Wp, p)
    x = x.transpose(0, 2, 4, 1, 3, 5)
    return x.reshape(B * Hp * Wp, C * p * p)


def init_params(key, *, in_chans, embed, num_classes, patch, num_tokens):
    if not (patch > 0 and patch & (patch - 1) == 0):
        raise ValueError("patch_size must be a positive power of 2.")
    steps = int(math.log2(patch))
    filters = [128 // 2 ** i for i in range(steps - 1)] + [num_classes]

    keys = iter(jax.random.split(key, 8 + 8 * steps))
    kdim = in_chans * patch * patch
    kpad = _round_up(kdim, 128)

    w_embed = 0.02 * jax.random.normal(next(keys), (kdim, embed), jnp.float32)
    w_embed = jnp.pad(w_embed, ((0, kpad - kdim), (0, 0)))
    params = {
        "patch_size": patch, "embed": embed, "num_classes": num_classes,
        "kdim": kdim, "kpad": kpad,
        "w_embed": w_embed.astype(jnp.bfloat16),
        "b_embed": 0.01 * jax.random.normal(next(keys), (1, embed), jnp.float32),
        "pos": 0.02 * jax.random.normal(next(keys), (num_tokens, embed), jnp.float32),
        "ln_g": 1.0 + 0.1 * jax.random.normal(next(keys), (1, embed), jnp.float32),
        "ln_b": 0.01 * jax.random.normal(next(keys), (1, embed), jnp.float32),
    }

    stages = []
    cin_l = cin_p = embed            # embed must be a multiple of 128 here
    for i, cout_l in enumerate(filters):
        cout_p = _round_up(cout_l, 128)
        w = (1.0 / math.sqrt(9 * cin_l)) * jax.random.normal(
            next(keys), (3, 3, cin_l, cout_l), jnp.float32)
        b = 0.01 * jax.random.normal(next(keys), (cout_l,), jnp.float32)
        if i < steps - 1:
            # fold eval-mode BatchNorm into the conv weights / bias
            gamma = 1.0 + 0.1 * jax.random.normal(next(keys), (cout_l,), jnp.float32)
            beta = 0.05 * jax.random.normal(next(keys), (cout_l,), jnp.float32)
            rmean = 0.1 * jax.random.normal(next(keys), (cout_l,), jnp.float32)
            rvar = 1.0 + 0.1 * jnp.abs(jax.random.normal(next(keys), (cout_l,), jnp.float32))
            scale = gamma / jnp.sqrt(rvar + 1e-5)
            w = w * scale[None, None, None, :]
            t = b * scale + (beta - rmean * scale)
            relu = True
        else:
            t = b
            relu = False
        # pad channels to multiples of 128 so every kernel tensor is lane-dense
        w = jnp.pad(w, ((0, 0), (0, 0), (0, cin_p - cin_l), (0, cout_p - cout_l)))
        t = jnp.pad(t, ((0, cout_p - cout_l),))
        # fused-kernel weight layout: [3 (row tap), 4*Cin, 2*Cout]
        #   lhs channel blocks: (Ye, Yo, Yo[j-1], Ye[j+1]); out blocks: (even, odd)
        zero = jnp.zeros((3, cin_p, cout_p), jnp.float32)
        w_even = jnp.concatenate([w[:, 1], w[:, 2], w[:, 0], zero], axis=1)
        w_odd = jnp.concatenate([w[:, 0], w[:, 1], zero, w[:, 2]], axis=1)
        w_cat = jnp.concatenate([w_even, w_odd], axis=2).astype(jnp.bfloat16)
        t2 = jnp.concatenate([t, t])[None, :]                      # [1, 2*Cout] f32
        stages.append({"w_cat": w_cat, "t2": t2, "relu": relu, "cout": cout_p})
        cin_l, cin_p = cout_l, cout_p
    params["stages"] = stages
    return params


def vit_segmentor_forward(params, x):
    # x: [B, C, H, W] (NCHW, like the PyTorch module) -> [B, num_classes, H, W]
    B, C, H, W = x.shape
    p = params["patch_size"]
    E = params["embed"]
    Hm, Wm = H // p, W // p
    N = Hm * Wm

    # --- synthetic encoder.get_intermediate_layers(x, norm=True)[0] ---
    patches = patchify(x, p)                                         # [B*N, kdim]
    patches = jnp.pad(patches, ((0, 0), (0, params["kpad"] - params["kdim"])))
    patches = patches.astype(jnp.bfloat16)
    tok = patch_embed_ln(patches, params["w_embed"], params["b_embed"],
                         params["pos"], params["ln_g"], params["ln_b"],
                         batch=B, tokens=N)                          # [B*N, E] bf16

    # permute(0,2,1).reshape(B, E, Hm, Wm) in NCHW == NHWC [B, Hm, Wm, E]
    h = tok.reshape(B, Hm, Wm, E)

    # --- ConvHead: fused (Upsample2x -> Conv3x3 [-> BN -> ReLU]) per stage ---
    for stage in params["stages"]:
        h = head_stage(h, stage)

    # drop padded classes, back to NCHW
    out = h[..., : params["num_classes"]].astype(jnp.float32)
    return out.transpose(0, 3, 1, 2)


if __name__ == "__main__":
    key = jax.random.PRNGKey(0)
    kx, kp = jax.random.split(key)

    B, Cin, H, W = 2, 3, 32, 32
    patch, embed, num_classes = 4, 128, 5

    x = jax.random.normal(kx, (B, Cin, H, W), jnp.float32)
    params = init_params(kp, in_chans=Cin, embed=embed, num_classes=num_classes,
                         patch=patch, num_tokens=(H // patch) * (W // patch))

    fwd = jax.jit(lambda inp: vit_segmentor_forward(params, inp))
    out = jax.block_until_ready(fwd(x))
    assert out.shape == (B, num_classes, H, W), out.shape
    assert bool(jnp.all(jnp.isfinite(out)))
    print("KERNEL_OK")
</pallas_src>

<mosaic_0001>
module attributes {stable_mosaic.version = 11 : i64} {
  func.func @_embed_ln_kernel(%arg0: i32, %arg1: i32, %arg2: memref<64x128xbf16, #tpu.memory_space<vmem>>, %arg3: memref<128x128xbf16, #tpu.memory_space<vmem>>, %arg4: memref<1x128xf32, #tpu.memory_space<vmem>>, %arg5: memref<64x128xf32, #tpu.memory_space<vmem>>, %arg6: memref<1x128xf32, #tpu.memory_space<vmem>>, %arg7: memref<1x128xf32, #tpu.memory_space<vmem>>, %arg8: memref<64x128xbf16, #tpu.memory_space<vmem>>) attributes {dimension_semantics = [#tpu.dimension_semantics<parallel>, #tpu.dimension_semantics<parallel>], iteration_bounds = array<i64: 2, 1>, scalar_prefetch = 0 : i64, scratch_operands = 0 : i64, tpu.core_type = #tpu.core_type<tc>, window_params = [{transform_indices = @transform_0, window_bounds = array<i64: 64, 128>}, {pipeline_mode = #tpu.pipeline_mode<synchronous>, transform_indices = @transform_1, window_bounds = array<i64: 128, 128>}, {pipeline_mode = #tpu.pipeline_mode<synchronous>, transform_indices = @transform_2, window_bounds = array<i64: 1, 128>}, {transform_indices = @transform_3, window_bounds = array<i64: 64, 128>}, {pipeline_mode = #tpu.pipeline_mode<synchronous>, transform_indices = @transform_4, window_bounds = array<i64: 1, 128>}, {pipeline_mode = #tpu.pipeline_mode<synchronous>, transform_indices = @transform_5, window_bounds = array<i64: 1, 128>}, {transform_indices = @transform_6, window_bounds = array<i64: 64, 128>}]} {
    %c0 = arith.constant 0 : index
    %c0_0 = arith.constant 0 : index
    %0 = vector.load %arg2[%c0, %c0_0] : memref<64x128xbf16, #tpu.memory_space<vmem>>, vector<64x128xbf16>
    %c0_1 = arith.constant 0 : index
    %c0_2 = arith.constant 0 : index
    %1 = vector.load %arg3[%c0_1, %c0_2] : memref<128x128xbf16, #tpu.memory_space<vmem>>, vector<128x128xbf16>
    %cst = arith.constant dense<0.000000e+00> : vector<64x128xf32>
    %2 = tpu.matmul %0, %1, %cst {dimension_numbers = #tpu.dot_dimension_numbers<[1], [0], [0], [1], [0, 0, 1, 1], [], []>} : vector<64x128xbf16>, vector<128x128xbf16>, vector<64x128xf32> -> vector<64x128xf32>
    %c0_3 = arith.constant 0 : index
    %c0_4 = arith.constant 0 : index
    %3 = vector.load %arg4[%c0_3, %c0_4] : memref<1x128xf32, #tpu.memory_space<vmem>>, vector<1x128xf32>
    %4 = vector.broadcast %3 : vector<1x128xf32> to vector<64x128xf32>
    %5 = arith.addf %2, %4 : vector<64x128xf32>
    %c0_5 = arith.constant 0 : index
    %c0_6 = arith.constant 0 : index
    %6 = vector.load %arg5[%c0_5, %c0_6] : memref<64x128xf32, #tpu.memory_space<vmem>>, vector<64x128xf32>
    %7 = arith.addf %5, %6 : vector<64x128xf32>
    %cst_7 = arith.constant dense<0.000000e+00> : vector<64xf32>
    %8 = vector.multi_reduction <add>, %7, %cst_7 [1] : vector<64x128xf32> to vector<64xf32>
    %9 = vector.shape_cast %8 : vector<64xf32> to vector<64x1xf32>
    %cst_8 = arith.constant 1.280000e+02 : f32
    %10 = vector.broadcast %cst_8 : f32 to vector<64x1xf32>
    %11 = arith.divf %9, %10 : vector<64x1xf32>
    %12 = vector.broadcast %11 : vector<64x1xf32> to vector<64x128xf32>
    %13 = arith.subf %7, %12 : vector<64x128xf32>
    %14 = arith.mulf %13, %13 : vector<64x128xf32>
    %cst_9 = arith.constant dense<0.000000e+00> : vector<64xf32>
    %15 = vector.multi_reduction <add>, %14, %cst_9 [1] : vector<64x128xf32> to vector<64xf32>
    %16 = vector.shape_cast %15 : vector<64xf32> to vector<64x1xf32>
    %cst_10 = arith.constant 1.280000e+02 : f32
    %17 = vector.broadcast %cst_10 : f32 to vector<64x1xf32>
    %18 = arith.divf %16, %17 : vector<64x1xf32>
    %19 = vector.broadcast %11 : vector<64x1xf32> to vector<64x128xf32>
    %20 = arith.subf %7, %19 : vector<64x128xf32>
    %cst_11 = arith.constant 9.99999997E-7 : f32
    %21 = vector.broadcast %cst_11 : f32 to vector<64x1xf32>
    %22 = arith.addf %18, %21 : vector<64x1xf32>
    %23 = math.rsqrt %22 : vector<64x1xf32>
    %24 = vector.broadcast %23 : vector<64x1xf32> to vector<64x128xf32>
    %25 = arith.mulf %20, %24 : vector<64x128xf32>
    %c0_12 = arith.constant 0 : index
    %c0_13 = arith.constant 0 : index
    %26 = vector.load %arg6[%c0_12, %c0_13] : memref<1x128xf32, #tpu.memory_space<vmem>>, vector<1x128xf32>
    %27 = vector.broadcast %26 : vector<1x128xf32> to vector<64x128xf32>
    %28 = arith.mulf %25, %27 : vector<64x128xf32>
    %c0_14 = arith.constant 0 : index
    %c0_15 = arith.constant 0 : index
    %29 = vector.load %arg7[%c0_14, %c0_15] : memref<1x128xf32, #tpu.memory_space<vmem>>, vector<1x128xf32>
    %30 = vector.broadcast %29 : vector<1x128xf32> to vector<64x128xf32>
    %31 = arith.addf %28, %30 : vector<64x128xf32>
    %32 = arith.truncf %31 : vector<64x128xf32> to vector<64x128xbf16>
    %c0_16 = arith.constant 0 : index
    %c0_17 = arith.constant 0 : index
    %33 = vector.load %arg8[%c0_16, %c0_17] : memref<64x128xbf16, #tpu.memory_space<vmem>>, vector<64x128xbf16>
    tpu.vector_store %arg8[%c0_16, %c0_17], %32 {strides = array<i32>} : memref<64x128xbf16, #tpu.memory_space<vmem>>, vector<64x128xbf16>,
    return
  }
  func.func @transform_0(%arg0: i32, %arg1: i32) -> (i32, i32) {
    %c1_i32 = arith.constant 1 : i32
    %0 = arith.muli %arg0, %c1_i32 : i32
    %1 = arith.addi %0, %arg1 : i32
    %c0_i32 = arith.constant 0 : i32
    %c0_i32_0 = arith.constant 0 : i32
    return %1, %c0_i32 : i32, i32
  }
  func.func @transform_1(%arg0: i32, %arg1: i32) -> (i32, i32) {
    %c0_i32 = arith.constant 0 : i32
    %c0_i32_0 = arith.constant 0 : i32
    %c0_i32_1 = arith.constant 0 : i32
    return %c0_i32, %c0_i32_0 : i32, i32
  }
  func.func @transform_2(%arg0: i32, %arg1: i32) -> (i32, i32) {
    %c0_i32 = arith.constant 0 : i32
    %c0_i32_0 = arith.constant 0 : i32
    %c0_i32_1 = arith.constant 0 : i32
    return %c0_i32, %c0_i32_0 : i32, i32
  }
  func.func @transform_3(%arg0: i32, %arg1: i32) -> (i32, i32) {
    %c0_i32 = arith.constant 0 : i32
    %c0_i32_0 = arith.constant 0 : i32
    return %arg1, %c0_i32 : i32, i32
  }
  func.func @transform_4(%arg0: i32, %arg1: i32) -> (i32, i32) {
    %c0_i32 = arith.constant 0 : i32
    %c0_i32_0 = arith.constant 0 : i32
    %c0_i32_1 = arith.constant 0 : i32
    return %c0_i32, %c0_i32_0 : i32, i32
  }
  func.func @transform_5(%arg0: i32, %arg1: i32) -> (i32, i32) {
    %c0_i32 = arith.constant 0 : i32
    %c0_i32_0 = arith.constant 0 : i32
    %c0_i32_1 = arith.constant 0 : i32
    return %c0_i32, %c0_i32_0 : i32, i32
  }
  func.func @transform_6(%arg0: i32, %arg1: i32) -> (i32, i32) {
    %c1_i32 = arith.constant 1 : i32
    %0 = arith.muli %arg0, %c1_i32 : i32
    %1 = arith.addi %0, %arg1 : i32
    %c0_i32 = arith.constant 0 : i32
    %c0_i32_0 = arith.constant 0 : i32
    return %1, %c0_i32 : i32, i32
  }
}

module attributes {stable_mosaic.version = 11 : i64} {
  func.func @_stage_kernel(%arg0: i32, %arg1: memref<1x8x8x128xbf16, #tpu.memory_space<vmem>>, %arg2: memref<3x512x256xbf16, #tpu.memory_space<vmem>>, %arg3: memref<1x256xf32, #tpu.memory_space<vmem>>, %arg4: memref<1x128x256xbf16, #tpu.memory_space<vmem>>, %arg5: memref<18x8x512xf32, #tpu.memory_space<vmem>>, %arg6: memref<128x256xf32, #tpu.memory_space<vmem>>) attributes {dimension_semantics = [#tpu.dimension_semantics<parallel>], iteration_bounds = array<i64: 2>, scalar_prefetch = 0 : i64, scratch_operands = 2 : i64, tpu.core_type = #tpu.core_type<tc>, window_params = [{transform_indices = @transform_0, window_bounds = array<i64: 1, 8, 8, 128>}, {pipeline_mode = #tpu.pipeline_mode<synchronous>, transform_indices = @transform_1, window_bounds = array<i64: 3, 512, 256>}, {pipeline_mode = #tpu.pipeline_mode<synchronous>, transform_indices = @transform_2, window_bounds = array<i64: 1, 256>}, {transform_indices = @transform_3, window_bounds = array<i64: 1, 128, 256>}]} {
    %c0 = arith.constant 0 : index
    %c0_0 = arith.constant 0 : index
    %c0_1 = arith.constant 0 : index
    %c0_2 = arith.constant 0 : index
    %0 = vector.load %arg1[%c0, %c0_0, %c0_1, %c0_2] : memref<1x8x8x128xbf16, #tpu.memory_space<vmem>>, vector<1x8x8x128xbf16>
    %1 = vector.shape_cast %0 : vector<1x8x8x128xbf16> to vector<8x8x128xbf16>
    %2 = arith.extf %1 : vector<8x8x128xbf16> to vector<8x8x128xf32>
    %3 = vector.extract_strided_slice %2 {offsets = [0, 0, 0], sizes = [1, 8, 128], strides = [1, 1, 1]} : vector<8x8x128xf32> to vector<1x8x128xf32>
    %4 = vector.extract_strided_slice %2 {offsets = [0, 0, 0], sizes = [7, 8, 128], strides = [1, 1, 1]} : vector<8x8x128xf32> to vector<7x8x128xf32>
    %5 = tpu.concatenate %3, %4 in 0 : vector<1x8x128xf32>, vector<7x8x128xf32> -> vector<8x8x128xf32>
    %6 = vector.extract_strided_slice %2 {offsets = [1, 0, 0], sizes = [7, 8, 128], strides = [1, 1, 1]} : vector<8x8x128xf32> to vector<7x8x128xf32>
    %7 = vector.extract_strided_slice %2 {offsets = [7, 0, 0], sizes = [1, 8, 128], strides = [1, 1, 1]} : vector<8x8x128xf32> to vector<1x8x128xf32>
    %8 = tpu.concatenate %6, %7 in 0 : vector<7x8x128xf32>, vector<1x8x128xf32> -> vector<8x8x128xf32>
    %cst = arith.constant 7.500000e-01 : f32
    %9 = vector.broadcast %cst : f32 to vector<8x8x128xf32>
    %10 = arith.mulf %9, %2 : vector<8x8x128xf32>
    %cst_3 = arith.constant 2.500000e-01 : f32
    %11 = vector.broadcast %cst_3 : f32 to vector<8x8x128xf32>
    %12 = arith.mulf %11, %5 : vector<8x8x128xf32>
    %13 = arith.addf %10, %12 : vector<8x8x128xf32>
    %cst_4 = arith.constant 7.500000e-01 : f32
    %14 = vector.broadcast %cst_4 : f32 to vector<8x8x128xf32>
    %15 = arith.mulf %14, %2 : vector<8x8x128xf32>
    %cst_5 = arith.constant 2.500000e-01 : f32
    %16 = vector.broadcast %cst_5 : f32 to vector<8x8x128xf32>
    %17 = arith.mulf %16, %8 : vector<8x8x128xf32>
    %18 = arith.addf %15, %17 : vector<8x8x128xf32>
    %19 = vector.shape_cast %13 : vector<8x8x128xf32> to vector<8x1x8x128xf32>
    %20 = vector.shape_cast %18 : vector<8x8x128xf32> to vector<8x1x8x128xf32>
    %21 = tpu.concatenate %19, %20 in 1 : vector<8x1x8x128xf32>, vector<8x1x8x128xf32> -> vector<8x2x8x128xf32>
    %22 = vector.shape_cast %21 : vector<8x2x8x128xf32> to vector<16x8x128xf32>
    %23 = vector.extract_strided_slice %22 {offsets = [0, 0, 0], sizes = [16, 1, 128], strides = [1, 1, 1]} : vector<16x8x128xf32> to vector<16x1x128xf32>
    %24 = vector.extract_strided_slice %22 {offsets = [0, 0, 0], sizes = [16, 7, 128], strides = [1, 1, 1]} : vector<16x8x128xf32> to vector<16x7x128xf32>
    %25 = tpu.concatenate %23, %24 in 1 : vector<16x1x128xf32>, vector<16x7x128xf32> -> vector<16x8x128xf32>
    %26 = vector.extract_strided_slice %22 {offsets = [0, 1, 0], sizes = [16, 7, 128], strides = [1, 1, 1]} : vector<16x8x128xf32> to vector<16x7x128xf32>
    %27 = vector.extract_strided_slice %22 {offsets = [0, 7, 0], sizes = [16, 1, 128], strides = [1, 1, 1]} : vector<16x8x128xf32> to vector<16x1x128xf32>
    %28 = tpu.concatenate %26, %27 in 1 : vector<16x7x128xf32>, vector<16x1x128xf32> -> vector<16x8x128xf32>
    %cst_6 = arith.constant 7.500000e-01 : f32
    %29 = vector.broadcast %cst_6 : f32 to vector<16x8x128xf32>
    %30 = arith.mulf %29, %22 : vector<16x8x128xf32>
    %cst_7 = arith.constant 2.500000e-01 : f32
    %31 = vector.broadcast %cst_7 : f32 to vector<16x8x128xf32>
    %32 = arith.mulf %31, %25 : vector<16x8x128xf32>
    %33 = arith.addf %30, %32 : vector<16x8x128xf32>
    %cst_8 = arith.constant 7.500000e-01 : f32
    %34 = vector.broadcast %cst_8 : f32 to vector<16x8x128xf32>
    %35 = arith.mulf %34, %22 : vector<16x8x128xf32>
    %cst_9 = arith.constant 2.500000e-01 : f32
    %36 = vector.broadcast %cst_9 : f32 to vector<16x8x128xf32>
    %37 = arith.mulf %36, %28 : vector<16x8x128xf32>
    %38 = arith.addf %35, %37 : vector<16x8x128xf32>
    %cst_10 = arith.constant 0.000000e+00 : f32
    %39 = vector.broadcast %cst_10 : f32 to vector<16x1x128xf32>
    %40 = vector.extract_strided_slice %38 {offsets = [0, 0, 0], sizes = [16, 7, 128], strides = [1, 1, 1]} : vector<16x8x128xf32> to vector<16x7x128xf32>
    %41 = tpu.concatenate %39, %40 in 1 : vector<16x1x128xf32>, vector<16x7x128xf32> -> vector<16x8x128xf32>
    %42 = vector.extract_strided_slice %33 {offsets = [0, 1, 0], sizes = [16, 7, 128], strides = [1, 1, 1]} : vector<16x8x128xf32> to vector<16x7x128xf32>
    %43 = tpu.concatenate %42, %39 in 1 : vector<16x7x128xf32>, vector<16x1x128xf32> -> vector<16x8x128xf32>
    %cst_11 = arith.constant 0.000000e+00 : f32
    %44 = vector.broadcast %cst_11 : f32 to vector<1x8x512xf32>
    %c0_12 = arith.constant 0 : index
    %c0_13 = arith.constant 0 : index
    %c0_14 = arith.constant 0 : index
    %45 = vector.load %arg5[%c0_12, %c0_13, %c0_14] : memref<18x8x512xf32, #tpu.memory_space<vmem>>, vector<1x8x512xf32>
    tpu.vector_store %arg5[%c0_12, %c0_13, %c0_14], %44 {strides = array<i32>} : memref<18x8x512xf32, #tpu.memory_space<vmem>>, vector<1x8x512xf32>,
    %cst_15 = arith.constant 0.000000e+00 : f32
    %46 = vector.broadcast %cst_15 : f32 to vector<1x8x512xf32>
    %c17 = arith.constant 17 : index
    %c0_16 = arith.constant 0 : index
    %c0_17 = arith.constant 0 : index
    %47 = vector.load %arg5[%c17, %c0_16, %c0_17] : memref<18x8x512xf32, #tpu.memory_space<vmem>>, vector<1x8x512xf32>
    tpu.vector_store %arg5[%c17, %c0_16, %c0_17], %46 {strides = array<i32>} : memref<18x8x512xf32, #tpu.memory_space<vmem>>, vector<1x8x512xf32>,
    %48 = tpu.concatenate %33, %38, %41, %43 in 2 : vector<16x8x128xf32>, vector<16x8x128xf32>, vector<16x8x128xf32>, vector<16x8x128xf32> -> vector<16x8x512xf32>
    %c1 = arith.constant 1 : index
    %c0_18 = arith.constant 0 : index
    %c0_19 = arith.constant 0 : index
    %49 = vector.load %arg5[%c1, %c0_18, %c0_19] : memref<18x8x512xf32, #tpu.memory_space<vmem>>, vector<16x8x512xf32>
    tpu.vector_store %arg5[%c1, %c0_18, %c0_19], %48 {strides = array<i32>} : memref<18x8x512xf32, #tpu.memory_space<vmem>>, vector<16x8x512xf32>,
    %c0_20 = arith.constant 0 : index
    %c0_21 = arith.constant 0 : index
    %c0_22 = arith.constant 0 : index
    %50 = vector.load %arg5[%c0_20, %c0_21, %c0_22] : memref<18x8x512xf32, #tpu.memory_space<vmem>>, vector<16x8x512xf32>
    %51 = vector.shape_cast %50 : vector<16x8x512xf32> to vector<128x512xf32>
    %52 = arith.truncf %51 : vector<128x512xf32> to vector<128x512xbf16>
    %c0_23 = arith.constant 0 : index
    %c0_24 = arith.constant 0 : index
    %c0_25 = arith.constant 0 : index
    %53 = vector.load %arg2[%c0_23, %c0_24, %c0_25] : memref<3x512x256xbf16, #tpu.memory_space<vmem>>, vector<1x512x256xbf16>
    %54 = vector.shape_cast %53 : vector<1x512x256xbf16> to vector<512x256xbf16>
    %cst_26 = arith.constant dense<0.000000e+00> : vector<128x256xf32>
    %55 = tpu.matmul %52, %54, %cst_26 {dimension_numbers = #tpu.dot_dimension_numbers<[1], [0], [0], [1], [0, 0, 1, 1], [], []>} : vector<128x512xbf16>, vector<512x256xbf16>, vector<128x256xf32> -> vector<128x256xf32>
    %c0_27 = arith.constant 0 : index
    %c0_28 = arith.constant 0 : index
    %56 = vector.load %arg6[%c0_27, %c0_28] : memref<128x256xf32, #tpu.memory_space<vmem>>, vector<128x256xf32>
    tpu.vector_store %arg6[%c0_27, %c0_28], %55 {strides = array<i32>} : memref<128x256xf32, #tpu.memory_space<vmem>>, vector<128x256xf32>,
    %c1_29 = arith.constant 1 : index
    %c0_30 = arith.constant 0 : index
    %c0_31 = arith.constant 0 : index
    %57 = vector.load %arg5[%c1_29, %c0_30, %c0_31] : memref<18x8x512xf32, #tpu.memory_space<vmem>>, vector<16x8x512xf32>
    %58 = vector.shape_cast %57 : vector<16x8x512xf32> to vector<128x512xf32>
    %59 = arith.truncf %58 : vector<128x512xf32> to vector<128x512xbf16>
    %c1_32 = arith.constant 1 : index
    %c0_33 = arith.constant 0 : index
    %c0_34 = arith.constant 0 : index
    %60 = vector.load %arg2[%c1_32, %c0_33, %c0_34] : memref<3x512x256xbf16, #tpu.memory_space<vmem>>, vector<1x512x256xbf16>
    %61 = vector.shape_cast %60 : vector<1x512x256xbf16> to vector<512x256xbf16>
    %cst_35 = arith.constant dense<0.000000e+00> : vector<128x256xf32>
    %62 = tpu.matmul %59, %61, %cst_35 {dimension_numbers = #tpu.dot_dimension_numbers<[1], [0], [0], [1], [0, 0, 1, 1], [], []>} : vector<128x512xbf16>, vector<512x256xbf16>, vector<128x256xf32> -> vector<128x256xf32>
    %c0_36 = arith.constant 0 : index
    %c0_37 = arith.constant 0 : index
    %63 = vector.load %arg6[%c0_36, %c0_37] : memref<128x256xf32, #tpu.memory_space<vmem>>, vector<128x256xf32>
    %64 = arith.addf %63, %62 : vector<128x256xf32>
    %c0_38 = arith.constant 0 : index
    %c0_39 = arith.constant 0 : index
    %65 = vector.load %arg6[%c0_38, %c0_39] : memref<128x256xf32, #tpu.memory_space<vmem>>, vector<128x256xf32>
    tpu.vector_store %arg6[%c0_38, %c0_39], %64 {strides = array<i32>} : memref<128x256xf32, #tpu.memory_space<vmem>>, vector<128x256xf32>,
    %c2 = arith.constant 2 : index
    %c0_40 = arith.constant 0 : index
    %c0_41 = arith.constant 0 : index
    %66 = vector.load %arg5[%c2, %c0_40, %c0_41] : memref<18x8x512xf32, #tpu.memory_space<vmem>>, vector<16x8x512xf32>
    %67 = vector.shape_cast %66 : vector<16x8x512xf32> to vector<128x512xf32>
    %68 = arith.truncf %67 : vector<128x512xf32> to vector<128x512xbf16>
    %c2_42 = arith.constant 2 : index
    %c0_43 = arith.constant 0 : index
    %c0_44 = arith.constant 0 : index
    %69 = vector.load %arg2[%c2_42, %c0_43, %c0_44] : memref<3x512x256xbf16, #tpu.memory_space<vmem>>, vector<1x512x256xbf16>
    %70 = vector.shape_cast %69 : vector<1x512x256xbf16> to vector<512x256xbf16>
    %cst_45 = arith.constant dense<0.000000e+00> : vector<128x256xf32>
    %71 = tpu.matmul %68, %70, %cst_45 {dimension_numbers = #tpu.dot_dimension_numbers<[1], [0], [0], [1], [0, 0, 1, 1], [], []>} : vector<128x512xbf16>, vector<512x256xbf16>, vector<128x256xf32> -> vector<128x256xf32>
    %c0_46 = arith.constant 0 : index
    %c0_47 = arith.constant 0 : index
    %72 = vector.load %arg6[%c0_46, %c0_47] : memref<128x256xf32, #tpu.memory_space<vmem>>, vector<128x256xf32>
    %73 = arith.addf %72, %71 : vector<128x256xf32>
    %c0_48 = arith.constant 0 : index
    %c0_49 = arith.constant 0 : index
    %74 = vector.load %arg6[%c0_48, %c0_49] : memref<128x256xf32, #tpu.memory_space<vmem>>, vector<128x256xf32>
    tpu.vector_store %arg6[%c0_48, %c0_49], %73 {strides = array<i32>} : memref<128x256xf32, #tpu.memory_space<vmem>>, vector<128x256xf32>,
    %c0_50 = arith.constant 0 : index
    %c0_51 = arith.constant 0 : index
    %75 = vector.load %arg6[%c0_50, %c0_51] : memref<128x256xf32, #tpu.memory_space<vmem>>, vector<128x256xf32>
    %c0_52 = arith.constant 0 : index
    %c0_53 = arith.constant 0 : index
    %76 = vector.load %arg3[%c0_52, %c0_53] : memref<1x256xf32, #tpu.memory_space<vmem>>, vector<1x256xf32>
    %77 = vector.broadcast %76 : vector<1x256xf32> to vector<128x256xf32>
    %78 = arith.addf %75, %77 : vector<128x256xf32>
    %cst_54 = arith.constant 0.000000e+00 : f32
    %79 = vector.broadcast %cst_54 : f32 to vector<128x256xf32>
    %80 = arith.maximumf %78, %79 : vector<128x256xf32>
    %81 = arith.truncf %80 : vector<128x256xf32> to vector<128x256xbf16>
    %c0_55 = arith.constant 0 : index
    %c0_56 = arith.constant 0 : index
    %c0_57 = arith.constant 0 : index
    %82 = vector.load %arg4[%c0_55, %c0_56, %c0_57] : memref<1x128x256xbf16, #tpu.memory_space<vmem>>, vector<1x128x256xbf16>
    %83 = vector.shape_cast %82 : vector<1x128x256xbf16> to vector<128x256xbf16>
    %84 = vector.shape_cast %81 : vector<128x256xbf16> to vector<1x128x256xbf16>
    tpu.vector_store %arg4[%c0_55, %c0_56, %c0_57], %84 {strides = array<i32>} : memref<1x128x256xbf16, #tpu.memory_space<vmem>>, vector<1x128x256xbf16>,
    return
  }
  func.func @transform_0(%arg0: i32) -> (i32, i32, i32, i32) {
    %c0_i32 = arith.constant 0 : i32
    %c0_i32_0 = arith.constant 0 : i32
    %c0_i32_1 = arith.constant 0 : i32
    %c0_i32_2 = arith.constant 0 : i32
    return %arg0, %c0_i32, %c0_i32_0, %c0_i32_1 : i32, i32, i32, i32
  }
  func.func @transform_1(%arg0: i32) -> (i32, i32, i32) {
    %c0_i32 = arith.constant 0 : i32
    %c0_i32_0 = arith.constant 0 : i32
    %c0_i32_1 = arith.constant 0 : i32
    %c0_i32_2 = arith.constant 0 : i32
    return %c0_i32, %c0_i32_0, %c0_i32_1 : i32, i32, i32
  }
  func.func @transform_2(%arg0: i32) -> (i32, i32) {
    %c0_i32 = arith.constant 0 : i32
    %c0_i32_0 = arith.constant 0 : i32
    %c0_i32_1 = arith.constant 0 : i32
    return %c0_i32, %c0_i32_0 : i32, i32
  }
  func.func @transform_3(%arg0: i32) -> (i32, i32, i32) {
    %c0_i32 = arith.constant 0 : i32
    %c0_i32_0 = arith.constant 0 : i32
    %c0_i32_1 = arith.constant 0 : i32
    return %arg0, %c0_i32, %c0_i32_0 : i32, i32, i32
  }
}

module attributes {stable_mosaic.version = 11 : i64} {
  func.func @_stage_kernel(%arg0: i32, %arg1: memref<1x16x16x128xbf16, #tpu.memory_space<vmem>>, %arg2: memref<3x512x256xbf16, #tpu.memory_space<vmem>>, %arg3: memref<1x256xf32, #tpu.memory_space<vmem>>, %arg4: memref<1x512x256xf32, #tpu.memory_space<vmem>>, %arg5: memref<34x16x512xf32, #tpu.memory_space<vmem>>, %arg6: memref<512x256xf32, #tpu.memory_space<vmem>>) attributes {dimension_semantics = [#tpu.dimension_semantics<parallel>], iteration_bounds = array<i64: 2>, scalar_prefetch = 0 : i64, scratch_operands = 2 : i64, tpu.core_type = #tpu.core_type<tc>, window_params = [{transform_indices = @transform_0, window_bounds = array<i64: 1, 16, 16, 128>}, {pipeline_mode = #tpu.pipeline_mode<synchronous>, transform_indices = @transform_1, window_bounds = array<i64: 3, 512, 256>}, {pipeline_mode = #tpu.pipeline_mode<synchronous>, transform_indices = @transform_2, window_bounds = array<i64: 1, 256>}, {transform_indices = @transform_3, window_bounds = array<i64: 1, 512, 256>}]} {
    %c0 = arith.constant 0 : index
    %c0_0 = arith.constant 0 : index
    %c0_1 = arith.constant 0 : index
    %c0_2 = arith.constant 0 : index
    %0 = vector.load %arg1[%c0, %c0_0, %c0_1, %c0_2] : memref<1x16x16x128xbf16, #tpu.memory_space<vmem>>, vector<1x16x16x128xbf16>
    %1 = vector.shape_cast %0 : vector<1x16x16x128xbf16> to vector<16x16x128xbf16>
    %2 = arith.extf %1 : vector<16x16x128xbf16> to vector<16x16x128xf32>
    %3 = vector.extract_strided_slice %2 {offsets = [0, 0, 0], sizes = [1, 16, 128], strides = [1, 1, 1]} : vector<16x16x128xf32> to vector<1x16x128xf32>
    %4 = vector.extract_strided_slice %2 {offsets = [0, 0, 0], sizes = [15, 16, 128], strides = [1, 1, 1]} : vector<16x16x128xf32> to vector<15x16x128xf32>
    %5 = tpu.concatenate %3, %4 in 0 : vector<1x16x128xf32>, vector<15x16x128xf32> -> vector<16x16x128xf32>
    %6 = vector.extract_strided_slice %2 {offsets = [1, 0, 0], sizes = [15, 16, 128], strides = [1, 1, 1]} : vector<16x16x128xf32> to vector<15x16x128xf32>
    %7 = vector.extract_strided_slice %2 {offsets = [15, 0, 0], sizes = [1, 16, 128], strides = [1, 1, 1]} : vector<16x16x128xf32> to vector<1x16x128xf32>
    %8 = tpu.concatenate %6, %7 in 0 : vector<15x16x128xf32>, vector<1x16x128xf32> -> vector<16x16x128xf32>
    %cst = arith.constant 7.500000e-01 : f32
    %9 = vector.broadcast %cst : f32 to vector<16x16x128xf32>
    %10 = arith.mulf %9, %2 : vector<16x16x128xf32>
    %cst_3 = arith.constant 2.500000e-01 : f32
    %11 = vector.broadcast %cst_3 : f32 to vector<16x16x128xf32>
    %12 = arith.mulf %11, %5 : vector<16x16x128xf32>
    %13 = arith.addf %10, %12 : vector<16x16x128xf32>
    %cst_4 = arith.constant 7.500000e-01 : f32
    %14 = vector.broadcast %cst_4 : f32 to vector<16x16x128xf32>
    %15 = arith.mulf %14, %2 : vector<16x16x128xf32>
    %cst_5 = arith.constant 2.500000e-01 : f32
    %16 = vector.broadcast %cst_5 : f32 to vector<16x16x128xf32>
    %17 = arith.mulf %16, %8 : vector<16x16x128xf32>
    %18 = arith.addf %15, %17 : vector<16x16x128xf32>
    %19 = vector.shape_cast %13 : vector<16x16x128xf32> to vector<16x1x16x128xf32>
    %20 = vector.shape_cast %18 : vector<16x16x128xf32> to vector<16x1x16x128xf32>
    %21 = tpu.concatenate %19, %20 in 1 : vector<16x1x16x128xf32>, vector<16x1x16x128xf32> -> vector<16x2x16x128xf32>
    %22 = vector.shape_cast %21 : vector<16x2x16x128xf32> to vector<32x16x128xf32>
    %23 = vector.extract_strided_slice %22 {offsets = [0, 0, 0], sizes = [32, 1, 128], strides = [1, 1, 1]} : vector<32x16x128xf32> to vector<32x1x128xf32>
    %24 = vector.extract_strided_slice %22 {offsets = [0, 0, 0], sizes = [32, 15, 128], strides = [1, 1, 1]} : vector<32x16x128xf32> to vector<32x15x128xf32>
    %25 = tpu.concatenate %23, %24 in 1 : vector<32x1x128xf32>, vector<32x15x128xf32> -> vector<32x16x128xf32>
    %26 = vector.extract_strided_slice %22 {offsets = [0, 1, 0], sizes = [32, 15, 128], strides = [1, 1, 1]} : vector<32x16x128xf32> to vector<32x15x128xf32>
    %27 = vector.extract_strided_slice %22 {offsets = [0, 15, 0], sizes = [32, 1, 128], strides = [1, 1, 1]} : vector<32x16x128xf32> to vector<32x1x128xf32>
    %28 = tpu.concatenate %26, %27 in 1 : vector<32x15x128xf32>, vector<32x1x128xf32> -> vector<32x16x128xf32>
    %cst_6 = arith.constant 7.500000e-01 : f32
    %29 = vector.broadcast %cst_6 : f32 to vector<32x16x128xf32>
    %30 = arith.mulf %29, %22 : vector<32x16x128xf32>
    %cst_7 = arith.constant 2.500000e-01 : f32
    %31 = vector.broadcast %cst_7 : f32 to vector<32x16x128xf32>
    %32 = arith.mulf %31, %25 : vector<32x16x128xf32>
    %33 = arith.addf %30, %32 : vector<32x16x128xf32>
    %cst_8 = arith.constant 7.500000e-01 : f32
    %34 = vector.broadcast %cst_8 : f32 to vector<32x16x128xf32>
    %35 = arith.mulf %34, %22 : vector<32x16x128xf32>
    %cst_9 = arith.constant 2.500000e-01 : f32
    %36 = vector.broadcast %cst_9 : f32 to vector<32x16x128xf32>
    %37 = arith.mulf %36, %28 : vector<32x16x128xf32>
    %38 = arith.addf %35, %37 : vector<32x16x128xf32>
    %cst_10 = arith.constant 0.000000e+00 : f32
    %39 = vector.broadcast %cst_10 : f32 to vector<32x1x128xf32>
    %40 = vector.extract_strided_slice %38 {offsets = [0, 0, 0], sizes = [32, 15, 128], strides = [1, 1, 1]} : vector<32x16x128xf32> to vector<32x15x128xf32>
    %41 = tpu.concatenate %39, %40 in 1 : vector<32x1x128xf32>, vector<32x15x128xf32> -> vector<32x16x128xf32>
    %42 = vector.extract_strided_slice %33 {offsets = [0, 1, 0], sizes = [32, 15, 128], strides = [1, 1, 1]} : vector<32x16x128xf32> to vector<32x15x128xf32>
    %43 = tpu.concatenate %42, %39 in 1 : vector<32x15x128xf32>, vector<32x1x128xf32> -> vector<32x16x128xf32>
    %cst_11 = arith.constant 0.000000e+00 : f32
    %44 = vector.broadcast %cst_11 : f32 to vector<1x16x512xf32>
    %c0_12 = arith.constant 0 : index
    %c0_13 = arith.constant 0 : index
    %c0_14 = arith.constant 0 : index
    %45 = vector.load %arg5[%c0_12, %c0_13, %c0_14] : memref<34x16x512xf32, #tpu.memory_space<vmem>>, vector<1x16x512xf32>
    tpu.vector_store %arg5[%c0_12, %c0_13, %c0_14], %44 {strides = array<i32>} : memref<34x16x512xf32, #tpu.memory_space<vmem>>, vector<1x16x512xf32>,
    %cst_15 = arith.constant 0.000000e+00 : f32
    %46 = vector.broadcast %cst_15 : f32 to vector<1x16x512xf32>
    %c33 = arith.constant 33 : index
    %c0_16 = arith.constant 0 : index
    %c0_17 = arith.constant 0 : index
    %47 = vector.load %arg5[%c33, %c0_16, %c0_17] : memref<34x16x512xf32, #tpu.memory_space<vmem>>, vector<1x16x512xf32>
    tpu.vector_store %arg5[%c33, %c0_16, %c0_17], %46 {strides = array<i32>} : memref<34x16x512xf32, #tpu.memory_space<vmem>>, vector<1x16x512xf32>,
    %48 = tpu.concatenate %33, %38, %41, %43 in 2 : vector<32x16x128xf32>, vector<32x16x128xf32>, vector<32x16x128xf32>, vector<32x16x128xf32> -> vector<32x16x512xf32>
    %c1 = arith.constant 1 : index
    %c0_18 = arith.constant 0 : index
    %c0_19 = arith.constant 0 : index
    %49 = vector.load %arg5[%c1, %c0_18, %c0_19] : memref<34x16x512xf32, #tpu.memory_space<vmem>>, vector<32x16x512xf32>
    tpu.vector_store %arg5[%c1, %c0_18, %c0_19], %48 {strides = array<i32>} : memref<34x16x512xf32, #tpu.memory_space<vmem>>, vector<32x16x512xf32>,
    %c0_20 = arith.constant 0 : index
    %c0_21 = arith.constant 0 : index
    %c0_22 = arith.constant 0 : index
    %50 = vector.load %arg5[%c0_20, %c0_21, %c0_22] : memref<34x16x512xf32, #tpu.memory_space<vmem>>, vector<32x16x512xf32>
    %51 = vector.shape_cast %50 : vector<32x16x512xf32> to vector<512x512xf32>
    %52 = arith.truncf %51 : vector<512x512xf32> to vector<512x512xbf16>
    %c0_23 = arith.constant 0 : index
    %c0_24 = arith.constant 0 : index
    %c0_25 = arith.constant 0 : index
    %53 = vector.load %arg2[%c0_23, %c0_24, %c0_25] : memref<3x512x256xbf16, #tpu.memory_space<vmem>>, vector<1x512x256xbf16>
    %54 = vector.shape_cast %53 : vector<1x512x256xbf16> to vector<512x256xbf16>
    %cst_26 = arith.constant dense<0.000000e+00> : vector<512x256xf32>
    %55 = tpu.matmul %52, %54, %cst_26 {dimension_numbers = #tpu.dot_dimension_numbers<[1], [0], [0], [1], [0, 0, 1, 1], [], []>} : vector<512x512xbf16>, vector<512x256xbf16>, vector<512x256xf32> -> vector<512x256xf32>
    %c0_27 = arith.constant 0 : index
    %c0_28 = arith.constant 0 : index
    %56 = vector.load %arg6[%c0_27, %c0_28] : memref<512x256xf32, #tpu.memory_space<vmem>>, vector<512x256xf32>
    tpu.vector_store %arg6[%c0_27, %c0_28], %55 {strides = array<i32>} : memref<512x256xf32, #tpu.memory_space<vmem>>, vector<512x256xf32>,
    %c1_29 = arith.constant 1 : index
    %c0_30 = arith.constant 0 : index
    %c0_31 = arith.constant 0 : index
    %57 = vector.load %arg5[%c1_29, %c0_30, %c0_31] : memref<34x16x512xf32, #tpu.memory_space<vmem>>, vector<32x16x512xf32>
    %58 = vector.shape_cast %57 : vector<32x16x512xf32> to vector<512x512xf32>
    %59 = arith.truncf %58 : vector<512x512xf32> to vector<512x512xbf16>
    %c1_32 = arith.constant 1 : index
    %c0_33 = arith.constant 0 : index
    %c0_34 = arith.constant 0 : index
    %60 = vector.load %arg2[%c1_32, %c0_33, %c0_34] : memref<3x512x256xbf16, #tpu.memory_space<vmem>>, vector<1x512x256xbf16>
    %61 = vector.shape_cast %60 : vector<1x512x256xbf16> to vector<512x256xbf16>
    %cst_35 = arith.constant dense<0.000000e+00> : vector<512x256xf32>
    %62 = tpu.matmul %59, %61, %cst_35 {dimension_numbers = #tpu.dot_dimension_numbers<[1], [0], [0], [1], [0, 0, 1, 1], [], []>} : vector<512x512xbf16>, vector<512x256xbf16>, vector<512x256xf32> -> vector<512x256xf32>
    %c0_36 = arith.constant 0 : index
    %c0_37 = arith.constant 0 : index
    %63 = vector.load %arg6[%c0_36, %c0_37] : memref<512x256xf32, #tpu.memory_space<vmem>>, vector<512x256xf32>
    %64 = arith.addf %63, %62 : vector<512x256xf32>
    %c0_38 = arith.constant 0 : index
    %c0_39 = arith.constant 0 : index
    %65 = vector.load %arg6[%c0_38, %c0_39] : memref<512x256xf32, #tpu.memory_space<vmem>>, vector<512x256xf32>
    tpu.vector_store %arg6[%c0_38, %c0_39], %64 {strides = array<i32>} : memref<512x256xf32, #tpu.memory_space<vmem>>, vector<512x256xf32>,
    %c2 = arith.constant 2 : index
    %c0_40 = arith.constant 0 : index
    %c0_41 = arith.constant 0 : index
    %66 = vector.load %arg5[%c2, %c0_40, %c0_41] : memref<34x16x512xf32, #tpu.memory_space<vmem>>, vector<32x16x512xf32>
    %67 = vector.shape_cast %66 : vector<32x16x512xf32> to vector<512x512xf32>
    %68 = arith.truncf %67 : vector<512x512xf32> to vector<512x512xbf16>
    %c2_42 = arith.constant 2 : index
    %c0_43 = arith.constant 0 : index
    %c0_44 = arith.constant 0 : index
    %69 = vector.load %arg2[%c2_42, %c0_43, %c0_44] : memref<3x512x256xbf16, #tpu.memory_space<vmem>>, vector<1x512x256xbf16>
    %70 = vector.shape_cast %69 : vector<1x512x256xbf16> to vector<512x256xbf16>
    %cst_45 = arith.constant dense<0.000000e+00> : vector<512x256xf32>
    %71 = tpu.matmul %68, %70, %cst_45 {dimension_numbers = #tpu.dot_dimension_numbers<[1], [0], [0], [1], [0, 0, 1, 1], [], []>} : vector<512x512xbf16>, vector<512x256xbf16>, vector<512x256xf32> -> vector<512x256xf32>
    %c0_46 = arith.constant 0 : index
    %c0_47 = arith.constant 0 : index
    %72 = vector.load %arg6[%c0_46, %c0_47] : memref<512x256xf32, #tpu.memory_space<vmem>>, vector<512x256xf32>
    %73 = arith.addf %72, %71 : vector<512x256xf32>
    %c0_48 = arith.constant 0 : index
    %c0_49 = arith.constant 0 : index
    %74 = vector.load %arg6[%c0_48, %c0_49] : memref<512x256xf32, #tpu.memory_space<vmem>>, vector<512x256xf32>
    tpu.vector_store %arg6[%c0_48, %c0_49], %73 {strides = array<i32>} : memref<512x256xf32, #tpu.memory_space<vmem>>, vector<512x256xf32>,
    %c0_50 = arith.constant 0 : index
    %c0_51 = arith.constant 0 : index
    %75 = vector.load %arg6[%c0_50, %c0_51] : memref<512x256xf32, #tpu.memory_space<vmem>>, vector<512x256xf32>
    %c0_52 = arith.constant 0 : index
    %c0_53 = arith.constant 0 : index
    %76 = vector.load %arg3[%c0_52, %c0_53] : memref<1x256xf32, #tpu.memory_space<vmem>>, vector<1x256xf32>
    %77 = vector.broadcast %76 : vector<1x256xf32> to vector<512x256xf32>
    %78 = arith.addf %75, %77 : vector<512x256xf32>
    %c0_54 = arith.constant 0 : index
    %c0_55 = arith.constant 0 : index
    %c0_56 = arith.constant 0 : index
    %79 = vector.load %arg4[%c0_54, %c0_55, %c0_56] : memref<1x512x256xf32, #tpu.memory_space<vmem>>, vector<1x512x256xf32>
    %80 = vector.shape_cast %79 : vector<1x512x256xf32> to vector<512x256xf32>
    %81 = vector.shape_cast %78 : vector<512x256xf32> to vector<1x512x256xf32>
    tpu.vector_store %arg4[%c0_54, %c0_55, %c0_56], %81 {strides = array<i32>} : memref<1x512x256xf32, #tpu.memory_space<vmem>>, vector<1x512x256xf32>,
    return
  }
  func.func @transform_0(%arg0: i32) -> (i32, i32, i32, i32) {
    %c0_i32 = arith.constant 0 : i32
    %c0_i32_0 = arith.constant 0 : i32
    %c0_i32_1 = arith.constant 0 : i32
    %c0_i32_2 = arith.constant 0 : i32
    return %arg0, %c0_i32, %c0_i32_0, %c0_i32_1 : i32, i32, i32, i32
  }
  func.func @transform_1(%arg0: i32) -> (i32, i32, i32) {
    %c0_i32 = arith.constant 0 : i32
    %c0_i32_0 = arith.constant 0 : i32
    %c0_i32_1 = arith.constant 0 : i32
    %c0_i32_2 = arith.constant 0 : i32
    return %c0_i32, %c0_i32_0, %c0_i32_1 : i32, i32, i32
  }
  func.func @transform_2(%arg0: i32) -> (i32, i32) {
    %c0_i32 = arith.constant 0 : i32
    %c0_i32_0 = arith.constant 0 : i32
    %c0_i32_1 = arith.constant 0 : i32
    return %c0_i32, %c0_i32_0 : i32, i32
  }
  func.func @transform_3(%arg0: i32) -> (i32, i32, i32) {
    %c0_i32 = arith.constant 0 : i32
    %c0_i32_0 = arith.constant 0 : i32
    %c0_i32_1 = arith.constant 0 : i32
    return %arg0, %c0_i32, %c0_i32_0 : i32, i32, i32
  }
}

</mosaic_0001>

<bundles_post_ra>
// kernel: _lambda_.3
= control target key start
LH: loop header
LB: loop body
LE: loop exit
PB: predicated region body
PF: predicated region fallthrough
CT: control target
= control target key end

     0   :  { %s957_s21 = smov 0   ;;  %s959_s22 = smov 0   ;;  %s1095_s0 = inlined_call_operand.vmem [shape: bf16[128,128], index: 0, kind: input, shape index: {}]   ;;  %s1096_s1 = inlined_call_operand.vmem [shape: bf16[128,128], index: 1, kind: input, shape index: {}]   ;;  %s1097_s2 = inlined_call_operand.vmem [shape: f32[1,128], index: 2, kind: input, shape index: {}]   ;;  %s1098_s3 = inlined_call_operand.vmem [shape: f32[64,128], index: 3, kind: input, shape index: {}]   ;;  %s1099_s4 = inlined_call_operand.vmem [shape: f32[1,128], index: 4, kind: input, shape index: {}]   ;;  %s1100_s5 = inlined_call_operand.vmem [shape: f32[1,128], index: 5, kind: input, shape index: {}]   ;;  %s1101_s6 = inlined_call_operand.vmem [shape: bf16[128,128], index: 6, kind: output, shape index: {}]  }
   0x1   :  { %s961_s23 = smov 0  }
   0x2 LB: > { %s28_s24 = sadd.s32 1, %s916_s22  ;;  %p733_p0 = scmp.ge.s32.totalorder %s920_s23, 1  ;;  %s920_s23 = sphi %s961_s23, %s16_s23   ;;  %s916_s22 = sphi %s959_s22, %s1103_s22   ;;  %s912_s21 = sphi %s957_s21, %s1102_s21  }
   0x3   : > { %p30_p1 = scmp.ge.s32.totalorder %s28_s24, 2  ;;  %p242_p2 = scmp.lt.s32.totalorder %s920_s23, 3 }
   0x5   : > { %s1105_s24 = smov (%p30_p1, %s28_s24), 0  ;;  %p243_p3 = pnand %p733_p0, %p242_p2 }
   0x6   : > { %v870_v0 = vld [vmem:[%s1096_s1] sm:$0xff] (!%p243_p3)   ;;  %s734_s27 = sshll.u32 (!%p243_p3), %s912_s21, 3  ;;  %v871_v1 = vld [vmem:[%s1096_s1 + $0x8] sm:$0xff] (!%p243_p3)   ;;  %v872_v2 = vld [vmem:[%s1096_s1 + $0x10] sm:$0xff] (!%p243_p3)  }
   0x7   : > { %246 = sbr.rel (%p243_p3) target bundleno = 586 (0x24a), region = 44  ;;  %p281_p4 = scmp.lt.s32.totalorder (!%p243_p3), %s734_s27, 15  ;;  %806 = vmatprep.subr.bf16.mxu0 (!%p243_p3), %v870_v0  ;;  %830 = vmatprep.subr.bf16.mxu1 (!%p243_p3), %v870_v0  ;;  %v873_v3 = vld [vmem:[%s1096_s1 + $0x18] sm:$0xff] (!%p243_p3)   ;;  %v874_v6 = vld [vmem:[%s1096_s1 + $0x20] sm:$0xff] (!%p243_p3)   ;;  %v875_v7 = vld [vmem:[%s1096_s1 + $0x28] sm:$0xff] (!%p243_p3)  }
   0x8   : > { %807 = vmatpush3.bf16.msra.mxu0 (!%p243_p3), %v870_v0  ;;  %838 = vmatpush3.bf16.msra.mxu1 (!%p243_p3), %v870_v0  ;;  %v876_v8 = vld [vmem:[%s1096_s1 + $0x30] sm:$0xff] (!%p243_p3)   ;;  %v877_v9 = vld [vmem:[%s1096_s1 + $0x38] sm:$0xff] (!%p243_p3)   ;;  %v738_v12 = vld [vmem:[%s1097_s2] ss:$0 sm:$0xff] (!%p243_p3) }
   0x9   : > { %808 = vmatprep.subr.bf16.mxu0 (!%p243_p3), %v871_v1  ;;  %831 = vmatprep.subr.bf16.mxu1 (!%p243_p3), %v871_v1  ;;  %v472_v15 = vld [vmem:[%s1098_s3 + $0x10] sm:$0xff] (!%p243_p3)  ;;  %v470_v19 = vld [vmem:[%s1098_s3] sm:$0xff] (!%p243_p3)  ;;  %v473_v30 = vld [vmem:[%s1098_s3 + $0x18] sm:$0xff] (!%p243_p3) }
   0xa   : > { %v474_v28 = vld [vmem:[%s1098_s3 + $0x20] sm:$0xff] (!%p243_p3)  ;;  %v475_v35 = vld [vmem:[%s1098_s3 + $0x28] sm:$0xff] (!%p243_p3)  ;;  %v477_v41 = vld [vmem:[%s1098_s3 + $0x38] sm:$0xff] (!%p243_p3) }
   0xb   : > { %v471_v36 = vld [vmem:[%s1098_s3 + $0x8] sm:$0xff] (!%p243_p3)  ;;  %v476_v42 = vld [vmem:[%s1098_s3 + $0x30] sm:$0xff] (!%p243_p3) }
   0xc   : > { %809 = vmatpush3.bf16.msra.mxu0 (!%p243_p3), %v871_v1  ;;  %839 = vmatpush3.bf16.msra.mxu1 (!%p243_p3), %v871_v1 }
   0xd   : > { %810 = vmatprep.subr.bf16.mxu0 (!%p243_p3), %v872_v2  ;;  %832 = vmatprep.subr.bf16.mxu1 (!%p243_p3), %v872_v2 }
   0xe   : > { %s1107_s27 = smov (!%p281_p4, %s734_s27), 15 }
   0xf   : > { %s735_s8 = sshll.u32 %s1107_s27, 2 }
  0x10   : > { %s992_s11 = scalar_lea.vmem %s1095_s0, %s735_s8  ;;  %811 = vmatpush3.bf16.msra.mxu0 %v872_v2  ;;  %840 = vmatpush3.bf16.msra.mxu1 %v872_v2  ;;  %s298_s7 = scalar_lea.vmem %s1101_s6, %s735_s8 }
  0x11   : > { %v878_v4 = vld [vmem:[%s992_s11] sm:$0xff]   ;;  %v880_v5 = vld [vmem:[%s992_s11 + $0x10] sm:$0xff]   ;;  %812 = vmatprep.subr.bf16.mxu0 %v873_v3  ;;  %833 = vmatprep.subr.bf16.mxu1 %v873_v3  ;;  %v879_v10 = vld [vmem:[%s992_s11 + $0x8] sm:$0xff]  }
  0x12   : > { %822 = vmatprep.mubr.bf16.mxu0 %v878_v4  ;;  %826 = vmatprep.mubr.bf16.mxu1 %v880_v5  ;;  %v881_v11 = vld [vmem:[%s992_s11 + $0x18] sm:$0xff]  }
  0x14   : > { %813 = vmatpush3.bf16.msra.mxu0 %v873_v3  ;;  %841 = vmatpush3.bf16.msra.mxu1 %v873_v3 }
  0x15   : > { %814 = vmatprep.subr.bf16.mxu0 %v874_v6  ;;  %834 = vmatprep.subr.bf16.mxu1 %v874_v6 }
  0x18   : > { %815 = vmatpush3.bf16.msra.mxu0 %v874_v6  ;;  %842 = vmatpush3.bf16.msra.mxu1 %v874_v6 }
  0x19   : > { %816 = vmatprep.subr.bf16.mxu0 %v875_v7  ;;  %835 = vmatprep.subr.bf16.mxu1 %v875_v7 }
  0x1c   : > { %817 = vmatpush3.bf16.msra.mxu0 %v875_v7  ;;  %843 = vmatpush3.bf16.msra.mxu1 %v875_v7 }
  0x1d   : > { %818 = vmatprep.subr.bf16.mxu0 %v876_v8  ;;  %836 = vmatprep.subr.bf16.mxu1 %v876_v8 }
  0x20   : > { %819 = vmatpush3.bf16.msra.mxu0 %v876_v8  ;;  %844 = vmatpush3.bf16.msra.mxu1 %v876_v8 }
  0x21   : > { %820 = vmatprep.subr.bf16.mxu0 %v877_v9  ;;  %837 = vmatprep.subr.bf16.mxu1 %v877_v9 }
  0x24   : > { %821 = vmatpush3.bf16.msra.mxu0 %v877_v9  ;;  %845 = vmatpush3.bf16.msra.mxu1 %v877_v9 }
  0x27   : > { %823 = vmatmul.mubr.bf16.vlgmr.msra.gmra.mrb[0].mxu0 %v879_v10  ;;  %827 = vmatmul.mubr.bf16.vlgmr.msra.gmra.mrb[0].mxu1 %v881_v11 }
  0xfa   : > { %v824_v13 = vpop.f32.mrb[0].mxu0  ;;  %v828_v14 = vpop.f32.mrb[0].mxu1 }
  0xfb   : > { %v448_v16 = vadd.f32 %v824_v13, %v738_v12  ;;  %v439_v17 = vpop.f32.mrb[1].mxu0  ;;  %v455_v18 = vpop.f32.mrb[1].mxu1  ;;  %v464_v39 = vadd.f32 %v828_v14, %v738_v12 }
  0xfc   : > { %v440_v20 = vadd.f32 %v738_v12, %v439_v17  ;;  %v825_v21 = vpop.f32.mrb[2].mxu0  ;;  %v456_v22 = vadd.f32 %v738_v12, %v455_v18  ;;  %v829_v23 = vpop.f32.mrb[2].mxu1 }
  0xfd   : > { %v451_v24 = vadd.f32 %v825_v21, %v738_v12  ;;  %v442_v25 = vpop.f32.mrb[3].mxu0  ;;  %v458_v26 = vpop.f32.mrb[3].mxu1  ;;  %v480_v27 = vadd.f32 %v472_v15, %v448_v16  ;;  %v467_v37 = vadd.f32 %v829_v23, %v738_v12  ;;  %v484_v44 = vadd.f32 %v476_v42, %v464_v39 }
  0xfe   : > { %v478_v29 = vadd.f32 %v470_v19, %v440_v20  ;;  %v482_v31 = vadd.f32 %v474_v28, %v456_v22  ;;  %v459_v32 = vadd.f32 %v738_v12, %v458_v26  ;;  %v443_v34 = vadd.f32 %v738_v12, %v442_v25 }
  0xff   : > { %490 = vadd.xlane.f32.xlu1 %v480_v27  ;;  %v481_v33 = vadd.f32 %v473_v30, %v451_v24  ;;  %v485_v43 = vadd.f32 %v477_v41, %v467_v37 }
 0x100   : > { %486 = vadd.xlane.f32.xlu0 %v478_v29  ;;  %v483_v38 = vadd.f32 %v475_v35, %v459_v32  ;;  %v479_v40 = vadd.f32 %v471_v36, %v443_v34  ;;  %v751_v36 = vld [vmem:[%s1099_s4] ss:$0 sm:$0xff] }
 0x103   : > { %492 = vadd.xlane.f32.xlu1 %v481_v33 }
 0x104   : > { %494 = vadd.xlane.f32.xlu0 %v482_v31 }
 0x107   : > { %496 = vadd.xlane.f32.xlu1 %v483_v38 }
 0x108   : > { %488 = vadd.xlane.f32.xlu0 %v479_v40 }
 0x10b   : > { %500 = vadd.xlane.f32.xlu1 %v485_v43 }
 0x10c   : > { %498 = vadd.xlane.f32.xlu0 %v484_v44 }
 0x18c   : > { %v491_v45 = vpop.xlane.xlu1 %490 }
 0x18d   : > { %v505_v46 = vmul.f32 0.0078125, %v491_v45  ;;  %v487_v47 = vpop.xlane.xlu0 %486 }
 0x18e   : > { %v503_v48 = vmul.f32 0.0078125, %v487_v47 }
 0x18f   : > { %v513_v49 = vsub.f32 %v480_v27, %v505_v46 }
 0x190   : > { %v493_v50 = vpop.xlane.xlu1 %492  ;;  %v1040_v51 = vsub.f32 %v478_v29, %v503_v48 }
 0x191   : > { %v506_v52 = vmul.f32 0.0078125, %v493_v50  ;;  %v495_v53 = vpop.xlane.xlu0 %494  ;;  %v521_v54 = vmul.f32 %v513_v49, %v513_v49 }
 0x192   : > { %v507_v55 = vmul.f32 0.0078125, %v495_v53  ;;  %v519_v61 = vmul.f32 %v1040_v51, %v1040_v51 }
 0x193   : > { %v1042_v56 = vsub.f32 %v481_v33, %v506_v52  ;;  %531 = vadd.xlane.f32.xlu0 %v521_v54 }
 0x194   : > { %v497_v57 = vpop.xlane.xlu1 %496  ;;  %v1044_v58 = vsub.f32 %v482_v31, %v507_v55 }
 0x195   : > { %v489_v59 = vpop.xlane.xlu0 %488  ;;  %v522_v60 = vmul.f32 %v1042_v56, %v1042_v56  ;;  %v508_v62 = vmul.f32 0.0078125, %v497_v57 }
 0x196   : > { %v504_v63 = vmul.f32 0.0078125, %v489_v59  ;;  %v523_v3 = vmul.f32 %v1044_v58, %v1044_v58 }
 0x197   : > { %533 = vadd.xlane.f32.xlu1 %v522_v60  ;;  %527 = vadd.xlane.f32.xlu0 %v519_v61  ;;  %v1054_v4 = vsub.f32 %v483_v38, %v508_v62 }
 0x198   : > { %v1050_v0 = vsub.f32 %v479_v40, %v504_v63  ;;  %v501_v1 = vpop.xlane.xlu1 %500 }
 0x199   : > { %v499_v2 = vpop.xlane.xlu0 %498  ;;  %v510_v5 = vmul.f32 0.0078125, %v501_v1  ;;  %v524_v10 = vmul.f32 %v1054_v4, %v1054_v4 }
 0x19a   : > { %v509_v6 = vmul.f32 0.0078125, %v499_v2  ;;  %v520_v7 = vmul.f32 %v1050_v0, %v1050_v0 }
 0x19b   : > { %535 = vadd.xlane.f32.xlu0 %v523_v3  ;;  %v1060_v9 = vsub.f32 %v485_v43, %v510_v5 }
 0x19c   : > { %v1058_v8 = vsub.f32 %v484_v44, %v509_v6  ;;  %529 = vadd.xlane.f32.xlu1 %v520_v7  ;;  %v752_v44 = vld [vmem:[%s1100_s5] ss:$0 sm:$0xff] }
 0x19d   : > { %v526_v12 = vmul.f32 %v1060_v9, %v1060_v9 }
 0x19e   : > { %v525_v11 = vmul.f32 %v1058_v8, %v1058_v8 }
 0x1a0   : > { %537 = vadd.xlane.f32.xlu1 %v524_v10  ;;  %539 = vadd.xlane.f32.xlu0 %v525_v11 }
 0x1a4   : > { %541 = vadd.xlane.f32.xlu1 %v526_v12 }
 0x220   : > { %v532_v13 = vpop.xlane.xlu0 %531 }
 0x221   : > { %v545_v14 = vmul.f32 0.0078125, %v532_v13 }
 0x223   : > { %v553_v15 = vadd.f32 1e-06, %v545_v14 }
 0x224   : > { %v534_v16 = vpop.xlane.xlu1 %533  ;;  %v528_v17 = vpop.xlane.xlu0 %527 }
 0x225   : > { %882 = vrsqrt.f32 %v553_v15  ;;  %v546_v18 = vmul.f32 0.0078125, %v534_v16  ;;  %v543_v19 = vmul.f32 0.0078125, %v528_v17 }
 0x227   : > { %v554_v20 = vadd.f32 1e-06, %v546_v18  ;;  %v551_v21 = vadd.f32 1e-06, %v543_v19 }
 0x228   : > { %v536_v22 = vpop.xlane.xlu0 %535 }
 0x229   : > { %884 = vrsqrt.f32 %v554_v20  ;;  %v547_v23 = vmul.f32 0.0078125, %v536_v22  ;;  %v530_v24 = vpop.xlane.xlu1 %529 }
 0x22a   : > { %886 = vrsqrt.f32 %v551_v21  ;;  %v544_v25 = vmul.f32 0.0078125, %v530_v24 }
 0x22b   : > { %v555_v26 = vadd.f32 1e-06, %v547_v23 }
 0x22c   : > { %v552_v27 = vadd.f32 1e-06, %v544_v25 }
 0x22d   : > { %888 = vrsqrt.f32 %v555_v26  ;;  %v538_v28 = vpop.xlane.xlu1 %537  ;;  %v540_v29 = vpop.xlane.xlu0 %539 }
 0x22e   : > { %890 = vrsqrt.f32 %v552_v27  ;;  %v548_v30 = vmul.f32 0.0078125, %v538_v28  ;;  %v549_v31 = vmul.f32 0.0078125, %v540_v29 }
 0x22f   : > { %v883_v32 = vpop.eup %882 }
 0x230   : > { %v569_v33 = vmul.f32 %v883_v32, %v513_v49  ;;  %v556_v34 = vadd.f32 1e-06, %v548_v30  ;;  %v557_v35 = vadd.f32 1e-06, %v549_v31 }
 0x231   : > { %v542_v37 = vpop.xlane.xlu1 %541 }
 0x232   : > { %892 = vrsqrt.f32 %v556_v34  ;;  %v550_v38 = vmul.f32 0.0078125, %v542_v37  ;;  %v584_v41 = vmul.f32 %v751_v36, %v569_v33 }
 0x233   : > { %v885_v39 = vpop.eup %884  ;;  %894 = vrsqrt.f32 %v557_v35 }
 0x234   : > { %v887_v40 = vpop.eup %886  ;;  %v570_v42 = vmul.f32 %v885_v39, %v1042_v56  ;;  %v558_v43 = vadd.f32 1e-06, %v550_v38  ;;  %v599_v49 = vadd.f32 %v752_v44, %v584_v41 }
 0x235   : > { %v567_v45 = vmul.f32 %v887_v40, %v1040_v51 }
 0x236   : > { %v585_v46 = vmul.f32 %v751_v36, %v570_v42  ;;  %896 = vrsqrt.f32 %v558_v43 }
 0x237   : > { %v889_v47 = vpop.eup %888  ;;  %v582_v52 = vmul.f32 %v751_v36, %v567_v45 }
 0x238   : > { %v891_v48 = vpop.eup %890  ;;  %v600_v50 = vadd.f32 %v752_v44, %v585_v46  ;;  %v571_v53 = vmul.f32 %v889_v47, %v1044_v58 }
 0x239   : > { %v568_v54 = vmul.f32 %v891_v48, %v1050_v0  ;;  %v597_v59 = vadd.f32 %v752_v44, %v582_v52 }
 0x23a   : > { %v779_v55 = vpack.c.bf16 %v600_v50, %v599_v49  ;;  %v586_v60 = vmul.f32 %v751_v36, %v571_v53 }
 0x23b   : > { %v583_v56 = vmul.f32 %v751_v36, %v568_v54 }
 0x23c   : > { %v893_v57 = vpop.eup %892  ;;  %791 = vst [vmem:[%s298_s7 + $0x8] sm:$0xff] %v779_v55   ;;  %v601_v5 = vadd.f32 %v752_v44, %v586_v60 }
 0x23d   : > { %v895_v51 = vpop.eup %894  ;;  %v598_v61 = vadd.f32 %v752_v44, %v583_v56  ;;  %v572_v62 = vmul.f32 %v893_v57, %v1054_v4 }
 0x23e   : > { %v573_v63 = vmul.f32 %v895_v51, %v1058_v8 }
 0x23f   : > { %v774_v1 = vpack.c.bf16 %v598_v61, %v597_v59  ;;  %v587_v2 = vmul.f32 %v751_v36, %v572_v62 }
 0x240   : > { %v897_v3 = vpop.eup %896  ;;  %v588_v6 = vmul.f32 %v751_v36, %v573_v63 }
 0x241   : > { %775 = vst [vmem:[%s298_s7] sm:$0xff] %v774_v1   ;;  %v602_v58 = vadd.f32 %v752_v44, %v587_v2  ;;  %v574_v0 = vmul.f32 %v897_v3, %v1060_v9 }
 0x242   : > { %v603_v11 = vadd.f32 %v752_v44, %v588_v6 }
 0x243   : > { %v784_v7 = vpack.c.bf16 %v602_v58, %v601_v5  ;;  %v589_v10 = vmul.f32 %v751_v36, %v574_v0 }
 0x245   : > { %792 = vst [vmem:[%s298_s7 + $0x10] sm:$0xff] %v784_v7   ;;  %v604_v12 = vadd.f32 %v752_v44, %v589_v10 }
 0x247   : > { %v789_v13 = vpack.c.bf16 %v604_v12, %v603_v11 }
 0x249   : > { %793 = vst [vmem:[%s298_s7 + $0x18] sm:$0xff] %v789_v13  }
 0x24a PF: > { %s16_s23 = sadd.s32 1, %s920_s23   ;;  %s1102_s21 = smov %s916_s22 }
 0x24b   : > { %p13_p5 = scmp.ge.s32.totalorder %s16_s23, 4   ;;  %s1103_s22 = smov %s1105_s24 }
 0x24d   :  { %15 = sbr.rel (!%p13_p5) target bundleno = 2 (0x2), region = 77 }

// kernel: _lambda_.4
= control target key start
LH: loop header
LB: loop body
LE: loop exit
PB: predicated region body
PF: predicated region fallthrough
CT: control target
= control target key end

     0   :  { %s4297_s12 = smov 0   ;;  %s5595_s0 = inlined_call_operand.vmem [shape: bf16[2,8,8,128], index: 0, kind: input, shape index: {}]   ;;  %s5596_s1 = inlined_call_operand.vmem [shape: bf16[3,512,256], index: 1, kind: input, shape index: {}]   ;;  %s5597_s2 = inlined_call_operand.vmem [shape: f32[1,256], index: 2, kind: input, shape index: {}]   ;;  %s5598_s3 = inlined_call_operand.vmem [shape: bf16[2,128,256], index: 3, kind: output, shape index: {}]  }
   0x1 LB: > { %s3235_s13 = sadd.s32 4294967295, %s4273_s12   ;;  %p3239_p0 = scmp.ge.s32.totalorder %s4273_s12, 1  ;;  %s4273_s12 = sphi %s4297_s12, %s13_s12  }
   0x2   : > { %p137_p1 = scmp.lt.s32.totalorder %s4273_s12, 3 }
   0x4   : > { %p138_p2 = pnand %p3239_p0, %p137_p1 }
   0x6   : > { %141 = sbr.rel (%p138_p2) target bundleno = 488 (0x1e8), region = 32 }
   0xd   : > { %v3979_v0 = vld [vmem:[%s5596_s1 + $0x4] ss:$8 sps:$4 sm:$0xff]   ;;  %v3983_v2 = vld [vmem:[%s5596_s1] ss:$8 sps:$4 sm:$0xff]   ;;  %v3985_v4 = vld [vmem:[%s5596_s1 + $0x14] ss:$8 sps:$4 sm:$0xff]  }
   0xe   : > { %v3981_v1 = vld [vmem:[%s5596_s1 + $0x304] ss:$8 sps:$4 sm:$0xff]   ;;  %1095 = vmatprep.subr.bf16.mxu1 %v3979_v0  ;;  %v3984_v3 = vld [vmem:[%s5596_s1 + $0x300] ss:$8 sps:$4 sm:$0xff]   ;;  %v3987_v5 = vld [vmem:[%s5596_s1 + $0x314] ss:$8 sps:$4 sm:$0xff]  }
   0xf   : > { %1947 = vmatprep.subr.bf16.mxu0 %v3981_v1  ;;  %1096 = vmatpush1.bf16.msra.mxu1 %v3983_v2  ;;  %v3989_v6 = vld [vmem:[%s5596_s1 + $0x10] ss:$8 sps:$4 sm:$0xff]   ;;  %v3991_v8 = vld [vmem:[%s5596_s1 + $0x24] ss:$8 sps:$4 sm:$0xff]   ;;  %v3995_v10 = vld [vmem:[%s5596_s1 + $0x20] ss:$8 sps:$4 sm:$0xff]  }
  0x10   : > { %1948 = vmatpush1.bf16.msra.mxu0 %v3984_v3  ;;  %1097 = vmatprep.subr.bf16.mxu1 %v3985_v4  ;;  %v3990_v7 = vld [vmem:[%s5596_s1 + $0x310] ss:$8 sps:$4 sm:$0xff]   ;;  %v3993_v9 = vld [vmem:[%s5596_s1 + $0x324] ss:$8 sps:$4 sm:$0xff]   ;;  %v3996_v11 = vld [vmem:[%s5596_s1 + $0x320] ss:$8 sps:$4 sm:$0xff]  }
  0x11   : > { %1949 = vmatprep.subr.bf16.mxu0 %v3987_v5  ;;  %v3997_v12 = vld [vmem:[%s5596_s1 + $0x34] ss:$8 sps:$4 sm:$0xff]   ;;  %v4001_v14 = vld [vmem:[%s5596_s1 + $0x30] ss:$8 sps:$4 sm:$0xff]   ;;  %v4003_v16 = vld [vmem:[%s5596_s1 + $0x44] ss:$8 sps:$4 sm:$0xff]  }
  0x12   : > { %v3999_v13 = vld [vmem:[%s5596_s1 + $0x334] ss:$8 sps:$4 sm:$0xff]   ;;  %v4002_v15 = vld [vmem:[%s5596_s1 + $0x330] ss:$8 sps:$4 sm:$0xff]   ;;  %v4005_v17 = vld [vmem:[%s5596_s1 + $0x344] ss:$8 sps:$4 sm:$0xff]  }
  0x13   : > { %1098 = vmatpush1.bf16.msra.mxu1 %v3989_v6  ;;  %v4007_v18 = vld [vmem:[%s5596_s1 + $0x40] ss:$8 sps:$4 sm:$0xff]   ;;  %v4009_v20 = vld [vmem:[%s5596_s1 + $0x54] ss:$8 sps:$4 sm:$0xff]   ;;  %v4013_v22 = vld [vmem:[%s5596_s1 + $0x50] ss:$8 sps:$4 sm:$0xff]  }
  0x14   : > { %1950 = vmatpush1.bf16.msra.mxu0 %v3990_v7  ;;  %1099 = vmatprep.subr.bf16.mxu1 %v3991_v8  ;;  %v4008_v19 = vld [vmem:[%s5596_s1 + $0x340] ss:$8 sps:$4 sm:$0xff]   ;;  %v4011_v21 = vld [vmem:[%s5596_s1 + $0x354] ss:$8 sps:$4 sm:$0xff]   ;;  %v4014_v23 = vld [vmem:[%s5596_s1 + $0x350] ss:$8 sps:$4 sm:$0xff]  }
  0x15   : > { %1951 = vmatprep.subr.bf16.mxu0 %v3993_v9  ;;  %v4015_v24 = vld [vmem:[%s5596_s1 + $0x64] ss:$8 sps:$4 sm:$0xff]   ;;  %v4019_v26 = vld [vmem:[%s5596_s1 + $0x60] ss:$8 sps:$4 sm:$0xff]   ;;  %v4021_v28 = vld [vmem:[%s5596_s1 + $0x74] ss:$8 sps:$4 sm:$0xff]  }
  0x16   : > { %v4017_v25 = vld [vmem:[%s5596_s1 + $0x364] ss:$8 sps:$4 sm:$0xff]   ;;  %v4020_v27 = vld [vmem:[%s5596_s1 + $0x360] ss:$8 sps:$4 sm:$0xff]   ;;  %v4023_v29 = vld [vmem:[%s5596_s1 + $0x374] ss:$8 sps:$4 sm:$0xff]  }
  0x17   : > { %1100 = vmatpush1.bf16.msra.mxu1 %v3995_v10  ;;  %v4025_v30 = vld [vmem:[%s5596_s1 + $0x70] ss:$8 sps:$4 sm:$0xff]   ;;  %v4027_v32 = vld [vmem:[%s5596_s1 + $0x84] ss:$8 sps:$4 sm:$0xff]   ;;  %p161_p3 = scmp.lt.s32.totalorder %s3235_s13, 1  ;;  %vm316_vm0 = vcmask 1046528  }
  0x18   : > { %1952 = vmatpush1.bf16.msra.mxu0 %v3996_v11  ;;  %1101 = vmatprep.subr.bf16.mxu1 %v3997_v12  ;;  %v4026_v31 = vld [vmem:[%s5596_s1 + $0x370] ss:$8 sps:$4 sm:$0xff]   ;;  %v4029_v33 = vld [vmem:[%s5596_s1 + $0x384] ss:$8 sps:$4 sm:$0xff]   ;;  %v4031_v34 = vld [vmem:[%s5596_s1 + $0x80] ss:$8 sps:$4 sm:$0xff]  }
  0x19   : > { %1953 = vmatprep.subr.bf16.mxu0 %v3999_v13  ;;  %v4032_v35 = vld [vmem:[%s5596_s1 + $0x380] ss:$8 sps:$4 sm:$0xff]   ;;  %v4033_v36 = vld [vmem:[%s5596_s1 + $0x94] ss:$8 sps:$4 sm:$0xff]   ;;  %s5706_s13 = smov (!%p161_p3, %s3235_s13), 1  ;;  %vm267_vm1 = vcmask 1040384   ;;  %vm4564_vm2 = vmpackc.low %vm316_vm0, %vm316_vm0 }
  0x1a   : > { %v4035_v37 = vld [vmem:[%s5596_s1 + $0x394] ss:$8 sps:$4 sm:$0xff]   ;;  %v4037_v38 = vld [vmem:[%s5596_s1 + $0x90] ss:$8 sps:$4 sm:$0xff]   ;;  %v4039_v40 = vld [vmem:[%s5596_s1 + $0xa4] ss:$8 sps:$4 sm:$0xff]  }
  0x1b   : > { %1102 = vmatpush1.bf16.msra.mxu1 %v4001_v14  ;;  %v4038_v39 = vld [vmem:[%s5596_s1 + $0x390] ss:$8 sps:$4 sm:$0xff]   ;;  %s3582_s21 = sshll.u32 %s5706_s13, 5  ;;  %v4041_v41 = vld [vmem:[%s5596_s1 + $0x3a4] ss:$8 sps:$4 sm:$0xff]   ;;  %vm4588_vm3 = vmneg %vm267_vm1  ;;  %vm4276_vm5 = vmmov 1  }
  0x1c   : > { %1954 = vmatpush1.bf16.msra.mxu0 %v4002_v15  ;;  %1103 = vmatprep.subr.bf16.mxu1 %v4003_v16  ;;  %v4043_v42 = vld [vmem:[%s5596_s1 + $0xa0] ss:$8 sps:$4 sm:$0xff]   ;;  %s4447_s30 = scalar_lea.vmem %s5595_s0, %s3582_s21  ;;  %v4045_v44 = vld [vmem:[%s5596_s1 + $0xb4] ss:$8 sps:$4 sm:$0xff]   ;;  %v4049_v46 = vld [vmem:[%s5596_s1 + $0xb0] ss:$8 sps:$4 sm:$0xff]  }
  0x1d   : > { %1955 = vmatprep.subr.bf16.mxu0 %v4005_v17  ;;  %v4044_v43 = vld [vmem:[%s5596_s1 + $0x3a0] ss:$8 sps:$4 sm:$0xff]   ;;  %v4047_v45 = vld [vmem:[%s5596_s1 + $0x3b4] ss:$8 sps:$4 sm:$0xff]   ;;  %v4050_v48 = vld [vmem:[%s5596_s1 + $0x3b0] ss:$8 sps:$4 sm:$0xff]  }
  0x1e   : > { %v3601_v47 = vld [vmem:[%s4447_s30] sm:$0xff]   ;;  %v4463_v51 = vld [vmem:[%s4447_s30 + $0x8] sm:$0xff]   ;;  %v4057_v2 = vld [vmem:[%s5596_s1 + $0xd4] ss:$8 sps:$4 sm:$0xff]   ;;  %s3583_s4 = sshll.u32 %s5706_s13, 7 }
  0x1f   : > { %1104 = vmatpush1.bf16.msra.mxu1 %v4007_v18  ;;  %v3602_v49 = vunpack.c.l.bf16 %v3601_v47  ;;  %v3603_v50 = vunpack.c.h.bf16 %v3601_v47  ;;  %v4051_v52 = vld [vmem:[%s5596_s1 + $0xc4] ss:$8 sps:$4 sm:$0xff]   ;;  %v3606_v54 = vunpack.c.l.bf16 %v4463_v51  ;;  %v3607_v55 = vunpack.c.h.bf16 %v4463_v51  ;;  %v4055_v60 = vld [vmem:[%s5596_s1 + $0xc0] ss:$8 sps:$4 sm:$0xff]   ;;  %v4059_v6 = vld [vmem:[%s5596_s1 + $0x3d4] ss:$8 sps:$4 sm:$0xff]   ;;  %s5546_s7 = scalar_lea.vmem %s5598_s3, %s3583_s4 }
  0x20   : > { %1956 = vmatpush1.bf16.msra.mxu0 %v4008_v19  ;;  %1105 = vmatprep.subr.bf16.mxu1 %v4009_v20  ;;  %v4053_v53 = vld [vmem:[%s5596_s1 + $0x3c4] ss:$8 sps:$4 sm:$0xff]   ;;  %v4056_v62 = vld [vmem:[%s5596_s1 + $0x3c0] ss:$8 sps:$4 sm:$0xff]   ;;  %v4061_v11 = vld [vmem:[%s5596_s1 + $0xd0] ss:$8 sps:$4 sm:$0xff]  }
  0x21   : > { %1957 = vmatprep.subr.bf16.mxu0 %v4011_v21  ;;  %v187_v56 = vmul.f32 0.75, %v3602_v49  ;;  %v188_v57 = vmul.f32 0.75, %v3603_v50  ;;  %v195_v58 = vmul.f32 0.25, %v3602_v49  ;;  %v196_v59 = vmul.f32 0.25, %v3603_v50  ;;  %v4062_v16 = vld [vmem:[%s5596_s1 + $0x3d0] ss:$8 sps:$4 sm:$0xff]   ;;  %vm4616_vm4 = vmpackc.low %vm4588_vm3, %vm4588_vm3 }
  0x22   : > { %v4476_v61 = vmul.f32 0.25, %v3606_v54  ;;  %v4487_v4 = vmul.f32 0.75, %v3606_v54  ;;  %v4491_v5 = vmul.f32 0.25, %v3607_v55  ;;  %v4063_v21 = vld [vmem:[%s5596_s1 + $0xe4] ss:$8 sps:$4 sm:$0xff]   ;;  %v4544_v47 = vmul.f32 0.75, %v3607_v55  ;;  %vm3619_vm6 = vmpackc.low %vm316_vm0, %vm4276_vm5 }
  0x23   : > { %1106 = vmatpush1.bf16.msra.mxu1 %v4013_v22  ;;  %v202_v63 = vadd.f32 %v195_v58, %v187_v56  ;;  %v203_v0 = vadd.f32 %v195_v58, %v188_v57  ;;  %v211_v1 = vadd.f32 %v196_v59, %v187_v56  ;;  %v4074_v56 = vld [vmem:[%s5596_s1 + $0x3f0] ss:$8 sps:$4 sm:$0xff]   ;;  %vm3623_vm7 = vmpackc.low %vm4588_vm3, %vm4276_vm5 }
  0x24   : > { %1958 = vmatpush1.bf16.msra.mxu0 %v4014_v23  ;;  %1107 = vmatprep.subr.bf16.mxu1 %v4015_v24  ;;  %v4485_v3 = vadd.f32 %v4476_v61, %v188_v57  ;;  %vm3802_vm8 = vmpackc.low %vm4276_vm5, %vm316_vm0 }
  0x25   : > { %1959 = vmatprep.subr.bf16.mxu0 %v4017_v25  ;;  %v284_v7 = vrot.slane %v202_v63, 1  ;;  %v333_v8 = vmul.f32 0.75, %v202_v63  ;;  %v235_v9 = vrot.slane %v202_v63, 7  ;;  %v236_v10 = vrot.slane %v211_v1, 7  ;;  %vm3806_vm9 = vmpackc.low %vm4276_vm5, %vm4588_vm3 }
  0x26   : > { %v237_v12 = vrot.slane %v203_v0, 7  ;;  %v285_v13 = vrot.slane %v211_v1, 1  ;;  %v334_v14 = vmul.f32 0.75, %v211_v1  ;;  %v335_v15 = vmul.f32 0.75, %v203_v0 }
  0x27   : > { %1108 = vmatpush1.bf16.msra.mxu1 %v4019_v26  ;;  %v317_v17 = vsel %vm316_vm0, %v284_v7, %v202_v63  ;;  %v268_v18 = vsel %vm267_vm1, %v202_v63, %v235_v9  ;;  %v269_v19 = vsel %vm267_vm1, %v211_v1, %v236_v10  ;;  %v286_v20 = vrot.slane %v203_v0, 1  ;;  %v4065_v26 = vld [vmem:[%s5596_s1 + $0x3e4] ss:$8 sps:$4 sm:$0xff]  }
  0x28   : > { %1960 = vmatpush1.bf16.msra.mxu0 %v4020_v27  ;;  %1109 = vmatprep.subr.bf16.mxu1 %v4021_v28  ;;  %v381_v22 = vmul.f32 0.25, %v317_v17  ;;  %v270_v23 = vsel %vm267_vm1, %v203_v0, %v237_v12  ;;  %v318_v24 = vsel %vm316_vm0, %v285_v13, %v211_v1  ;;  %v349_v25 = vmul.f32 0.25, %v268_v18  ;;  %v4077_v63 = vld [vmem:[%s5596_s1 + $0x104] ss:$8 sps:$4 sm:$0xff]   ;;  %v4075_v17 = vld [vmem:[%s5596_s1 + $0x100] ss:$8 sps:$4 sm:$0xff]  }
  0x29   : > { %1961 = vmatprep.subr.bf16.mxu0 %v4023_v29  ;;  %v350_v27 = vmul.f32 0.25, %v269_v19  ;;  %v351_v28 = vmul.f32 0.25, %v270_v23  ;;  %v382_v29 = vmul.f32 0.25, %v318_v24  ;;  %v336_v55 = vmul.f32 0.75, %v4485_v3 }
  0x2a   : > { %v287_v1 = vrot.slane %v4485_v3, 1  ;;  %v4597_v12 = vadd.f32 %v4476_v61, %v4544_v47 }
  0x2b   : > { %1110 = vmatpush1.bf16.msra.mxu1 %v4025_v30  ;;  %v319_v30 = vsel %vm316_vm0, %v286_v20, %v203_v0 }
  0x2c   : > { %1962 = vmatpush1.bf16.msra.mxu0 %v4026_v31  ;;  %1111 = vmatprep.subr.bf16.mxu1 %v4027_v32  ;;  %v4067_v31 = vld [vmem:[%s5596_s1 + $0xe0] ss:$8 sps:$4 sm:$0xff]   ;;  %v4517_v32 = vadd.f32 %v381_v22, %v333_v8  ;;  %v320_v13 = vsel %vm316_vm0, %v287_v1, %v4485_v3 }
  0x2d   : > { %1963 = vmatprep.subr.bf16.mxu0 %v4029_v33  ;;  %v4519_v33 = vadd.f32 %v349_v25, %v333_v8  ;;  %v4080_v8 = vld [vmem:[%s5596_s1 + $0x404] ss:$8 sps:$4 sm:$0xff]   ;;  %v384_v18 = vmul.f32 0.25, %v320_v13 }
  0x2f   : > { %1112 = vmatpush1.bf16.msra.mxu1 %v4031_v34  ;;  %v383_v34 = vmul.f32 0.25, %v319_v30 }
  0x30   : > { %1964 = vmatpush1.bf16.msra.mxu0 %v4032_v35  ;;  %1113 = vmatprep.subr.bf16.mxu1 %v4033_v36  ;;  %v238_v35 = vrot.slane %v4485_v3, 7  ;;  %v4068_v36 = vld [vmem:[%s5596_s1 + $0x3e0] ss:$8 sps:$4 sm:$0xff]  }
  0x31   : > { %1965 = vmatprep.subr.bf16.mxu0 %v4035_v37  ;;  %v4069_v37 = vld [vmem:[%s5596_s1 + $0xf4] ss:$8 sps:$4 sm:$0xff]  }
  0x32   : > { %v271_v54 = vsel %vm267_vm1, %v4485_v3, %v238_v35  ;;  %v2994_v3 = vlaneseq }
  0x33   : > { %1114 = vmatpush1.bf16.msra.mxu1 %v4037_v38  ;;  %v4528_v38 = vadd.f32 %v350_v27, %v334_v14  ;;  %v352_v0 = vmul.f32 0.25, %v271_v54  ;;  %v4086_v27 = vld [vmem:[%s5596_s1 + $0x414] ss:$8 sps:$4 sm:$0xff]   ;;  %v4089_v54 = vld [vmem:[%s5596_s1 + $0x124] ss:$8 sps:$4 sm:$0xff]  }
  0x34   : > { %1966 = vmatpush1.bf16.msra.mxu0 %v4038_v39  ;;  %1115 = vmatprep.subr.bf16.mxu1 %v4039_v40  ;;  %v4530_v39 = vadd.f32 %v351_v28, %v335_v15  ;;  %v4532_v40 = vadd.f32 %v382_v29, %v334_v14  ;;  %v4631_v28 = vadd.f32 %v384_v18, %v336_v55  ;;  %v4095_v18 = vld [vmem:[%s5596_s1 + $0x134] ss:$8 sps:$4 sm:$0xff]  }
  0x35   : > { %1967 = vmatprep.subr.bf16.mxu0 %v4041_v41  ;;  %v204_v41 = vadd.f32 %v196_v59, %v4487_v4 }
  0x36   : > { %v495_v49 = vrot.slane %v4530_v39, 1  ;;  %v430_v50 = vrot.slane %v4532_v40, 7 }
  0x37   : > { %1116 = vmatpush1.bf16.msra.mxu1 %v4043_v42  ;;  %v4071_v42 = vld [vmem:[%s5596_s1 + $0x3f4] ss:$8 sps:$4 sm:$0xff]   ;;  %v239_v9 = vrot.slane %v204_v41, 7  ;;  %v288_v10 = vrot.slane %v204_v41, 1 }
  0x38   : > { %1968 = vmatpush1.bf16.msra.mxu0 %v4044_v43  ;;  %1117 = vmatprep.subr.bf16.mxu1 %v4045_v44  ;;  %v5599_v43 = vrot.slane %v4517_v32, 7  ;;  %v5601_v44 = vmov 0.0  }
  0x39   : > { %1969 = vmatprep.subr.bf16.mxu0 %v4047_v45  ;;  %v680_v45 = vpack.c.bf16 %v4517_v32, %v5601_v44  ;;  %v679_v51 = vpack.c.bf16 %v4519_v33, %v5601_v44  ;;  %v272_v61 = vsel %vm267_vm1, %v204_v41, %v239_v9  ;;  %v321_v19 = vsel %vm316_vm0, %v288_v10, %v204_v41 }
  0x3a   : > { %v353_v23 = vmul.f32 0.25, %v272_v61  ;;  %v385_v24 = vmul.f32 0.25, %v321_v19  ;;  %v290_v10 = vrot.slane %v4597_v12, 1 }
  0x3b   : > { %1118 = vmatpush1.bf16.msra.mxu1 %v4049_v46  ;;  %v5600_v46 = vrot.slane %v4519_v33, 1  ;;  %1127 = vmatprep.mubr.bf16.mxu1 %v680_v45 }
  0x3c   : > { %1970 = vmatpush1.bf16.msra.mxu0 %v4050_v48  ;;  %1119 = vmatprep.subr.bf16.mxu1 %v4051_v52  ;;  %v494_v48 = vrot.slane %v4528_v38, 1  ;;  %v4549_v52 = vadd.f32 %v383_v34, %v335_v15  ;;  %v323_v61 = vsel %vm316_vm0, %v290_v10, %v4597_v12 }
  0x3d   : > { %1971 = vmatprep.subr.bf16.mxu0 %v4053_v53  ;;  %v4073_v53 = vld [vmem:[%s5596_s1 + $0xf0] ss:$8 sps:$4 sm:$0xff]  }
  0x3e   : > { %v4568_v58 = vpack.c.bf16 %v495_v49, %v494_v48  ;;  %v3683_v59 = vpack.c.bf16 %v494_v48, %v5600_v46 }
  0x3f   : > { %1120 = vmatpush1.bf16.msra.mxu1 %v4055_v60  ;;  %v3688_v60 = vpack.c.bf16 %v430_v50, %v5599_v43 }
  0x40   : > { %1972 = vmatpush1.bf16.msra.mxu0 %v4056_v62  ;;  %1121 = vmatprep.subr.bf16.mxu1 %v4057_v2  ;;  %v4578_v62 = vpack.c.bf16 %v4549_v52, %v4532_v40  ;;  %v431_v2 = vrot.slane %v4549_v52, 7 }
  0x41   : > { %1973 = vmatprep.subr.bf16.mxu0 %v4059_v6  ;;  %v213_v6 = vadd.f32 %v4491_v5, %v4487_v4  ;;  %3684 = vmatprep.mubr.msk.bf16.mxu0 %vm4564_vm2, %v3683_v59  ;;  %v4601_v4 = vadd.f32 %v352_v0, %v336_v55 }
  0x43   : > { %1122 = vmatpush1.bf16.msra.mxu1 %v4061_v11  ;;  %v337_v11 = vmul.f32 0.75, %v204_v41  ;;  %v240_v14 = vrot.slane %v213_v6, 7  ;;  %v338_v15 = vmul.f32 0.75, %v213_v6  ;;  %v289_v20 = vrot.slane %v213_v6, 1  ;;  %v4081_v41 = vld [vmem:[%s5596_s1 + $0x110] ss:$8 sps:$4 sm:$0xff]  }
  0x44   : > { %1974 = vmatpush1.bf16.msra.mxu0 %v4062_v16  ;;  %1123 = vmatprep.subr.bf16.mxu1 %v4063_v21  ;;  %v4606_v16 = vld [vmem:[%s4447_s30 + $0x10] sm:$0xff]   ;;  %v4078_v21 = vld [vmem:[%s5596_s1 + $0x400] ss:$8 sps:$4 sm:$0xff]   ;;  %v5616_v22 = vrot.slane %v4601_v4, 1 }
  0x45   : > { %1975 = vmatprep.subr.bf16.mxu0 %v4065_v26  ;;  %v273_v25 = vsel %vm267_vm1, %v213_v6, %v240_v14  ;;  %v4083_v26 = vld [vmem:[%s5596_s1 + $0x114] ss:$8 sps:$4 sm:$0xff]   ;;  %v322_v30 = vsel %vm316_vm0, %v289_v20, %v213_v6  ;;  %v4637_v35 = vadd.f32 %v353_v23, %v337_v11  ;;  %v4087_v6 = vld [vmem:[%s5596_s1 + $0x120] ss:$8 sps:$4 sm:$0xff]  }
  0x46   : > { %v354_v29 = vmul.f32 0.25, %v273_v25  ;;  %v3691_v34 = vpack.c.bf16 %v5616_v22, %v495_v49  ;;  %v241_v49 = vrot.slane %v4597_v12, 7  ;;  %v4098_v23 = vld [vmem:[%s5596_s1 + $0x434] ss:$8 sps:$4 sm:$0xff]   ;;  %v387_v25 = vmul.f32 0.25, %v323_v61 }
  0x47   : > { %1124 = vmatpush1.bf16.msra.mxu1 %v4067_v31  ;;  %v3610_v31 = vunpack.c.l.bf16 %v4606_v16  ;;  %v5615_v55 = vrot.slane %v4637_v35, 1 }
  0x48   : > { %1976 = vmatpush1.bf16.msra.mxu0 %v4068_v36  ;;  %1125 = vmatprep.subr.bf16.mxu1 %v4069_v37  ;;  %v4639_v36 = vadd.f32 %v385_v24, %v337_v11  ;;  %v386_v37 = vmul.f32 0.25, %v322_v30  ;;  %v4647_v45 = vadd.f32 %v354_v29, %v338_v15  ;;  %v274_v9 = vsel %vm267_vm1, %v4597_v12, %v241_v49 }
  0x49   : > { %1977 = vmatprep.subr.bf16.mxu0 %v4071_v42  ;;  %v5614_v42 = vrot.slane %v4631_v28, 7  ;;  %v4649_v48 = vmul.f32 0.25, %v3610_v31  ;;  %v339_v11 = vmul.f32 0.75, %v4597_v12 }
  0x4a   : > { %v5608_v0 = vrot.slane %v4647_v45, 1 }
  0x4b   : > { %1126 = vmatpush1.bf16.msra.mxu1 %v4073_v53  ;;  %v4084_v53 = vld [vmem:[%s5596_s1 + $0x410] ss:$8 sps:$4 sm:$0xff]   ;;  %v3696_v59 = vpack.c.bf16 %v5614_v42, %v431_v2  ;;  %v214_v1 = vadd.f32 %v4649_v48, %v4544_v47  ;;  %v4090_v47 = vld [vmem:[%s5596_s1 + $0x420] ss:$8 sps:$4 sm:$0xff]  }
  0x4c   : > { %1978 = vmatpush1.bf16.msra.mxu0 %v4074_v56  ;;  %1208 = vmatprep.subr.bf16.mxu1 %v4077_v63  ;;  %v4663_v56 = vadd.f32 %v386_v37, %v338_v15  ;;  %v4674_v63 = vpack.c.bf16 %v4639_v36, %v4631_v28  ;;  %v3699_v13 = vpack.c.bf16 %v5608_v0, %v5615_v55  ;;  %v355_v15 = vmul.f32 0.25, %v274_v9  ;;  %v4096_v37 = vld [vmem:[%s5596_s1 + $0x430] ss:$8 sps:$4 sm:$0xff]   ;;  %v4104_v9 = vld [vmem:[%s5596_s1 + $0x444] ss:$8 sps:$4 sm:$0xff]  }
  0x4d   : > { %2638 = vmatprep.subr.bf16.mxu0 %v4080_v8  ;;  %v5611_v8 = vrot.slane %v4639_v36, 7  ;;  %v340_v19 = vmul.f32 0.75, %v214_v1  ;;  %v291_v20 = vrot.slane %v214_v1, 1 }
  0x4e   : > { %1128 = vmatmul.mubr.bf16.vlgmr.msra.gmra.mrb[0].mxu1 %v679_v51  ;;  %v4657_v51 = vpack.c.bf16 %v4530_v39, %v4528_v38  ;;  %v5606_v14 = vrot.slane %v4663_v56, 7  ;;  %v4707_v24 = vadd.f32 %v355_v15, %v339_v11 }
  0x4f   : > { %3689 = vmatmul.mubr.msk.bf16.vlgmr.msra.gmra.mrb[0].mxu0 %vm4616_vm4, %v3688_v60  ;;  %1209 = vmatpush1.bf16.msra.mxu1 %v4075_v17  ;;  %v4092_v60 = vld [vmem:[%s5596_s1 + $0x424] ss:$8 sps:$4 sm:$0xff]   ;;  %v242_v17 = vrot.slane %v214_v1, 7  ;;  %v324_v30 = vsel %vm316_vm0, %v291_v20, %v214_v1 }
  0x50   : > { %2639 = vmatpush1.bf16.msra.mxu0 %v4078_v21  ;;  %1210 = vmatprep.subr.bf16.mxu1 %v4083_v26  ;;  %v3611_v21 = vunpack.c.h.bf16 %v4606_v16  ;;  %v4720_v16 = vpack.c.bf16 %v431_v2, %v430_v50  ;;  %v3704_v50 = vpack.c.bf16 %v5606_v14, %v5611_v8  ;;  %v4739_v2 = vadd.f32 %v387_v25, %v339_v11  ;;  %v4119_v14 = vld [vmem:[%s5596_s1 + $0x174] ss:$8 sps:$4 sm:$0xff]   ;;  %v4125_v8 = vld [vmem:[%s5596_s1 + $0x184] ss:$8 sps:$4 sm:$0xff]  }
  0x51   : > { %2640 = vmatprep.subr.bf16.mxu0 %v4086_v27  ;;  %1137 = vmatprep.mubr.bf16.mxu1 %v4578_v62  ;;  %v275_v26 = vsel %vm267_vm1, %v214_v1, %v242_v17  ;;  %v191_v27 = vmul.f32 0.75, %v3610_v31  ;;  %v4093_v31 = vld [vmem:[%s5596_s1 + $0x130] ss:$8 sps:$4 sm:$0xff]   ;;  %v388_v49 = vmul.f32 0.25, %v324_v30  ;;  %v4755_v10 = vpack.c.bf16 %v4707_v24, %v4647_v45 }
  0x52   : > { %3692 = vmatprep.mubr.msk.bf16.mxu0 %vm4564_vm2, %v3691_v34  ;;  %v356_v29 = vmul.f32 0.25, %v275_v26  ;;  %v4711_v12 = vmul.f32 0.25, %v3611_v21  ;;  %v4714_v34 = vld [vmem:[%s4447_s30 + $0x18] sm:$0xff]   ;;  %v192_v61 = vmul.f32 0.75, %v3611_v21 }
  0x53   : > { %1211 = vmatpush1.bf16.msra.mxu1 %v4081_v41  ;;  %v4733_v41 = vpack.c.bf16 %v4637_v35, %v4601_v4  ;;  %v3614_v1 = vunpack.c.l.bf16 %v4714_v34  ;;  %5642 = vst [vmem:[#allocation5_spill] sm:$0xff] %v4755_v10  ;;  %v4757_v11 = vadd.f32 %v388_v49, %v340_v19 }
  0x54   : > { %2641 = vmatpush1.bf16.msra.mxu0 %v4084_v53  ;;  %1212 = vmatprep.subr.bf16.mxu1 %v4089_v54  ;;  %v4101_v53 = vld [vmem:[%s5596_s1 + $0x144] ss:$8 sps:$4 sm:$0xff]   ;;  %v4744_v54 = vadd.f32 %v356_v29, %v340_v19  ;;  %v4102_v19 = vld [vmem:[%s5596_s1 + $0x440] ss:$8 sps:$4 sm:$0xff]   ;;  %v207_v46 = vadd.f32 %v4649_v48, %v192_v61 }
  0x55   : > { %2642 = vmatprep.subr.bf16.mxu0 %v4092_v60  ;;  %5641 = vst [vmem:[#allocation4_spill] sm:$0xff] %v4733_v41  ;;  %v215_v60 = vadd.f32 %v4711_v12, %v191_v27  ;;  %v5604_v20 = vrot.slane %v4757_v11, 7  ;;  %v4778_v30 = vmul.f32 0.25, %v3614_v1 }
  0x56   : > { %1138 = vmatmul.mubr.bf16.gmra.mrb[4].mxu1 %v4657_v51  ;;  %v5603_v15 = vrot.slane %v4744_v54, 1  ;;  %v245_v44 = vrot.slane %v207_v46, 7 }
  0x57   : > { %3697 = vmatmul.mubr.msk.bf16.gmra.mrb[4].mxu0 %vm4616_vm4, %v3696_v59  ;;  %1213 = vmatpush1.bf16.msra.mxu1 %v4087_v6  ;;  %v206_v59 = vadd.f32 %v4491_v5, %v191_v27  ;;  %v5607_v6 = vrot.slane %v4707_v24, 1  ;;  %v5605_v5 = vrot.slane %v4739_v2, 7  ;;  %v244_v25 = vrot.slane %v215_v60, 7 }
  0x58   : > { %2643 = vmatpush1.bf16.msra.mxu0 %v4090_v47  ;;  %1214 = vmatprep.subr.bf16.mxu1 %v4095_v18  ;;  %v4099_v47 = vld [vmem:[%s5596_s1 + $0x140] ss:$8 sps:$4 sm:$0xff]   ;;  %v293_v26 = vrot.slane %v215_v60, 1  ;;  %v342_v21 = vmul.f32 0.75, %v215_v60  ;;  %v216_v48 = vadd.f32 %v4778_v30, %v192_v61 }
  0x59   : > { %2644 = vmatprep.subr.bf16.mxu0 %v4098_v23  ;;  %1147 = vmatprep.mubr.bf16.mxu1 %v4674_v63  ;;  %v243_v17 = vrot.slane %v206_v59, 7  ;;  %v292_v18 = vrot.slane %v206_v59, 1  ;;  %v341_v23 = vmul.f32 0.75, %v206_v59 }
  0x5a   : > { %3700 = vmatprep.mubr.msk.bf16.mxu0 %vm4564_vm2, %v3699_v13  ;;  %v4107_v13 = vld [vmem:[%s5596_s1 + $0x154] ss:$8 sps:$4 sm:$0xff]   ;;  %v295_v0 = vrot.slane %v216_v48, 1 }
  0x5b   : > { %1215 = vmatpush1.bf16.msra.mxu1 %v4093_v31  ;;  %v276_v27 = vsel %vm267_vm1, %v206_v59, %v243_v17  ;;  %v325_v29 = vsel %vm316_vm0, %v292_v18, %v206_v59  ;;  %v4110_v31 = vld [vmem:[%s5596_s1 + $0x454] ss:$8 sps:$4 sm:$0xff]   ;;  %v277_v17 = vsel %vm267_vm1, %v215_v60, %v244_v25  ;;  %v4105_v59 = vld [vmem:[%s5596_s1 + $0x150] ss:$8 sps:$4 sm:$0xff]   ;;  %v326_v18 = vsel %vm316_vm0, %v293_v26, %v215_v60 }
  0x5c   : > { %2645 = vmatpush1.bf16.msra.mxu0 %v4096_v37  ;;  %1216 = vmatprep.subr.bf16.mxu1 %v4101_v53  ;;  %v4785_v37 = vpack.c.bf16 %v4739_v2, %v4663_v56  ;;  %v357_v49 = vmul.f32 0.25, %v276_v27  ;;  %v389_v43 = vmul.f32 0.25, %v325_v29  ;;  %v3707_v53 = vpack.c.bf16 %v5603_v15, %v5607_v6  ;;  %v4108_v25 = vld [vmem:[%s5596_s1 + $0x450] ss:$8 sps:$4 sm:$0xff]   ;;  %v4113_v27 = vld [vmem:[%s5596_s1 + $0x164] ss:$8 sps:$4 sm:$0xff]  }
  0x5d   : > { %2646 = vmatprep.subr.bf16.mxu0 %v4104_v9  ;;  %v358_v9 = vmul.f32 0.25, %v277_v17  ;;  %v390_v60 = vmul.f32 0.25, %v326_v18  ;;  %v294_v15 = vrot.slane %v207_v46, 1 }
  0x5e   : > { %5643 = vst [vmem:[#allocation6_spill] sm:$0xff] %v4785_v37  ;;  %1148 = vmatmul.mubr.bf16.gmra.mrb[8].mxu1 %v4733_v41  ;;  %v4806_v29 = vadd.f32 %v357_v49, %v341_v23  ;;  %v4808_v17 = vadd.f32 %v389_v43, %v341_v23  ;;  %v4116_v43 = vld [vmem:[%s5596_s1 + $0x464] ss:$8 sps:$4 sm:$0xff]  }
  0x5f   : > { %3705 = vmatmul.mubr.msk.bf16.gmra.mrb[8].mxu0 %vm4616_vm4, %v3704_v50  ;;  %1217 = vmatpush1.bf16.msra.mxu1 %v4099_v47  ;;  %v3712_v50 = vpack.c.bf16 %v5604_v20, %v5605_v5  ;;  %v4815_v26 = vadd.f32 %v358_v9, %v342_v21  ;;  %v4821_v61 = vadd.f32 %v390_v60, %v342_v21  ;;  %v343_v47 = vmul.f32 0.75, %v207_v46 }
  0x60   : > { %2647 = vmatpush1.bf16.msra.mxu0 %v4102_v19  ;;  %1218 = vmatprep.subr.bf16.mxu1 %v4107_v13  ;;  %v5610_v23 = vrot.slane %v4806_v29, 1  ;;  %v3615_v19 = vunpack.c.h.bf16 %v4714_v34  ;;  %v4111_v13 = vld [vmem:[%s5596_s1 + $0x160] ss:$8 sps:$4 sm:$0xff]   ;;  %v5613_v21 = vrot.slane %v4808_v17, 7  ;;  %v278_v9 = vsel %vm267_vm1, %v207_v46, %v245_v44 }
  0x61   : > { %2648 = vmatprep.subr.bf16.mxu0 %v4110_v31  ;;  %1157 = vmatprep.mubr.bf16.mxu1 %v4785_v37  ;;  %v4114_v31 = vld [vmem:[%s5596_s1 + $0x460] ss:$8 sps:$4 sm:$0xff]   ;;  %v5609_v49 = vrot.slane %v4815_v26, 1  ;;  %v327_v18 = vsel %vm316_vm0, %v294_v15, %v207_v46  ;;  %v5612_v60 = vrot.slane %v4821_v61, 7  ;;  %v359_v20 = vmul.f32 0.25, %v278_v9 }
  0x62   : > { %3708 = vmatprep.mubr.msk.bf16.mxu0 %vm4564_vm2, %v3707_v53  ;;  %v391_v53 = vmul.f32 0.25, %v327_v18  ;;  %v246_v5 = vrot.slane %v216_v48, 7  ;;  %v4843_v6 = vpack.c.bf16 %v4808_v17, %v4757_v11  ;;  %v193_v44 = vmul.f32 0.75, %v3614_v1  ;;  %v4122_v46 = vld [vmem:[%s5596_s1 + $0x474] ss:$8 sps:$4 sm:$0xff]  }
  0x63   : > { %1219 = vmatpush1.bf16.msra.mxu1 %v4105_v59  ;;  %v3715_v15 = vpack.c.bf16 %v5609_v49, %v5610_v23  ;;  %v4854_v59 = vadd.f32 %v359_v20, %v343_v47  ;;  %v210_v9 = vmul.f32 0.25, %v3615_v19  ;;  %v328_v34 = vsel %vm316_vm0, %v295_v0, %v216_v48  ;;  %v4120_v20 = vld [vmem:[%s5596_s1 + $0x470] ss:$8 sps:$4 sm:$0xff]  }
  0x64   : > { %2649 = vmatpush1.bf16.msra.mxu0 %v4108_v25  ;;  %5644 = vst [vmem:[#allocation7_spill] sm:$0xff] %v4843_v6  ;;  %1220 = vmatprep.subr.bf16.mxu1 %v4113_v27  ;;  %v344_v25 = vmul.f32 0.75, %v216_v48  ;;  %v279_v18 = vsel %vm267_vm1, %v216_v48, %v246_v5  ;;  %v208_v1 = vadd.f32 %v4711_v12, %v193_v44  ;;  %v194_v27 = vmul.f32 0.75, %v3615_v19 }
  0x65   : > { %2650 = vmatprep.subr.bf16.mxu0 %v4116_v43  ;;  %v4117_v43 = vld [vmem:[%s5596_s1 + $0x170] ss:$8 sps:$4 sm:$0xff]   ;;  %v4870_v5 = vpack.c.bf16 %v4806_v29, %v4744_v54  ;;  %v3720_v0 = vpack.c.bf16 %v5612_v60, %v5613_v21  ;;  %v4876_v12 = vadd.f32 %v391_v53, %v343_v47  ;;  %v360_v48 = vmul.f32 0.25, %v279_v18  ;;  %v4128_v60 = vld [vmem:[%s5596_s1 + $0x484] ss:$8 sps:$4 sm:$0xff]  }
  0x66   : > { %1158 = vmatmul.mubr.bf16.gmra.mrb[12].mxu1 %v4755_v10  ;;  %v392_v19 = vmul.f32 0.25, %v328_v34  ;;  %v217_v49 = vadd.f32 %v210_v9, %v193_v44  ;;  %v247_v23 = vrot.slane %v208_v1, 7  ;;  %v296_v53 = vrot.slane %v208_v1, 1  ;;  %v4123_v34 = vld [vmem:[%s5596_s1 + $0x180] ss:$8 sps:$4 sm:$0xff]  }
  0x67   : > { %3713 = vmatmul.mubr.msk.bf16.gmra.mrb[12].mxu0 %vm4616_vm4, %v3712_v50  ;;  %5645 = vst [vmem:[#allocation8_spill] sm:$0xff] %v4870_v5  ;;  %1221 = vmatpush1.bf16.msra.mxu1 %v4111_v13  ;;  %v5618_v50 = vrot.slane %v4854_v59, 1  ;;  %v4885_v47 = vadd.f32 %v360_v48, %v344_v25  ;;  %v345_v13 = vmul.f32 0.75, %v208_v1  ;;  %v5654_v10 = vrot.slane %v4647_v45, 1 }
  0x68   : > { %2651 = vmatpush1.bf16.msra.mxu0 %v4114_v31  ;;  %1222 = vmatprep.subr.bf16.mxu1 %v4119_v14  ;;  %v209_v31 = vadd.f32 %v4778_v30, %v194_v27  ;;  %v4891_v14 = vadd.f32 %v392_v19, %v344_v25  ;;  %v280_v44 = vsel %vm267_vm1, %v208_v1, %v247_v23  ;;  %v346_v18 = vmul.f32 0.75, %v217_v49  ;;  %v4131_v23 = vld [vmem:[%s5596_s1 + $0x194] ss:$8 sps:$4 sm:$0xff]  }
  0x69   : > { %2652 = vmatprep.subr.bf16.mxu0 %v4122_v46  ;;  %1167 = vmatprep.mubr.bf16.mxu1 %v4843_v6  ;;  %v248_v46 = vrot.slane %v217_v49, 7  ;;  %v5617_v48 = vrot.slane %v4885_v47, 1  ;;  %v329_v21 = vsel %vm316_vm0, %v296_v53, %v208_v1  ;;  %v361_v30 = vmul.f32 0.25, %v280_v44  ;;  %v4134_v1 = vld [vmem:[%s5596_s1 + $0x494] ss:$8 sps:$4 sm:$0xff]  }
  0x6a   : > { %3716 = vmatprep.mubr.msk.bf16.mxu0 %vm4564_vm2, %v3715_v15  ;;  %v297_v42 = vrot.slane %v217_v49, 1  ;;  %v4126_v15 = vld [vmem:[%s5596_s1 + $0x480] ss:$8 sps:$4 sm:$0xff]   ;;  %v393_v25 = vmul.f32 0.25, %v329_v21  ;;  %v4129_v21 = vld [vmem:[%s5596_s1 + $0x190] ss:$8 sps:$4 sm:$0xff]  }
  0x6b   : > { %1223 = vmatpush1.bf16.msra.mxu1 %v4117_v43  ;;  %v281_v19 = vsel %vm267_vm1, %v217_v49, %v248_v46  ;;  %v4911_v43 = vpack.c.bf16 %v4876_v12, %v4821_v61  ;;  %v218_v46 = vadd.f32 %v210_v9, %v194_v27  ;;  %v249_v55 = vrot.slane %v209_v31, 7  ;;  %v4137_v27 = vld [vmem:[%s5596_s1 + $0x1a4] ss:$8 sps:$4 sm:$0xff]  }
  0x6c   : > { %2653 = vmatpush1.bf16.msra.mxu0 %v4120_v20  ;;  %1224 = vmatprep.subr.bf16.mxu1 %v4125_v8  ;;  %v4913_v20 = vadd.f32 %v361_v30, %v345_v13  ;;  %v362_v53 = vmul.f32 0.25, %v281_v19  ;;  %v330_v44 = vsel %vm316_vm0, %v297_v42, %v217_v49  ;;  %v3723_v8 = vpack.c.bf16 %v5617_v48, %v5618_v50  ;;  %v4132_v42 = vld [vmem:[%s5596_s1 + $0x490] ss:$8 sps:$4 sm:$0xff]  }
  0x6d   : > { %2654 = vmatprep.subr.bf16.mxu0 %v4128_v60  ;;  %5646 = vst [vmem:[#allocation9_spill] sm:$0xff] %v4911_v43  ;;  %v394_v60 = vmul.f32 0.25, %v330_v44  ;;  %v5622_v49 = vrot.slane %v4876_v12, 7  ;;  %v5621_v30 = vrot.slane %v4891_v14, 7  ;;  %v298_v22 = vrot.slane %v209_v31, 1 }
  0x6e   : > { %1168 = vmatmul.mubr.bf16.gmra.mrb[16].mxu1 %v4870_v5  ;;  %v4931_v19 = vadd.f32 %v362_v53, %v346_v18  ;;  %v4935_v9 = vpack.c.bf16 %v4854_v59, %v4815_v26  ;;  %v282_v44 = vsel %vm267_vm1, %v209_v31, %v249_v55  ;;  %v4140_v53 = vld [vmem:[%s5596_s1 + $0x4a4] ss:$8 sps:$4 sm:$0xff]   ;;  %v347_v48 = vmul.f32 0.75, %v209_v31 }
  0x6f   : > { %3721 = vmatmul.mubr.msk.bf16.gmra.mrb[16].mxu0 %vm4616_vm4, %v3720_v0  ;;  %1225 = vmatpush1.bf16.msra.mxu1 %v4123_v34  ;;  %v4940_v0 = vadd.f32 %v393_v25, %v345_v13  ;;  %v505_v34 = vrot.slane %v4913_v20, 1  ;;  %v363_v50 = vmul.f32 0.25, %v282_v44  ;;  %v4952_v55 = vadd.f32 %v394_v60, %v346_v18  ;;  %v4138_v18 = vld [vmem:[%s5596_s1 + $0x4a0] ss:$8 sps:$4 sm:$0xff]   ;;  %v4143_v60 = vld [vmem:[%s5596_s1 + $0x1b4] ss:$8 sps:$4 sm:$0xff]  }
  0x70   : > { %2655 = vmatpush1.bf16.msra.mxu0 %v4126_v15  ;;  %5647 = vst [vmem:[#allocation10_spill] sm:$0xff] %v4935_v9  ;;  %1226 = vmatprep.subr.bf16.mxu1 %v4131_v23  ;;  %v331_v15 = vsel %vm316_vm0, %v298_v22, %v209_v31  ;;  %v506_v13 = vrot.slane %v4931_v19, 1  ;;  %v250_v25 = vrot.slane %v218_v46, 7  ;;  %v3728_v22 = vpack.c.bf16 %v5621_v30, %v5622_v49 }
  0x71   : > { %2656 = vmatprep.subr.bf16.mxu0 %v4134_v1  ;;  %1177 = vmatprep.mubr.bf16.mxu1 %v4911_v43  ;;  %v395_v23 = vmul.f32 0.25, %v331_v15  ;;  %v4135_v1 = vld [vmem:[%s5596_s1 + $0x1a0] ss:$8 sps:$4 sm:$0xff]   ;;  %v348_v31 = vmul.f32 0.75, %v218_v46  ;;  %v299_v44 = vrot.slane %v218_v46, 1  ;;  %v5648_v43 = vrot.slane %v4601_v4, 1 }
  0x72   : > { %3724 = vmatprep.mubr.msk.bf16.mxu0 %vm4564_vm2, %v3723_v8  ;;  %v5649_v8 = vrot.slane %v4637_v35, 1  ;;  %v4973_v15 = vadd.f32 %v363_v50, %v347_v48  ;;  %v283_v49 = vsel %vm267_vm1, %v218_v46, %v250_v25  ;;  %v441_v25 = vrot.slane %v4940_v0, 7 }
  0x73   : > { %1227 = vmatpush1.bf16.msra.mxu1 %v4129_v21  ;;  %v4975_v30 = vadd.f32 %v395_v23, %v347_v48  ;;  %v4983_v21 = vpack.c.bf16 %v4940_v0, %v4891_v14  ;;  %v364_v50 = vmul.f32 0.25, %v283_v49  ;;  %v332_v48 = vsel %vm316_vm0, %v299_v44, %v218_v46  ;;  %v4141_v46 = vld [vmem:[%s5596_s1 + $0x1b0] ss:$8 sps:$4 sm:$0xff]  }
  0x74   : > { %v4965_v5 = vpack.c.bf16 %v5649_v8, %v5648_v43  ;;  %2657 = vmatpush1.bf16.msra.mxu0 %v4132_v42  ;;  %1228 = vmatprep.subr.bf16.mxu1 %v4137_v27  ;;  %v4146_v43 = vld [vmem:[%s5596_s1 + $0x4b4] ss:$8 sps:$4 sm:$0xff]   ;;  %v4987_v42 = vpack.c.bf16 %v4913_v20, %v4885_v47  ;;  %v3731_v23 = vpack.c.bf16 %v506_v13, %v505_v34  ;;  %v442_v27 = vrot.slane %v4952_v55, 7 }
  0x75   : > { %2658 = vmatprep.subr.bf16.mxu0 %v4140_v53  ;;  %v5651_v53 = vrot.slane %v4631_v28, 7  ;;  %v5652_v8 = vrot.slane %v4639_v36, 7  ;;  %v5004_v49 = vadd.f32 %v364_v50, %v348_v31  ;;  %v396_v44 = vmul.f32 0.25, %v332_v48 }
  0x76   : > { %5650 = vst [vmem:[#allocation11_spill] sm:$0xff] %v4965_v5  ;;  %1178 = vmatmul.mubr.bf16.gmra.mrb[20].mxu1 %v4935_v9  ;;  %v5655_v37 = vrot.slane %v4707_v24, 1  ;;  %v507_v50 = vrot.slane %v4973_v15, 1  ;;  %v443_v48 = vrot.slane %v4975_v30, 7  ;;  %v5671_v41 = vrot.slane %v4891_v14, 7 }
  0x77   : > { %v4996_v6 = vpack.c.bf16 %v5652_v8, %v5651_v53  ;;  %3729 = vmatmul.mubr.msk.bf16.gmra.mrb[20].mxu0 %vm4616_vm4, %v3728_v22  ;;  %v5657_v53 = vrot.slane %v4663_v56, 7  ;;  %v5658_v8 = vrot.slane %v4739_v2, 7  ;;  %1229 = vmatpush1.bf16.msra.mxu1 %v4135_v1  ;;  %v4144_v22 = vld [vmem:[%s5596_s1 + $0x4b0] ss:$8 sps:$4 sm:$0xff]  }
  0x78   : > { %v5010_v5 = vpack.c.bf16 %v5655_v37, %v5654_v10  ;;  %2659 = vmatpush1.bf16.msra.mxu0 %v4138_v18  ;;  %v5661_v10 = vrot.slane %v4806_v29, 1  ;;  %1230 = vmatprep.subr.bf16.mxu1 %v4143_v60  ;;  %v4149_v18 = vld [vmem:[%s5596_s1 + $0x1c4] ss:$8 sps:$4 sm:$0xff]   ;;  %v5669_v60 = vrot.slane %v4876_v12, 7 }
  0x79   : > { %5653 = vst [vmem:[#allocation12_spill] sm:$0xff] %v4996_v6  ;;  %v5016_v9 = vpack.c.bf16 %v5658_v8, %v5657_v53  ;;  %v5660_v6 = vrot.slane %v4744_v54, 1  ;;  %v5664_v53 = vrot.slane %v4808_v17, 7  ;;  %2660 = vmatprep.subr.bf16.mxu0 %v4146_v43  ;;  %v4152_v8 = vld [vmem:[%s5596_s1 + $0x4c4] ss:$8 sps:$4 sm:$0xff]   ;;  %1187 = vmatprep.mubr.bf16.mxu1 %v4983_v21 }
  0x7a   : > { %5656 = vst [vmem:[#allocation13_spill] sm:$0xff] %v5010_v5  ;;  %v5663_v5 = vrot.slane %v4757_v11, 7  ;;  %3732 = vmatprep.mubr.msk.bf16.mxu0 %vm4564_vm2, %v3731_v23  ;;  %v5672_v23 = vrot.slane %v5004_v49, 1 }
  0x7b   : > { %5659 = vst [vmem:[#allocation14_spill] sm:$0xff] %v5016_v9  ;;  %v5027_v37 = vpack.c.bf16 %v5661_v10, %v5660_v6  ;;  %v5666_v6 = vrot.slane %v4815_v26, 1  ;;  %v5667_v10 = vrot.slane %v4854_v59, 1  ;;  %v3736_v9 = vpack.c.bf16 %v442_v27, %v441_v25  ;;  %1231 = vmatpush1.bf16.msra.mxu1 %v4141_v46  ;;  %v4155_v46 = vld [vmem:[%s5596_s1 + $0x1d4] ss:$8 sps:$4 sm:$0xff]  }
  0x7c   : > { %v5033_v1 = vpack.c.bf16 %v5664_v53, %v5663_v5  ;;  %v5668_v5 = vrot.slane %v4821_v61, 7  ;;  %v5670_v53 = vrot.slane %v4885_v47, 1  ;;  %2661 = vmatpush1.bf16.msra.mxu0 %v4144_v22  ;;  %1232 = vmatprep.subr.bf16.mxu1 %v4149_v18  ;;  %v1421_v22 = vpack.c.bf16 %v4601_v4, %v4530_v39  ;;  %v4233_v18 = vld [vmem:[%s5596_s1 + $0x2a4] ss:$8 sps:$4 sm:$0xff]  }
  0x7d   : > { %5662 = vst [vmem:[#allocation15_spill] sm:$0xff] %v5027_v37  ;;  %v5046_v37 = vpack.c.bf16 %v5667_v10, %v5666_v6  ;;  %v5063_v6 = vpack.c.bf16 %v441_v25, %v5671_v41  ;;  %v5065_v10 = vpack.c.bf16 %v507_v50, %v506_v13  ;;  %v4147_v41 = vld [vmem:[%s5596_s1 + $0x1c0] ss:$8 sps:$4 sm:$0xff]   ;;  %v3739_v25 = vpack.c.bf16 %v5672_v23, %v507_v50 }
  0x7e   : > { %5665 = vst [vmem:[#allocation16_spill] sm:$0xff] %v5033_v1  ;;  %v5052_v43 = vpack.c.bf16 %v5669_v60, %v5668_v5  ;;  %v5056_v1 = vpack.c.bf16 %v505_v34, %v5670_v53  ;;  %v5069_v5 = vpack.c.bf16 %v4975_v30, %v4952_v55  ;;  %v5071_v60 = vadd.f32 %v396_v44, %v348_v31  ;;  %v4150_v13 = vld [vmem:[%s5596_s1 + $0x4c0] ss:$8 sps:$4 sm:$0xff]   ;;  %v4158_v44 = vld [vmem:[%s5596_s1 + $0x4d4] ss:$8 sps:$4 sm:$0xff]  }
  0x7f   : > { %v5073_v34 = vpack.c.bf16 %v443_v48, %v442_v27  ;;  %v1418_v53 = vpack.c.bf16 %v4532_v40, %v4517_v32  ;;  %2662 = vmatprep.subr.bf16.mxu0 %v4152_v8  ;;  %1188 = vmatmul.mubr.bf16.gmra.mrb[24].mxu1 %v4987_v42  ;;  %v4153_v31 = vld [vmem:[%s5596_s1 + $0x1d0] ss:$8 sps:$4 sm:$0xff]   ;;  %v4159_v23 = vld [vmem:[%s5596_s1 + $0x1e0] ss:$8 sps:$4 sm:$0xff]   ;;  %v4227_v27 = vld [vmem:[%s5596_s1 + $0x294] ss:$8 sps:$4 sm:$0xff]   ;;  %v5694_v39 = vpack.c.bf16 %v4744_v54, %v4707_v24 }
  0x80   : > { %3737 = vmatmul.mubr.msk.bf16.gmra.mrb[24].mxu0 %vm4616_vm4, %v3736_v9  ;;  %v5634_v50 = vrot.slane %v5071_v60, 7  ;;  %1233 = vmatpush1.bf16.msra.mxu1 %v4147_v41  ;;  %v4156_v9 = vld [vmem:[%s5596_s1 + $0x4d0] ss:$8 sps:$4 sm:$0xff]   ;;  %v4161_v41 = vld [vmem:[%s5596_s1 + $0x1e4] ss:$8 sps:$4 sm:$0xff]   ;;  %v5695_v40 = vpack.c.bf16 %v4821_v61, %v4808_v17  ;;  %v5698_v4 = vpack.c.bf16 %v4885_v47, %v4854_v59  ;;  %v5703_v57 = vrot.slane %v5071_v60, 7 }
  0x81   : > { %2663 = vmatpush1.bf16.msra.mxu0 %v4150_v13  ;;  %1234 = vmatprep.subr.bf16.mxu1 %v4155_v46  ;;  %v4164_v13 = vld [vmem:[%s5596_s1 + $0x4e4] ss:$8 sps:$4 sm:$0xff]   ;;  %v5142_v46 = vpack.c.bf16 %v4973_v15, %v4931_v19  ;;  %v4162_v8 = vld [vmem:[%s5596_s1 + $0x4e0] ss:$8 sps:$4 sm:$0xff]  }
  0x82   : > { %2664 = vmatprep.subr.bf16.mxu0 %v4158_v44  ;;  %1197 = vmatprep.mubr.bf16.mxu1 %v5069_v5  ;;  %v3744_v44 = vpack.c.bf16 %v5634_v50, %v443_v48  ;;  %v4170_v48 = vld [vmem:[%s5596_s1 + $0x4f4] ss:$8 sps:$4 sm:$0xff]  }
  0x83   : > { %3740 = vmatprep.mubr.msk.bf16.mxu0 %vm4564_vm2, %v3739_v25  ;;  %v4167_v25 = vld [vmem:[%s5596_s1 + $0x1f4] ss:$8 sps:$4 sm:$0xff]  }
  0x84   : > { %1235 = vmatpush1.bf16.msra.mxu1 %v4153_v31  ;;  %v5673_v31 = vmov 0.0  }
  0x85   : > { %2665 = vmatpush1.bf16.msra.mxu0 %v4156_v9  ;;  %1236 = vmatprep.subr.bf16.mxu1 %v4161_v41  ;;  %v5674_v9 = vrot.slane %v4519_v33, 1  ;;  %v4165_v41 = vld [vmem:[%s5596_s1 + $0x1f0] ss:$8 sps:$4 sm:$0xff]   ;;  %v3807_v24 = vpack.c.bf16 %v5673_v31, %v5703_v57 }
  0x86   : > { %2666 = vmatprep.subr.bf16.mxu0 %v4164_v13  ;;  %v4168_v13 = vld [vmem:[%s5596_s1 + $0x4f0] ss:$8 sps:$4 sm:$0xff]  }
  0x87   : > { %v3620_v50 = vpack.c.bf16 %v5674_v9, %v5673_v31  ;;  %1198 = vmatmul.mubr.bf16.gmra.mrb[28].mxu1 %v5142_v46  ;;  %v4176_v9 = vld [vmem:[%s5596_s1 + $0x504] ss:$8 sps:$4 sm:$0xff]  }
  0x88   : > { %3745 = vmatmul.mubr.msk.bf16.gmra.mrb[28].mxu0 %vm4616_vm4, %v3744_v44  ;;  %1237 = vmatpush1.bf16.msra.mxu1 %v4159_v23  ;;  %v4173_v44 = vld [vmem:[%s5596_s1 + $0x204] ss:$8 sps:$4 sm:$0xff]   ;;  %v5675_v23 = vrot.slane %v4517_v32, 7  ;;  %v5691_v32 = vpack.c.bf16 %v4663_v56, %v4639_v36  ;;  %v5702_v56 = vpack.c.bf16 %v5071_v60, %v4975_v30 }
  0x89   : > { %2667 = vmatpush1.bf16.msra.mxu0 %v4162_v8  ;;  %1238 = vmatprep.subr.bf16.mxu1 %v4167_v25  ;;  %v4171_v25 = vld [vmem:[%s5596_s1 + $0x200] ss:$8 sps:$4 sm:$0xff]  }
  0x8a   : > { %2668 = vmatprep.subr.bf16.mxu0 %v4170_v48  ;;  %3621 = vmatprep.mubr.msk.bf16.mxu1 %vm3619_vm6, %v3620_v50  ;;  %v3624_v8 = vpack.c.bf16 %v5675_v23, %v5673_v31  ;;  %v4174_v50 = vld [vmem:[%s5596_s1 + $0x500] ss:$8 sps:$4 sm:$0xff]   ;;  %v4182_v48 = vld [vmem:[%s5596_s1 + $0x514] ss:$8 sps:$4 sm:$0xff]  }
  0x8b   : > { %2670 = vmatprep.mubr.bf16.mxu0 %v4578_v62  ;;  %v4179_v62 = vld [vmem:[%s5596_s1 + $0x214] ss:$8 sps:$4 sm:$0xff]   ;;  %v4186_v23 = vld [vmem:[%s5596_s1 + $0x520] ss:$8 sps:$4 sm:$0xff]  }
  0x8c   : > { %1239 = vmatpush1.bf16.msra.mxu1 %v4165_v41  ;;  %v4177_v41 = vld [vmem:[%s5596_s1 + $0x210] ss:$8 sps:$4 sm:$0xff]  }
  0x8d   : > { %2669 = vmatpush1.bf16.msra.mxu0 %v4168_v13  ;;  %1834 = vmatprep.subr.bf16.mxu1 %v4173_v44  ;;  %v4180_v13 = vld [vmem:[%s5596_s1 + $0x510] ss:$8 sps:$4 sm:$0xff]   ;;  %v4185_v44 = vld [vmem:[%s5596_s1 + $0x224] ss:$8 sps:$4 sm:$0xff]  }
  0x8e   : > { %2751 = vmatprep.subr.bf16.mxu0 %v4176_v9  ;;  %v4183_v9 = vld [vmem:[%s5596_s1 + $0x220] ss:$8 sps:$4 sm:$0xff]  }
  0x8f   : > { %3625 = vmatmul.mubr.msk.bf16.vlgmr.msra.gmra.mrb[0].mxu1 %vm3623_vm7, %v3624_v8  ;;  %v4191_v8 = vld [vmem:[%s5596_s1 + $0x234] ss:$8 sps:$4 sm:$0xff]  }
  0x90   : > { %2671 = vmatmul.mubr.bf16.vlgmr.msra.gmra.mrb[0].mxu0 %v4657_v51  ;;  %1835 = vmatpush1.bf16.msra.mxu1 %v4171_v25  ;;  %v4188_v51 = vld [vmem:[%s5596_s1 + $0x524] ss:$8 sps:$4 sm:$0xff]  }
  0x91   : > { %2752 = vmatpush1.bf16.msra.mxu0 %v4174_v50  ;;  %1836 = vmatprep.subr.bf16.mxu1 %v4179_v62  ;;  %v5676_v25 = vld [vmem:[#allocation4_spill] sm:$0xff]  ;;  %v4189_v50 = vld [vmem:[%s5596_s1 + $0x230] ss:$8 sps:$4 sm:$0xff]  }
  0x92   : > { %2753 = vmatprep.subr.bf16.mxu0 %v4182_v48  ;;  %3628 = vmatprep.mubr.msk.bf16.mxu1 %vm4564_vm2, %v4568_v58  ;;  %v4192_v62 = vld [vmem:[%s5596_s1 + $0x530] ss:$8 sps:$4 sm:$0xff]   ;;  %v4197_v48 = vld [vmem:[%s5596_s1 + $0x244] ss:$8 sps:$4 sm:$0xff]  }
  0x93   : > { %2680 = vmatprep.mubr.bf16.mxu0 %v4674_v63  ;;  %v4194_v63 = vld [vmem:[%s5596_s1 + $0x534] ss:$8 sps:$4 sm:$0xff]  }
  0x94   : > { %1837 = vmatpush1.bf16.msra.mxu1 %v4177_v41  ;;  %v4200_v41 = vld [vmem:[%s5596_s1 + $0x544] ss:$8 sps:$4 sm:$0xff]  }
  0x95   : > { %2754 = vmatpush1.bf16.msra.mxu0 %v4180_v13  ;;  %1838 = vmatprep.subr.bf16.mxu1 %v4185_v44  ;;  %v5677_v13 = vld [vmem:[#allocation11_spill] sm:$0xff]  ;;  %v5678_v44 = vld [vmem:[#allocation6_spill] sm:$0xff] }
  0x96   : > { %2755 = vmatprep.subr.bf16.mxu0 %v4188_v51  ;;  %v4195_v51 = vld [vmem:[%s5596_s1 + $0x240] ss:$8 sps:$4 sm:$0xff]  }
  0x97   : > { %3633 = vmatmul.mubr.msk.bf16.gmra.mrb[4].mxu1 %vm4616_vm4, %v4720_v16 }
  0x98   : > { %2681 = vmatmul.mubr.bf16.gmra.mrb[4].mxu0 %v5676_v25  ;;  %1839 = vmatpush1.bf16.msra.mxu1 %v4183_v9  ;;  %v4198_v9 = vld [vmem:[%s5596_s1 + $0x540] ss:$8 sps:$4 sm:$0xff]  }
  0x99   : > { %2756 = vmatpush1.bf16.msra.mxu0 %v4186_v23  ;;  %1840 = vmatprep.subr.bf16.mxu1 %v4191_v8  ;;  %v4203_v23 = vld [vmem:[%s5596_s1 + $0x254] ss:$8 sps:$4 sm:$0xff]   ;;  %v5680_v25 = vld [vmem:[#allocation5_spill] sm:$0xff] }
  0x9a   : > { %2757 = vmatprep.subr.bf16.mxu0 %v4194_v63  ;;  %3636 = vmatprep.mubr.msk.bf16.mxu1 %vm4564_vm2, %v5677_v13  ;;  %v4206_v8 = vld [vmem:[%s5596_s1 + $0x554] ss:$8 sps:$4 sm:$0xff]   ;;  %v5679_v63 = vld [vmem:[#allocation12_spill] sm:$0xff] }
  0x9b   : > { %2690 = vmatprep.mubr.bf16.mxu0 %v5678_v44  ;;  %v5681_v44 = vld [vmem:[#allocation13_spill] sm:$0xff] }
  0x9c   : > { %1841 = vmatpush1.bf16.msra.mxu1 %v4189_v50  ;;  %v4201_v50 = vld [vmem:[%s5596_s1 + $0x250] ss:$8 sps:$4 sm:$0xff]  }
  0x9d   : > { %2758 = vmatpush1.bf16.msra.mxu0 %v4192_v62  ;;  %1842 = vmatprep.subr.bf16.mxu1 %v4197_v48  ;;  %v4204_v62 = vld [vmem:[%s5596_s1 + $0x550] ss:$8 sps:$4 sm:$0xff]   ;;  %v4209_v48 = vld [vmem:[%s5596_s1 + $0x264] ss:$8 sps:$4 sm:$0xff]  }
  0x9e   : > { %2759 = vmatprep.subr.bf16.mxu0 %v4200_v41  ;;  %v4212_v41 = vld [vmem:[%s5596_s1 + $0x564] ss:$8 sps:$4 sm:$0xff]  }
  0x9f   : > { %3641 = vmatmul.mubr.msk.bf16.gmra.mrb[8].mxu1 %vm4616_vm4, %v5679_v63 }
  0xa0   : > { %2691 = vmatmul.mubr.bf16.gmra.mrb[8].mxu0 %v5680_v25  ;;  %1843 = vmatpush1.bf16.msra.mxu1 %v4195_v51  ;;  %v5682_v51 = vld [vmem:[#allocation7_spill] sm:$0xff] }
  0xa1   : > { %2760 = vmatpush1.bf16.msra.mxu0 %v4198_v9  ;;  %1844 = vmatprep.subr.bf16.mxu1 %v4203_v23  ;;  %v4207_v9 = vld [vmem:[%s5596_s1 + $0x260] ss:$8 sps:$4 sm:$0xff]   ;;  %v4218_v25 = vld [vmem:[%s5596_s1 + $0x574] ss:$8 sps:$4 sm:$0xff]  }
  0xa2   : > { %2761 = vmatprep.subr.bf16.mxu0 %v4206_v8  ;;  %3644 = vmatprep.mubr.msk.bf16.mxu1 %vm4564_vm2, %v5681_v44  ;;  %v4210_v23 = vld [vmem:[%s5596_s1 + $0x560] ss:$8 sps:$4 sm:$0xff]   ;;  %v4215_v8 = vld [vmem:[%s5596_s1 + $0x274] ss:$8 sps:$4 sm:$0xff]  }
  0xa3   : > { %2700 = vmatprep.mubr.bf16.mxu0 %v5682_v51  ;;  %v4221_v51 = vld [vmem:[%s5596_s1 + $0x284] ss:$8 sps:$4 sm:$0xff]  }
  0xa4   : > { %1845 = vmatpush1.bf16.msra.mxu1 %v4201_v50  ;;  %v5683_v50 = vld [vmem:[#allocation14_spill] sm:$0xff] }
  0xa5   : > { %2762 = vmatpush1.bf16.msra.mxu0 %v4204_v62  ;;  %1846 = vmatprep.subr.bf16.mxu1 %v4209_v48  ;;  %v5684_v62 = vld [vmem:[#allocation8_spill] sm:$0xff]  ;;  %v4213_v48 = vld [vmem:[%s5596_s1 + $0x270] ss:$8 sps:$4 sm:$0xff]  }
  0xa6   : > { %2763 = vmatprep.subr.bf16.mxu0 %v4212_v41  ;;  %v4216_v41 = vld [vmem:[%s5596_s1 + $0x570] ss:$8 sps:$4 sm:$0xff]  }
  0xa7   : > { %3649 = vmatmul.mubr.msk.bf16.gmra.mrb[12].mxu1 %vm4616_vm4, %v5683_v50 }
  0xa8   : > { %2701 = vmatmul.mubr.bf16.gmra.mrb[12].mxu0 %v5684_v62  ;;  %1847 = vmatpush1.bf16.msra.mxu1 %v4207_v9  ;;  %v4224_v62 = vld [vmem:[%s5596_s1 + $0x584] ss:$8 sps:$4 sm:$0xff]   ;;  %v5685_v9 = vld [vmem:[#allocation15_spill] sm:$0xff] }
  0xa9   : > { %2764 = vmatpush1.bf16.msra.mxu0 %v4210_v23  ;;  %1848 = vmatprep.subr.bf16.mxu1 %v4215_v8  ;;  %v5686_v23 = vld [vmem:[#allocation9_spill] sm:$0xff] }
  0xaa   : > { %2765 = vmatprep.subr.bf16.mxu0 %v4218_v25  ;;  %3652 = vmatprep.mubr.msk.bf16.mxu1 %vm4564_vm2, %v5685_v9  ;;  %v4219_v8 = vld [vmem:[%s5596_s1 + $0x280] ss:$8 sps:$4 sm:$0xff]  }
  0xab   : > { %2710 = vmatprep.mubr.bf16.mxu0 %v5686_v23  ;;  %v4222_v25 = vld [vmem:[%s5596_s1 + $0x580] ss:$8 sps:$4 sm:$0xff]   ;;  %v4230_v23 = vld [vmem:[%s5596_s1 + $0x594] ss:$8 sps:$4 sm:$0xff]  }
  0xac   : > { %1849 = vmatpush1.bf16.msra.mxu1 %v4213_v48  ;;  %v5687_v48 = vld [vmem:[#allocation16_spill] sm:$0xff] }
  0xad   : > { %2766 = vmatpush1.bf16.msra.mxu0 %v4216_v41  ;;  %1850 = vmatprep.subr.bf16.mxu1 %v4221_v51  ;;  %v5688_v41 = vld [vmem:[#allocation10_spill] sm:$0xff] }
  0xae   : > { %2767 = vmatprep.subr.bf16.mxu0 %v4224_v62  ;;  %v4225_v51 = vld [vmem:[%s5596_s1 + $0x290] ss:$8 sps:$4 sm:$0xff]  }
  0xaf   : > { %3657 = vmatmul.mubr.msk.bf16.gmra.mrb[16].mxu1 %vm4616_vm4, %v5687_v48  ;;  %v4228_v62 = vld [vmem:[%s5596_s1 + $0x590] ss:$8 sps:$4 sm:$0xff]  }
  0xb0   : > { %2711 = vmatmul.mubr.bf16.gmra.mrb[16].mxu0 %v5688_v41  ;;  %1851 = vmatpush1.bf16.msra.mxu1 %v4219_v8  ;;  %v4236_v41 = vld [vmem:[%s5596_s1 + $0x5a4] ss:$8 sps:$4 sm:$0xff]   ;;  %v4234_v8 = vld [vmem:[%s5596_s1 + $0x5a0] ss:$8 sps:$4 sm:$0xff]  }
  0xb1   : > { %2768 = vmatpush1.bf16.msra.mxu0 %v4222_v25  ;;  %1852 = vmatprep.subr.bf16.mxu1 %v4227_v27  ;;  %v4231_v27 = vld [vmem:[%s5596_s1 + $0x2a0] ss:$8 sps:$4 sm:$0xff]   ;;  %v4239_v25 = vld [vmem:[%s5596_s1 + $0x2b4] ss:$8 sps:$4 sm:$0xff]  }
  0xb2   : > { %2769 = vmatprep.subr.bf16.mxu0 %v4230_v23  ;;  %3660 = vmatprep.mubr.msk.bf16.mxu1 %vm4564_vm2, %v5046_v37  ;;  %v4240_v23 = vld [vmem:[%s5596_s1 + $0x5b0] ss:$8 sps:$4 sm:$0xff]  }
  0xb3   : > { %2720 = vmatprep.mubr.bf16.mxu0 %v4983_v21  ;;  %v4242_v21 = vld [vmem:[%s5596_s1 + $0x5b4] ss:$8 sps:$4 sm:$0xff]  }
  0xb4   : > { %1853 = vmatpush1.bf16.msra.mxu1 %v4225_v51  ;;  %v4245_v51 = vld [vmem:[%s5596_s1 + $0x2c4] ss:$8 sps:$4 sm:$0xff]  }
  0xb5   : > { %2770 = vmatpush1.bf16.msra.mxu0 %v4228_v62  ;;  %1854 = vmatprep.subr.bf16.mxu1 %v4233_v18  ;;  %v4237_v18 = vld [vmem:[%s5596_s1 + $0x2b0] ss:$8 sps:$4 sm:$0xff]   ;;  %v4243_v62 = vld [vmem:[%s5596_s1 + $0x2c0] ss:$8 sps:$4 sm:$0xff]  }
  0xb6   : > { %2771 = vmatprep.subr.bf16.mxu0 %v4236_v41  ;;  %v4246_v41 = vld [vmem:[%s5596_s1 + $0x5c0] ss:$8 sps:$4 sm:$0xff]  }
  0xb7   : > { %3665 = vmatmul.mubr.msk.bf16.gmra.mrb[20].mxu1 %vm4616_vm4, %v5052_v43 }
  0xb8   : > { %2721 = vmatmul.mubr.bf16.gmra.mrb[20].mxu0 %v4987_v42  ;;  %1855 = vmatpush1.bf16.msra.mxu1 %v4231_v27  ;;  %v4248_v42 = vld [vmem:[%s5596_s1 + $0x5c4] ss:$8 sps:$4 sm:$0xff]   ;;  %v4251_v27 = vld [vmem:[%s5596_s1 + $0x2d4] ss:$8 sps:$4 sm:$0xff]  }
  0xb9   : > { %2772 = vmatpush1.bf16.msra.mxu0 %v4234_v8  ;;  %1856 = vmatprep.subr.bf16.mxu1 %v4239_v25  ;;  %v2250_v8 = vpack.c.bf16 %v5673_v31, %v5071_v60  ;;  %v4249_v25 = vld [vmem:[%s5596_s1 + $0x2d0] ss:$8 sps:$4 sm:$0xff]  }
  0xba   : > { %2773 = vmatprep.subr.bf16.mxu0 %v4242_v21  ;;  %3668 = vmatprep.mubr.msk.bf16.mxu1 %vm4564_vm2, %v5056_v1  ;;  %v4252_v21 = vld [vmem:[%s5596_s1 + $0x5d0] ss:$8 sps:$4 sm:$0xff]  }
  0xbb   : > { %2730 = vmatprep.mubr.bf16.mxu0 %v5069_v5  ;;  %v4254_v5 = vld [vmem:[%s5596_s1 + $0x5d4] ss:$8 sps:$4 sm:$0xff]  }
  0xbc   : > { %1857 = vmatpush1.bf16.msra.mxu1 %v4237_v18  ;;  %v4257_v18 = vld [vmem:[%s5596_s1 + $0x2e4] ss:$8 sps:$4 sm:$0xff]  }
  0xbd   : > { %2774 = vmatpush1.bf16.msra.mxu0 %v4240_v23  ;;  %1858 = vmatprep.subr.bf16.mxu1 %v4245_v51  ;;  %v2249_v23 = vpack.c.bf16 %v5673_v31, %v5004_v49  ;;  %v4255_v51 = vld [vmem:[%s5596_s1 + $0x2e0] ss:$8 sps:$4 sm:$0xff]  }
  0xbe   : > { %2775 = vmatprep.subr.bf16.mxu0 %v4248_v42  ;;  %v4258_v42 = vld [vmem:[%s5596_s1 + $0x5e0] ss:$8 sps:$4 sm:$0xff]  }
  0xbf   : > { %3673 = vmatmul.mubr.msk.bf16.gmra.mrb[24].mxu1 %vm4616_vm4, %v5063_v6 }
  0xc0   : > { %2731 = vmatmul.mubr.bf16.gmra.mrb[24].mxu0 %v5142_v46  ;;  %1859 = vmatpush1.bf16.msra.mxu1 %v4243_v62  ;;  %v4260_v46 = vld [vmem:[%s5596_s1 + $0x5e4] ss:$8 sps:$4 sm:$0xff]   ;;  %v4263_v62 = vld [vmem:[%s5596_s1 + $0x2f4] ss:$8 sps:$4 sm:$0xff]  }
  0xc1   : > { %2776 = vmatpush1.bf16.msra.mxu0 %v4246_v41  ;;  %1860 = vmatprep.subr.bf16.mxu1 %v4251_v27  ;;  %v4266_v41 = vld [vmem:[%s5596_s1 + $0x5f4] ss:$8 sps:$4 sm:$0xff]   ;;  %v4261_v27 = vld [vmem:[%s5596_s1 + $0x2f0] ss:$8 sps:$4 sm:$0xff]  }
  0xc2   : > { %2777 = vmatprep.subr.bf16.mxu0 %v4254_v5  ;;  %3676 = vmatprep.mubr.msk.bf16.mxu1 %vm4564_vm2, %v5065_v10  ;;  %v4264_v5 = vld [vmem:[%s5596_s1 + $0x5f0] ss:$8 sps:$4 sm:$0xff]  }
  0xc3   : > { %2740 = vmatprep.mubr.bf16.mxu0 %v2250_v8  ;;  %v5689_v8 = vpack.c.bf16 %v4528_v38, %v4519_v33  ;;  %v5692_v33 = vpack.c.bf16 %v4647_v45, %v4637_v35  ;;  %v5693_v38 = vpack.c.bf16 %v4757_v11, %v4739_v2  ;;  %v5700_v35 = vrot.slane %v5004_v49, 1  ;;  %v2992_v11 = vld [vmem:[%s5597_s2] sm:$0x3] }
  0xc4   : > { %1861 = vmatpush1.bf16.msra.mxu1 %v4249_v25  ;;  %v5690_v25 = vpack.c.bf16 %v4631_v28, %v4549_v52  ;;  %v5696_v52 = vpack.c.bf16 %v4815_v26, %v4806_v29  ;;  %v5699_v28 = vpack.c.bf16 %v4952_v55, %v4940_v0  ;;  %v5701_v45 = vpack.c.bf16 %v4931_v19, %v4913_v20 }
  0xc5   : > { %2778 = vmatpush1.bf16.msra.mxu0 %v4252_v21  ;;  %1862 = vmatprep.subr.bf16.mxu1 %v4257_v18  ;;  %v3803_v36 = vpack.c.bf16 %v5673_v31, %v5700_v35  ;;  %v2995_v2 = vshrl.u32 %v2994_v3, 7 }
  0xc6   : > { %2779 = vmatprep.subr.bf16.mxu0 %v4260_v46 }
  0xc7   : > { %3681 = vmatmul.mubr.msk.bf16.gmra.mrb[28].mxu1 %vm4616_vm4, %v5073_v34  ;;  %v2996_v54 = vsub.s32 0, %v2995_v2  ;;  %v3000_v29 = vsub.s32 1, %v2995_v2 }
  0xc8   : > { %2741 = vmatmul.mubr.bf16.gmra.mrb[28].mxu0 %v2249_v23  ;;  %1863 = vmatpush1.bf16.msra.mxu1 %v4255_v51 }
  0xc9   : > { %2780 = vmatpush1.bf16.msra.mxu0 %v4258_v42  ;;  %1864 = vmatprep.subr.bf16.mxu1 %v4263_v62  ;;  %v5534_v17 = vrot.slane %v2992_v11, %v2996_v54  ;;  %v5536_v61 = vrot.slane %v2992_v11, %v3000_v29 }
  0xca   : > { %2781 = vmatprep.subr.bf16.mxu0 %v4266_v41  ;;  %1866 = vmatprep.mubr.bf16.mxu1 %v1418_v53 }
  0xcb   : > { %3748 = vmatprep.mubr.msk.bf16.mxu0 %vm4564_vm2, %v4568_v58  ;;  %v5697_v58 = vpack.c.bf16 %v4891_v14, %v4876_v12 }
  0xcc   : > { %1865 = vmatpush1.bf16.msra.mxu1 %v4261_v27 }
  0xcd   : > { %2782 = vmatpush1.bf16.msra.mxu0 %v4264_v5 }
  0xcf   : > { %1867 = vmatmul.mubr.bf16.vlgmr.msra.gmra.mrb[0].mxu1 %v5689_v8 }
  0xd0   : > { %3753 = vmatmul.mubr.msk.bf16.vlgmr.msra.gmra.mrb[0].mxu0 %vm4616_vm4, %v4720_v16  ;;  %1876 = vmatprep.mubr.bf16.mxu1 %v5690_v25  ;;  %v5704_v16 = vpack.c.bf16 %v5004_v49, %v4973_v15 }
  0xd1   : > { %3756 = vmatprep.mubr.msk.bf16.mxu0 %vm4564_vm2, %v5677_v13 }
  0xd7   : > { %1877 = vmatmul.mubr.bf16.gmra.mrb[4].mxu1 %v1421_v22 }
  0xd8   : > { %3761 = vmatmul.mubr.msk.bf16.gmra.mrb[4].mxu0 %vm4616_vm4, %v5679_v63  ;;  %1886 = vmatprep.mubr.bf16.mxu1 %v5691_v32 }
  0xd9   : > { %3764 = vmatprep.mubr.msk.bf16.mxu0 %vm4564_vm2, %v5681_v44 }
  0xdf   : > { %1887 = vmatmul.mubr.bf16.gmra.mrb[8].mxu1 %v5692_v33 }
  0xe0   : > { %3769 = vmatmul.mubr.msk.bf16.gmra.mrb[8].mxu0 %vm4616_vm4, %v5683_v50  ;;  %1896 = vmatprep.mubr.bf16.mxu1 %v5693_v38 }
  0xe1   : > { %3772 = vmatprep.mubr.msk.bf16.mxu0 %vm4564_vm2, %v5685_v9 }
  0xe7   : > { %1897 = vmatmul.mubr.bf16.gmra.mrb[12].mxu1 %v5694_v39 }
  0xe8   : > { %3777 = vmatmul.mubr.msk.bf16.gmra.mrb[12].mxu0 %vm4616_vm4, %v5687_v48  ;;  %1906 = vmatprep.mubr.bf16.mxu1 %v5695_v40 }
  0xe9   : > { %3780 = vmatprep.mubr.msk.bf16.mxu0 %vm4564_vm2, %v5046_v37 }
  0xef   : > { %1907 = vmatmul.mubr.bf16.gmra.mrb[16].mxu1 %v5696_v52 }
  0xf0   : > { %3785 = vmatmul.mubr.msk.bf16.gmra.mrb[16].mxu0 %vm4616_vm4, %v5052_v43  ;;  %1916 = vmatprep.mubr.bf16.mxu1 %v5697_v58 }
  0xf1   : > { %3788 = vmatprep.mubr.msk.bf16.mxu0 %vm4564_vm2, %v5056_v1 }
  0xf7   : > { %1917 = vmatmul.mubr.bf16.gmra.mrb[20].mxu1 %v5698_v4 }
  0xf8   : > { %3793 = vmatmul.mubr.msk.bf16.gmra.mrb[20].mxu0 %vm4616_vm4, %v5063_v6  ;;  %1926 = vmatprep.mubr.bf16.mxu1 %v5699_v28 }
  0xf9   : > { %3796 = vmatprep.mubr.msk.bf16.mxu0 %vm4564_vm2, %v5065_v10 }
  0xff   : > { %1927 = vmatmul.mubr.bf16.gmra.mrb[24].mxu1 %v5701_v45 }
 0x100   : > { %3801 = vmatmul.mubr.msk.bf16.gmra.mrb[24].mxu0 %vm4616_vm4, %v5073_v34  ;;  %1936 = vmatprep.mubr.bf16.mxu1 %v5702_v56 }
 0x101   : > { %3804 = vmatprep.mubr.msk.bf16.mxu0 %vm3802_vm8, %v3803_v36 }
 0x107   : > { %1937 = vmatmul.mubr.bf16.gmra.mrb[28].mxu1 %v5704_v16 }
 0x108   : > { %3808 = vmatmul.mubr.msk.bf16.gmra.mrb[28].mxu0 %vm3806_vm9, %v3807_v24 }
 0x1a2   : > { %v1868_v26 = vpop.f32.mrb[0].mxu1 }
 0x1a3   : > { %v2785_v7 = vpop.f32.mrb[0].mxu0  ;;  %v1870_v12 = vpop.f32.mrb[1].mxu1 }
 0x1a4   : > { %v3809_v59 = vadd.f32 %v2785_v7, %v1868_v26  ;;  %v2787_v47 = vpop.f32.mrb[1].mxu0  ;;  %v1872_v20 = vpop.f32.mrb[2].mxu1 }
 0x1a5   : > { %v3810_v14 = vadd.f32 %v2787_v47, %v1870_v12  ;;  %v2789_v30 = vpop.f32.mrb[2].mxu0  ;;  %v1874_v55 = vpop.f32.mrb[3].mxu1 }
 0x1a6   : > { %v3004_v19 = vadd.f32 %v3809_v59, %v5534_v17  ;;  %v3811_v0 = vadd.f32 %v2789_v30, %v1872_v20  ;;  %v2791_v15 = vpop.f32.mrb[3].mxu0 }
 0x1a7   : > { %v3005_v49 = vadd.f32 %v3810_v14, %v5536_v61  ;;  %v3812_v37 = vadd.f32 %v2791_v15, %v1874_v55 }
 0x1a8   : > { %v3036_v1 = vmax.f32 %v3004_v19, 0.0  ;;  %v3006_v43 = vadd.f32 %v3811_v0, %v5534_v17 }
 0x1a9   : > { %v3037_v6 = vmax.f32 %v3005_v49, 0.0  ;;  %v3007_v10 = vadd.f32 %v3812_v37, %v5536_v61 }
 0x1aa   : > { %v3038_v60 = vmax.f32 %v3006_v43, 0.0  ;;  %v1878_v22 = vpop.f32.mrb[4].mxu1 }
 0x1ab   : > { %v3584_v34 = vpack.c.bf16 %v3037_v6, %v3036_v1  ;;  %v3039_v53 = vmax.f32 %v3007_v10, 0.0  ;;  %v2795_v31 = vpop.f32.mrb[4].mxu0  ;;  %v1880_v63 = vpop.f32.mrb[5].mxu1 }
 0x1ac   : > { %v3813_v13 = vadd.f32 %v2795_v31, %v1878_v22  ;;  %v2797_v44 = vpop.f32.mrb[5].mxu0  ;;  %v1882_v48 = vpop.f32.mrb[6].mxu1 }
 0x1ad   : > { %3164 = vst [vmem:[%s5546_s7] sm:$0xff] %v3584_v34  ;;  %v3585_v50 = vpack.c.bf16 %v3039_v53, %v3038_v60  ;;  %v3814_v9 = vadd.f32 %v2797_v44, %v1880_v63  ;;  %v2799_v21 = vpop.f32.mrb[6].mxu0  ;;  %v1884_v23 = vpop.f32.mrb[7].mxu1 }
 0x1ae   : > { %v3008_v18 = vadd.f32 %v3813_v13, %v5534_v17  ;;  %v3815_v46 = vadd.f32 %v2799_v21, %v1882_v48  ;;  %v2801_v51 = vpop.f32.mrb[7].mxu0 }
 0x1af   : > { %3165 = vst [vmem:[%s5546_s7 + $0x8] sm:$0xff] %v3585_v50  ;;  %v3009_v42 = vadd.f32 %v3814_v9, %v5536_v61  ;;  %v3816_v62 = vadd.f32 %v2801_v51, %v1884_v23 }
 0x1b0   : > { %v3040_v41 = vmax.f32 %v3008_v18, 0.0  ;;  %v3010_v27 = vadd.f32 %v3815_v46, %v5534_v17 }
 0x1b1   : > { %v3041_v5 = vmax.f32 %v3009_v42, 0.0  ;;  %v3011_v8 = vadd.f32 %v3816_v62, %v5536_v61 }
 0x1b2   : > { %v3042_v25 = vmax.f32 %v3010_v27, 0.0  ;;  %v1888_v38 = vpop.f32.mrb[8].mxu1 }
 0x1b3   : > { %v3586_v32 = vpack.c.bf16 %v3041_v5, %v3040_v41  ;;  %v3043_v33 = vmax.f32 %v3011_v8, 0.0  ;;  %v2805_v39 = vpop.f32.mrb[8].mxu0  ;;  %v1890_v52 = vpop.f32.mrb[9].mxu1 }
 0x1b4   : > { %v3817_v40 = vadd.f32 %v2805_v39, %v1888_v38  ;;  %v2807_v58 = vpop.f32.mrb[9].mxu0  ;;  %v1892_v35 = vpop.f32.mrb[10].mxu1 }
 0x1b5   : > { %3166 = vst [vmem:[%s5546_s7 + $0x10] sm:$0xff] %v3586_v32  ;;  %v3587_v4 = vpack.c.bf16 %v3043_v33, %v3042_v25  ;;  %v3818_v28 = vadd.f32 %v2807_v58, %v1890_v52  ;;  %v2809_v36 = vpop.f32.mrb[10].mxu0  ;;  %v1894_v57 = vpop.f32.mrb[11].mxu1 }
 0x1b6   : > { %v3012_v45 = vadd.f32 %v3817_v40, %v5534_v17  ;;  %v3819_v56 = vadd.f32 %v2809_v36, %v1892_v35  ;;  %v2811_v24 = vpop.f32.mrb[11].mxu0 }
 0x1b7   : > { %3167 = vst [vmem:[%s5546_s7 + $0x18] sm:$0xff] %v3587_v4  ;;  %v3013_v16 = vadd.f32 %v3818_v28, %v5536_v61  ;;  %v3820_v3 = vadd.f32 %v2811_v24, %v1894_v57 }
 0x1b8   : > { %v3044_v2 = vmax.f32 %v3012_v45, 0.0  ;;  %v3014_v54 = vadd.f32 %v3819_v56, %v5534_v17 }
 0x1b9   : > { %v3045_v11 = vmax.f32 %v3013_v16, 0.0  ;;  %v3015_v29 = vadd.f32 %v3820_v3, %v5536_v61 }
 0x1ba   : > { %v3046_v26 = vmax.f32 %v3014_v54, 0.0  ;;  %v1898_v12 = vpop.f32.mrb[12].mxu1 }
 0x1bb   : > { %v3588_v7 = vpack.c.bf16 %v3045_v11, %v3044_v2  ;;  %v3047_v59 = vmax.f32 %v3015_v29, 0.0  ;;  %v2815_v47 = vpop.f32.mrb[12].mxu0  ;;  %v1900_v20 = vpop.f32.mrb[13].mxu1 }
 0x1bc   : > { %v3821_v14 = vadd.f32 %v2815_v47, %v1898_v12  ;;  %v2817_v30 = vpop.f32.mrb[13].mxu0  ;;  %v1902_v55 = vpop.f32.mrb[14].mxu1 }
 0x1bd   : > { %3168 = vst [vmem:[%s5546_s7 + $0x20] sm:$0xff] %v3588_v7  ;;  %v3589_v19 = vpack.c.bf16 %v3047_v59, %v3046_v26  ;;  %v3822_v0 = vadd.f32 %v2817_v30, %v1900_v20  ;;  %v2819_v15 = vpop.f32.mrb[14].mxu0  ;;  %v1904_v1 = vpop.f32.mrb[15].mxu1 }
 0x1be   : > { %v3016_v49 = vadd.f32 %v3821_v14, %v5534_v17  ;;  %v3823_v37 = vadd.f32 %v2819_v15, %v1902_v55  ;;  %v2821_v43 = vpop.f32.mrb[15].mxu0 }
 0x1bf   : > { %3169 = vst [vmem:[%s5546_s7 + $0x28] sm:$0xff] %v3589_v19  ;;  %v3017_v6 = vadd.f32 %v3822_v0, %v5536_v61  ;;  %v3824_v10 = vadd.f32 %v2821_v43, %v1904_v1 }
 0x1c0   : > { %v3048_v60 = vmax.f32 %v3016_v49, 0.0  ;;  %v3018_v34 = vadd.f32 %v3823_v37, %v5534_v17 }
 0x1c1   : > { %v3049_v53 = vmax.f32 %v3017_v6, 0.0  ;;  %v3019_v22 = vadd.f32 %v3824_v10, %v5536_v61 }
 0x1c2   : > { %v3050_v31 = vmax.f32 %v3018_v34, 0.0  ;;  %v1908_v44 = vpop.f32.mrb[16].mxu1 }
 0x1c3   : > { %v3590_v13 = vpack.c.bf16 %v3049_v53, %v3048_v60  ;;  %v3051_v63 = vmax.f32 %v3019_v22, 0.0  ;;  %v2825_v50 = vpop.f32.mrb[16].mxu0  ;;  %v1910_v48 = vpop.f32.mrb[17].mxu1 }
 0x1c4   : > { %v3825_v9 = vadd.f32 %v2825_v50, %v1908_v44  ;;  %v2827_v21 = vpop.f32.mrb[17].mxu0  ;;  %v1912_v23 = vpop.f32.mrb[18].mxu1 }
 0x1c5   : > { %3170 = vst [vmem:[%s5546_s7 + $0x30] sm:$0xff] %v3590_v13  ;;  %v3591_v18 = vpack.c.bf16 %v3051_v63, %v3050_v31  ;;  %v3826_v46 = vadd.f32 %v2827_v21, %v1910_v48  ;;  %v2829_v51 = vpop.f32.mrb[18].mxu0  ;;  %v1914_v41 = vpop.f32.mrb[19].mxu1 }
 0x1c6   : > { %v3020_v42 = vadd.f32 %v3825_v9, %v5534_v17  ;;  %v3827_v62 = vadd.f32 %v2829_v51, %v1912_v23  ;;  %v2831_v27 = vpop.f32.mrb[19].mxu0 }
 0x1c7   : > { %3171 = vst [vmem:[%s5546_s7 + $0x38] sm:$0xff] %v3591_v18  ;;  %v3021_v5 = vadd.f32 %v3826_v46, %v5536_v61  ;;  %v3828_v8 = vadd.f32 %v2831_v27, %v1914_v41 }
 0x1c8   : > { %v3052_v25 = vmax.f32 %v3020_v42, 0.0  ;;  %v3022_v32 = vadd.f32 %v3827_v62, %v5534_v17 }
 0x1c9   : > { %v3053_v33 = vmax.f32 %v3021_v5, 0.0  ;;  %v3023_v38 = vadd.f32 %v3828_v8, %v5536_v61 }
 0x1ca   : > { %v3054_v39 = vmax.f32 %v3022_v32, 0.0  ;;  %v1918_v58 = vpop.f32.mrb[20].mxu1 }
 0x1cb   : > { %v3592_v40 = vpack.c.bf16 %v3053_v33, %v3052_v25  ;;  %v3055_v52 = vmax.f32 %v3023_v38, 0.0  ;;  %v2835_v4 = vpop.f32.mrb[20].mxu0  ;;  %v1920_v35 = vpop.f32.mrb[21].mxu1 }
 0x1cc   : > { %v3829_v28 = vadd.f32 %v2835_v4, %v1918_v58  ;;  %v2837_v36 = vpop.f32.mrb[21].mxu0  ;;  %v1922_v57 = vpop.f32.mrb[22].mxu1 }
 0x1cd   : > { %3172 = vst [vmem:[%s5546_s7 + $0x40] sm:$0xff] %v3592_v40  ;;  %v3593_v45 = vpack.c.bf16 %v3055_v52, %v3054_v39  ;;  %v3830_v56 = vadd.f32 %v2837_v36, %v1920_v35  ;;  %v2839_v24 = vpop.f32.mrb[22].mxu0  ;;  %v1924_v2 = vpop.f32.mrb[23].mxu1 }
 0x1ce   : > { %v3024_v16 = vadd.f32 %v3829_v28, %v5534_v17  ;;  %v3831_v3 = vadd.f32 %v2839_v24, %v1922_v57  ;;  %v2841_v54 = vpop.f32.mrb[23].mxu0 }
 0x1cf   : > { %3173 = vst [vmem:[%s5546_s7 + $0x48] sm:$0xff] %v3593_v45  ;;  %v3025_v11 = vadd.f32 %v3830_v56, %v5536_v61  ;;  %v3832_v29 = vadd.f32 %v2841_v54, %v1924_v2 }
 0x1d0   : > { %v3056_v26 = vmax.f32 %v3024_v16, 0.0  ;;  %v3026_v7 = vadd.f32 %v3831_v3, %v5534_v17 }
 0x1d1   : > { %v3057_v59 = vmax.f32 %v3025_v11, 0.0  ;;  %v3027_v12 = vadd.f32 %v3832_v29, %v5536_v61 }
 0x1d2   : > { %v3058_v47 = vmax.f32 %v3026_v7, 0.0  ;;  %v1928_v30 = vpop.f32.mrb[24].mxu1 }
 0x1d3   : > { %v3594_v14 = vpack.c.bf16 %v3057_v59, %v3056_v26  ;;  %v3059_v20 = vmax.f32 %v3027_v12, 0.0  ;;  %v2845_v19 = vpop.f32.mrb[24].mxu0  ;;  %v1930_v55 = vpop.f32.mrb[25].mxu1 }
 0x1d4   : > { %v3833_v0 = vadd.f32 %v2845_v19, %v1928_v30  ;;  %v2847_v15 = vpop.f32.mrb[25].mxu0  ;;  %v1932_v1 = vpop.f32.mrb[26].mxu1 }
 0x1d5   : > { %3174 = vst [vmem:[%s5546_s7 + $0x50] sm:$0xff] %v3594_v14  ;;  %v3595_v49 = vpack.c.bf16 %v3059_v20, %v3058_v47  ;;  %v3834_v37 = vadd.f32 %v2847_v15, %v1930_v55  ;;  %v2849_v43 = vpop.f32.mrb[26].mxu0  ;;  %v1934_v60 = vpop.f32.mrb[27].mxu1 }
 0x1d6   : > { %v3028_v6 = vadd.f32 %v3833_v0, %v5534_v17  ;;  %v3835_v10 = vadd.f32 %v2849_v43, %v1932_v1  ;;  %v2851_v34 = vpop.f32.mrb[27].mxu0 }
 0x1d7   : > { %3175 = vst [vmem:[%s5546_s7 + $0x58] sm:$0xff] %v3595_v49  ;;  %v3029_v53 = vadd.f32 %v3834_v37, %v5536_v61  ;;  %v3836_v22 = vadd.f32 %v2851_v34, %v1934_v60 }
 0x1d8   : > { %v3060_v31 = vmax.f32 %v3028_v6, 0.0  ;;  %v3030_v13 = vadd.f32 %v3835_v10, %v5534_v17 }
 0x1d9   : > { %v3061_v63 = vmax.f32 %v3029_v53, 0.0  ;;  %v3031_v44 = vadd.f32 %v3836_v22, %v5536_v61 }
 0x1da   : > { %v3062_v50 = vmax.f32 %v3030_v13, 0.0  ;;  %v1938_v21 = vpop.f32.mrb[28].mxu1 }
 0x1db   : > { %v3596_v9 = vpack.c.bf16 %v3061_v63, %v3060_v31  ;;  %v3063_v48 = vmax.f32 %v3031_v44, 0.0  ;;  %v2855_v18 = vpop.f32.mrb[28].mxu0  ;;  %v1940_v23 = vpop.f32.mrb[29].mxu1 }
 0x1dc   : > { %v3837_v46 = vadd.f32 %v2855_v18, %v1938_v21  ;;  %v2857_v51 = vpop.f32.mrb[29].mxu0  ;;  %v1942_v41 = vpop.f32.mrb[30].mxu1 }
 0x1dd   : > { %3176 = vst [vmem:[%s5546_s7 + $0x60] sm:$0xff] %v3596_v9  ;;  %v3597_v42 = vpack.c.bf16 %v3063_v48, %v3062_v50  ;;  %v3838_v62 = vadd.f32 %v2857_v51, %v1940_v23  ;;  %v2859_v27 = vpop.f32.mrb[30].mxu0  ;;  %v1944_v25 = vpop.f32.mrb[31].mxu1 }
 0x1de   : > { %v3032_v5 = vadd.f32 %v3837_v46, %v5534_v17  ;;  %v3839_v8 = vadd.f32 %v2859_v27, %v1942_v41  ;;  %v2861_v32 = vpop.f32.mrb[31].mxu0 }
 0x1df   : > { %3177 = vst [vmem:[%s5546_s7 + $0x68] sm:$0xff] %v3597_v42  ;;  %v3033_v33 = vadd.f32 %v3838_v62, %v5536_v61  ;;  %v3840_v38 = vadd.f32 %v2861_v32, %v1944_v25 }
 0x1e0   : > { %v3064_v39 = vmax.f32 %v3032_v5, 0.0  ;;  %v3034_v40 = vadd.f32 %v3839_v8, %v5534_v17 }
 0x1e1   : > { %v3065_v52 = vmax.f32 %v3033_v33, 0.0  ;;  %v3035_v58 = vadd.f32 %v3840_v38, %v5536_v61 }
 0x1e2   : > { %v3066_v4 = vmax.f32 %v3034_v40, 0.0 }
 0x1e3   : > { %v3598_v28 = vpack.c.bf16 %v3065_v52, %v3064_v39  ;;  %v3067_v35 = vmax.f32 %v3035_v58, 0.0 }
 0x1e5   : > { %3178 = vst [vmem:[%s5546_s7 + $0x70] sm:$0xff] %v3598_v28  ;;  %v3599_v36 = vpack.c.bf16 %v3067_v35, %v3066_v4 }
 0x1e7   : > { %3179 = vst [vmem:[%s5546_s7 + $0x78] sm:$0xff] %v3599_v36 }
 0x1e8 PF: > { %s13_s12 = sadd.s32 1, %s4273_s12  }
 0x1e9   : > { %p10_p4 = scmp.ge.s32.totalorder %s13_s12, 4  }
 0x1eb   :  { %12 = sbr.rel (!%p10_p4) target bundleno = 1 (0x1), region = 67 }

// kernel: _lambda_.5
= control target key start
LH: loop header
LB: loop body
LE: loop exit
PB: predicated region body
PF: predicated region fallthrough
CT: control target
= control target key end

     0   :  { %s9729_s12 = smov 0   ;;  %s12271_s0 = inlined_call_operand.vmem [shape: bf16[2,16,16,128], index: 0, kind: input, shape index: {}]   ;;  %s12272_s1 = inlined_call_operand.vmem [shape: bf16[3,512,256], index: 1, kind: input, shape index: {}]   ;;  %s12273_s2 = inlined_call_operand.vmem [shape: f32[1,256], index: 2, kind: input, shape index: {}]   ;;  %s12274_s3 = inlined_call_operand.vmem [shape: f32[2,512,256], index: 3, kind: output, shape index: {}]  }
   0x1 LB: > { %s7691_s13 = sadd.s32 4294967295, %s9705_s12   ;;  %p7695_p0 = scmp.ge.s32.totalorder %s9705_s12, 1  ;;  %s9705_s12 = sphi %s9729_s12, %s13_s12  }
   0x2   : > { %p137_p1 = scmp.lt.s32.totalorder %s9705_s12, 3 }
   0x4   : > { %p138_p2 = pnand %p7695_p0, %p137_p1 }
   0x6   : > { %141 = sbr.rel (%p138_p2) target bundleno = 1063 (0x427), region = 32 }
   0xd   : > { %v9411_v0 = vld [vmem:[%s12272_s1 + $0x4] ss:$8 sps:$4 sm:$0xff]   ;;  %v12275_v2 = vmov 0.0|0.0   ;;  %v9415_v3 = vld [vmem:[%s12272_s1] ss:$8 sps:$4 sm:$0xff]   ;;  %p161_p3 = scmp.lt.s32.totalorder %s7691_s13, 1 }
   0xe   : > { %v9413_v1 = vld [vmem:[%s12272_s1 + $0x304] ss:$8 sps:$4 sm:$0xff]   ;;  %2719 = vmatprep.mubr.bf16.mxu1 %v12275_v2  ;;  %2687 = vmatprep.subr.bf16.mxu1 %v9411_v0  ;;  %v9416_v4 = vld [vmem:[%s12272_s1 + $0x300] ss:$8 sps:$4 sm:$0xff]   ;;  %v9417_v5 = vld [vmem:[%s12272_s1 + $0x14] ss:$8 sps:$4 sm:$0xff]  }
   0xf   : > { %4643 = vmatprep.subr.bf16.mxu0 %v9413_v1  ;;  %2688 = vmatpush1.bf16.msra.mxu1 %v9415_v3  ;;  %v9419_v6 = vld [vmem:[%s12272_s1 + $0x314] ss:$8 sps:$4 sm:$0xff]   ;;  %v9421_v7 = vld [vmem:[%s12272_s1 + $0x10] ss:$8 sps:$4 sm:$0xff]   ;;  %v9423_v9 = vld [vmem:[%s12272_s1 + $0x24] ss:$8 sps:$4 sm:$0xff]  }
  0x10   : > { %4644 = vmatpush1.bf16.msra.mxu0 %v9416_v4  ;;  %2689 = vmatprep.subr.bf16.mxu1 %v9417_v5  ;;  %v9422_v8 = vld [vmem:[%s12272_s1 + $0x310] ss:$8 sps:$4 sm:$0xff]   ;;  %v9425_v10 = vld [vmem:[%s12272_s1 + $0x324] ss:$8 sps:$4 sm:$0xff]   ;;  %v9427_v11 = vld [vmem:[%s12272_s1 + $0x20] ss:$8 sps:$4 sm:$0xff]  }
  0x11   : > { %4645 = vmatprep.subr.bf16.mxu0 %v9419_v6  ;;  %v9428_v12 = vld [vmem:[%s12272_s1 + $0x320] ss:$8 sps:$4 sm:$0xff]   ;;  %v9429_v13 = vld [vmem:[%s12272_s1 + $0x34] ss:$8 sps:$4 sm:$0xff]   ;;  %v9433_v15 = vld [vmem:[%s12272_s1 + $0x30] ss:$8 sps:$4 sm:$0xff]  }
  0x12   : > { %v9431_v14 = vld [vmem:[%s12272_s1 + $0x334] ss:$8 sps:$4 sm:$0xff]   ;;  %v9434_v16 = vld [vmem:[%s12272_s1 + $0x330] ss:$8 sps:$4 sm:$0xff]   ;;  %v9435_v17 = vld [vmem:[%s12272_s1 + $0x44] ss:$8 sps:$4 sm:$0xff]  }
  0x13   : > { %2690 = vmatpush1.bf16.msra.mxu1 %v9421_v7  ;;  %v9437_v18 = vld [vmem:[%s12272_s1 + $0x344] ss:$8 sps:$4 sm:$0xff]   ;;  %v9439_v19 = vld [vmem:[%s12272_s1 + $0x40] ss:$8 sps:$4 sm:$0xff]   ;;  %v9441_v21 = vld [vmem:[%s12272_s1 + $0x54] ss:$8 sps:$4 sm:$0xff]  }
  0x14   : > { %4646 = vmatpush1.bf16.msra.mxu0 %v9422_v8  ;;  %2691 = vmatprep.subr.bf16.mxu1 %v9423_v9  ;;  %v9440_v20 = vld [vmem:[%s12272_s1 + $0x340] ss:$8 sps:$4 sm:$0xff]   ;;  %v9443_v22 = vld [vmem:[%s12272_s1 + $0x354] ss:$8 sps:$4 sm:$0xff]   ;;  %v9445_v23 = vld [vmem:[%s12272_s1 + $0x50] ss:$8 sps:$4 sm:$0xff]  }
  0x15   : > { %4647 = vmatprep.subr.bf16.mxu0 %v9425_v10  ;;  %v9446_v24 = vld [vmem:[%s12272_s1 + $0x350] ss:$8 sps:$4 sm:$0xff]   ;;  %v9447_v25 = vld [vmem:[%s12272_s1 + $0x64] ss:$8 sps:$4 sm:$0xff]   ;;  %v9451_v27 = vld [vmem:[%s12272_s1 + $0x60] ss:$8 sps:$4 sm:$0xff]  }
  0x16   : > { %v9449_v26 = vld [vmem:[%s12272_s1 + $0x364] ss:$8 sps:$4 sm:$0xff]   ;;  %v9452_v28 = vld [vmem:[%s12272_s1 + $0x360] ss:$8 sps:$4 sm:$0xff]   ;;  %v9453_v29 = vld [vmem:[%s12272_s1 + $0x74] ss:$8 sps:$4 sm:$0xff]  }
  0x17   : > { %2692 = vmatpush1.bf16.msra.mxu1 %v9427_v11  ;;  %v9455_v30 = vld [vmem:[%s12272_s1 + $0x374] ss:$8 sps:$4 sm:$0xff]   ;;  %v9457_v31 = vld [vmem:[%s12272_s1 + $0x70] ss:$8 sps:$4 sm:$0xff]   ;;  %v9459_v33 = vld [vmem:[%s12272_s1 + $0x84] ss:$8 sps:$4 sm:$0xff]  }
  0x18   : > { %4648 = vmatpush1.bf16.msra.mxu0 %v9428_v12  ;;  %2693 = vmatprep.subr.bf16.mxu1 %v9429_v13  ;;  %v9458_v32 = vld [vmem:[%s12272_s1 + $0x370] ss:$8 sps:$4 sm:$0xff]   ;;  %v9461_v34 = vld [vmem:[%s12272_s1 + $0x384] ss:$8 sps:$4 sm:$0xff]   ;;  %v9463_v35 = vld [vmem:[%s12272_s1 + $0x80] ss:$8 sps:$4 sm:$0xff]  }
  0x19   : > { %4649 = vmatprep.subr.bf16.mxu0 %v9431_v14  ;;  %v9464_v36 = vld [vmem:[%s12272_s1 + $0x380] ss:$8 sps:$4 sm:$0xff]   ;;  %v9465_v37 = vld [vmem:[%s12272_s1 + $0x94] ss:$8 sps:$4 sm:$0xff]   ;;  %s12726_s13 = smov (!%p161_p3, %s7691_s13), 1  ;;  %vm427_vm0 = vcmask 1040384  }
  0x1a   : > { %v9467_v38 = vld [vmem:[%s12272_s1 + $0x394] ss:$8 sps:$4 sm:$0xff]   ;;  %v9469_v39 = vld [vmem:[%s12272_s1 + $0x90] ss:$8 sps:$4 sm:$0xff]   ;;  %v9471_v41 = vld [vmem:[%s12272_s1 + $0xa4] ss:$8 sps:$4 sm:$0xff]  }
  0x1b   : > { %2694 = vmatpush1.bf16.msra.mxu1 %v9433_v15  ;;  %v9470_v40 = vld [vmem:[%s12272_s1 + $0x390] ss:$8 sps:$4 sm:$0xff]   ;;  %s8022_s21 = sshll.u32 %s12726_s13, 7  ;;  %v9473_v42 = vld [vmem:[%s12272_s1 + $0x3a4] ss:$8 sps:$4 sm:$0xff]   ;;  %vm620_vm1 = vcmask 1046528   ;;  %vm9997_vm4 = vmneg %vm427_vm0 }
  0x1c   : > { %4650 = vmatpush1.bf16.msra.mxu0 %v9434_v16  ;;  %2695 = vmatprep.subr.bf16.mxu1 %v9435_v17  ;;  %v9475_v43 = vld [vmem:[%s12272_s1 + $0xa0] ss:$8 sps:$4 sm:$0xff]   ;;  %s9880_s30 = scalar_lea.vmem %s12271_s0, %s8022_s21  ;;  %v9477_v45 = vld [vmem:[%s12272_s1 + $0xb4] ss:$8 sps:$4 sm:$0xff]   ;;  %v9481_v47 = vld [vmem:[%s12272_s1 + $0xb0] ss:$8 sps:$4 sm:$0xff]  }
  0x1d   : > { %4651 = vmatprep.subr.bf16.mxu0 %v9437_v18  ;;  %v9476_v44 = vld [vmem:[%s12272_s1 + $0x3a0] ss:$8 sps:$4 sm:$0xff]   ;;  %v9479_v46 = vld [vmem:[%s12272_s1 + $0x3b4] ss:$8 sps:$4 sm:$0xff]   ;;  %v9482_v49 = vld [vmem:[%s12272_s1 + $0x3b0] ss:$8 sps:$4 sm:$0xff]  }
  0x1e   : > { %v8025_v48 = vld [vmem:[%s9880_s30] sm:$0xff]   ;;  %v8088_v52 = vld [vmem:[%s9880_s30 + $0x8] sm:$0xff]   ;;  %v9489_v6 = vld [vmem:[%s12272_s1 + $0xd4] ss:$8 sps:$4 sm:$0xff]   ;;  %vm9708_vm2 = vmmov 1   ;;  %s8023_s8 = sshll.u32 %s12726_s13, 10 }
  0x1f   : > { %2696 = vmatpush1.bf16.msra.mxu1 %v9439_v19  ;;  %v8026_v50 = vunpack.c.l.bf16 %v8025_v48  ;;  %v8027_v51 = vunpack.c.h.bf16 %v8025_v48  ;;  %v9483_v53 = vld [vmem:[%s12272_s1 + $0xc4] ss:$8 sps:$4 sm:$0xff]   ;;  %v8030_v55 = vunpack.c.l.bf16 %v8088_v52  ;;  %v8031_v56 = vunpack.c.h.bf16 %v8088_v52  ;;  %v9487_v1 = vld [vmem:[%s12272_s1 + $0xc0] ss:$8 sps:$4 sm:$0xff]   ;;  %v9491_v10 = vld [vmem:[%s12272_s1 + $0x3d4] ss:$8 sps:$4 sm:$0xff]   ;;  %s11978_s11 = scalar_lea.vmem %s12274_s3, %s8023_s8 }
  0x20   : > { %4652 = vmatpush1.bf16.msra.mxu0 %v9440_v20  ;;  %2697 = vmatprep.subr.bf16.mxu1 %v9441_v21  ;;  %v9485_v54 = vld [vmem:[%s12272_s1 + $0x3c4] ss:$8 sps:$4 sm:$0xff]   ;;  %v9488_v5 = vld [vmem:[%s12272_s1 + $0x3c0] ss:$8 sps:$4 sm:$0xff]   ;;  %v9493_v15 = vld [vmem:[%s12272_s1 + $0xd0] ss:$8 sps:$4 sm:$0xff]  }
  0x21   : > { %4653 = vmatprep.subr.bf16.mxu0 %v9443_v22  ;;  %v235_v57 = vmul.f32 0.75, %v8026_v50  ;;  %v236_v58 = vmul.f32 0.75, %v8027_v51  ;;  %v267_v59 = vmul.f32 0.25, %v8026_v50  ;;  %v268_v60 = vmul.f32 0.25, %v8027_v51  ;;  %v9494_v20 = vld [vmem:[%s12272_s1 + $0x3d0] ss:$8 sps:$4 sm:$0xff]   ;;  %vm9986_vm3 = vmpackc.low %vm620_vm1, %vm9708_vm2 }
  0x22   : > { %v9902_v61 = vmul.f32 0.75, %v8030_v55  ;;  %v9904_v62 = vmul.f32 0.75, %v8031_v56  ;;  %v9906_v63 = vmul.f32 0.25, %v8030_v55  ;;  %v9908_v0 = vmul.f32 0.25, %v8031_v56  ;;  %v9503_v50 = vld [vmem:[%s12272_s1 + $0x3f4] ss:$8 sps:$4 sm:$0xff]   ;;  %vm10029_vm5 = vmpackc.low %vm9708_vm2, %vm9997_vm4 }
  0x23   : > { %2698 = vmatpush1.bf16.msra.mxu1 %v9445_v23  ;;  %v297_v3 = vadd.f32 %v267_v59, %v235_v57  ;;  %v298_v4 = vadd.f32 %v268_v60, %v236_v58  ;;  %v9505_v55 = vld [vmem:[%s12272_s1 + $0xf0] ss:$8 sps:$4 sm:$0xff]  }
  0x24   : > { %4654 = vmatpush1.bf16.msra.mxu0 %v9446_v24  ;;  %2699 = vmatprep.subr.bf16.mxu1 %v9447_v25  ;;  %v9920_v7 = vadd.f32 %v267_v59, %v9902_v61  ;;  %v9923_v8 = vadd.f32 %v268_v60, %v9904_v62  ;;  %v9926_v9 = vadd.f32 %v9906_v63, %v235_v57  ;;  %v9495_v25 = vld [vmem:[%s12272_s1 + $0xe4] ss:$8 sps:$4 sm:$0xff]   ;;  %v9506_v60 = vld [vmem:[%s12272_s1 + $0x3f0] ss:$8 sps:$4 sm:$0xff]  }
  0x25   : > { %4655 = vmatprep.subr.bf16.mxu0 %v9449_v26  ;;  %v9932_v11 = vadd.f32 %v9908_v0, %v236_v58  ;;  %v428_v12 = vrot.slane %v297_v3, 7  ;;  %v429_v13 = vrot.slane %v298_v4, 7  ;;  %v622_v14 = vrot.slane %v298_v4, 1 }
  0x26   : > { %v813_v16 = vmul.f32 0.75, %v297_v3  ;;  %v814_v17 = vmul.f32 0.75, %v298_v4  ;;  %v621_v18 = vrot.slane %v297_v3, 1  ;;  %v431_v19 = vrot.slane %v9926_v9, 7 }
  0x27   : > { %2700 = vmatpush1.bf16.msra.mxu1 %v9451_v27  ;;  %v430_v21 = vsel %vm427_vm0, %v428_v12, %v429_v13  ;;  %v588_v22 = vsel %vm427_vm0, %v297_v3, %v428_v12  ;;  %v781_v23 = vsel %vm620_vm1, %v622_v14, %v298_v4  ;;  %v432_v24 = vrot.slane %v9932_v11, 7  ;;  %v9509_v4 = vld [vmem:[%s12272_s1 + $0x104] ss:$8 sps:$4 sm:$0xff]  }
  0x28   : > { %4656 = vmatpush1.bf16.msra.mxu0 %v9452_v28  ;;  %2701 = vmatprep.subr.bf16.mxu1 %v9453_v29  ;;  %v877_v26 = vmul.f32 0.25, %v588_v22  ;;  %v878_v27 = vmul.f32 0.25, %v430_v21  ;;  %v1006_v28 = vmul.f32 0.25, %v781_v23  ;;  %v623_v29 = vsel %vm620_vm1, %v621_v18, %v622_v14  ;;  %v8089_v21 = vld [vmem:[%s9880_s30 + $0x10] sm:$0xff]  }
  0x29   : > { %4657 = vmatprep.subr.bf16.mxu0 %v9455_v30  ;;  %v9497_v30 = vld [vmem:[%s12272_s1 + $0x3e4] ss:$8 sps:$4 sm:$0xff]   ;;  %v625_v57 = vrot.slane %v9932_v11, 1  ;;  %v434_v58 = vrot.slane %v9920_v7, 7  ;;  %v435_v59 = vrot.slane %v9923_v8, 7  ;;  %v818_v23 = vmul.f32 0.75, %v9923_v8 }
  0x2b   : > { %2702 = vmatpush1.bf16.msra.mxu1 %v9457_v31  ;;  %v1005_v31 = vmul.f32 0.25, %v623_v29  ;;  %v782_v14 = vsel %vm620_vm1, %v625_v57, %v9932_v11  ;;  %v590_v22 = vsel %vm427_vm0, %v9920_v7, %v434_v58 }
  0x2c   : > { %4658 = vmatpush1.bf16.msra.mxu0 %v9458_v32  ;;  %2703 = vmatprep.subr.bf16.mxu1 %v9459_v33  ;;  %v433_v32 = vsel %vm427_vm0, %v431_v19, %v432_v24  ;;  %v589_v33 = vsel %vm427_vm0, %v9926_v9, %v431_v19  ;;  %v1008_v19 = vmul.f32 0.25, %v782_v14 }
  0x2d   : > { %4659 = vmatprep.subr.bf16.mxu0 %v9461_v34  ;;  %v815_v34 = vmul.f32 0.75, %v9926_v9 }
  0x2f   : > { %2704 = vmatpush1.bf16.msra.mxu1 %v9463_v35  ;;  %v941_v35 = vadd.f32 %v877_v26, %v813_v16 }
  0x30   : > { %4660 = vmatpush1.bf16.msra.mxu0 %v9464_v36  ;;  %2705 = vmatprep.subr.bf16.mxu1 %v9465_v37  ;;  %v942_v36 = vadd.f32 %v878_v27, %v814_v17  ;;  %v1070_v37 = vadd.f32 %v1006_v28, %v814_v17  ;;  %v881_v28 = vmul.f32 0.25, %v590_v22 }
  0x31   : > { %4661 = vmatprep.subr.bf16.mxu0 %v9467_v38  ;;  %v816_v38 = vmul.f32 0.75, %v9932_v11 }
  0x32   : > { %v9964_v48 = vpack.c.bf16 %v942_v36, %v941_v35 }
  0x33   : > { %2706 = vmatpush1.bf16.msra.mxu1 %v9469_v39  ;;  %v9499_v39 = vld [vmem:[%s12272_s1 + $0xe0] ss:$8 sps:$4 sm:$0xff]   ;;  %v1072_v27 = vadd.f32 %v1008_v19, %v816_v38 }
  0x34   : > { %4662 = vmatpush1.bf16.msra.mxu0 %v9470_v40  ;;  %2707 = vmatprep.subr.bf16.mxu1 %v9471_v41  ;;  %v1069_v40 = vadd.f32 %v1005_v31, %v813_v16  ;;  %v879_v41 = vmul.f32 0.25, %v589_v33  ;;  %12456 = vst [vmem:[#allocation4_spill] sm:$0xff] %v9964_v48  ;;  %v9512_v16 = vld [vmem:[%s12272_s1 + $0x404] ss:$8 sps:$4 sm:$0xff]   ;;  %v9510_v31 = vld [vmem:[%s12272_s1 + $0x400] ss:$8 sps:$4 sm:$0xff]  }
  0x35   : > { %4663 = vmatprep.subr.bf16.mxu0 %v9473_v42  ;;  %v880_v42 = vmul.f32 0.25, %v433_v32  ;;  %v627_v33 = vrot.slane %v9920_v7, 1 }
  0x36   : > { %v1197_v51 = vrot.slane %v1069_v40, 7  ;;  %v9972_v52 = vpack.c.bf16 %v1070_v37, %v1069_v40 }
  0x37   : > { %2708 = vmatpush1.bf16.msra.mxu1 %v9475_v43  ;;  %v624_v43 = vrot.slane %v9926_v9, 1 }
  0x38   : > { %4664 = vmatpush1.bf16.msra.mxu0 %v9476_v44  ;;  %2709 = vmatprep.subr.bf16.mxu1 %v9477_v45  ;;  %v9500_v44 = vld [vmem:[%s12272_s1 + $0x3e0] ss:$8 sps:$4 sm:$0xff]   ;;  %v1198_v45 = vrot.slane %v1070_v37, 7  ;;  %12457 = vst [vmem:[#allocation5_spill] sm:$0xff] %v9972_v52  ;;  %v1201_v37 = vrot.slane %v1072_v27, 7 }
  0x39   : > { %4665 = vmatprep.subr.bf16.mxu0 %v9479_v46  ;;  %v1453_v46 = vrot.slane %v941_v35, 1  ;;  %v626_v13 = vsel %vm620_vm1, %v624_v43, %v625_v57  ;;  %v8034_v35 = vunpack.c.l.bf16 %v8089_v21 }
  0x3a   : > { %v1007_v18 = vmul.f32 0.25, %v626_v13 }
  0x3b   : > { %2710 = vmatpush1.bf16.msra.mxu1 %v9481_v47  ;;  %v1454_v47 = vrot.slane %v942_v36, 1 }
  0x3c   : > { %4666 = vmatpush1.bf16.msra.mxu0 %v9482_v49  ;;  %2711 = vmatprep.subr.bf16.mxu1 %v9483_v53  ;;  %v9501_v49 = vld [vmem:[%s12272_s1 + $0xf4] ss:$8 sps:$4 sm:$0xff]   ;;  %v943_v53 = vadd.f32 %v879_v41, %v815_v34  ;;  %v1071_v26 = vadd.f32 %v1007_v18, %v815_v34  ;;  %v628_v34 = vrot.slane %v9923_v8, 1  ;;  %v9513_v41 = vld [vmem:[%s12272_s1 + $0x110] ss:$8 sps:$4 sm:$0xff]  }
  0x3d   : > { %4667 = vmatprep.subr.bf16.mxu0 %v9485_v54  ;;  %v944_v54 = vadd.f32 %v880_v42, %v816_v38  ;;  %v1455_v56 = vsel %vm620_vm1, %v1453_v46, %v1454_v47  ;;  %v9515_v42 = vld [vmem:[%s12272_s1 + $0x114] ss:$8 sps:$4 sm:$0xff]  }
  0x3e   : > { %v9990_v3 = vpack.c.bf16 %v1454_v47, %v1455_v56  ;;  %v1200_v36 = vrot.slane %v1071_v26, 7  ;;  %v10038_v38 = vpack.c.bf16 %v1072_v27, %v1071_v26  ;;  %v783_v43 = vsel %vm620_vm1, %v628_v34, %v9923_v8  ;;  %v9516_v8 = vld [vmem:[%s12272_s1 + $0x410] ss:$8 sps:$4 sm:$0xff]   ;;  %v9521_v56 = vld [vmem:[%s12272_s1 + $0x124] ss:$8 sps:$4 sm:$0xff]  }
  0x3f   : > { %2712 = vmatpush1.bf16.msra.mxu1 %v9487_v1  ;;  %v1457_v9 = vrot.slane %v944_v54, 1  ;;  %v10024_v29 = vpack.c.bf16 %v944_v54, %v943_v53 }
  0x40   : > { %4668 = vmatpush1.bf16.msra.mxu0 %v9488_v5  ;;  %2713 = vmatprep.subr.bf16.mxu1 %v9489_v6  ;;  %v1199_v5 = vsel %vm427_vm0, %v1197_v51, %v1198_v45  ;;  %v1456_v6 = vrot.slane %v943_v53, 1  ;;  %v8035_v45 = vunpack.c.h.bf16 %v8089_v21  ;;  %v1202_v46 = vsel %vm427_vm0, %v1200_v36, %v1201_v37 }
  0x41   : > { %4669 = vmatprep.subr.bf16.mxu0 %v9491_v10  ;;  %v10001_v12 = vpack.c.bf16 %v1199_v5, %v1197_v51  ;;  %8322 = vmatprep.mubr.msk.bf16.mxu0 %vm9986_vm3, %v9990_v3  ;;  %v10060_v51 = vpack.c.bf16 %v1202_v46, %v1200_v36  ;;  %v10062_v53 = vmul.f32 0.25, %v8034_v35  ;;  %v9528_v36 = vld [vmem:[%s12272_s1 + $0x430] ss:$8 sps:$4 sm:$0xff]  }
  0x42   : > { %v1458_v17 = vsel %vm620_vm1, %v1456_v6, %v1457_v9  ;;  %v10064_v54 = vmul.f32 0.25, %v8035_v45  ;;  %v10087_v10 = vmul.f32 0.75, %v8035_v45 }
  0x43   : > { %2714 = vmatpush1.bf16.msra.mxu1 %v9493_v15  ;;  %v817_v15 = vmul.f32 0.75, %v9920_v7  ;;  %v10016_v11 = vpack.c.bf16 %v1457_v9, %v1458_v17  ;;  %v629_v7 = vsel %vm620_vm1, %v627_v33, %v628_v34  ;;  %v333_v6 = vadd.f32 %v10062_v53, %v9902_v61  ;;  %v9519_v61 = vld [vmem:[%s12272_s1 + $0x120] ss:$8 sps:$4 sm:$0xff]  }
  0x44   : > { %4670 = vmatpush1.bf16.msra.mxu0 %v9494_v20  ;;  %2715 = vmatprep.subr.bf16.mxu1 %v9495_v25  ;;  %v436_v20 = vsel %vm427_vm0, %v434_v58, %v435_v59  ;;  %v9507_v25 = vld [vmem:[%s12272_s1 + $0x100] ss:$8 sps:$4 sm:$0xff]   ;;  %v334_v9 = vadd.f32 %v10064_v54, %v9904_v62 }
  0x45   : > { %4671 = vmatprep.subr.bf16.mxu0 %v9497_v30  ;;  %v882_v24 = vmul.f32 0.25, %v436_v20  ;;  %v437_v17 = vrot.slane %v333_v6, 7  ;;  %v819_v19 = vmul.f32 0.75, %v333_v6  ;;  %v630_v21 = vrot.slane %v333_v6, 1 }
  0x46   : > { %v438_v18 = vrot.slane %v334_v9, 7  ;;  %v820_v20 = vmul.f32 0.75, %v334_v9  ;;  %v631_v22 = vrot.slane %v334_v9, 1 }
  0x47   : > { %2716 = vmatpush1.bf16.msra.mxu1 %v9499_v39  ;;  %v946_v32 = vadd.f32 %v882_v24, %v818_v23  ;;  %v945_v39 = vadd.f32 %v881_v28, %v817_v15  ;;  %v591_v26 = vsel %vm427_vm0, %v333_v6, %v437_v17  ;;  %v9527_v28 = vld [vmem:[%s12272_s1 + $0x134] ss:$8 sps:$4 sm:$0xff]   ;;  %v9531_v6 = vld [vmem:[%s12272_s1 + $0x140] ss:$8 sps:$4 sm:$0xff]  }
  0x48   : > { %4672 = vmatpush1.bf16.msra.mxu0 %v9500_v44  ;;  %2717 = vmatprep.subr.bf16.mxu1 %v9501_v49  ;;  %v9518_v44 = vld [vmem:[%s12272_s1 + $0x414] ss:$8 sps:$4 sm:$0xff]   ;;  %v1009_v49 = vmul.f32 0.25, %v629_v7  ;;  %v632_v33 = vsel %vm620_vm1, %v630_v21, %v631_v22  ;;  %v784_v34 = vsel %vm620_vm1, %v631_v22, %v334_v9  ;;  %v9536_v7 = vld [vmem:[%s12272_s1 + $0x444] ss:$8 sps:$4 sm:$0xff]  }
  0x49   : > { %4673 = vmatprep.subr.bf16.mxu0 %v9503_v50  ;;  %v1460_v40 = vrot.slane %v946_v32, 1  ;;  %v1459_v47 = vrot.slane %v945_v39, 1  ;;  %v1010_v50 = vmul.f32 0.25, %v783_v43  ;;  %v1011_v37 = vmul.f32 0.25, %v632_v33  ;;  %v9534_v9 = vld [vmem:[%s12272_s1 + $0x440] ss:$8 sps:$4 sm:$0xff]  }
  0x4a   : > { %v1073_v58 = vadd.f32 %v1009_v49, %v817_v15  ;;  %v9537_v33 = vld [vmem:[%s12272_s1 + $0x150] ss:$8 sps:$4 sm:$0xff]  }
  0x4b   : > { %2718 = vmatpush1.bf16.msra.mxu1 %v9505_v55  ;;  %v10066_v55 = vpack.c.bf16 %v946_v32, %v945_v39  ;;  %v1461_v57 = vsel %vm620_vm1, %v1459_v47, %v1460_v40  ;;  %v1074_v59 = vadd.f32 %v1010_v50, %v818_v23  ;;  %v10101_v23 = vadd.f32 %v9908_v0, %v10087_v10  ;;  %v9530_v0 = vld [vmem:[%s12272_s1 + $0x434] ss:$8 sps:$4 sm:$0xff]  }
  0x4c   : > { %4674 = vmatpush1.bf16.msra.mxu0 %v9506_v60  ;;  %3040 = vmatprep.subr.bf16.mxu1 %v9509_v4  ;;  %v10076_v60 = vmul.f32 0.75, %v8034_v35  ;;  %v9524_v4 = vld [vmem:[%s12272_s1 + $0x424] ss:$8 sps:$4 sm:$0xff]   ;;  %v10081_v5 = vpack.c.bf16 %v1460_v40, %v1461_v57  ;;  %v1203_v13 = vrot.slane %v1073_v58, 7  ;;  %v9525_v35 = vld [vmem:[%s12272_s1 + $0x130] ss:$8 sps:$4 sm:$0xff]   ;;  %v1075_v49 = vadd.f32 %v1011_v37, %v819_v19 }
  0x4d   : > { %6150 = vmatprep.subr.bf16.mxu0 %v9512_v16  ;;  %v1204_v14 = vrot.slane %v1074_v59, 7  ;;  %v10089_v15 = vpack.c.bf16 %v1074_v59, %v1073_v58  ;;  %v1012_v39 = vmul.f32 0.25, %v784_v34  ;;  %v441_v40 = vrot.slane %v10101_v23, 7  ;;  %v8090_v47 = vld [vmem:[%s9880_s30 + $0x18] sm:$0xff]  }
  0x4e   : > { %2720 = vmatmul.mubr.bf16.vlgmr.msra.gmra.mrb[0].mxu1 %v12275_v2  ;;  %v10093_v16 = vadd.f32 %v9906_v63, %v10076_v60  ;;  %v9522_v63 = vld [vmem:[%s12272_s1 + $0x420] ss:$8 sps:$4 sm:$0xff]   ;;  %v822_v46 = vmul.f32 0.75, %v10101_v23  ;;  %v9540_v34 = vld [vmem:[%s12272_s1 + $0x450] ss:$8 sps:$4 sm:$0xff]   ;;  %v8039_v37 = vunpack.c.h.bf16 %v8090_v47 }
  0x4f   : > { %8326 = vmatmul.mubr.msk.bf16.vlgmr.msra.gmra.mrb[0].mxu0 %vm10029_vm5, %v10001_v12  ;;  %3041 = vmatpush1.bf16.msra.mxu1 %v9507_v25  ;;  %v1205_v62 = vsel %vm427_vm0, %v1203_v13, %v1204_v14  ;;  %v439_v25 = vsel %vm427_vm0, %v437_v17, %v438_v18  ;;  %v1076_v50 = vadd.f32 %v1012_v39, %v820_v20 }
  0x50   : > { %6151 = vmatpush1.bf16.msra.mxu0 %v9510_v31  ;;  %2729 = vmatprep.mubr.bf16.mxu1 %v9972_v52  ;;  %v10106_v24 = vpack.c.bf16 %v1205_v62, %v1203_v13  ;;  %v440_v27 = vrot.slane %v10093_v16, 7  ;;  %v883_v31 = vmul.f32 0.25, %v591_v26  ;;  %v884_v32 = vmul.f32 0.25, %v439_v25 }
  0x51   : > { %8329 = vmatprep.mubr.msk.bf16.mxu0 %vm9986_vm3, %v10016_v11  ;;  %3042 = vmatprep.subr.bf16.mxu1 %v9515_v42  ;;  %v9533_v42 = vld [vmem:[%s12272_s1 + $0x144] ss:$8 sps:$4 sm:$0xff]   ;;  %v821_v45 = vmul.f32 0.75, %v10093_v16  ;;  %v1206_v13 = vrot.slane %v1075_v49, 7  ;;  %v1207_v14 = vrot.slane %v1076_v50, 7  ;;  %v10154_v17 = vpack.c.bf16 %v1076_v50, %v1075_v49 }
  0x52   : > { %6152 = vmatprep.subr.bf16.mxu0 %v9518_v44  ;;  %v947_v43 = vadd.f32 %v883_v31, %v819_v19  ;;  %v948_v44 = vadd.f32 %v884_v32, %v820_v20  ;;  %v10157_v19 = vld [vmem:[%s9880_s30 + $0x20] sm:$0xff]   ;;  %v9539_v20 = vld [vmem:[%s12272_s1 + $0x154] ss:$8 sps:$4 sm:$0xff]   ;;  %v633_v22 = vrot.slane %v10093_v16, 1  ;;  %v10206_v50 = vmul.f32 0.25, %v8039_v37 }
  0x53   : > { %3043 = vmatpush1.bf16.msra.mxu1 %v9513_v41  ;;  %v592_v41 = vsel %vm427_vm0, %v10093_v16, %v440_v27  ;;  %v1208_v26 = vsel %vm427_vm0, %v1206_v13, %v1207_v14 }
  0x54   : > { %6153 = vmatpush1.bf16.msra.mxu0 %v9516_v8  ;;  %3044 = vmatprep.subr.bf16.mxu1 %v9521_v56  ;;  %v442_v8 = vsel %vm427_vm0, %v440_v27, %v441_v40  ;;  %v885_v56 = vmul.f32 0.25, %v592_v41  ;;  %v1462_v57 = vrot.slane %v947_v43, 1  ;;  %v1463_v58 = vrot.slane %v948_v44, 1 }
  0x55   : > { %6154 = vmatprep.subr.bf16.mxu0 %v9524_v4  ;;  %v886_v59 = vmul.f32 0.25, %v442_v8  ;;  %v10146_v4 = vpack.c.bf16 %v948_v44, %v947_v43  ;;  %v9548_v43 = vld [vmem:[%s12272_s1 + $0x464] ss:$8 sps:$4 sm:$0xff]  }
  0x56   : > { %2730 = vmatmul.mubr.bf16.gmra.mrb[4].mxu1 %v9964_v48  ;;  %v949_v18 = vadd.f32 %v885_v56, %v821_v45  ;;  %v1464_v62 = vsel %vm620_vm1, %v1462_v57, %v1463_v58  ;;  %v10210_v56 = vmul.f32 0.75, %v8039_v37 }
  0x57   : > { %8333 = vmatmul.mubr.msk.bf16.gmra.mrb[4].mxu0 %vm10029_vm5, %v10060_v51  ;;  %2739 = vmatprep.mubr.bf16.mxu1 %v10038_v38  ;;  %v950_v21 = vadd.f32 %v886_v59, %v822_v46  ;;  %v10168_v25 = vpack.c.bf16 %v1463_v58, %v1464_v62  ;;  %v8043_v58 = vunpack.c.h.bf16 %v10157_v19 }
  0x58   : > { %8336 = vmatprep.mubr.msk.bf16.mxu0 %vm9986_vm3, %v10081_v5  ;;  %3045 = vmatpush1.bf16.msra.mxu1 %v9519_v61  ;;  %v9542_v61 = vld [vmem:[%s12272_s1 + $0x454] ss:$8 sps:$4 sm:$0xff]   ;;  %v1465_v27 = vrot.slane %v949_v18, 1 }
  0x59   : > { %6155 = vmatpush1.bf16.msra.mxu0 %v9522_v63  ;;  %3046 = vmatprep.subr.bf16.mxu1 %v9527_v28  ;;  %v634_v63 = vrot.slane %v10101_v23, 1  ;;  %v8038_v28 = vunpack.c.l.bf16 %v8090_v47  ;;  %v1466_v16 = vrot.slane %v950_v21, 1  ;;  %v10196_v41 = vpack.c.bf16 %v950_v21, %v949_v18 }
  0x5a   : > { %6156 = vmatprep.subr.bf16.mxu0 %v9530_v0  ;;  %v10175_v0 = vpack.c.bf16 %v1208_v26, %v1206_v13  ;;  %v9554_v13 = vld [vmem:[%s12272_s1 + $0x474] ss:$8 sps:$4 sm:$0xff]  }
  0x5b   : > { %v635_v31 = vsel %vm620_vm1, %v633_v22, %v634_v63  ;;  %v785_v32 = vsel %vm620_vm1, %v634_v63, %v10101_v23  ;;  %v10190_v39 = vmul.f32 0.25, %v8038_v28  ;;  %v9545_v23 = vld [vmem:[%s12272_s1 + $0x164] ss:$8 sps:$4 sm:$0xff]   ;;  %v1467_v40 = vsel %vm620_vm1, %v1465_v27, %v1466_v16 }
  0x5c   : > { %3047 = vmatpush1.bf16.msra.mxu1 %v9525_v35  ;;  %v1013_v35 = vmul.f32 0.25, %v635_v31  ;;  %v10204_v44 = vpack.c.bf16 %v1466_v16, %v1467_v40  ;;  %v9552_v16 = vld [vmem:[%s12272_s1 + $0x470] ss:$8 sps:$4 sm:$0xff]  }
  0x5d   : > { %6157 = vmatpush1.bf16.msra.mxu0 %v9528_v36  ;;  %3048 = vmatprep.subr.bf16.mxu1 %v9533_v42  ;;  %v1014_v36 = vmul.f32 0.25, %v785_v32  ;;  %v10198_v42 = vmul.f32 0.75, %v8038_v28  ;;  %v335_v8 = vadd.f32 %v10190_v39, %v10076_v60  ;;  %v336_v60 = vadd.f32 %v10206_v50, %v10087_v10  ;;  %v9549_v28 = vld [vmem:[%s12272_s1 + $0x170] ss:$8 sps:$4 sm:$0xff]  }
  0x5e   : > { %6158 = vmatprep.subr.bf16.mxu0 %v9536_v7  ;;  %2740 = vmatmul.mubr.bf16.gmra.mrb[8].mxu1 %v10024_v29  ;;  %v8042_v7 = vunpack.c.l.bf16 %v10157_v19  ;;  %v1077_v47 = vadd.f32 %v1013_v35, %v821_v45  ;;  %v9543_v45 = vld [vmem:[%s12272_s1 + $0x160] ss:$8 sps:$4 sm:$0xff]   ;;  %v9557_v35 = vld [vmem:[%s12272_s1 + $0x184] ss:$8 sps:$4 sm:$0xff]  }
  0x5f   : > { %8340 = vmatmul.mubr.msk.bf16.gmra.mrb[8].mxu0 %vm10029_vm5, %v10106_v24  ;;  %2749 = vmatprep.mubr.bf16.mxu1 %v10089_v15  ;;  %v1078_v49 = vadd.f32 %v1014_v36, %v822_v46  ;;  %v10214_v57 = vadd.f32 %v10062_v53, %v10198_v42  ;;  %v9546_v46 = vld [vmem:[%s12272_s1 + $0x460] ss:$8 sps:$4 sm:$0xff]   ;;  %v9551_v53 = vld [vmem:[%s12272_s1 + $0x174] ss:$8 sps:$4 sm:$0xff]   ;;  %v443_v14 = vrot.slane %v335_v8, 7  ;;  %v823_v18 = vmul.f32 0.75, %v335_v8 }
  0x60   : > { %8343 = vmatprep.mubr.msk.bf16.mxu0 %vm9986_vm3, %v10168_v25  ;;  %3049 = vmatpush1.bf16.msra.mxu1 %v9531_v6  ;;  %v1209_v59 = vrot.slane %v1077_v47, 7  ;;  %v444_v10 = vrot.slane %v336_v60, 7  ;;  %v824_v21 = vmul.f32 0.75, %v336_v60  ;;  %v637_v22 = vrot.slane %v336_v60, 1 }
  0x61   : > { %6159 = vmatpush1.bf16.msra.mxu0 %v9534_v9  ;;  %3050 = vmatprep.subr.bf16.mxu1 %v9539_v20  ;;  %v1210_v6 = vrot.slane %v1078_v49, 7  ;;  %v10223_v9 = vpack.c.bf16 %v1078_v49, %v1077_v47  ;;  %v636_v20 = vrot.slane %v335_v8, 1  ;;  %v446_v26 = vrot.slane %v10214_v57, 7 }
  0x62   : > { %6160 = vmatprep.subr.bf16.mxu0 %v9542_v61  ;;  %v10235_v61 = vadd.f32 %v10064_v54, %v10210_v56  ;;  %v593_v54 = vsel %vm427_vm0, %v335_v8, %v443_v14  ;;  %v445_v31 = vsel %vm427_vm0, %v443_v14, %v444_v10  ;;  %v825_v49 = vmul.f32 0.75, %v10214_v57 }
  0x63   : > { %v1211_v62 = vsel %vm427_vm0, %v1209_v59, %v1210_v6  ;;  %v887_v32 = vmul.f32 0.25, %v593_v54  ;;  %v888_v36 = vmul.f32 0.25, %v445_v31  ;;  %v594_v47 = vsel %vm427_vm0, %v10214_v57, %v446_v26 }
  0x64   : > { %3051 = vmatpush1.bf16.msra.mxu1 %v9537_v33  ;;  %v10242_v63 = vpack.c.bf16 %v1211_v62, %v1209_v59  ;;  %v447_v27 = vrot.slane %v10235_v61, 7  ;;  %v638_v33 = vsel %vm620_vm1, %v636_v20, %v637_v22  ;;  %v826_v8 = vmul.f32 0.75, %v10235_v61  ;;  %v9560_v59 = vld [vmem:[%s12272_s1 + $0x484] ss:$8 sps:$4 sm:$0xff]  }
  0x65   : > { %6161 = vmatpush1.bf16.msra.mxu0 %v9540_v34  ;;  %3052 = vmatprep.subr.bf16.mxu1 %v9545_v23  ;;  %v786_v34 = vsel %vm620_vm1, %v637_v22, %v336_v60  ;;  %v1015_v37 = vmul.f32 0.25, %v638_v33  ;;  %v952_v6 = vadd.f32 %v888_v36, %v824_v21  ;;  %v889_v20 = vmul.f32 0.25, %v594_v47  ;;  %v10296_v36 = vld [vmem:[%s9880_s30 + $0x28] sm:$0xff]  }
  0x66   : > { %6162 = vmatprep.subr.bf16.mxu0 %v9548_v43  ;;  %2750 = vmatmul.mubr.bf16.gmra.mrb[12].mxu1 %v10066_v55  ;;  %v1016_v23 = vmul.f32 0.25, %v786_v34  ;;  %v448_v40 = vsel %vm427_vm0, %v446_v26, %v447_v27  ;;  %v951_v43 = vadd.f32 %v887_v32, %v823_v18 }
  0x67   : > { %8347 = vmatmul.mubr.msk.bf16.gmra.mrb[12].mxu0 %vm10029_vm5, %v10175_v0  ;;  %2759 = vmatprep.mubr.bf16.mxu1 %v10154_v17  ;;  %v1079_v60 = vadd.f32 %v1015_v37, %v823_v18  ;;  %v890_v10 = vmul.f32 0.25, %v448_v40  ;;  %v9563_v18 = vld [vmem:[%s12272_s1 + $0x194] ss:$8 sps:$4 sm:$0xff]   ;;  %v953_v27 = vadd.f32 %v889_v20, %v825_v49  ;;  %v9564_v37 = vld [vmem:[%s12272_s1 + $0x490] ss:$8 sps:$4 sm:$0xff]  }
  0x68   : > { %8350 = vmatprep.mubr.msk.bf16.mxu0 %vm9986_vm3, %v10204_v44  ;;  %3053 = vmatpush1.bf16.msra.mxu1 %v9543_v45  ;;  %v1080_v14 = vadd.f32 %v1016_v23, %v824_v21  ;;  %v9555_v45 = vld [vmem:[%s12272_s1 + $0x180] ss:$8 sps:$4 sm:$0xff]   ;;  %v1468_v62 = vrot.slane %v951_v43, 1  ;;  %v1469_v21 = vrot.slane %v952_v6, 1  ;;  %v10284_v32 = vpack.c.bf16 %v952_v6, %v951_v43  ;;  %v9566_v23 = vld [vmem:[%s12272_s1 + $0x494] ss:$8 sps:$4 sm:$0xff]  }
  0x69   : > { %6163 = vmatpush1.bf16.msra.mxu0 %v9546_v46  ;;  %3054 = vmatprep.subr.bf16.mxu1 %v9551_v53  ;;  %v9558_v46 = vld [vmem:[%s12272_s1 + $0x480] ss:$8 sps:$4 sm:$0xff]   ;;  %v639_v53 = vrot.slane %v10214_v57, 1  ;;  %v1212_v22 = vrot.slane %v1079_v60, 7  ;;  %v954_v31 = vadd.f32 %v890_v10, %v826_v8  ;;  %v1471_v43 = vrot.slane %v953_v27, 1 }
  0x6a   : > { %6164 = vmatprep.subr.bf16.mxu0 %v9554_v13  ;;  %v640_v13 = vrot.slane %v10235_v61, 1  ;;  %v1213_v54 = vrot.slane %v1080_v14, 7  ;;  %v10282_v26 = vpack.c.bf16 %v1080_v14, %v1079_v60  ;;  %v1470_v33 = vsel %vm620_vm1, %v1468_v62, %v1469_v21  ;;  %v9569_v6 = vld [vmem:[%s12272_s1 + $0x1a4] ss:$8 sps:$4 sm:$0xff]  }
  0x6b   : > { %v10308_v40 = vpack.c.bf16 %v1469_v21, %v1470_v33  ;;  %v1472_v47 = vrot.slane %v954_v31, 1  ;;  %v9572_v60 = vld [vmem:[%s12272_s1 + $0x4a4] ss:$8 sps:$4 sm:$0xff]   ;;  %v10320_v62 = vmul.f32 0.25, %v8042_v7  ;;  %v10324_v10 = vmul.f32 0.25, %v8043_v58 }
  0x6c   : > { %3055 = vmatpush1.bf16.msra.mxu1 %v9549_v28  ;;  %v641_v57 = vsel %vm620_vm1, %v639_v53, %v640_v13  ;;  %v1214_v34 = vsel %vm427_vm0, %v1212_v22, %v1213_v54  ;;  %v787_v28 = vsel %vm620_vm1, %v640_v13, %v10235_v61  ;;  %v10330_v53 = vpack.c.bf16 %v954_v31, %v953_v27  ;;  %v9567_v54 = vld [vmem:[%s12272_s1 + $0x1a0] ss:$8 sps:$4 sm:$0xff]  }
  0x6d   : > { %6165 = vmatpush1.bf16.msra.mxu0 %v9552_v16  ;;  %3056 = vmatprep.subr.bf16.mxu1 %v9557_v35  ;;  %v1017_v16 = vmul.f32 0.25, %v641_v57  ;;  %v9561_v35 = vld [vmem:[%s12272_s1 + $0x190] ss:$8 sps:$4 sm:$0xff]   ;;  %v10310_v61 = vpack.c.bf16 %v1214_v34, %v1212_v22  ;;  %v1018_v14 = vmul.f32 0.25, %v787_v28  ;;  %v10338_v13 = vmul.f32 0.75, %v8043_v58 }
  0x6e   : > { %2760 = vmatmul.mubr.bf16.gmra.mrb[16].mxu1 %v10146_v4  ;;  %6166 = vmatprep.subr.bf16.mxu0 %v9560_v59  ;;  %v1473_v59 = vsel %vm620_vm1, %v1471_v43, %v1472_v47  ;;  %v337_v22 = vadd.f32 %v10320_v62, %v10198_v42  ;;  %v338_v19 = vadd.f32 %v10324_v10, %v10210_v56  ;;  %v8046_v42 = vunpack.c.l.bf16 %v10296_v36 }
  0x6f   : > { %8354 = vmatmul.mubr.msk.bf16.gmra.mrb[16].mxu0 %vm10029_vm5, %v10242_v63  ;;  %2769 = vmatprep.mubr.bf16.mxu1 %v10223_v9  ;;  %12464 = vst [vmem:[#allocation6_spill] sm:$0xff] %v10310_v61  ;;  %v1081_v20 = vadd.f32 %v1017_v16, %v825_v49  ;;  %v10334_v49 = vmul.f32 0.75, %v8042_v7  ;;  %v10340_v21 = vpack.c.bf16 %v1472_v47, %v1473_v59  ;;  %v9570_v7 = vld [vmem:[%s12272_s1 + $0x4a0] ss:$8 sps:$4 sm:$0xff]  }
  0x70   : > { %3057 = vmatpush1.bf16.msra.mxu1 %v9555_v45  ;;  %8357 = vmatprep.mubr.msk.bf16.mxu0 %vm9986_vm3, %v10308_v40  ;;  %v1082_v45 = vadd.f32 %v1018_v14, %v826_v8  ;;  %v10358_v8 = vadd.f32 %v10206_v50, %v10338_v13  ;;  %v449_v31 = vrot.slane %v337_v22, 7  ;;  %v827_v57 = vmul.f32 0.75, %v337_v22 }
  0x71   : > { %6167 = vmatpush1.bf16.msra.mxu0 %v9558_v46  ;;  %3058 = vmatprep.subr.bf16.mxu1 %v9563_v18  ;;  %12465 = vst [vmem:[#allocation7_spill] sm:$0xff] %v10340_v21  ;;  %v1215_v46 = vrot.slane %v1081_v20, 7  ;;  %v10354_v58 = vadd.f32 %v10190_v39, %v10334_v49  ;;  %v450_v33 = vrot.slane %v338_v19, 7  ;;  %v828_v34 = vmul.f32 0.75, %v338_v19 }
  0x72   : > { %6168 = vmatprep.subr.bf16.mxu0 %v9566_v23  ;;  %v1216_v18 = vrot.slane %v1082_v45, 7  ;;  %v10361_v27 = vpack.c.bf16 %v1082_v45, %v1081_v20  ;;  %v642_v56 = vrot.slane %v337_v22, 1  ;;  %v643_v28 = vrot.slane %v338_v19, 1 }
  0x73   : > { %v595_v50 = vsel %vm427_vm0, %v337_v22, %v449_v31  ;;  %v452_v16 = vrot.slane %v10354_v58, 7  ;;  %v451_v23 = vsel %vm427_vm0, %v449_v31, %v450_v33  ;;  %v830_v33 = vmul.f32 0.75, %v10358_v8 }
  0x74   : > { %3059 = vmatpush1.bf16.msra.mxu1 %v9561_v35  ;;  %v1217_v39 = vsel %vm427_vm0, %v1215_v46, %v1216_v18  ;;  %v453_v35 = vrot.slane %v10358_v8, 7  ;;  %v891_v43 = vmul.f32 0.25, %v595_v50  ;;  %v644_v47 = vsel %vm620_vm1, %v642_v56, %v643_v28 }
  0x75   : > { %6169 = vmatpush1.bf16.msra.mxu0 %v9564_v37  ;;  %3060 = vmatprep.subr.bf16.mxu1 %v9569_v6  ;;  %v10375_v37 = vpack.c.bf16 %v1217_v39, %v1215_v46  ;;  %v892_v6 = vmul.f32 0.25, %v451_v23  ;;  %v1019_v14 = vmul.f32 0.25, %v644_v47  ;;  %v596_v22 = vsel %vm427_vm0, %v10354_v58, %v452_v16 }
  0x76   : > { %6170 = vmatprep.subr.bf16.mxu0 %v9572_v60  ;;  %2770 = vmatmul.mubr.bf16.gmra.mrb[20].mxu1 %v10196_v41  ;;  %v788_v60 = vsel %vm620_vm1, %v643_v28, %v338_v19  ;;  %v454_v20 = vsel %vm427_vm0, %v452_v16, %v453_v35  ;;  %v955_v59 = vadd.f32 %v891_v43, %v827_v57  ;;  %v829_v46 = vmul.f32 0.75, %v10354_v58 }
  0x77   : > { %8361 = vmatmul.mubr.msk.bf16.gmra.mrb[20].mxu0 %vm10029_vm5, %v10310_v61  ;;  %2779 = vmatprep.mubr.bf16.mxu1 %v10282_v26  ;;  %12466 = vst [vmem:[#allocation8_spill] sm:$0xff] %v10375_v37  ;;  %v1020_v45 = vmul.f32 0.25, %v788_v60  ;;  %v956_v18 = vadd.f32 %v892_v6, %v828_v34  ;;  %v1083_v31 = vadd.f32 %v1019_v14, %v827_v57  ;;  %v893_v56 = vmul.f32 0.25, %v596_v22  ;;  %v9573_v14 = vld [vmem:[%s12272_s1 + $0x1b0] ss:$8 sps:$4 sm:$0xff]  }
  0x78   : > { %8364 = vmatprep.mubr.msk.bf16.mxu0 %vm9986_vm3, %v10340_v21  ;;  %3061 = vmatpush1.bf16.msra.mxu1 %v9567_v54  ;;  %v1474_v39 = vrot.slane %v955_v59, 1  ;;  %v894_v19 = vmul.f32 0.25, %v454_v20  ;;  %v645_v28 = vrot.slane %v10354_v58, 1  ;;  %v646_v6 = vrot.slane %v10358_v8, 1  ;;  %v9575_v20 = vld [vmem:[%s12272_s1 + $0x1b4] ss:$8 sps:$4 sm:$0xff]  }
  0x79   : > { %6171 = vmatpush1.bf16.msra.mxu0 %v9570_v7  ;;  %v1084_v50 = vadd.f32 %v1020_v45, %v828_v34  ;;  %v1475_v35 = vrot.slane %v956_v18, 1  ;;  %v1218_v54 = vrot.slane %v1083_v31, 7  ;;  %v957_v7 = vadd.f32 %v893_v56, %v829_v46  ;;  %v9578_v56 = vld [vmem:[%s12272_s1 + $0x4b4] ss:$8 sps:$4 sm:$0xff]   ;;  %3062 = vmatprep.subr.bf16.mxu1 %v9575_v20 }
  0x7a   : > { %v10386_v23 = vpack.c.bf16 %v956_v18, %v955_v59  ;;  %v958_v16 = vadd.f32 %v894_v19, %v830_v33  ;;  %v8047_v34 = vunpack.c.h.bf16 %v10296_v36  ;;  %v10399_v60 = vmul.f32 0.25, %v8046_v42  ;;  %6172 = vmatprep.subr.bf16.mxu0 %v9578_v56 }
  0x7b   : > { %v1219_v43 = vrot.slane %v1084_v50, 7  ;;  %v10388_v47 = vpack.c.bf16 %v1084_v50, %v1083_v31  ;;  %v1476_v57 = vsel %vm620_vm1, %v1474_v39, %v1475_v35  ;;  %v1477_v58 = vrot.slane %v957_v7, 1  ;;  %v9576_v31 = vld [vmem:[%s12272_s1 + $0x4b0] ss:$8 sps:$4 sm:$0xff]  }
  0x7c   : > { %12467 = vst [vmem:[#allocation9_spill] sm:$0xff] %v10386_v23  ;;  %v10408_v59 = vpack.c.bf16 %v1475_v35, %v1476_v57  ;;  %v1478_v22 = vrot.slane %v958_v16, 1  ;;  %v647_v18 = vsel %vm620_vm1, %v645_v28, %v646_v6  ;;  %v789_v50 = vsel %vm620_vm1, %v646_v6, %v10358_v8  ;;  %3063 = vmatpush1.bf16.msra.mxu1 %v9573_v14 }
  0x7d   : > { %v1220_v45 = vsel %vm427_vm0, %v1218_v54, %v1219_v43  ;;  %v1021_v19 = vmul.f32 0.25, %v647_v18  ;;  %v10422_v35 = vmul.f32 0.25, %v8047_v34  ;;  %v1022_v43 = vmul.f32 0.25, %v789_v50  ;;  %6173 = vmatpush1.bf16.msra.mxu0 %v9576_v31 }
  0x7e   : > { %2780 = vmatmul.mubr.bf16.gmra.mrb[24].mxu1 %v10284_v32  ;;  %12468 = vst [vmem:[#allocation10_spill] sm:$0xff] %v10408_v59  ;;  %v10418_v39 = vpack.c.bf16 %v1220_v45, %v1218_v54  ;;  %v1479_v28 = vsel %vm620_vm1, %v1477_v58, %v1478_v22  ;;  %v339_v57 = vadd.f32 %v10399_v60, %v10334_v49  ;;  %v10438_v58 = vmul.f32 0.75, %v8046_v42 }
  0x7f   : > { %8368 = vmatmul.mubr.msk.bf16.gmra.mrb[24].mxu0 %vm10029_vm5, %v10375_v37  ;;  %2789 = vmatprep.mubr.bf16.mxu1 %v10361_v27  ;;  %v10430_v2 = vpack.c.bf16 %v958_v16, %v957_v7  ;;  %v10432_v54 = vpack.c.bf16 %v1478_v22, %v1479_v28  ;;  %v1085_v8 = vadd.f32 %v1021_v19, %v829_v46  ;;  %v10441_v19 = vmul.f32 0.75, %v8047_v34 }
  0x80   : > { %12469 = vst [vmem:[#allocation11_spill] sm:$0xff] %v10418_v39  ;;  %8371 = vmatprep.mubr.msk.bf16.mxu0 %vm9986_vm3, %v10408_v59  ;;  %v340_v6 = vadd.f32 %v10422_v35, %v10338_v13  ;;  %v1086_v20 = vadd.f32 %v1022_v43, %v830_v33  ;;  %v455_v45 = vrot.slane %v339_v57, 7  ;;  %v648_v18 = vrot.slane %v339_v57, 1  ;;  %v8093_v43 = vld [vmem:[%s9880_s30 + $0x30] sm:$0xff]  }
  0x81   : > { %12470 = vst [vmem:[#allocation12_spill] sm:$0xff] %v10430_v2  ;;  %12471 = vst [vmem:[#allocation13_spill] sm:$0xff] %v10432_v54  ;;  %v1221_v50 = vrot.slane %v1085_v8, 7  ;;  %v831_v7 = vmul.f32 0.75, %v339_v57 }
  0x82   : > { %v456_v49 = vrot.slane %v340_v6, 7  ;;  %v649_v16 = vrot.slane %v340_v6, 1  ;;  %v1222_v56 = vrot.slane %v1086_v20, 7  ;;  %v597_v46 = vsel %vm427_vm0, %v339_v57, %v455_v45 }
  0x83   : > { %v832_v22 = vmul.f32 0.75, %v340_v6  ;;  %v895_v13 = vmul.f32 0.25, %v597_v46  ;;  %v10456_v57 = vpack.c.bf16 %v1086_v20, %v1085_v8 }
  0x84   : > { %v457_v36 = vsel %vm427_vm0, %v455_v45, %v456_v49  ;;  %v650_v42 = vsel %vm620_vm1, %v648_v18, %v649_v16  ;;  %v790_v33 = vsel %vm620_vm1, %v649_v16, %v340_v6  ;;  %v1223_v34 = vsel %vm427_vm0, %v1221_v50, %v1222_v56 }
  0x85   : > { %v896_v14 = vmul.f32 0.25, %v457_v36  ;;  %v1023_v31 = vmul.f32 0.25, %v650_v42  ;;  %v1024_v28 = vmul.f32 0.25, %v790_v33  ;;  %12472 = vst [vmem:[#allocation14_spill] sm:$0xff] %v10456_v57  ;;  %v959_v45 = vadd.f32 %v895_v13, %v831_v7 }
  0x86   : > { %2790 = vmatmul.mubr.bf16.gmra.mrb[28].mxu1 %v10330_v53  ;;  %v307_v18 = vadd.f32 %v10320_v62, %v10438_v58  ;;  %v308_v6 = vadd.f32 %v10324_v10, %v10441_v19  ;;  %v10462_v49 = vpack.c.bf16 %v1223_v34, %v1221_v50  ;;  %v8050_v42 = vunpack.c.l.bf16 %v8093_v43 }
  0x87   : > { %8375 = vmatmul.mubr.msk.bf16.gmra.mrb[28].mxu0 %vm10029_vm5, %v10418_v39  ;;  %2799 = vmatprep.mubr.bf16.mxu1 %v10388_v47  ;;  %v960_v16 = vadd.f32 %v896_v14, %v832_v22  ;;  %v1087_v46 = vadd.f32 %v1023_v31, %v831_v7  ;;  %v1088_v48 = vadd.f32 %v1024_v28, %v832_v22  ;;  %v1480_v52 = vrot.slane %v959_v45, 1 }
  0x88   : > { %8378 = vmatprep.mubr.msk.bf16.mxu0 %vm9986_vm3, %v10432_v54  ;;  %12473 = vst [vmem:[#allocation15_spill] sm:$0xff] %v10462_v49  ;;  %v458_v56 = vrot.slane %v307_v18, 7  ;;  %v459_v36 = vrot.slane %v308_v6, 7  ;;  %v833_v20 = vmul.f32 0.75, %v307_v18  ;;  %v834_v10 = vmul.f32 0.75, %v308_v6 }
  0x89   : > { %v1481_v33 = vrot.slane %v960_v16, 1  ;;  %v1224_v54 = vrot.slane %v1087_v46, 7  ;;  %v1225_v8 = vrot.slane %v1088_v48, 7  ;;  %v10464_v13 = vpack.c.bf16 %v1088_v48, %v1087_v46 }
  0x8a   : > { %v460_v62 = vsel %vm427_vm0, %v458_v56, %v459_v36  ;;  %v598_v39 = vsel %vm427_vm0, %v307_v18, %v458_v56  ;;  %v10476_v14 = vpack.c.bf16 %v960_v16, %v959_v45  ;;  %v651_v31 = vrot.slane %v307_v18, 1  ;;  %v10492_v45 = vld [vmem:[%s9880_s30 + $0x38] sm:$0xff]   ;;  %v9582_v18 = vld [vmem:[%s12272_s1 + $0x4c0] ss:$8 sps:$4 sm:$0xff]   ;;  %v9584_v16 = vld [vmem:[%s12272_s1 + $0x4c4] ss:$8 sps:$4 sm:$0xff]  }
  0x8b   : > { %12474 = vst [vmem:[#allocation16_spill] sm:$0xff] %v10464_v13  ;;  %v1482_v50 = vsel %vm620_vm1, %v1480_v52, %v1481_v33  ;;  %v1226_v7 = vsel %vm427_vm0, %v1224_v54, %v1225_v8  ;;  %v897_v22 = vmul.f32 0.25, %v598_v39  ;;  %v898_v34 = vmul.f32 0.25, %v460_v62  ;;  %v9579_v52 = vld [vmem:[%s12272_s1 + $0x1c0] ss:$8 sps:$4 sm:$0xff]   ;;  %6174 = vmatprep.subr.bf16.mxu0 %v9584_v16 }
  0x8c   : > { %v10474_v48 = vpack.c.bf16 %v1481_v33, %v1482_v50  ;;  %12476 = vst [vmem:[#allocation18_spill] sm:$0xff] %v10476_v14  ;;  %v652_v28 = vrot.slane %v308_v6, 1  ;;  %v9581_v39 = vld [vmem:[%s12272_s1 + $0x1c4] ss:$8 sps:$4 sm:$0xff]   ;;  %v8051_v36 = vunpack.c.h.bf16 %v8093_v43  ;;  %v10489_v33 = vmul.f32 0.25, %v8050_v42  ;;  %6175 = vmatpush1.bf16.msra.mxu0 %v9582_v18 }
  0x8d   : > { %v10485_v46 = vadd.f32 %v897_v22, %v833_v20  ;;  %v10487_v56 = vadd.f32 %v898_v34, %v834_v10  ;;  %v10503_v8 = vpack.c.bf16 %v1226_v7, %v1224_v54  ;;  %v10507_v50 = vmul.f32 0.75, %v8050_v42  ;;  %3064 = vmatprep.subr.bf16.mxu1 %v9581_v39 }
  0x8e   : > { %2800 = vmatmul.mubr.bf16.gmra.mrb[32].mxu1 %v10386_v23  ;;  %12475 = vst [vmem:[#allocation17_spill] sm:$0xff] %v10474_v48  ;;  %v653_v43 = vsel %vm620_vm1, %v651_v31, %v652_v28  ;;  %v791_v62 = vsel %vm620_vm1, %v652_v28, %v308_v6  ;;  %v10511_v37 = vmul.f32 0.25, %v8051_v36  ;;  %v341_v54 = vadd.f32 %v10489_v33, %v10438_v58 }
  0x8f   : > { %8382 = vmatmul.mubr.msk.bf16.gmra.mrb[32].mxu0 %vm10029_vm5, %v10462_v49  ;;  %2809 = vmatprep.mubr.bf16.mxu1 %v10456_v57  ;;  %12477 = vst [vmem:[#allocation19_spill] sm:$0xff] %v10503_v8  ;;  %v1483_v22 = vrot.slane %v10485_v46, 1  ;;  %v1484_v34 = vrot.slane %v10487_v56, 1  ;;  %v1025_v49 = vmul.f32 0.25, %v653_v43  ;;  %v1026_v59 = vmul.f32 0.25, %v791_v62 }
  0x90   : > { %8385 = vmatprep.mubr.msk.bf16.mxu0 %vm9986_vm3, %v10474_v48  ;;  %3065 = vmatpush1.bf16.msra.mxu1 %v9579_v52  ;;  %v10515_v7 = vmul.f32 0.75, %v8051_v36  ;;  %v309_v39 = vadd.f32 %v10399_v60, %v10507_v50  ;;  %v342_v52 = vadd.f32 %v10511_v37, %v10441_v19  ;;  %v461_v16 = vrot.slane %v341_v54, 7 }
  0x91   : > { %v1485_v42 = vsel %vm620_vm1, %v1483_v22, %v1484_v34  ;;  %v1089_v31 = vadd.f32 %v1025_v49, %v833_v20  ;;  %v1090_v28 = vadd.f32 %v1026_v59, %v834_v10  ;;  %v835_v62 = vmul.f32 0.75, %v341_v54 }
  0x92   : > { %v10521_v43 = vpack.c.bf16 %v1484_v34, %v1485_v42  ;;  %v654_v6 = vrot.slane %v341_v54, 1  ;;  %v462_v59 = vrot.slane %v342_v52, 7  ;;  %v599_v60 = vsel %vm427_vm0, %v341_v54, %v461_v16 }
  0x93   : > { %v1227_v58 = vrot.slane %v1089_v31, 7  ;;  %v1228_v36 = vrot.slane %v1090_v28, 7  ;;  %v10525_v48 = vpack.c.bf16 %v1090_v28, %v1089_v31  ;;  %v836_v49 = vmul.f32 0.75, %v342_v52 }
  0x94   : > { %12478 = vst [vmem:[#allocation20_spill] sm:$0xff] %v10521_v43  ;;  %v655_v20 = vrot.slane %v342_v52, 1  ;;  %v899_v10 = vmul.f32 0.25, %v599_v60  ;;  %v310_v18 = vadd.f32 %v10422_v35, %v10515_v7  ;;  %v464_v22 = vrot.slane %v309_v39, 7 }
  0x95   : > { %12479 = vst [vmem:[#allocation21_spill] sm:$0xff] %v10525_v48  ;;  %v1229_v19 = vsel %vm427_vm0, %v1227_v58, %v1228_v36  ;;  %v463_v42 = vsel %vm427_vm0, %v461_v16, %v462_v59  ;;  %v837_v60 = vmul.f32 0.75, %v309_v39  ;;  %v657_v59 = vrot.slane %v309_v39, 1 }
  0x96   : > { %2810 = vmatmul.mubr.bf16.gmra.mrb[36].mxu1 %v10430_v2  ;;  %v10539_v34 = vpack.c.bf16 %v1229_v19, %v1227_v58  ;;  %v656_v54 = vsel %vm620_vm1, %v654_v6, %v655_v20  ;;  %v792_v31 = vsel %vm620_vm1, %v655_v20, %v342_v52  ;;  %v900_v28 = vmul.f32 0.25, %v463_v42  ;;  %v9588_v42 = vld [vmem:[%s12272_s1 + $0x4d0] ss:$8 sps:$4 sm:$0xff]  }
  0x97   : > { %8389 = vmatmul.mubr.msk.bf16.gmra.mrb[36].mxu0 %vm10029_vm5, %v10503_v8  ;;  %2819 = vmatprep.mubr.bf16.mxu1 %v10464_v13  ;;  %v963_v8 = vadd.f32 %v899_v10, %v835_v62  ;;  %v1027_v13 = vmul.f32 0.25, %v656_v54  ;;  %v1028_v2 = vmul.f32 0.25, %v792_v31  ;;  %v600_v36 = vsel %vm427_vm0, %v309_v39, %v464_v22  ;;  %v9590_v54 = vld [vmem:[%s12272_s1 + $0x4d4] ss:$8 sps:$4 sm:$0xff]  }
  0x98   : > { %8392 = vmatprep.mubr.msk.bf16.mxu0 %vm9986_vm3, %v10521_v43  ;;  %12480 = vst [vmem:[#allocation22_spill] sm:$0xff] %v10539_v34  ;;  %v465_v43 = vrot.slane %v310_v18, 7  ;;  %v838_v57 = vmul.f32 0.75, %v310_v18  ;;  %v964_v23 = vadd.f32 %v900_v28, %v836_v49  ;;  %v901_v16 = vmul.f32 0.25, %v600_v36  ;;  %6176 = vmatprep.subr.bf16.mxu0 %v9590_v54 }
  0x99   : > { %v1486_v35 = vrot.slane %v963_v8, 1  ;;  %v1091_v21 = vadd.f32 %v1027_v13, %v835_v62  ;;  %v1092_v58 = vadd.f32 %v1028_v2, %v836_v49  ;;  %v658_v6 = vrot.slane %v310_v18, 1  ;;  %v9585_v62 = vld [vmem:[%s12272_s1 + $0x1d0] ss:$8 sps:$4 sm:$0xff]   ;;  %6177 = vmatpush1.bf16.msra.mxu0 %v9588_v42 }
  0x9a   : > { %v466_v19 = vsel %vm427_vm0, %v464_v22, %v465_v43  ;;  %v1487_v61 = vrot.slane %v964_v23, 1  ;;  %v10548_v52 = vpack.c.bf16 %v10487_v56, %v10485_v46  ;;  %v965_v43 = vadd.f32 %v901_v16, %v837_v60  ;;  %v9587_v46 = vld [vmem:[%s12272_s1 + $0x1d4] ss:$8 sps:$4 sm:$0xff]  }
  0x9b   : > { %v1230_v20 = vrot.slane %v1091_v21, 7  ;;  %v1231_v10 = vrot.slane %v1092_v58, 7  ;;  %v10554_v13 = vpack.c.bf16 %v1092_v58, %v1091_v21  ;;  %v902_v2 = vmul.f32 0.25, %v466_v19  ;;  %3066 = vmatprep.subr.bf16.mxu1 %v9587_v46 }
  0x9c   : > { %12481 = vst [vmem:[#allocation23_spill] sm:$0xff] %v10548_v52  ;;  %v659_v39 = vsel %vm620_vm1, %v657_v59, %v658_v6  ;;  %v1488_v56 = vsel %vm620_vm1, %v1486_v35, %v1487_v61  ;;  %v793_v49 = vsel %vm620_vm1, %v658_v6, %v310_v18  ;;  %v1489_v36 = vrot.slane %v965_v43, 1  ;;  %v10583_v6 = vld [vmem:[%s9880_s30 + $0x40] sm:$0xff]   ;;  %3067 = vmatpush1.bf16.msra.mxu1 %v9585_v62 }
  0x9d   : > { %12482 = vst [vmem:[#allocation24_spill] sm:$0xff] %v10554_v13  ;;  %v1232_v21 = vsel %vm427_vm0, %v1230_v20, %v1231_v10  ;;  %v1029_v22 = vmul.f32 0.25, %v659_v39  ;;  %v10573_v31 = vpack.c.bf16 %v1487_v61, %v1488_v56  ;;  %v966_v28 = vadd.f32 %v902_v2, %v838_v57 }
  0x9e   : > { %2820 = vmatmul.mubr.bf16.gmra.mrb[40].mxu1 %v10476_v14  ;;  %v10575_v58 = vpack.c.bf16 %v964_v23, %v963_v8  ;;  %v1030_v35 = vmul.f32 0.25, %v793_v49  ;;  %v8055_v18 = vunpack.c.h.bf16 %v10492_v45  ;;  %v12485_v16 = vunpack.c.l.bf16 %v10492_v45 }
  0x9f   : > { %8396 = vmatmul.mubr.msk.bf16.gmra.mrb[40].mxu0 %vm10029_vm5, %v10539_v34  ;;  %2829 = vmatprep.mubr.bf16.mxu1 %v10525_v48  ;;  %12483 = vst [vmem:[#allocation25_spill] sm:$0xff] %v10573_v31  ;;  %v1093_v19 = vadd.f32 %v1029_v22, %v837_v60  ;;  %v10588_v61 = vpack.c.bf16 %v1232_v21, %v1230_v20  ;;  %v1490_v23 = vrot.slane %v966_v28, 1 }
  0xa0   : > { %12484 = vst [vmem:[#allocation26_spill] sm:$0xff] %v10575_v58  ;;  %v10580_v59 = vmul.f32 0.25, %v12485_v16  ;;  %8399 = vmatprep.mubr.msk.bf16.mxu0 %vm9986_vm3, %v10573_v31  ;;  %v10590_v8 = vpack.c.bf16 %v966_v28, %v965_v43  ;;  %v12488_v60 = vmov %v12485_v16  ;;  %v1094_v2 = vadd.f32 %v1030_v35, %v838_v57 }
  0xa1   : > { %12486 = vst [vmem:[#allocation27_spill] sm:$0xff] %v10588_v61  ;;  %v10594_v10 = vmul.f32 0.75, %v12488_v60  ;;  %v1233_v39 = vrot.slane %v1093_v19, 7  ;;  %v10596_v46 = vmul.f32 0.25, %v8055_v18  ;;  %v1491_v56 = vsel %vm620_vm1, %v1489_v36, %v1490_v23 }
  0xa2   : > { %12487 = vst [vmem:[#allocation28_spill] sm:$0xff] %v10590_v8  ;;  %v343_v62 = vadd.f32 %v10580_v59, %v10507_v50  ;;  %v10601_v49 = vmul.f32 0.75, %v8055_v18  ;;  %v10606_v45 = vpack.c.bf16 %v1490_v23, %v1491_v56  ;;  %v1234_v21 = vrot.slane %v1094_v2, 7 }
  0xa3   : > { %v311_v20 = vadd.f32 %v10489_v33, %v10594_v10  ;;  %v10608_v22 = vpack.c.bf16 %v1094_v2, %v1093_v19  ;;  %v344_v57 = vadd.f32 %v10596_v46, %v10515_v7 }
  0xa4   : > { %12489 = vst [vmem:[#allocation29_spill] sm:$0xff] %v10606_v45  ;;  %v467_v50 = vrot.slane %v343_v62, 7  ;;  %v839_v42 = vmul.f32 0.75, %v343_v62  ;;  %v660_v54 = vrot.slane %v343_v62, 1  ;;  %v312_v33 = vadd.f32 %v10511_v37, %v10601_v49 }
  0xa5   : > { %12490 = vst [vmem:[#allocation30_spill] sm:$0xff] %v10608_v22  ;;  %v1235_v7 = vsel %vm427_vm0, %v1233_v39, %v1234_v21  ;;  %v468_v28 = vrot.slane %v344_v57, 7  ;;  %v840_v36 = vmul.f32 0.75, %v344_v57  ;;  %v661_v35 = vrot.slane %v344_v57, 1 }
  0xa6   : > { %2830 = vmatmul.mubr.bf16.gmra.mrb[44].mxu1 %v10548_v52  ;;  %v10623_v19 = vpack.c.bf16 %v1235_v7, %v1233_v39  ;;  %v601_v18 = vsel %vm427_vm0, %v343_v62, %v467_v50  ;;  %v470_v16 = vrot.slane %v311_v20, 7  ;;  %v471_v23 = vrot.slane %v312_v33, 7 }
  0xa7   : > { %8403 = vmatmul.mubr.msk.bf16.gmra.mrb[44].mxu0 %vm10029_vm5, %v10588_v61  ;;  %2839 = vmatprep.mubr.bf16.mxu1 %v10554_v13  ;;  %v469_v60 = vsel %vm427_vm0, %v467_v50, %v468_v28  ;;  %v903_v37 = vmul.f32 0.25, %v601_v18  ;;  %v662_v2 = vsel %vm620_vm1, %v660_v54, %v661_v35  ;;  %v794_v56 = vsel %vm620_vm1, %v661_v35, %v344_v57 }
  0xa8   : > { %8406 = vmatprep.mubr.msk.bf16.mxu0 %vm9986_vm3, %v10606_v45  ;;  %12491 = vst [vmem:[#allocation31_spill] sm:$0xff] %v10623_v19  ;;  %v904_v43 = vmul.f32 0.25, %v469_v60  ;;  %v1031_v45 = vmul.f32 0.25, %v662_v2  ;;  %v1032_v61 = vmul.f32 0.25, %v794_v56  ;;  %v472_v21 = vsel %vm427_vm0, %v470_v16, %v471_v23  ;;  %v9594_v60 = vld [vmem:[%s12272_s1 + $0x4e0] ss:$8 sps:$4 sm:$0xff]  }
  0xa9   : > { %v967_v31 = vadd.f32 %v903_v37, %v839_v42  ;;  %v602_v39 = vsel %vm427_vm0, %v311_v20, %v470_v16  ;;  %v841_v7 = vmul.f32 0.75, %v311_v20  ;;  %v842_v34 = vmul.f32 0.75, %v312_v33 }
  0xaa   : > { %v968_v62 = vadd.f32 %v904_v43, %v840_v36  ;;  %v1095_v13 = vadd.f32 %v1031_v45, %v839_v42  ;;  %v1096_v52 = vadd.f32 %v1032_v61, %v840_v36  ;;  %v905_v48 = vmul.f32 0.25, %v602_v39  ;;  %v9591_v61 = vld [vmem:[%s12272_s1 + $0x1e0] ss:$8 sps:$4 sm:$0xff]   ;;  %v9593_v36 = vld [vmem:[%s12272_s1 + $0x1e4] ss:$8 sps:$4 sm:$0xff]  }
  0xab   : > { %v1492_v50 = vrot.slane %v967_v31, 1  ;;  %v906_v28 = vmul.f32 0.25, %v472_v21  ;;  %v663_v18 = vrot.slane %v311_v20, 1  ;;  %v664_v54 = vrot.slane %v312_v33, 1  ;;  %3068 = vmatprep.subr.bf16.mxu1 %v9593_v36 }
  0xac   : > { %v1493_v57 = vrot.slane %v968_v62, 1  ;;  %v1236_v35 = vrot.slane %v1095_v13, 7  ;;  %v1237_v23 = vrot.slane %v1096_v52, 7  ;;  %v8059_v16 = vunpack.c.h.bf16 %v10583_v6  ;;  %3069 = vmatpush1.bf16.msra.mxu1 %v9591_v61 }
  0xad   : > { %v10640_v43 = vpack.c.bf16 %v1096_v52, %v1095_v13  ;;  %v10642_v20 = vadd.f32 %v905_v48, %v841_v7  ;;  %v10644_v45 = vadd.f32 %v906_v28, %v842_v34  ;;  %v665_v42 = vsel %vm620_vm1, %v663_v18, %v664_v54  ;;  %v9596_v52 = vld [vmem:[%s12272_s1 + $0x4e4] ss:$8 sps:$4 sm:$0xff]  }
  0xae   : > { %2840 = vmatmul.mubr.bf16.gmra.mrb[48].mxu1 %v10575_v58  ;;  %v1494_v48 = vsel %vm620_vm1, %v1492_v50, %v1493_v57  ;;  %v1238_v13 = vsel %vm427_vm0, %v1236_v35, %v1237_v23  ;;  %v795_v37 = vsel %vm620_vm1, %v664_v54, %v312_v33  ;;  %v1033_v2 = vmul.f32 0.25, %v665_v42  ;;  %6178 = vmatprep.subr.bf16.mxu0 %v9596_v52  ;;  %v10672_v33 = vld [vmem:[%s9880_s30 + $0x48] sm:$0xff]  }
  0xaf   : > { %8410 = vmatmul.mubr.msk.bf16.gmra.mrb[48].mxu0 %vm10029_vm5, %v10623_v19  ;;  %2849 = vmatprep.mubr.bf16.mxu1 %v10608_v22  ;;  %12492 = vst [vmem:[#allocation32_spill] sm:$0xff] %v10640_v43  ;;  %v10659_v56 = vpack.c.bf16 %v1493_v57, %v1494_v48  ;;  %v10661_v21 = vpack.c.bf16 %v1238_v13, %v1236_v35  ;;  %v1495_v39 = vrot.slane %v10642_v20, 1  ;;  %v1496_v28 = vrot.slane %v10644_v45, 1 }
  0xb0   : > { %v1034_v18 = vmul.f32 0.25, %v795_v37  ;;  %v1097_v19 = vadd.f32 %v1033_v2, %v841_v7  ;;  %v12495_v22 = vunpack.c.l.bf16 %v10583_v6  ;;  %v10669_v23 = vmul.f32 0.25, %v8059_v16  ;;  %6179 = vmatpush1.bf16.msra.mxu0 %v9594_v60 }
  0xb1   : > { %12493 = vst [vmem:[#allocation33_spill] sm:$0xff] %v10659_v56  ;;  %12494 = vst [vmem:[#allocation34_spill] sm:$0xff] %v10661_v21  ;;  %8413 = vmatprep.mubr.msk.bf16.mxu0 %vm9986_vm3, %v10659_v56  ;;  %v1497_v54 = vsel %vm620_vm1, %v1495_v39, %v1496_v28  ;;  %v10678_v57 = vpack.c.bf16 %v968_v62, %v967_v31 }
  0xb2   : > { %v10667_v50 = vmul.f32 0.25, %v12495_v22  ;;  %v12497_v7 = vmov %v12495_v22  ;;  %v10684_v22 = vmul.f32 0.75, %v8059_v16  ;;  %v10686_v42 = vpack.c.bf16 %v1496_v28, %v1497_v54 }
  0xb3   : > { %12496 = vst [vmem:[#allocation35_spill] sm:$0xff] %v10678_v57  ;;  %v10682_v35 = vmul.f32 0.75, %v12497_v7  ;;  %v1098_v36 = vadd.f32 %v1034_v18, %v842_v34  ;;  %v1239_v52 = vrot.slane %v1097_v19, 7  ;;  %v346_v60 = vadd.f32 %v10669_v23, %v10601_v49 }
  0xb4   : > { %12498 = vst [vmem:[#allocation36_spill] sm:$0xff] %v10686_v42  ;;  %v345_v61 = vadd.f32 %v10667_v50, %v10594_v10  ;;  %v10698_v6 = vadd.f32 %v10596_v46, %v10684_v22 }
  0xb5   : > { %v10694_v31 = vadd.f32 %v10580_v59, %v10682_v35  ;;  %v1240_v34 = vrot.slane %v1098_v36, 7  ;;  %v10705_v10 = vpack.c.bf16 %v1098_v36, %v1097_v19  ;;  %v474_v59 = vrot.slane %v346_v60, 7 }
  0xb6   : > { %2850 = vmatmul.mubr.bf16.gmra.mrb[52].mxu1 %v10590_v8  ;;  %v473_v49 = vrot.slane %v345_v61, 7  ;;  %v843_v16 = vmul.f32 0.75, %v345_v61  ;;  %v844_v46 = vmul.f32 0.75, %v346_v60  ;;  %v666_v48 = vrot.slane %v345_v61, 1 }
  0xb7   : > { %8417 = vmatmul.mubr.msk.bf16.gmra.mrb[52].mxu0 %vm10029_vm5, %v10661_v21  ;;  %12499 = vst [vmem:[#allocation37_spill] sm:$0xff] %v10705_v10  ;;  %2859 = vmatprep.mubr.bf16.mxu1 %v10640_v43  ;;  %v667_v13 = vrot.slane %v346_v60, 1  ;;  %v1241_v37 = vsel %vm427_vm0, %v1239_v52, %v1240_v34  ;;  %v476_v39 = vrot.slane %v10694_v31, 7  ;;  %v477_v19 = vrot.slane %v10698_v6, 7 }
  0xb8   : > { %8420 = vmatprep.mubr.msk.bf16.mxu0 %vm9986_vm3, %v10686_v42  ;;  %v603_v2 = vsel %vm427_vm0, %v345_v61, %v473_v49  ;;  %v10715_v28 = vpack.c.bf16 %v1241_v37, %v1239_v52  ;;  %v475_v18 = vsel %vm427_vm0, %v473_v49, %v474_v59  ;;  %v845_v43 = vmul.f32 0.75, %v10694_v31 }
  0xb9   : > { %v907_v54 = vmul.f32 0.25, %v603_v2  ;;  %v668_v7 = vsel %vm620_vm1, %v666_v48, %v667_v13  ;;  %v908_v36 = vmul.f32 0.25, %v475_v18  ;;  %v796_v62 = vsel %vm620_vm1, %v667_v13, %v346_v60 }
  0xba   : > { %12500 = vst [vmem:[#allocation38_spill] sm:$0xff] %v10715_v28  ;;  %v1035_v42 = vmul.f32 0.25, %v668_v7  ;;  %v478_v21 = vsel %vm427_vm0, %v476_v39, %v477_v19  ;;  %v1036_v56 = vmul.f32 0.25, %v796_v62  ;;  %v604_v61 = vsel %vm427_vm0, %v10694_v31, %v476_v39 }
  0xbb   : > { %v971_v34 = vadd.f32 %v907_v54, %v843_v16  ;;  %v972_v52 = vadd.f32 %v908_v36, %v844_v46  ;;  %v846_v49 = vmul.f32 0.75, %v10698_v6  ;;  %v909_v59 = vmul.f32 0.25, %v604_v61  ;;  %v9600_v61 = vld [vmem:[%s12272_s1 + $0x4f0] ss:$8 sps:$4 sm:$0xff]  }
  0xbc   : > { %v1099_v37 = vadd.f32 %v1035_v42, %v843_v16  ;;  %v1100_v48 = vadd.f32 %v1036_v56, %v844_v46  ;;  %v910_v18 = vmul.f32 0.25, %v478_v21  ;;  %v669_v60 = vrot.slane %v10694_v31, 1  ;;  %v9597_v56 = vld [vmem:[%s12272_s1 + $0x1f0] ss:$8 sps:$4 sm:$0xff]   ;;  %v9599_v21 = vld [vmem:[%s12272_s1 + $0x1f4] ss:$8 sps:$4 sm:$0xff]  }
  0xbd   : > { %v1498_v2 = vrot.slane %v971_v34, 1  ;;  %v1499_v62 = vrot.slane %v972_v52, 1  ;;  %v10732_v13 = vpack.c.bf16 %v10644_v45, %v10642_v20  ;;  %v973_v16 = vadd.f32 %v909_v59, %v845_v43  ;;  %3070 = vmatprep.subr.bf16.mxu1 %v9599_v21 }
  0xbe   : > { %2860 = vmatmul.mubr.bf16.gmra.mrb[56].mxu1 %v10678_v57  ;;  %v1242_v42 = vrot.slane %v1099_v37, 7  ;;  %v1243_v31 = vrot.slane %v1100_v48, 7  ;;  %v974_v46 = vadd.f32 %v910_v18, %v846_v49  ;;  %v10741_v39 = vpack.c.bf16 %v972_v52, %v971_v34  ;;  %v9602_v34 = vld [vmem:[%s12272_s1 + $0x4f4] ss:$8 sps:$4 sm:$0xff]  }
  0xbf   : > { %8424 = vmatmul.mubr.msk.bf16.gmra.mrb[56].mxu0 %vm10029_vm5, %v10715_v28  ;;  %12501 = vst [vmem:[#allocation39_spill] sm:$0xff] %v10732_v13  ;;  %2869 = vmatprep.mubr.bf16.mxu1 %v10705_v10  ;;  %v670_v19 = vrot.slane %v10698_v6, 1  ;;  %v1500_v20 = vsel %vm620_vm1, %v1498_v2, %v1499_v62  ;;  %v1501_v45 = vrot.slane %v973_v16, 1  ;;  %v8063_v54 = vunpack.c.h.bf16 %v10672_v33 }
  0xc0   : > { %12502 = vst [vmem:[#allocation40_spill] sm:$0xff] %v10741_v39  ;;  %v12503_v7 = vunpack.c.l.bf16 %v10672_v33  ;;  %v10756_v52 = vpack.c.bf16 %v1499_v62, %v1500_v20  ;;  %v1244_v59 = vsel %vm427_vm0, %v1242_v42, %v1243_v31  ;;  %v1502_v2 = vrot.slane %v974_v46, 1  ;;  %3071 = vmatpush1.bf16.msra.mxu1 %v9597_v56  ;;  %6180 = vmatprep.subr.bf16.mxu0 %v9602_v34 }
  0xc1   : > { %v671_v18 = vsel %vm620_vm1, %v669_v60, %v670_v19  ;;  %v10760_v28 = vpack.c.bf16 %v1244_v59, %v1242_v42  ;;  %v797_v21 = vsel %vm620_vm1, %v670_v19, %v10698_v6  ;;  %v10764_v10 = vmul.f32 0.25, %v8063_v54  ;;  %6181 = vmatpush1.bf16.msra.mxu0 %v9600_v61 }
  0xc2   : > { %v10748_v36 = vmul.f32 0.25, %v12503_v7  ;;  %12504 = vst [vmem:[#allocation41_spill] sm:$0xff] %v10756_v52  ;;  %v1037_v7 = vmul.f32 0.25, %v671_v18  ;;  %8427 = vmatprep.mubr.msk.bf16.mxu0 %vm9986_vm3, %v10756_v52  ;;  %v10769_v62 = vpack.c.bf16 %v1100_v48, %v1099_v37  ;;  %v1503_v31 = vsel %vm620_vm1, %v1501_v45, %v1502_v2  ;;  %v8097_v52 = vld [vmem:[%s9880_s30 + $0x50] sm:$0xff]  }
  0xc3   : > { %12505 = vst [vmem:[#allocation42_spill] sm:$0xff] %v10760_v28  ;;  %v1038_v20 = vmul.f32 0.25, %v797_v21  ;;  %v10774_v42 = vpack.c.bf16 %v1502_v2, %v1503_v31  ;;  %v348_v56 = vadd.f32 %v10764_v10, %v10684_v22  ;;  %v10778_v19 = vpack.c.bf16 %v974_v46, %v973_v16 }
  0xc4   : > { %12506 = vst [vmem:[#allocation43_spill] sm:$0xff] %v10769_v62  ;;  %v347_v60 = vadd.f32 %v10748_v36, %v10682_v35  ;;  %v1101_v6 = vadd.f32 %v1037_v7, %v845_v43  ;;  %v12509_v37 = vunpack.c.l.bf16 %v10672_v33  ;;  %v10793_v46 = vmul.f32 0.75, %v8063_v54 }
  0xc5   : > { %12507 = vst [vmem:[#allocation44_spill] sm:$0xff] %v10774_v42  ;;  %12508 = vst [vmem:[#allocation45_spill] sm:$0xff] %v10778_v19  ;;  %v1102_v34 = vadd.f32 %v1038_v20, %v846_v49  ;;  %v480_v43 = vrot.slane %v348_v56, 7  ;;  %v673_v22 = vrot.slane %v348_v56, 1  ;;  %v848_v16 = vmul.f32 0.75, %v348_v56 }
  0xc6   : > { %v479_v59 = vrot.slane %v347_v60, 7  ;;  %v672_v18 = vrot.slane %v347_v60, 1  ;;  %v10782_v48 = vmul.f32 0.75, %v12509_v37  ;;  %2870 = vmatmul.mubr.bf16.gmra.mrb[60].mxu1 %v10732_v13  ;;  %v1245_v35 = vrot.slane %v1101_v6, 7 }
  0xc7   : > { %8431 = vmatmul.mubr.msk.bf16.gmra.mrb[60].mxu0 %vm10029_vm5, %v10760_v28  ;;  %v847_v45 = vmul.f32 0.75, %v347_v60  ;;  %2879 = vmatprep.mubr.bf16.mxu1 %v10769_v62  ;;  %v1246_v33 = vrot.slane %v1102_v34, 7  ;;  %v798_v7 = vsel %vm620_vm1, %v673_v22, %v348_v56 }
  0xc8   : > { %8434 = vmatprep.mubr.msk.bf16.mxu0 %vm9986_vm3, %v10774_v42  ;;  %v605_v49 = vsel %vm427_vm0, %v347_v60, %v479_v59  ;;  %v481_v61 = vsel %vm427_vm0, %v479_v59, %v480_v43  ;;  %v674_v21 = vsel %vm620_vm1, %v672_v18, %v673_v22  ;;  %v1040_v28 = vmul.f32 0.25, %v798_v7 }
  0xc9   : > { %v911_v2 = vmul.f32 0.25, %v605_v49  ;;  %v1247_v31 = vsel %vm427_vm0, %v1245_v35, %v1246_v33  ;;  %v912_v20 = vmul.f32 0.25, %v481_v61  ;;  %v1039_v37 = vmul.f32 0.25, %v674_v21 }
  0xca   : > { %v10800_v42 = vpack.c.bf16 %v1247_v31, %v1245_v35  ;;  %v315_v54 = vadd.f32 %v10667_v50, %v10782_v48  ;;  %v316_v60 = vadd.f32 %v10669_v23, %v10793_v46  ;;  %v10806_v59 = vpack.c.bf16 %v1102_v34, %v1101_v6  ;;  %v9605_v34 = vld [vmem:[%s12272_s1 + $0x204] ss:$8 sps:$4 sm:$0xff]  }
  0xcb   : > { %v975_v62 = vadd.f32 %v911_v2, %v847_v45  ;;  %v976_v18 = vadd.f32 %v912_v20, %v848_v16  ;;  %v1103_v43 = vadd.f32 %v1039_v37, %v847_v45  ;;  %v1104_v56 = vadd.f32 %v1040_v28, %v848_v16  ;;  %4290 = vmatprep.subr.bf16.mxu1 %v9605_v34 }
  0xcc   : > { %12510 = vst [vmem:[#allocation46_spill] sm:$0xff] %v10800_v42  ;;  %12511 = vst [vmem:[#allocation47_spill] sm:$0xff] %v10806_v59  ;;  %v482_v33 = vrot.slane %v315_v54, 7  ;;  %v483_v49 = vrot.slane %v316_v60, 7  ;;  %v8066_v61 = vunpack.c.l.bf16 %v8097_v52  ;;  %v849_v31 = vmul.f32 0.75, %v315_v54 }
  0xcd   : > { %v1504_v22 = vrot.slane %v975_v62, 1  ;;  %v1505_v21 = vrot.slane %v976_v18, 1  ;;  %v1248_v7 = vrot.slane %v1103_v43, 7  ;;  %v1249_v35 = vrot.slane %v1104_v56, 7 }
  0xce   : > { %2880 = vmatmul.mubr.bf16.gmra.mrb[64].mxu1 %v10741_v39  ;;  %v10812_v50 = vpack.c.bf16 %v1104_v56, %v1103_v43  ;;  %v484_v23 = vsel %vm427_vm0, %v482_v33, %v483_v49  ;;  %v606_v28 = vsel %vm427_vm0, %v315_v54, %v482_v33  ;;  %v850_v6 = vmul.f32 0.75, %v316_v60  ;;  %v9608_v49 = vld [vmem:[%s12272_s1 + $0x504] ss:$8 sps:$4 sm:$0xff]  }
  0xcf   : > { %8438 = vmatmul.mubr.msk.bf16.gmra.mrb[64].mxu0 %vm10029_vm5, %v10800_v42  ;;  %2889 = vmatprep.mubr.bf16.mxu1 %v10806_v59  ;;  %v1506_v45 = vsel %vm620_vm1, %v1504_v22, %v1505_v21  ;;  %v1250_v16 = vsel %vm427_vm0, %v1248_v7, %v1249_v35  ;;  %v913_v2 = vmul.f32 0.25, %v606_v28  ;;  %v914_v20 = vmul.f32 0.25, %v484_v23  ;;  %v10836_v35 = vld [vmem:[%s9880_s30 + $0x58] sm:$0xff]  }
  0xd0   : > { %12512 = vst [vmem:[#allocation48_spill] sm:$0xff] %v10812_v50  ;;  %v10822_v37 = vpack.c.bf16 %v1505_v21, %v1506_v45  ;;  %v10824_v43 = vpack.c.bf16 %v976_v18, %v975_v62  ;;  %v675_v56 = vrot.slane %v315_v54, 1  ;;  %v676_v33 = vrot.slane %v316_v60, 1  ;;  %6503 = vmatprep.subr.bf16.mxu0 %v9608_v49 }
  0xd1   : > { %v10829_v42 = vadd.f32 %v913_v2, %v849_v31  ;;  %v10831_v59 = vadd.f32 %v914_v20, %v850_v6  ;;  %v8067_v22 = vunpack.c.h.bf16 %v8097_v52  ;;  %v10833_v39 = vmul.f32 0.25, %v8066_v61 }
  0xd2   : > { %12513 = vst [vmem:[#allocation49_spill] sm:$0xff] %v10822_v37  ;;  %12514 = vst [vmem:[#allocation50_spill] sm:$0xff] %v10824_v43  ;;  %8441 = vmatprep.mubr.msk.bf16.mxu0 %vm9986_vm3, %v10822_v37  ;;  %v10841_v62 = vpack.c.bf16 %v1250_v16, %v1248_v7  ;;  %v677_v54 = vsel %vm620_vm1, %v675_v56, %v676_v33  ;;  %v799_v18 = vsel %vm620_vm1, %v676_v33, %v316_v60 }
  0xd3   : > { %v10845_v21 = vmul.f32 0.75, %v8066_v61  ;;  %v1507_v23 = vrot.slane %v10829_v42, 1  ;;  %v1508_v52 = vrot.slane %v10831_v59, 1  ;;  %v1041_v28 = vmul.f32 0.25, %v677_v54 }
  0xd4   : > { %12515 = vst [vmem:[#allocation51_spill] sm:$0xff] %v10841_v62  ;;  %v1042_v34 = vmul.f32 0.25, %v799_v18  ;;  %v10849_v45 = vmul.f32 0.25, %v8067_v22  ;;  %v349_v2 = vadd.f32 %v10833_v39, %v10782_v48  ;;  %v10853_v7 = vmul.f32 0.75, %v8067_v22 }
  0xd5   : > { %v1509_v60 = vsel %vm620_vm1, %v1507_v23, %v1508_v52  ;;  %v1105_v61 = vadd.f32 %v1041_v28, %v849_v31  ;;  %v317_v56 = vadd.f32 %v10748_v36, %v10845_v21 }
  0xd6   : > { %v1106_v20 = vadd.f32 %v1042_v34, %v850_v6  ;;  %2890 = vmatmul.mubr.bf16.gmra.mrb[68].mxu1 %v10778_v19  ;;  %v10863_v33 = vpack.c.bf16 %v1508_v52, %v1509_v60  ;;  %v350_v48 = vadd.f32 %v10849_v45, %v10793_v46  ;;  %v485_v49 = vrot.slane %v349_v2, 7 }
  0xd7   : > { %8445 = vmatmul.mubr.msk.bf16.gmra.mrb[68].mxu0 %vm10029_vm5, %v10841_v62  ;;  %v851_v22 = vmul.f32 0.75, %v349_v2  ;;  %2899 = vmatprep.mubr.bf16.mxu1 %v10812_v50  ;;  %v1251_v31 = vrot.slane %v1105_v61, 7  ;;  %v678_v36 = vrot.slane %v349_v2, 1  ;;  %v318_v60 = vadd.f32 %v10764_v10, %v10853_v7 }
  0xd8   : > { %12516 = vst [vmem:[#allocation52_spill] sm:$0xff] %v10863_v33  ;;  %v1252_v6 = vrot.slane %v1106_v20, 7  ;;  %v10868_v54 = vpack.c.bf16 %v1106_v20, %v1105_v61  ;;  %8448 = vmatprep.mubr.msk.bf16.mxu0 %vm9986_vm3, %v10863_v33  ;;  %v486_v18 = vrot.slane %v350_v48, 7  ;;  %v607_v23 = vsel %vm427_vm0, %v349_v2, %v485_v49 }
  0xd9   : > { %v852_v52 = vmul.f32 0.75, %v350_v48  ;;  %v679_v28 = vrot.slane %v350_v48, 1  ;;  %v915_v34 = vmul.f32 0.25, %v607_v23  ;;  %v488_v16 = vrot.slane %v317_v56, 7 }
  0xda   : > { %12517 = vst [vmem:[#allocation53_spill] sm:$0xff] %v10868_v54  ;;  %v1253_v46 = vsel %vm427_vm0, %v1251_v31, %v1252_v6  ;;  %v487_v61 = vsel %vm427_vm0, %v485_v49, %v486_v18  ;;  %v489_v13 = vrot.slane %v318_v60, 7  ;;  %v853_v23 = vmul.f32 0.75, %v317_v56 }
  0xdb   : > { %v10877_v62 = vpack.c.bf16 %v1253_v46, %v1251_v31  ;;  %v680_v20 = vsel %vm620_vm1, %v678_v36, %v679_v28  ;;  %v800_v33 = vsel %vm620_vm1, %v679_v28, %v350_v48  ;;  %v916_v37 = vmul.f32 0.25, %v487_v61 }
  0xdc   : > { %v979_v50 = vadd.f32 %v915_v34, %v851_v22  ;;  %v1043_v2 = vmul.f32 0.25, %v680_v20  ;;  %v1044_v19 = vmul.f32 0.25, %v800_v33  ;;  %v608_v6 = vsel %vm427_vm0, %v317_v56, %v488_v16 }
  0xdd   : > { %12518 = vst [vmem:[#allocation54_spill] sm:$0xff] %v10877_v62  ;;  %v854_v57 = vmul.f32 0.75, %v318_v60  ;;  %v980_v8 = vadd.f32 %v916_v37, %v852_v52  ;;  %v490_v48 = vsel %vm427_vm0, %v488_v16, %v489_v13  ;;  %v917_v49 = vmul.f32 0.25, %v608_v6 }
  0xde   : > { %v1510_v10 = vrot.slane %v979_v50, 1  ;;  %v1107_v58 = vadd.f32 %v1043_v2, %v851_v22  ;;  %v1108_v31 = vadd.f32 %v1044_v19, %v852_v52  ;;  %2900 = vmatmul.mubr.bf16.gmra.mrb[72].mxu1 %v10824_v43  ;;  %v681_v36 = vrot.slane %v317_v56, 1 }
  0xdf   : > { %8452 = vmatmul.mubr.msk.bf16.gmra.mrb[72].mxu0 %vm10029_vm5, %v10877_v62  ;;  %v682_v33 = vrot.slane %v318_v60, 1  ;;  %2909 = vmatprep.mubr.bf16.mxu1 %v10868_v54  ;;  %v1511_v18 = vrot.slane %v980_v8, 1  ;;  %v10891_v37 = vpack.c.bf16 %v10831_v59, %v10829_v42  ;;  %v918_v28 = vmul.f32 0.25, %v490_v48 }
  0xe0   : > { %v1254_v22 = vrot.slane %v1107_v58, 7  ;;  %v1255_v19 = vrot.slane %v1108_v31, 7  ;;  %v10893_v52 = vpack.c.bf16 %v1108_v31, %v1107_v58  ;;  %v981_v46 = vadd.f32 %v917_v49, %v853_v23 }
  0xe1   : > { %12519 = vst [vmem:[#allocation55_spill] sm:$0xff] %v10891_v37  ;;  %v683_v34 = vsel %vm620_vm1, %v681_v36, %v682_v33  ;;  %v1512_v13 = vsel %vm620_vm1, %v1510_v10, %v1511_v18  ;;  %v801_v56 = vsel %vm620_vm1, %v682_v33, %v318_v60  ;;  %v982_v59 = vadd.f32 %v918_v28, %v854_v57  ;;  %v10909_v10 = vld [vmem:[%s9880_s30 + $0x60] sm:$0xff]  }
  0xe2   : > { %12520 = vst [vmem:[#allocation56_spill] sm:$0xff] %v10893_v52  ;;  %v1256_v16 = vsel %vm427_vm0, %v1254_v22, %v1255_v19  ;;  %v1045_v61 = vmul.f32 0.25, %v683_v34  ;;  %v10899_v20 = vpack.c.bf16 %v1511_v18, %v1512_v13  ;;  %v1513_v2 = vrot.slane %v981_v46, 1 }
  0xe3   : > { %v10901_v42 = vpack.c.bf16 %v1256_v16, %v1254_v22  ;;  %v1046_v58 = vmul.f32 0.25, %v801_v56  ;;  %v8071_v31 = vunpack.c.h.bf16 %v10836_v35  ;;  %v12523_v48 = vunpack.c.l.bf16 %v10836_v35 }
  0xe4   : > { %12521 = vst [vmem:[#allocation57_spill] sm:$0xff] %v10899_v20  ;;  %v1109_v6 = vadd.f32 %v1045_v61, %v853_v23  ;;  %8455 = vmatprep.mubr.msk.bf16.mxu0 %vm9986_vm3, %v10899_v20  ;;  %v1514_v60 = vrot.slane %v982_v59, 1  ;;  %v10914_v36 = vpack.c.bf16 %v980_v8, %v979_v50  ;;  %v10916_v33 = vpack.c.bf16 %v982_v59, %v981_v46 }
  0xe5   : > { %12522 = vst [vmem:[#allocation58_spill] sm:$0xff] %v10901_v42  ;;  %v10906_v49 = vmul.f32 0.25, %v12523_v48  ;;  %v12526_v18 = vmov %v12523_v48  ;;  %v1110_v22 = vadd.f32 %v1046_v58, %v854_v57  ;;  %v10922_v28 = vmul.f32 0.25, %v8071_v31 }
  0xe6   : > { %12524 = vst [vmem:[#allocation59_spill] sm:$0xff] %v10914_v36  ;;  %12525 = vst [vmem:[#allocation60_spill] sm:$0xff] %v10916_v33  ;;  %v10920_v23 = vmul.f32 0.75, %v12526_v18  ;;  %v1257_v19 = vrot.slane %v1109_v6, 7  ;;  %2910 = vmatmul.mubr.bf16.gmra.mrb[76].mxu1 %v10891_v37  ;;  %v1515_v8 = vsel %vm620_vm1, %v1513_v2, %v1514_v60  ;;  %v10931_v50 = vmul.f32 0.75, %v8071_v31 }
  0xe7   : > { %v351_v34 = vadd.f32 %v10906_v49, %v10845_v21  ;;  %8459 = vmatmul.mubr.msk.bf16.gmra.mrb[76].mxu0 %vm10029_vm5, %v10901_v42  ;;  %2919 = vmatprep.mubr.bf16.mxu1 %v10893_v52  ;;  %v10937_v46 = vpack.c.bf16 %v1514_v60, %v1515_v8  ;;  %v1258_v21 = vrot.slane %v1110_v22, 7  ;;  %v10939_v13 = vpack.c.bf16 %v1110_v22, %v1109_v6 }
  0xe8   : > { %v319_v35 = vadd.f32 %v10833_v39, %v10920_v23  ;;  %v352_v16 = vadd.f32 %v10922_v28, %v10853_v7  ;;  %v320_v2 = vadd.f32 %v10849_v45, %v10931_v50 }
  0xe9   : > { %12527 = vst [vmem:[#allocation61_spill] sm:$0xff] %v10937_v46  ;;  %12528 = vst [vmem:[#allocation62_spill] sm:$0xff] %v10939_v13  ;;  %v491_v56 = vrot.slane %v351_v34, 7  ;;  %v855_v61 = vmul.f32 0.75, %v351_v34  ;;  %v684_v59 = vrot.slane %v351_v34, 1  ;;  %8462 = vmatprep.mubr.msk.bf16.mxu0 %vm9986_vm3, %v10937_v46  ;;  %v1259_v39 = vsel %vm427_vm0, %v1257_v19, %v1258_v21 }
  0xea   : > { %v492_v58 = vrot.slane %v352_v16, 7  ;;  %v856_v31 = vmul.f32 0.75, %v352_v16  ;;  %v685_v48 = vrot.slane %v352_v16, 1  ;;  %v10949_v6 = vpack.c.bf16 %v1259_v39, %v1257_v19 }
  0xeb   : > { %v609_v60 = vsel %vm427_vm0, %v351_v34, %v491_v56  ;;  %v494_v7 = vrot.slane %v319_v35, 7  ;;  %v495_v18 = vrot.slane %v320_v2, 7  ;;  %v857_v39 = vmul.f32 0.75, %v319_v35 }
  0xec   : > { %12529 = vst [vmem:[#allocation63_spill] sm:$0xff] %v10949_v6  ;;  %v493_v22 = vsel %vm427_vm0, %v491_v56, %v492_v58  ;;  %v919_v8 = vmul.f32 0.25, %v609_v60  ;;  %v686_v45 = vsel %vm620_vm1, %v684_v59, %v685_v48  ;;  %v802_v57 = vsel %vm620_vm1, %v685_v48, %v352_v16 }
  0xed   : > { %v920_v42 = vmul.f32 0.25, %v493_v22  ;;  %v1047_v46 = vmul.f32 0.25, %v686_v45  ;;  %v1048_v20 = vmul.f32 0.25, %v802_v57  ;;  %v496_v21 = vsel %vm427_vm0, %v494_v7, %v495_v18 }
  0xee   : > { %v983_v62 = vadd.f32 %v919_v8, %v855_v61  ;;  %v610_v19 = vsel %vm427_vm0, %v319_v35, %v494_v7  ;;  %v858_v52 = vmul.f32 0.75, %v320_v2  ;;  %2920 = vmatmul.mubr.bf16.gmra.mrb[80].mxu1 %v10914_v36  ;;  %v922_v58 = vmul.f32 0.25, %v496_v21 }
  0xef   : > { %8466 = vmatmul.mubr.msk.bf16.gmra.mrb[80].mxu0 %vm10029_vm5, %v10949_v6  ;;  %v984_v34 = vadd.f32 %v920_v42, %v856_v31  ;;  %v1111_v56 = vadd.f32 %v1047_v46, %v855_v61  ;;  %v1112_v59 = vadd.f32 %v1048_v20, %v856_v31  ;;  %v921_v16 = vmul.f32 0.25, %v610_v19  ;;  %2929 = vmatprep.mubr.bf16.mxu1 %v10939_v13 }
  0xf0   : > { %v1516_v57 = vrot.slane %v983_v62, 1  ;;  %v687_v48 = vrot.slane %v319_v35, 1  ;;  %v688_v60 = vrot.slane %v320_v2, 1  ;;  %v8075_v8 = vunpack.c.h.bf16 %v10909_v10 }
  0xf1   : > { %v1517_v18 = vrot.slane %v984_v34, 1  ;;  %v1260_v7 = vrot.slane %v1111_v56, 7  ;;  %v1261_v22 = vrot.slane %v1112_v59, 7  ;;  %v10963_v45 = vpack.c.bf16 %v1112_v59, %v1111_v56 }
  0xf2   : > { %v10965_v36 = vadd.f32 %v921_v16, %v857_v39  ;;  %v10967_v42 = vadd.f32 %v922_v58, %v858_v52  ;;  %v689_v20 = vsel %vm620_vm1, %v687_v48, %v688_v60  ;;  %v803_v35 = vsel %vm620_vm1, %v688_v60, %v320_v2 }
  0xf3   : > { %12530 = vst [vmem:[#allocation64_spill] sm:$0xff] %v10963_v45  ;;  %v1518_v46 = vsel %vm620_vm1, %v1516_v57, %v1517_v18  ;;  %v1262_v61 = vsel %vm427_vm0, %v1260_v7, %v1261_v22  ;;  %v1049_v31 = vmul.f32 0.25, %v689_v20  ;;  %v1050_v16 = vmul.f32 0.25, %v803_v35  ;;  %v10986_v22 = vld [vmem:[%s9880_s30 + $0x68] sm:$0xff]  }
  0xf4   : > { %v10973_v21 = vpack.c.bf16 %v1517_v18, %v1518_v46  ;;  %v10975_v19 = vpack.c.bf16 %v1262_v61, %v1260_v7  ;;  %v1519_v56 = vrot.slane %v10965_v36, 1  ;;  %v1520_v59 = vrot.slane %v10967_v42, 1 }
  0xf5   : > { %v1113_v58 = vadd.f32 %v1049_v31, %v857_v39  ;;  %v12533_v6 = vunpack.c.l.bf16 %v10909_v10  ;;  %v10983_v57 = vmul.f32 0.25, %v8075_v8  ;;  %v10992_v60 = vpack.c.bf16 %v984_v34, %v983_v62 }
  0xf6   : > { %12531 = vst [vmem:[#allocation65_spill] sm:$0xff] %v10973_v21  ;;  %12532 = vst [vmem:[#allocation66_spill] sm:$0xff] %v10975_v19  ;;  %8469 = vmatprep.mubr.msk.bf16.mxu0 %vm9986_vm3, %v10973_v21  ;;  %v1521_v2 = vsel %vm620_vm1, %v1519_v56, %v1520_v59  ;;  %v10998_v39 = vmul.f32 0.75, %v8075_v8  ;;  %2930 = vmatmul.mubr.bf16.gmra.mrb[84].mxu1 %v10916_v33  ;;  %v1114_v20 = vadd.f32 %v1050_v16, %v858_v52 }
  0xf7   : > { %v10981_v48 = vmul.f32 0.25, %v12533_v6  ;;  %12534 = vst [vmem:[#allocation67_spill] sm:$0xff] %v10992_v60  ;;  %v12535_v18 = vmov %v12533_v6  ;;  %8473 = vmatmul.mubr.msk.bf16.gmra.mrb[84].mxu0 %vm10029_vm5, %v10975_v19  ;;  %v11004_v6 = vpack.c.bf16 %v1520_v59, %v1521_v2  ;;  %v1263_v46 = vrot.slane %v1113_v58, 7  ;;  %2939 = vmatprep.mubr.bf16.mxu1 %v10963_v45 }
  0xf8   : > { %v10996_v7 = vmul.f32 0.75, %v12535_v18  ;;  %v354_v10 = vadd.f32 %v10983_v57, %v10931_v50  ;;  %v322_v8 = vadd.f32 %v10922_v28, %v10998_v39  ;;  %v1264_v52 = vrot.slane %v1114_v20, 7 }
  0xf9   : > { %12536 = vst [vmem:[#allocation68_spill] sm:$0xff] %v11004_v6  ;;  %v353_v62 = vadd.f32 %v10981_v48, %v10920_v23  ;;  %8476 = vmatprep.mubr.msk.bf16.mxu0 %vm9986_vm3, %v11004_v6  ;;  %v11019_v35 = vpack.c.bf16 %v1114_v20, %v1113_v58 }
  0xfa   : > { %v321_v34 = vadd.f32 %v10906_v49, %v10996_v7  ;;  %v498_v56 = vrot.slane %v354_v10, 7  ;;  %v860_v59 = vmul.f32 0.75, %v354_v10  ;;  %v691_v16 = vrot.slane %v354_v10, 1 }
  0xfb   : > { %12537 = vst [vmem:[#allocation69_spill] sm:$0xff] %v11019_v35  ;;  %v497_v23 = vrot.slane %v353_v62, 7  ;;  %v859_v31 = vmul.f32 0.75, %v353_v62  ;;  %v690_v50 = vrot.slane %v353_v62, 1  ;;  %v1265_v49 = vsel %vm427_vm0, %v1263_v46, %v1264_v52 }
  0xfc   : > { %v500_v28 = vrot.slane %v321_v34, 7  ;;  %v501_v18 = vrot.slane %v322_v8, 7  ;;  %v11023_v61 = vpack.c.bf16 %v1265_v49, %v1263_v46  ;;  %v804_v21 = vsel %vm620_vm1, %v691_v16, %v354_v10 }
  0xfd   : > { %v611_v2 = vsel %vm427_vm0, %v353_v62, %v497_v23  ;;  %v499_v19 = vsel %vm427_vm0, %v497_v23, %v498_v56  ;;  %v692_v58 = vsel %vm620_vm1, %v690_v50, %v691_v16  ;;  %v1052_v37 = vmul.f32 0.25, %v804_v21 }
  0xfe   : > { %12538 = vst [vmem:[#allocation70_spill] sm:$0xff] %v11023_v61  ;;  %v923_v6 = vmul.f32 0.25, %v611_v2  ;;  %v924_v20 = vmul.f32 0.25, %v499_v19  ;;  %v1051_v45 = vmul.f32 0.25, %v692_v58  ;;  %v502_v33 = vsel %vm427_vm0, %v500_v28, %v501_v18  ;;  %2940 = vmatmul.mubr.bf16.gmra.mrb[88].mxu1 %v10992_v60 }
  0xff   : > { %v612_v52 = vsel %vm427_vm0, %v321_v34, %v500_v28  ;;  %v861_v62 = vmul.f32 0.75, %v321_v34  ;;  %8480 = vmatmul.mubr.msk.bf16.gmra.mrb[88].mxu0 %vm10029_vm5, %v11023_v61  ;;  %v862_v56 = vmul.f32 0.75, %v322_v8  ;;  %2949 = vmatprep.mubr.bf16.mxu1 %v11019_v35  ;;  %v1116_v50 = vadd.f32 %v1052_v37, %v860_v59 }
 0x100   : > { %v987_v13 = vadd.f32 %v923_v6, %v859_v31  ;;  %v988_v46 = vadd.f32 %v924_v20, %v860_v59  ;;  %v1115_v23 = vadd.f32 %v1051_v45, %v859_v31  ;;  %v925_v19 = vmul.f32 0.25, %v612_v52 }
 0x101   : > { %v926_v16 = vmul.f32 0.25, %v502_v33  ;;  %v693_v6 = vrot.slane %v321_v34, 1  ;;  %v11037_v49 = vpack.c.bf16 %v10967_v42, %v10965_v36  ;;  %v1267_v18 = vrot.slane %v1116_v50, 7 }
 0x102   : > { %v1522_v10 = vrot.slane %v987_v13, 1  ;;  %v1523_v21 = vrot.slane %v988_v46, 1  ;;  %v1266_v2 = vrot.slane %v1115_v23, 7  ;;  %v989_v28 = vadd.f32 %v925_v19, %v861_v62 }
 0x103   : > { %12539 = vst [vmem:[#allocation71_spill] sm:$0xff] %v11037_v49  ;;  %v11039_v58 = vpack.c.bf16 %v1116_v50, %v1115_v23  ;;  %v990_v20 = vadd.f32 %v926_v16, %v862_v56  ;;  %v694_v45 = vrot.slane %v322_v8, 1  ;;  %v8079_v61 = vunpack.c.h.bf16 %v10986_v22 }
 0x104   : > { %v1524_v31 = vsel %vm620_vm1, %v1522_v10, %v1523_v21  ;;  %v1525_v52 = vrot.slane %v989_v28, 1  ;;  %v12541_v37 = vunpack.c.l.bf16 %v10986_v22  ;;  %v1268_v36 = vsel %vm427_vm0, %v1266_v2, %v1267_v18 }
 0x105   : > { %12540 = vst [vmem:[#allocation72_spill] sm:$0xff] %v11039_v58  ;;  %v11047_v34 = vpack.c.bf16 %v1523_v21, %v1524_v31  ;;  %v1526_v42 = vrot.slane %v990_v20, 1  ;;  %v695_v59 = vsel %vm620_vm1, %v693_v6, %v694_v45  ;;  %v11051_v23 = vpack.c.bf16 %v1268_v36, %v1266_v2 }
 0x106   : > { %v11045_v33 = vmul.f32 0.25, %v12541_v37  ;;  %v805_v19 = vsel %vm620_vm1, %v694_v45, %v322_v8  ;;  %v1053_v50 = vmul.f32 0.25, %v695_v59  ;;  %v11054_v10 = vmul.f32 0.25, %v8079_v61  ;;  %2950 = vmatmul.mubr.bf16.gmra.mrb[92].mxu1 %v11037_v49  ;;  %v8101_v49 = vld [vmem:[%s9880_s30 + $0x70] sm:$0xff]  }
 0x107   : > { %12542 = vst [vmem:[#allocation73_spill] sm:$0xff] %v11047_v34  ;;  %12543 = vst [vmem:[#allocation74_spill] sm:$0xff] %v11051_v23  ;;  %8483 = vmatprep.mubr.msk.bf16.mxu0 %vm9986_vm3, %v11047_v34  ;;  %v1527_v16 = vsel %vm620_vm1, %v1525_v52, %v1526_v42  ;;  %v11060_v21 = vpack.c.bf16 %v988_v46, %v987_v13  ;;  %v1054_v31 = vmul.f32 0.25, %v805_v19  ;;  %v12546_v45 = vmov %v12541_v37 }
 0x108   : > { %v355_v18 = vadd.f32 %v11045_v33, %v10996_v7  ;;  %8487 = vmatmul.mubr.msk.bf16.gmra.mrb[92].mxu0 %vm10029_vm5, %v11051_v23  ;;  %v11068_v8 = vpack.c.bf16 %v1526_v42, %v1527_v16  ;;  %v1117_v6 = vadd.f32 %v1053_v50, %v861_v62  ;;  %v356_v2 = vadd.f32 %v11054_v10, %v10998_v39 }
 0x109   : > { %12544 = vst [vmem:[#allocation75_spill] sm:$0xff] %v11060_v21  ;;  %v11074_v13 = vmul.f32 0.75, %v12546_v45  ;;  %2959 = vmatprep.mubr.bf16.mxu1 %v11039_v58  ;;  %v1118_v46 = vadd.f32 %v1054_v31, %v862_v56  ;;  %v11083_v50 = vmul.f32 0.75, %v8079_v61 }
 0x10a   : > { %12545 = vst [vmem:[#allocation76_spill] sm:$0xff] %v11068_v8  ;;  %v503_v7 = vrot.slane %v355_v18, 7  ;;  %v863_v52 = vmul.f32 0.75, %v355_v18  ;;  %v696_v37 = vrot.slane %v355_v18, 1  ;;  %8490 = vmatprep.mubr.msk.bf16.mxu0 %vm9986_vm3, %v11068_v8  ;;  %v1269_v36 = vrot.slane %v1117_v6, 7 }
 0x10b   : > { %v504_v62 = vrot.slane %v356_v2, 7  ;;  %v864_v42 = vmul.f32 0.75, %v356_v2  ;;  %v697_v59 = vrot.slane %v356_v2, 1  ;;  %v1270_v39 = vrot.slane %v1118_v46, 7 }
 0x10c   : > { %v11080_v19 = vpack.c.bf16 %v1118_v46, %v1117_v6  ;;  %v613_v22 = vsel %vm427_vm0, %v355_v18, %v503_v7  ;;  %v323_v61 = vadd.f32 %v10981_v48, %v11074_v13  ;;  %v324_v18 = vadd.f32 %v10983_v57, %v11083_v50 }
 0x10d   : > { %v505_v56 = vsel %vm427_vm0, %v503_v7, %v504_v62  ;;  %v927_v16 = vmul.f32 0.25, %v613_v22  ;;  %v698_v31 = vsel %vm620_vm1, %v696_v37, %v697_v59  ;;  %v806_v45 = vsel %vm620_vm1, %v697_v59, %v356_v2 }
 0x10e   : > { %12547 = vst [vmem:[#allocation77_spill] sm:$0xff] %v11080_v19  ;;  %v1271_v8 = vsel %vm427_vm0, %v1269_v36, %v1270_v39  ;;  %v928_v23 = vmul.f32 0.25, %v505_v56  ;;  %v1055_v34 = vmul.f32 0.25, %v698_v31  ;;  %v1056_v58 = vmul.f32 0.25, %v806_v45  ;;  %2960 = vmatmul.mubr.bf16.gmra.mrb[96].mxu1 %v11060_v21 }
 0x10f   : > { %v11090_v35 = vpack.c.bf16 %v1271_v8, %v1269_v36  ;;  %v991_v6 = vadd.f32 %v927_v16, %v863_v52  ;;  %v11096_v7 = vpack.c.bf16 %v990_v20, %v989_v28  ;;  %v506_v36 = vrot.slane %v323_v61, 7  ;;  %2969 = vmatprep.mubr.bf16.mxu1 %v11080_v19 }
 0x110   : > { %v992_v46 = vadd.f32 %v928_v23, %v864_v42  ;;  %v1119_v37 = vadd.f32 %v1055_v34, %v863_v52  ;;  %v1120_v2 = vadd.f32 %v1056_v58, %v864_v42  ;;  %v507_v62 = vrot.slane %v324_v18, 7 }
 0x111   : > { %12548 = vst [vmem:[#allocation78_spill] sm:$0xff] %v11090_v35  ;;  %12549 = vst [vmem:[#allocation79_spill] sm:$0xff] %v11096_v7  ;;  %8494 = vmatmul.mubr.msk.bf16.gmra.mrb[96].mxu0 %vm10029_vm5, %v11090_v35  ;;  %v1528_v8 = vrot.slane %v991_v6, 1  ;;  %v8082_v59 = vunpack.c.l.bf16 %v8101_v49  ;;  %v865_v23 = vmul.f32 0.75, %v323_v61  ;;  %v614_v20 = vsel %vm427_vm0, %v323_v61, %v506_v36 }
 0x112   : > { %v1529_v48 = vrot.slane %v992_v46, 1  ;;  %v1272_v39 = vrot.slane %v1119_v37, 7  ;;  %v1273_v57 = vrot.slane %v1120_v2, 7  ;;  %v11103_v28 = vpack.c.bf16 %v1120_v2, %v1119_v37 }
 0x113   : > { %v508_v58 = vsel %vm427_vm0, %v506_v36, %v507_v62  ;;  %v866_v34 = vmul.f32 0.75, %v324_v18  ;;  %v929_v22 = vmul.f32 0.25, %v614_v20  ;;  %v699_v45 = vrot.slane %v323_v61, 1  ;;  %v11120_v36 = vld [vmem:[%s9880_s30 + $0x78] sm:$0xff]  }
 0x114   : > { %12550 = vst [vmem:[#allocation80_spill] sm:$0xff] %v11103_v28  ;;  %v1530_v52 = vsel %vm620_vm1, %v1528_v8, %v1529_v48  ;;  %v1274_v42 = vsel %vm427_vm0, %v1272_v39, %v1273_v57  ;;  %v930_v56 = vmul.f32 0.25, %v508_v58  ;;  %v700_v35 = vrot.slane %v324_v18, 1 }
 0x115   : > { %v11109_v16 = vpack.c.bf16 %v1529_v48, %v1530_v52  ;;  %v11111_v31 = vpack.c.bf16 %v1274_v42, %v1272_v39  ;;  %v11113_v37 = vadd.f32 %v929_v22, %v865_v23  ;;  %v8083_v62 = vunpack.c.h.bf16 %v8101_v49 }
 0x116   : > { %v11115_v2 = vadd.f32 %v930_v56, %v866_v34  ;;  %v11117_v19 = vmul.f32 0.25, %v8082_v59  ;;  %v11125_v8 = vpack.c.bf16 %v992_v46, %v991_v6  ;;  %v701_v48 = vsel %vm620_vm1, %v699_v45, %v700_v35  ;;  %2970 = vmatmul.mubr.bf16.gmra.mrb[100].mxu1 %v11096_v7 }
 0x117   : > { %12551 = vst [vmem:[#allocation81_spill] sm:$0xff] %v11109_v16  ;;  %12552 = vst [vmem:[#allocation82_spill] sm:$0xff] %v11111_v31  ;;  %8497 = vmatprep.mubr.msk.bf16.mxu0 %vm9986_vm3, %v11109_v16  ;;  %v807_v61 = vsel %vm620_vm1, %v700_v35, %v324_v18  ;;  %v11129_v39 = vmul.f32 0.75, %v8082_v59  ;;  %v1531_v57 = vrot.slane %v11113_v37, 1  ;;  %v1057_v58 = vmul.f32 0.25, %v701_v48  ;;  %2979 = vmatprep.mubr.bf16.mxu1 %v11103_v28 }
 0x118   : > { %12553 = vst [vmem:[#allocation83_spill] sm:$0xff] %v11125_v8  ;;  %v1532_v49 = vrot.slane %v11115_v2, 1  ;;  %v1058_v20 = vmul.f32 0.25, %v807_v61  ;;  %v11137_v6 = vmul.f32 0.25, %v8083_v62  ;;  %v357_v46 = vadd.f32 %v11117_v19, %v11074_v13 }
 0x119   : > { %8501 = vmatmul.mubr.msk.bf16.gmra.mrb[100].mxu0 %vm10029_vm5, %v11111_v31  ;;  %v11141_v35 = vmul.f32 0.75, %v8083_v62  ;;  %v1121_v52 = vadd.f32 %v1057_v58, %v865_v23  ;;  %v325_v22 = vadd.f32 %v11045_v33, %v11129_v39 }
 0x11a   : > { %v1533_v59 = vsel %vm620_vm1, %v1531_v57, %v1532_v49  ;;  %v1122_v42 = vadd.f32 %v1058_v20, %v866_v34  ;;  %v358_v45 = vadd.f32 %v11137_v6, %v11083_v50  ;;  %v509_v48 = vrot.slane %v357_v46, 7 }
 0x11b   : > { %v11148_v56 = vpack.c.bf16 %v1532_v49, %v1533_v59  ;;  %v867_v13 = vmul.f32 0.75, %v357_v46  ;;  %v1275_v62 = vrot.slane %v1121_v52, 7  ;;  %v702_v18 = vrot.slane %v357_v46, 1 }
 0x11c   : > { %v1276_v61 = vrot.slane %v1122_v42, 7  ;;  %v11152_v31 = vpack.c.bf16 %v1122_v42, %v1121_v52  ;;  %v510_v23 = vrot.slane %v358_v45, 7  ;;  %v615_v34 = vsel %vm427_vm0, %v357_v46, %v509_v48 }
 0x11d   : > { %12554 = vst [vmem:[#allocation84_spill] sm:$0xff] %v11148_v56  ;;  %8504 = vmatprep.mubr.msk.bf16.mxu0 %vm9986_vm3, %v11148_v56  ;;  %v868_v33 = vmul.f32 0.75, %v358_v45  ;;  %v703_v57 = vrot.slane %v358_v45, 1  ;;  %v931_v58 = vmul.f32 0.25, %v615_v34  ;;  %v326_v50 = vadd.f32 %v11054_v10, %v11141_v35 }
 0x11e   : > { %12555 = vst [vmem:[#allocation85_spill] sm:$0xff] %v11152_v31  ;;  %v1277_v49 = vsel %vm427_vm0, %v1275_v62, %v1276_v61  ;;  %v512_v20 = vrot.slane %v325_v22, 7  ;;  %v511_v52 = vsel %vm427_vm0, %v509_v48, %v510_v23  ;;  %2980 = vmatmul.mubr.bf16.gmra.mrb[104].mxu1 %v11125_v8  ;;  %v869_v61 = vmul.f32 0.75, %v325_v22 }
 0x11f   : > { %v11161_v59 = vpack.c.bf16 %v1277_v49, %v1275_v62  ;;  %v704_v42 = vsel %vm620_vm1, %v702_v18, %v703_v57  ;;  %v808_v56 = vsel %vm620_vm1, %v703_v57, %v358_v45  ;;  %v932_v16 = vmul.f32 0.25, %v511_v52  ;;  %2989 = vmatprep.mubr.bf16.mxu1 %v11152_v31 }
 0x120   : > { %v995_v28 = vadd.f32 %v931_v58, %v867_v13  ;;  %v1059_v46 = vmul.f32 0.25, %v704_v42  ;;  %v1060_v7 = vmul.f32 0.25, %v808_v56  ;;  %v513_v10 = vrot.slane %v326_v50, 7 }
 0x121   : > { %12556 = vst [vmem:[#allocation86_spill] sm:$0xff] %v11161_v59  ;;  %8508 = vmatmul.mubr.msk.bf16.gmra.mrb[104].mxu0 %vm10029_vm5, %v11161_v59  ;;  %v616_v62 = vsel %vm427_vm0, %v325_v22, %v512_v20  ;;  %v870_v34 = vmul.f32 0.75, %v326_v50  ;;  %v996_v18 = vadd.f32 %v932_v16, %v868_v33  ;;  %v705_v49 = vrot.slane %v325_v22, 1 }
 0x122   : > { %v1534_v48 = vrot.slane %v995_v28, 1  ;;  %v1123_v45 = vadd.f32 %v1059_v46, %v867_v13  ;;  %v1124_v23 = vadd.f32 %v1060_v7, %v868_v33  ;;  %v514_v57 = vsel %vm427_vm0, %v512_v20, %v513_v10 }
 0x123   : > { %v933_v56 = vmul.f32 0.25, %v616_v62  ;;  %v706_v58 = vrot.slane %v326_v50, 1  ;;  %v1535_v52 = vrot.slane %v996_v18, 1  ;;  %v11175_v42 = vpack.c.bf16 %v11115_v2, %v11113_v37 }
 0x124   : > { %v1278_v59 = vrot.slane %v1123_v45, 7  ;;  %v1279_v8 = vrot.slane %v1124_v23, 7  ;;  %v11177_v21 = vpack.c.bf16 %v1124_v23, %v1123_v45  ;;  %v934_v60 = vmul.f32 0.25, %v514_v57 }
 0x125   : > { %12557 = vst [vmem:[#allocation87_spill] sm:$0xff] %v11175_v42  ;;  %v997_v31 = vadd.f32 %v933_v56, %v869_v61  ;;  %v707_v16 = vsel %vm620_vm1, %v705_v49, %v706_v58  ;;  %v1536_v7 = vsel %vm620_vm1, %v1534_v48, %v1535_v52  ;;  %v809_v22 = vsel %vm620_vm1, %v706_v58, %v326_v50 }
 0x126   : > { %12558 = vst [vmem:[#allocation88_spill] sm:$0xff] %v11177_v21  ;;  %v1280_v13 = vsel %vm427_vm0, %v1278_v59, %v1279_v8  ;;  %v1061_v33 = vmul.f32 0.25, %v707_v16  ;;  %v11183_v20 = vpack.c.bf16 %v1535_v52, %v1536_v7  ;;  %v998_v37 = vadd.f32 %v934_v60, %v870_v34  ;;  %2990 = vmatmul.mubr.bf16.gmra.mrb[108].mxu1 %v11175_v42 }
 0x127   : > { %v11185_v46 = vpack.c.bf16 %v1280_v13, %v1278_v59  ;;  %v1537_v2 = vrot.slane %v997_v31, 1  ;;  %v1062_v10 = vmul.f32 0.25, %v809_v22  ;;  %v8087_v45 = vunpack.c.h.bf16 %v11120_v36  ;;  %2999 = vmatprep.mubr.bf16.mxu1 %v11177_v21 }
 0x128   : > { %12559 = vst [vmem:[#allocation89_spill] sm:$0xff] %v11183_v20  ;;  %v1125_v62 = vadd.f32 %v1061_v33, %v869_v61  ;;  %v12561_v23 = vunpack.c.l.bf16 %v11120_v36  ;;  %8511 = vmatprep.mubr.msk.bf16.mxu0 %vm9986_vm3, %v11183_v20  ;;  %v1538_v8 = vrot.slane %v998_v37, 1  ;;  %v11194_v50 = vpack.c.bf16 %v996_v18, %v995_v28 }
 0x129   : > { %12560 = vst [vmem:[#allocation90_spill] sm:$0xff] %v11185_v46  ;;  %8515 = vmatmul.mubr.msk.bf16.gmra.mrb[108].mxu0 %vm10029_vm5, %v11185_v46  ;;  %v1126_v61 = vadd.f32 %v1062_v10, %v870_v34  ;;  %v11202_v56 = vmul.f32 0.25, %v8087_v45  ;;  %v11206_v52 = vpack.c.bf16 %v998_v37, %v997_v31  ;;  %v266_v28 = vmul.f32 0.75, %v8087_v45 }
 0x12a   : > { %v329_v57 = vmul.f32 0.25, %v12561_v23  ;;  %12562 = vst [vmem:[#allocation91_spill] sm:$0xff] %v11194_v50  ;;  %v12563_v59 = vmov %v12561_v23  ;;  %v1281_v48 = vrot.slane %v1125_v62, 7  ;;  %v1539_v58 = vsel %vm620_vm1, %v1537_v2, %v1538_v8 }
 0x12b   : > { %v265_v60 = vmul.f32 0.75, %v12563_v59  ;;  %v11209_v18 = vpack.c.bf16 %v1538_v8, %v1539_v58  ;;  %v1282_v16 = vrot.slane %v1126_v61, 7  ;;  %v11211_v7 = vpack.c.bf16 %v1126_v61, %v1125_v62 }
 0x12c   : > { %v359_v49 = vadd.f32 %v329_v57, %v11129_v39  ;;  %v360_v34 = vadd.f32 %v11202_v56, %v11141_v35  ;;  %v328_v39 = vadd.f32 %v11137_v6, %v266_v28 }
 0x12d   : > { %v327_v36 = vadd.f32 %v11117_v19, %v265_v60  ;;  %12564 = vst [vmem:[#allocation92_spill] sm:$0xff] %v11209_v18  ;;  %12565 = vst [vmem:[#allocation93_spill] sm:$0xff] %v11211_v7  ;;  %8518 = vmatprep.mubr.msk.bf16.mxu0 %vm9986_vm3, %v11209_v18  ;;  %v1283_v31 = vsel %vm427_vm0, %v1281_v48, %v1282_v16 }
 0x12e   : > { %v515_v13 = vrot.slane %v359_v49, 7  ;;  %v871_v22 = vmul.f32 0.75, %v359_v49  ;;  %v708_v33 = vrot.slane %v359_v49, 1  ;;  %v516_v19 = vrot.slane %v360_v34, 7  ;;  %3000 = vmatmul.mubr.bf16.gmra.mrb[112].mxu1 %v11194_v50 }
 0x12f   : > { %v872_v37 = vmul.f32 0.75, %v360_v34  ;;  %v709_v2 = vrot.slane %v360_v34, 1  ;;  %v11220_v10 = vpack.c.bf16 %v1283_v31, %v1281_v48  ;;  %v518_v45 = vrot.slane %v327_v36, 7  ;;  %3009 = vmatprep.mubr.bf16.mxu1 %v11211_v7 }
 0x130   : > { %v617_v62 = vsel %vm427_vm0, %v359_v49, %v515_v13  ;;  %v519_v35 = vrot.slane %v328_v39, 7  ;;  %v517_v23 = vsel %vm427_vm0, %v515_v13, %v516_v19  ;;  %v873_v13 = vmul.f32 0.75, %v327_v36 }
 0x131   : > { %12566 = vst [vmem:[#allocation94_spill] sm:$0xff] %v11220_v10  ;;  %v935_v8 = vmul.f32 0.25, %v617_v62  ;;  %v710_v6 = vsel %vm620_vm1, %v708_v33, %v709_v2  ;;  %v810_v59 = vsel %vm620_vm1, %v709_v2, %v360_v34  ;;  %v936_v61 = vmul.f32 0.25, %v517_v23  ;;  %8522 = vmatmul.mubr.msk.bf16.gmra.mrb[112].mxu0 %vm10029_vm5, %v11220_v10 }
 0x132   : > { %v1063_v58 = vmul.f32 0.25, %v710_v6  ;;  %v1064_v16 = vmul.f32 0.25, %v810_v59  ;;  %v520_v18 = vsel %vm427_vm0, %v518_v45, %v519_v35  ;;  %v618_v49 = vsel %vm427_vm0, %v327_v36, %v518_v45 }
 0x133   : > { %v999_v48 = vadd.f32 %v935_v8, %v871_v22  ;;  %v874_v33 = vmul.f32 0.75, %v328_v39  ;;  %v1000_v31 = vadd.f32 %v936_v61, %v872_v37  ;;  %v937_v2 = vmul.f32 0.25, %v618_v49 }
 0x134   : > { %v1127_v34 = vadd.f32 %v1063_v58, %v871_v22  ;;  %v1128_v19 = vadd.f32 %v1064_v16, %v872_v37  ;;  %v938_v23 = vmul.f32 0.25, %v520_v18  ;;  %v711_v6 = vrot.slane %v327_v36, 1 }
 0x135   : > { %v1540_v62 = vrot.slane %v999_v48, 1  ;;  %v712_v59 = vrot.slane %v328_v39, 1  ;;  %v1541_v35 = vrot.slane %v1000_v31, 1  ;;  %v361_v50 = vadd.f32 %v329_v57, %v265_v60 }
 0x136   : > { %v1284_v46 = vrot.slane %v1127_v34, 7  ;;  %v1285_v20 = vrot.slane %v1128_v19, 7  ;;  %v11233_v10 = vpack.c.bf16 %v1128_v19, %v1127_v34  ;;  %v1001_v7 = vadd.f32 %v937_v2, %v873_v13  ;;  %3010 = vmatmul.mubr.bf16.gmra.mrb[116].mxu1 %v11206_v52 }
 0x137   : > { %v1002_v8 = vadd.f32 %v938_v23, %v874_v33  ;;  %v713_v45 = vsel %vm620_vm1, %v711_v6, %v712_v59  ;;  %v1542_v21 = vsel %vm620_vm1, %v1540_v62, %v1541_v35  ;;  %v811_v37 = vsel %vm620_vm1, %v712_v59, %v328_v39 }
 0x138   : > { %v1286_v22 = vsel %vm427_vm0, %v1284_v46, %v1285_v20  ;;  %v1065_v61 = vmul.f32 0.25, %v713_v45  ;;  %v11239_v18 = vpack.c.bf16 %v1541_v35, %v1542_v21  ;;  %v1543_v58 = vrot.slane %v1001_v7, 1  ;;  %3019 = vmatprep.mubr.bf16.mxu1 %v11233_v10 }
 0x139   : > { %v11241_v36 = vpack.c.bf16 %v1286_v22, %v1284_v46  ;;  %v1544_v16 = vrot.slane %v1002_v8, 1  ;;  %v1066_v57 = vmul.f32 0.25, %v811_v37  ;;  %v362_v49 = vadd.f32 %v11202_v56, %v266_v28 }
 0x13a   : > { %v1129_v60 = vadd.f32 %v1065_v61, %v873_v13  ;;  %v521_v34 = vrot.slane %v361_v50, 7  ;;  %8525 = vmatprep.mubr.msk.bf16.mxu0 %vm9986_vm3, %v11239_v18  ;;  %v875_v20 = vmul.f32 0.75, %v361_v50  ;;  %v714_v46 = vrot.slane %v361_v50, 1 }
 0x13b   : > { %v1545_v21 = vsel %vm620_vm1, %v1543_v58, %v1544_v16  ;;  %8529 = vmatmul.mubr.msk.bf16.gmra.mrb[116].mxu0 %vm10029_vm5, %v11241_v36  ;;  %v1130_v13 = vadd.f32 %v1066_v57, %v874_v33  ;;  %v522_v56 = vrot.slane %v362_v49, 7  ;;  %v876_v2 = vmul.f32 0.75, %v362_v49 }
 0x13c   : > { %v11253_v39 = vpack.c.bf16 %v1544_v16, %v1545_v21  ;;  %v1287_v19 = vrot.slane %v1129_v60, 7  ;;  %v619_v28 = vsel %vm427_vm0, %v361_v50, %v521_v34  ;;  %v715_v62 = vrot.slane %v362_v49, 1 }
 0x13d   : > { %v11259_v23 = vpack.c.bf16 %v1000_v31, %v999_v48  ;;  %v1288_v6 = vrot.slane %v1130_v13, 7  ;;  %v523_v59 = vsel %vm427_vm0, %v521_v34, %v522_v56  ;;  %v939_v35 = vmul.f32 0.25, %v619_v28 }
 0x13e   : > { %8532 = vmatprep.mubr.msk.bf16.mxu0 %vm9986_vm3, %v11253_v39  ;;  %v11262_v45 = vpack.c.bf16 %v1130_v13, %v1129_v60  ;;  %v940_v22 = vmul.f32 0.25, %v523_v59  ;;  %v716_v33 = vsel %vm620_vm1, %v714_v46, %v715_v62  ;;  %v812_v37 = vsel %vm620_vm1, %v715_v62, %v362_v49  ;;  %v9606_v62 = vld [vmem:[%s12272_s1 + $0x500] ss:$8 sps:$4 sm:$0xff]   ;;  %v9609_v59 = vld [vmem:[%s12272_s1 + $0x210] ss:$8 sps:$4 sm:$0xff]  }
 0x13f   : > { %12567 = vst [vmem:[#allocation95_spill] sm:$0xff] %v11259_v23  ;;  %v1289_v50 = vsel %vm427_vm0, %v1287_v19, %v1288_v6  ;;  %v11267_v61 = vadd.f32 %v939_v35, %v875_v20  ;;  %v1067_v58 = vmul.f32 0.25, %v716_v33  ;;  %v1068_v16 = vmul.f32 0.25, %v812_v37  ;;  %3020 = vmatmul.mubr.bf16.gmra.mrb[120].mxu1 %v11259_v23  ;;  %v9614_v6 = vld [vmem:[%s12272_s1 + $0x514] ss:$8 sps:$4 sm:$0xff]  }
 0x140   : > { %v11269_v57 = vpack.c.bf16 %v1289_v50, %v1287_v19  ;;  %v11271_v48 = vadd.f32 %v940_v22, %v876_v2  ;;  %3029 = vmatprep.mubr.bf16.mxu1 %v11262_v45  ;;  %v9617_v35 = vld [vmem:[%s12272_s1 + $0x224] ss:$8 sps:$4 sm:$0xff]   ;;  %v9612_v22 = vld [vmem:[%s12272_s1 + $0x510] ss:$8 sps:$4 sm:$0xff]   ;;  %v9615_v33 = vld [vmem:[%s12272_s1 + $0x220] ss:$8 sps:$4 sm:$0xff]  }
 0x141   : > { %v1546_v31 = vrot.slane %v11267_v61, 1  ;;  %v11275_v60 = vadd.f32 %v1067_v58, %v875_v20  ;;  %v11277_v34 = vadd.f32 %v1068_v16, %v876_v2  ;;  %v11289_v20 = vpack.c.bf16 %v1002_v8, %v1001_v7  ;;  %v9603_v7 = vld [vmem:[%s12272_s1 + $0x200] ss:$8 sps:$4 sm:$0xff]   ;;  %v9611_v8 = vld [vmem:[%s12272_s1 + $0x214] ss:$8 sps:$4 sm:$0xff]  }
 0x142   : > { %v1547_v49 = vrot.slane %v11271_v48, 1  ;;  %v12570_v2 = vmov 0.0|0.0   ;;  %v9623_v37 = vld [vmem:[%s12272_s1 + $0x234] ss:$8 sps:$4 sm:$0xff]   ;;  %v9618_v50 = vld [vmem:[%s12272_s1 + $0x520] ss:$8 sps:$4 sm:$0xff]  }
 0x143   : > { %8536 = vmatmul.mubr.msk.bf16.gmra.mrb[120].mxu0 %vm10029_vm5, %v11269_v57  ;;  %v1290_v21 = vrot.slane %v11275_v60, 7  ;;  %v1291_v46 = vrot.slane %v11277_v34, 7  ;;  %v9626_v58 = vld [vmem:[%s12272_s1 + $0x534] ss:$8 sps:$4 sm:$0xff]   ;;  %v9621_v16 = vld [vmem:[%s12272_s1 + $0x230] ss:$8 sps:$4 sm:$0xff]  }
 0x144   : > { %v1548_v13 = vsel %vm620_vm1, %v1546_v31, %v1547_v49  ;;  %v9624_v31 = vld [vmem:[%s12272_s1 + $0x530] ss:$8 sps:$4 sm:$0xff]  }
 0x145   : > { %v11287_v19 = vpack.c.bf16 %v1547_v49, %v1548_v13  ;;  %v1292_v56 = vsel %vm427_vm0, %v1290_v21, %v1291_v46  ;;  %v9632_v49 = vld [vmem:[%s12272_s1 + $0x544] ss:$8 sps:$4 sm:$0xff]   ;;  %v9635_v46 = vld [vmem:[%s12272_s1 + $0x254] ss:$8 sps:$4 sm:$0xff]   ;;  %v9630_v13 = vld [vmem:[%s12272_s1 + $0x540] ss:$8 sps:$4 sm:$0xff]  }
 0x146   : > { %v11295_v28 = vpack.c.bf16 %v1292_v56, %v1290_v21  ;;  %v9627_v21 = vld [vmem:[%s12272_s1 + $0x240] ss:$8 sps:$4 sm:$0xff]   ;;  %v9638_v56 = vld [vmem:[%s12272_s1 + $0x554] ss:$8 sps:$4 sm:$0xff]  }
 0x147   : > { %12568 = vst [vmem:[#allocation96_spill] sm:$0xff] %v11287_v19  ;;  %8539 = vmatprep.mubr.msk.bf16.mxu0 %vm9986_vm3, %v11287_v19  ;;  %3030 = vmatmul.mubr.bf16.gmra.mrb[124].mxu1 %v11289_v20  ;;  %v9686_v19 = vld [vmem:[%s12272_s1 + $0x5d4] ss:$8 sps:$4 sm:$0xff]  }
 0x148   : > { %12569 = vst [vmem:[#allocation97_spill] sm:$0xff] %v11295_v28  ;;  %3072 = vmatprep.mubr.bf16.mxu1 %v12570_v2 }
 0x14b   : > { %8543 = vmatmul.mubr.msk.bf16.gmra.mrb[124].mxu0 %vm10029_vm5, %v11295_v28  ;;  %v9684_v28 = vld [vmem:[%s12272_s1 + $0x5d0] ss:$8 sps:$4 sm:$0xff]  }
 0x14c   : > { %6182 = vmatprep.mubr.bf16.mxu0 %v10038_v38 }
 0x14f   : > { %3073 = vmatmul.mubr.bf16.vlgmr.msra.gmra.mrb[0].mxu1 %v12570_v2 }
 0x150   : > { %4291 = vmatpush1.bf16.msra.mxu1 %v9603_v7  ;;  %8105 = vmatprep.mubr.msk.bf16.mxu1 %vm9986_vm3, %v9990_v3  ;;  %v9620_v3 = vld [vmem:[%s12272_s1 + $0x524] ss:$8 sps:$4 sm:$0xff]   ;;  %v9633_v7 = vld [vmem:[%s12272_s1 + $0x250] ss:$8 sps:$4 sm:$0xff]  }
 0x151   : > { %4292 = vmatprep.subr.bf16.mxu1 %v9611_v8  ;;  %v9641_v8 = vld [vmem:[%s12272_s1 + $0x264] ss:$8 sps:$4 sm:$0xff]  }
 0x153   : > { %6183 = vmatmul.mubr.bf16.vlgmr.msra.gmra.mrb[0].mxu0 %v10024_v29 }
 0x154   : > { %6504 = vmatpush1.bf16.msra.mxu0 %v9606_v62  ;;  %6192 = vmatprep.mubr.bf16.mxu0 %v10089_v15  ;;  %v9636_v62 = vld [vmem:[%s12272_s1 + $0x550] ss:$8 sps:$4 sm:$0xff]  }
 0x155   : > { %6505 = vmatprep.subr.bf16.mxu0 %v9614_v6  ;;  %4293 = vmatpush1.bf16.msra.mxu1 %v9609_v59  ;;  %v9644_v6 = vld [vmem:[%s12272_s1 + $0x564] ss:$8 sps:$4 sm:$0xff]   ;;  %v9639_v59 = vld [vmem:[%s12272_s1 + $0x260] ss:$8 sps:$4 sm:$0xff]  }
 0x156   : > { %4294 = vmatprep.subr.bf16.mxu1 %v9617_v35  ;;  %v9647_v35 = vld [vmem:[%s12272_s1 + $0x274] ss:$8 sps:$4 sm:$0xff]  }
 0x157   : > { %8109 = vmatmul.mubr.msk.bf16.gmra.mrb[4].mxu1 %vm10029_vm5, %v10001_v12  ;;  %v9629_v12 = vld [vmem:[%s12272_s1 + $0x244] ss:$8 sps:$4 sm:$0xff]  }
 0x158   : > { %6506 = vmatpush1.bf16.msra.mxu0 %v9612_v22  ;;  %8112 = vmatprep.mubr.msk.bf16.mxu1 %vm9986_vm3, %v10016_v11  ;;  %v9642_v22 = vld [vmem:[%s12272_s1 + $0x560] ss:$8 sps:$4 sm:$0xff]  }
 0x159   : > { %6507 = vmatprep.subr.bf16.mxu0 %v9620_v3  ;;  %4295 = vmatpush1.bf16.msra.mxu1 %v9615_v33  ;;  %v9650_v3 = vld [vmem:[%s12272_s1 + $0x574] ss:$8 sps:$4 sm:$0xff]   ;;  %v9645_v33 = vld [vmem:[%s12272_s1 + $0x270] ss:$8 sps:$4 sm:$0xff]  }
 0x15a   : > { %4296 = vmatprep.subr.bf16.mxu1 %v9623_v37  ;;  %v9653_v37 = vld [vmem:[%s12272_s1 + $0x284] ss:$8 sps:$4 sm:$0xff]  }
 0x15b   : > { %6193 = vmatmul.mubr.bf16.gmra.mrb[4].mxu0 %v10066_v55 }
 0x15c   : > { %6202 = vmatprep.mubr.bf16.mxu0 %v10154_v17  ;;  %6508 = vmatpush1.bf16.msra.mxu0 %v9618_v50  ;;  %v9648_v50 = vld [vmem:[%s12272_s1 + $0x570] ss:$8 sps:$4 sm:$0xff]  }
 0x15d   : > { %6509 = vmatprep.subr.bf16.mxu0 %v9626_v58  ;;  %4297 = vmatpush1.bf16.msra.mxu1 %v9621_v16  ;;  %v9656_v58 = vld [vmem:[%s12272_s1 + $0x584] ss:$8 sps:$4 sm:$0xff]   ;;  %v9651_v16 = vld [vmem:[%s12272_s1 + $0x280] ss:$8 sps:$4 sm:$0xff]  }
 0x15e   : > { %4298 = vmatprep.subr.bf16.mxu1 %v9629_v12  ;;  %v9659_v12 = vld [vmem:[%s12272_s1 + $0x294] ss:$8 sps:$4 sm:$0xff]  }
 0x15f   : > { %8116 = vmatmul.mubr.msk.bf16.gmra.mrb[8].mxu1 %vm10029_vm5, %v10060_v51 }
 0x160   : > { %6510 = vmatpush1.bf16.msra.mxu0 %v9624_v31  ;;  %8119 = vmatprep.mubr.msk.bf16.mxu1 %vm9986_vm3, %v10081_v5  ;;  %v9654_v31 = vld [vmem:[%s12272_s1 + $0x580] ss:$8 sps:$4 sm:$0xff]  }
 0x161   : > { %6511 = vmatprep.subr.bf16.mxu0 %v9632_v49  ;;  %4299 = vmatpush1.bf16.msra.mxu1 %v9627_v21  ;;  %v9662_v49 = vld [vmem:[%s12272_s1 + $0x594] ss:$8 sps:$4 sm:$0xff]   ;;  %v9657_v21 = vld [vmem:[%s12272_s1 + $0x290] ss:$8 sps:$4 sm:$0xff]  }
 0x162   : > { %4300 = vmatprep.subr.bf16.mxu1 %v9635_v46  ;;  %v9665_v46 = vld [vmem:[%s12272_s1 + $0x2a4] ss:$8 sps:$4 sm:$0xff]  }
 0x163   : > { %6203 = vmatmul.mubr.bf16.gmra.mrb[8].mxu0 %v10146_v4 }
 0x164   : > { %6212 = vmatprep.mubr.bf16.mxu0 %v10223_v9  ;;  %6512 = vmatpush1.bf16.msra.mxu0 %v9630_v13  ;;  %v9660_v13 = vld [vmem:[%s12272_s1 + $0x590] ss:$8 sps:$4 sm:$0xff]  }
 0x165   : > { %6513 = vmatprep.subr.bf16.mxu0 %v9638_v56  ;;  %4301 = vmatpush1.bf16.msra.mxu1 %v9633_v7  ;;  %v9668_v56 = vld [vmem:[%s12272_s1 + $0x5a4] ss:$8 sps:$4 sm:$0xff]   ;;  %v9663_v7 = vld [vmem:[%s12272_s1 + $0x2a0] ss:$8 sps:$4 sm:$0xff]  }
 0x166   : > { %4302 = vmatprep.subr.bf16.mxu1 %v9641_v8  ;;  %v9666_v8 = vld [vmem:[%s12272_s1 + $0x5a0] ss:$8 sps:$4 sm:$0xff]  }
 0x167   : > { %8123 = vmatmul.mubr.msk.bf16.gmra.mrb[12].mxu1 %vm10029_vm5, %v10106_v24 }
 0x168   : > { %6514 = vmatpush1.bf16.msra.mxu0 %v9636_v62  ;;  %8126 = vmatprep.mubr.msk.bf16.mxu1 %vm9986_vm3, %v10168_v25  ;;  %v12571_v62 = vld [vmem:[#allocation6_spill] sm:$0xff] }
 0x169   : > { %6515 = vmatprep.subr.bf16.mxu0 %v9644_v6  ;;  %4303 = vmatpush1.bf16.msra.mxu1 %v9639_v59  ;;  %v9669_v6 = vld [vmem:[%s12272_s1 + $0x2b0] ss:$8 sps:$4 sm:$0xff]   ;;  %v9671_v59 = vld [vmem:[%s12272_s1 + $0x2b4] ss:$8 sps:$4 sm:$0xff]  }
 0x16a   : > { %4304 = vmatprep.subr.bf16.mxu1 %v9647_v35  ;;  %v12572_v35 = vld [vmem:[#allocation7_spill] sm:$0xff] }
 0x16b   : > { %6213 = vmatmul.mubr.bf16.gmra.mrb[12].mxu0 %v10196_v41 }
 0x16c   : > { %6222 = vmatprep.mubr.bf16.mxu0 %v10282_v26  ;;  %6516 = vmatpush1.bf16.msra.mxu0 %v9642_v22  ;;  %v12573_v22 = vld [vmem:[#allocation9_spill] sm:$0xff] }
 0x16d   : > { %6517 = vmatprep.subr.bf16.mxu0 %v9650_v3  ;;  %4305 = vmatpush1.bf16.msra.mxu1 %v9645_v33  ;;  %v9672_v3 = vld [vmem:[%s12272_s1 + $0x5b0] ss:$8 sps:$4 sm:$0xff]   ;;  %v9674_v33 = vld [vmem:[%s12272_s1 + $0x5b4] ss:$8 sps:$4 sm:$0xff]  }
 0x16e   : > { %4306 = vmatprep.subr.bf16.mxu1 %v9653_v37  ;;  %v12574_v37 = vld [vmem:[#allocation14_spill] sm:$0xff] }
 0x16f   : > { %8130 = vmatmul.mubr.msk.bf16.gmra.mrb[16].mxu1 %vm10029_vm5, %v10175_v0 }
 0x170   : > { %6518 = vmatpush1.bf16.msra.mxu0 %v9648_v50  ;;  %8133 = vmatprep.mubr.msk.bf16.mxu1 %vm9986_vm3, %v10204_v44  ;;  %v12575_v50 = vld [vmem:[#allocation8_spill] sm:$0xff] }
 0x171   : > { %6519 = vmatprep.subr.bf16.mxu0 %v9656_v58  ;;  %4307 = vmatpush1.bf16.msra.mxu1 %v9651_v16  ;;  %v12576_v58 = vld [vmem:[#allocation10_spill] sm:$0xff]  ;;  %v12577_v16 = vld [vmem:[#allocation12_spill] sm:$0xff] }
 0x172   : > { %4308 = vmatprep.subr.bf16.mxu1 %v9659_v12  ;;  %v12578_v12 = vld [vmem:[#allocation16_spill] sm:$0xff] }
 0x173   : > { %6223 = vmatmul.mubr.bf16.gmra.mrb[16].mxu0 %v10284_v32 }
 0x174   : > { %6232 = vmatprep.mubr.bf16.mxu0 %v10361_v27  ;;  %6520 = vmatpush1.bf16.msra.mxu0 %v9654_v31  ;;  %v12579_v31 = vld [vmem:[#allocation11_spill] sm:$0xff] }
 0x175   : > { %6521 = vmatprep.subr.bf16.mxu0 %v9662_v49  ;;  %4309 = vmatpush1.bf16.msra.mxu1 %v9657_v21  ;;  %v9675_v49 = vld [vmem:[%s12272_s1 + $0x2c0] ss:$8 sps:$4 sm:$0xff]   ;;  %v9677_v21 = vld [vmem:[%s12272_s1 + $0x2c4] ss:$8 sps:$4 sm:$0xff]  }
 0x176   : > { %4310 = vmatprep.subr.bf16.mxu1 %v9665_v46  ;;  %v12580_v46 = vld [vmem:[#allocation13_spill] sm:$0xff] }
 0x177   : > { %8137 = vmatmul.mubr.msk.bf16.gmra.mrb[20].mxu1 %vm10029_vm5, %v10242_v63 }
 0x178   : > { %6522 = vmatpush1.bf16.msra.mxu0 %v9660_v13  ;;  %8140 = vmatprep.mubr.msk.bf16.mxu1 %vm9986_vm3, %v10308_v40  ;;  %v9678_v13 = vld [vmem:[%s12272_s1 + $0x5c0] ss:$8 sps:$4 sm:$0xff]  }
 0x179   : > { %6523 = vmatprep.subr.bf16.mxu0 %v9668_v56  ;;  %4311 = vmatpush1.bf16.msra.mxu1 %v9663_v7  ;;  %v9680_v56 = vld [vmem:[%s12272_s1 + $0x5c4] ss:$8 sps:$4 sm:$0xff]  }
 0x17a   : > { %4312 = vmatprep.subr.bf16.mxu1 %v9671_v59  ;;  %v12581_v7 = vld [vmem:[#allocation21_spill] sm:$0xff]  ;;  %v12584_v59 = vld [vmem:[#allocation23_spill] sm:$0xff] }
 0x17b   : > { %6233 = vmatmul.mubr.bf16.gmra.mrb[20].mxu0 %v10330_v53 }
 0x17c   : > { %6242 = vmatprep.mubr.bf16.mxu0 %v10388_v47  ;;  %6524 = vmatpush1.bf16.msra.mxu0 %v9666_v8  ;;  %v12582_v8 = vld [vmem:[#allocation15_spill] sm:$0xff] }
 0x17d   : > { %4313 = vmatpush1.bf16.msra.mxu1 %v9669_v6  ;;  %6525 = vmatprep.subr.bf16.mxu0 %v9674_v33  ;;  %v12583_v6 = vld [vmem:[#allocation17_spill] sm:$0xff]  ;;  %v12586_v33 = vld [vmem:[#allocation19_spill] sm:$0xff] }
 0x17e   : > { %4314 = vmatprep.subr.bf16.mxu1 %v9677_v21  ;;  %v9683_v21 = vld [vmem:[%s12272_s1 + $0x2d4] ss:$8 sps:$4 sm:$0xff]  }
 0x17f   : > { %8144 = vmatmul.mubr.msk.bf16.gmra.mrb[24].mxu1 %vm10029_vm5, %v12571_v62 }
 0x180   : > { %8147 = vmatprep.mubr.msk.bf16.mxu1 %vm9986_vm3, %v12572_v35  ;;  %6526 = vmatpush1.bf16.msra.mxu0 %v9672_v3  ;;  %v12585_v3 = vld [vmem:[#allocation24_spill] sm:$0xff] }
 0x181   : > { %4315 = vmatpush1.bf16.msra.mxu1 %v9675_v49  ;;  %6527 = vmatprep.subr.bf16.mxu0 %v9680_v56  ;;  %v9681_v49 = vld [vmem:[%s12272_s1 + $0x2d0] ss:$8 sps:$4 sm:$0xff]  }
 0x182   : > { %v12588_v56 = vld [vmem:[#allocation26_spill] sm:$0xff]  ;;  %4316 = vmatprep.subr.bf16.mxu1 %v9683_v21  ;;  %v12592_v21 = vld [vmem:[#allocation28_spill] sm:$0xff] }
 0x183   : > { %6243 = vmatmul.mubr.bf16.gmra.mrb[24].mxu0 %v12573_v22 }
 0x184   : > { %6252 = vmatprep.mubr.bf16.mxu0 %v12574_v37  ;;  %6528 = vmatpush1.bf16.msra.mxu0 %v9678_v13  ;;  %v12587_v13 = vld [vmem:[#allocation20_spill] sm:$0xff] }
 0x185   : > { %4317 = vmatpush1.bf16.msra.mxu1 %v9681_v49  ;;  %6529 = vmatprep.subr.bf16.mxu0 %v9686_v19  ;;  %v9687_v19 = vld [vmem:[%s12272_s1 + $0x2e0] ss:$8 sps:$4 sm:$0xff]  }
 0x186   : > { %v12595_v49 = vld [vmem:[#allocation29_spill] sm:$0xff] }
 0x187   : > { %8151 = vmatmul.mubr.msk.bf16.gmra.mrb[28].mxu1 %vm10029_vm5, %v12575_v50 }
 0x188   : > { %8154 = vmatprep.mubr.msk.bf16.mxu1 %vm9986_vm3, %v12576_v58  ;;  %6530 = vmatpush1.bf16.msra.mxu0 %v9684_v28  ;;  %v9689_v28 = vld [vmem:[%s12272_s1 + $0x2e4] ss:$8 sps:$4 sm:$0xff]  }
 0x189   : > { %4318 = vmatprep.subr.bf16.mxu1 %v9689_v28  ;;  %v12600_v28 = vld [vmem:[#allocation39_spill] sm:$0xff] }
 0x18a   : > { %4319 = vmatpush1.bf16.msra.mxu1 %v9687_v19  ;;  %v12603_v19 = vld [vmem:[#allocation36_spill] sm:$0xff] }
 0x18b   : > { %6253 = vmatmul.mubr.bf16.gmra.mrb[28].mxu0 %v12577_v16 }
 0x18c   : > { %6262 = vmatprep.mubr.bf16.mxu0 %v12578_v12 }
 0x18f   : > { %8158 = vmatmul.mubr.msk.bf16.gmra.mrb[32].mxu1 %vm10029_vm5, %v12579_v31 }
 0x190   : > { %8161 = vmatprep.mubr.msk.bf16.mxu1 %vm9986_vm3, %v12580_v46 }
 0x193   : > { %6263 = vmatmul.mubr.bf16.gmra.mrb[32].mxu0 %v10476_v14  ;;  %v12594_v14 = vld [vmem:[#allocation27_spill] sm:$0xff] }
 0x194   : > { %6272 = vmatprep.mubr.bf16.mxu0 %v12581_v7  ;;  %v12591_v7 = vld [vmem:[#allocation25_spill] sm:$0xff] }
 0x197   : > { %8165 = vmatmul.mubr.msk.bf16.gmra.mrb[36].mxu1 %vm10029_vm5, %v12582_v8 }
 0x198   : > { %8168 = vmatprep.mubr.msk.bf16.mxu1 %vm9986_vm3, %v12583_v6 }
 0x19b   : > { %6273 = vmatmul.mubr.bf16.gmra.mrb[36].mxu0 %v12584_v59  ;;  %v12590_v59 = vld [vmem:[#allocation22_spill] sm:$0xff] }
 0x19c   : > { %6282 = vmatprep.mubr.bf16.mxu0 %v12585_v3  ;;  %v12589_v3 = vld [vmem:[#allocation30_spill] sm:$0xff] }
 0x19f   : > { %8172 = vmatmul.mubr.msk.bf16.gmra.mrb[40].mxu1 %vm10029_vm5, %v12586_v33 }
 0x1a0   : > { %8175 = vmatprep.mubr.msk.bf16.mxu1 %vm9986_vm3, %v12587_v13 }
 0x1a3   : > { %6283 = vmatmul.mubr.bf16.gmra.mrb[40].mxu0 %v12588_v56  ;;  %v12593_v56 = vld [vmem:[#allocation32_spill] sm:$0xff] }
 0x1a4   : > { %6292 = vmatprep.mubr.bf16.mxu0 %v12589_v3  ;;  %v12596_v3 = vld [vmem:[#allocation35_spill] sm:$0xff] }
 0x1a7   : > { %8179 = vmatmul.mubr.msk.bf16.gmra.mrb[44].mxu1 %vm10029_vm5, %v12590_v59  ;;  %v12602_v59 = vld [vmem:[#allocation34_spill] sm:$0xff] }
 0x1a8   : > { %8182 = vmatprep.mubr.msk.bf16.mxu1 %vm9986_vm3, %v12591_v7  ;;  %v12598_v7 = vld [vmem:[#allocation31_spill] sm:$0xff] }
 0x1ab   : > { %6293 = vmatmul.mubr.bf16.gmra.mrb[44].mxu0 %v12592_v21  ;;  %v9692_v21 = vld [vmem:[%s12272_s1 + $0x5e4] ss:$8 sps:$4 sm:$0xff]  }
 0x1ac   : > { %6302 = vmatprep.mubr.bf16.mxu0 %v12593_v56  ;;  %v9690_v56 = vld [vmem:[%s12272_s1 + $0x5e0] ss:$8 sps:$4 sm:$0xff]   ;;  %6531 = vmatprep.subr.bf16.mxu0 %v9692_v21  ;;  %v9695_v21 = vld [vmem:[%s12272_s1 + $0x2f4] ss:$8 sps:$4 sm:$0xff]  }
 0x1ad   : > { %6532 = vmatpush1.bf16.msra.mxu0 %v9690_v56  ;;  %v9693_v56 = vld [vmem:[%s12272_s1 + $0x2f0] ss:$8 sps:$4 sm:$0xff]   ;;  %4320 = vmatprep.subr.bf16.mxu1 %v9695_v21  ;;  %v12608_v21 = vld [vmem:[#allocation45_spill] sm:$0xff] }
 0x1ae   : > { %4321 = vmatpush1.bf16.msra.mxu1 %v9693_v56  ;;  %v12614_v56 = vld [vmem:[#allocation55_spill] sm:$0xff] }
 0x1af   : > { %8186 = vmatmul.mubr.msk.bf16.gmra.mrb[48].mxu1 %vm10029_vm5, %v12594_v14  ;;  %v12597_v14 = vld [vmem:[#allocation37_spill] sm:$0xff] }
 0x1b0   : > { %8189 = vmatprep.mubr.msk.bf16.mxu1 %vm9986_vm3, %v12595_v49  ;;  %v12599_v49 = vld [vmem:[#allocation33_spill] sm:$0xff] }
 0x1b3   : > { %6303 = vmatmul.mubr.bf16.gmra.mrb[48].mxu0 %v12596_v3  ;;  %v12601_v3 = vld [vmem:[#allocation43_spill] sm:$0xff] }
 0x1b4   : > { %6312 = vmatprep.mubr.bf16.mxu0 %v12597_v14  ;;  %v12604_v14 = vld [vmem:[#allocation40_spill] sm:$0xff] }
 0x1b7   : > { %8193 = vmatmul.mubr.msk.bf16.gmra.mrb[52].mxu1 %vm10029_vm5, %v12598_v7  ;;  %v12610_v7 = vld [vmem:[#allocation42_spill] sm:$0xff] }
 0x1b8   : > { %8196 = vmatprep.mubr.msk.bf16.mxu1 %vm9986_vm3, %v12599_v49  ;;  %v12606_v49 = vld [vmem:[#allocation38_spill] sm:$0xff] }
 0x1bb   : > { %6313 = vmatmul.mubr.bf16.gmra.mrb[52].mxu0 %v12600_v28  ;;  %v9698_v28 = vld [vmem:[%s12272_s1 + $0x5f4] ss:$8 sps:$4 sm:$0xff]  }
 0x1bc   : > { %6322 = vmatprep.mubr.bf16.mxu0 %v12601_v3  ;;  %v9696_v3 = vld [vmem:[%s12272_s1 + $0x5f0] ss:$8 sps:$4 sm:$0xff]   ;;  %6533 = vmatprep.subr.bf16.mxu0 %v9698_v28  ;;  %v12613_v28 = vld [vmem:[#allocation49_spill] sm:$0xff] }
 0x1bd   : > { %6534 = vmatpush1.bf16.msra.mxu0 %v9696_v3  ;;  %v12612_v3 = vld [vmem:[#allocation46_spill] sm:$0xff] }
 0x1bf   : > { %8200 = vmatmul.mubr.msk.bf16.gmra.mrb[56].mxu1 %vm10029_vm5, %v12602_v59  ;;  %v12605_v59 = vld [vmem:[#allocation47_spill] sm:$0xff] }
 0x1c0   : > { %8203 = vmatprep.mubr.msk.bf16.mxu1 %vm9986_vm3, %v12603_v19  ;;  %v12607_v19 = vld [vmem:[#allocation41_spill] sm:$0xff] }
 0x1c3   : > { %6323 = vmatmul.mubr.bf16.gmra.mrb[56].mxu0 %v12604_v14  ;;  %v12609_v14 = vld [vmem:[#allocation48_spill] sm:$0xff] }
 0x1c4   : > { %6332 = vmatprep.mubr.bf16.mxu0 %v12605_v59  ;;  %v12611_v59 = vld [vmem:[#allocation44_spill] sm:$0xff] }
 0x1c7   : > { %8207 = vmatmul.mubr.msk.bf16.gmra.mrb[60].mxu1 %vm10029_vm5, %v12606_v49 }
 0x1c8   : > { %8210 = vmatprep.mubr.msk.bf16.mxu1 %vm9986_vm3, %v12607_v19 }
 0x1cb   : > { %6333 = vmatmul.mubr.bf16.gmra.mrb[60].mxu0 %v12608_v21  ;;  %v12616_v21 = vld [vmem:[#allocation51_spill] sm:$0xff] }
 0x1cc   : > { %6342 = vmatprep.mubr.bf16.mxu0 %v12609_v14  ;;  %v12615_v14 = vld [vmem:[#allocation56_spill] sm:$0xff] }
 0x1cf   : > { %8214 = vmatmul.mubr.msk.bf16.gmra.mrb[64].mxu1 %vm10029_vm5, %v12610_v7 }
 0x1d0   : > { %8217 = vmatprep.mubr.msk.bf16.mxu1 %vm9986_vm3, %v12611_v59  ;;  %v12617_v59 = vld [vmem:[#allocation52_spill] sm:$0xff] }
 0x1d3   : > { %6343 = vmatmul.mubr.bf16.gmra.mrb[64].mxu0 %v10824_v43  ;;  %v12619_v43 = vld [vmem:[#allocation62_spill] sm:$0xff] }
 0x1d4   : > { %6352 = vmatprep.mubr.bf16.mxu0 %v10868_v54  ;;  %v12618_v54 = vld [vmem:[#allocation59_spill] sm:$0xff] }
 0x1d7   : > { %8221 = vmatmul.mubr.msk.bf16.gmra.mrb[68].mxu1 %vm10029_vm5, %v12612_v3  ;;  %v12620_v3 = vld [vmem:[#allocation54_spill] sm:$0xff] }
 0x1d8   : > { %8224 = vmatprep.mubr.msk.bf16.mxu1 %vm9986_vm3, %v12613_v28  ;;  %v12621_v28 = vld [vmem:[#allocation57_spill] sm:$0xff] }
 0x1db   : > { %6353 = vmatmul.mubr.bf16.gmra.mrb[68].mxu0 %v12614_v56  ;;  %v12623_v56 = vld [vmem:[#allocation64_spill] sm:$0xff] }
 0x1dc   : > { %6362 = vmatprep.mubr.bf16.mxu0 %v12615_v14  ;;  %v12622_v14 = vld [vmem:[#allocation60_spill] sm:$0xff] }
 0x1df   : > { %8228 = vmatmul.mubr.msk.bf16.gmra.mrb[72].mxu1 %vm10029_vm5, %v12616_v21  ;;  %v12624_v21 = vld [vmem:[#allocation58_spill] sm:$0xff] }
 0x1e0   : > { %8231 = vmatprep.mubr.msk.bf16.mxu1 %vm9986_vm3, %v12617_v59  ;;  %v12625_v59 = vld [vmem:[#allocation61_spill] sm:$0xff] }
 0x1e3   : > { %6363 = vmatmul.mubr.bf16.gmra.mrb[72].mxu0 %v12618_v54  ;;  %v12627_v54 = vld [vmem:[#allocation69_spill] sm:$0xff] }
 0x1e4   : > { %6372 = vmatprep.mubr.bf16.mxu0 %v12619_v43  ;;  %v12626_v43 = vld [vmem:[#allocation67_spill] sm:$0xff] }
 0x1e7   : > { %8235 = vmatmul.mubr.msk.bf16.gmra.mrb[76].mxu1 %vm10029_vm5, %v12620_v3  ;;  %v12628_v3 = vld [vmem:[#allocation63_spill] sm:$0xff] }
 0x1e8   : > { %8238 = vmatprep.mubr.msk.bf16.mxu1 %vm9986_vm3, %v12621_v28  ;;  %v12629_v28 = vld [vmem:[#allocation65_spill] sm:$0xff] }
 0x1eb   : > { %6373 = vmatmul.mubr.bf16.gmra.mrb[76].mxu0 %v12622_v14  ;;  %v12631_v14 = vld [vmem:[#allocation72_spill] sm:$0xff] }
 0x1ec   : > { %6382 = vmatprep.mubr.bf16.mxu0 %v12623_v56  ;;  %v12630_v56 = vld [vmem:[#allocation71_spill] sm:$0xff] }
 0x1ef   : > { %8242 = vmatmul.mubr.msk.bf16.gmra.mrb[80].mxu1 %vm10029_vm5, %v12624_v21  ;;  %v12632_v21 = vld [vmem:[#allocation66_spill] sm:$0xff] }
 0x1f0   : > { %8245 = vmatprep.mubr.msk.bf16.mxu1 %vm9986_vm3, %v12625_v59  ;;  %v12633_v59 = vld [vmem:[#allocation68_spill] sm:$0xff] }
 0x1f3   : > { %6383 = vmatmul.mubr.bf16.gmra.mrb[80].mxu0 %v12626_v43  ;;  %v12635_v43 = vld [vmem:[#allocation77_spill] sm:$0xff] }
 0x1f4   : > { %6392 = vmatprep.mubr.bf16.mxu0 %v12627_v54  ;;  %v12634_v54 = vld [vmem:[#allocation75_spill] sm:$0xff] }
 0x1f7   : > { %8249 = vmatmul.mubr.msk.bf16.gmra.mrb[84].mxu1 %vm10029_vm5, %v12628_v3  ;;  %v12636_v3 = vld [vmem:[#allocation70_spill] sm:$0xff] }
 0x1f8   : > { %8252 = vmatprep.mubr.msk.bf16.mxu1 %vm9986_vm3, %v12629_v28  ;;  %v12637_v28 = vld [vmem:[#allocation73_spill] sm:$0xff] }
 0x1fb   : > { %6393 = vmatmul.mubr.bf16.gmra.mrb[84].mxu0 %v12630_v56  ;;  %v12639_v56 = vld [vmem:[#allocation80_spill] sm:$0xff] }
 0x1fc   : > { %6402 = vmatprep.mubr.bf16.mxu0 %v12631_v14  ;;  %v12638_v14 = vld [vmem:[#allocation79_spill] sm:$0xff] }
 0x1ff   : > { %8256 = vmatmul.mubr.msk.bf16.gmra.mrb[88].mxu1 %vm10029_vm5, %v12632_v21  ;;  %v12640_v21 = vld [vmem:[#allocation74_spill] sm:$0xff] }
 0x200   : > { %8259 = vmatprep.mubr.msk.bf16.mxu1 %vm9986_vm3, %v12633_v59  ;;  %v12641_v59 = vld [vmem:[#allocation76_spill] sm:$0xff] }
 0x203   : > { %6403 = vmatmul.mubr.bf16.gmra.mrb[88].mxu0 %v12634_v54  ;;  %v12643_v54 = vld [vmem:[#allocation85_spill] sm:$0xff] }
 0x204   : > { %6412 = vmatprep.mubr.bf16.mxu0 %v12635_v43  ;;  %v12642_v43 = vld [vmem:[#allocation83_spill] sm:$0xff] }
 0x207   : > { %8263 = vmatmul.mubr.msk.bf16.gmra.mrb[92].mxu1 %vm10029_vm5, %v12636_v3  ;;  %v12644_v3 = vld [vmem:[#allocation78_spill] sm:$0xff] }
 0x208   : > { %8266 = vmatprep.mubr.msk.bf16.mxu1 %vm9986_vm3, %v12637_v28  ;;  %v12645_v28 = vld [vmem:[#allocation81_spill] sm:$0xff] }
 0x20b   : > { %6413 = vmatmul.mubr.bf16.gmra.mrb[92].mxu0 %v12638_v14  ;;  %v12647_v14 = vld [vmem:[#allocation82_spill] sm:$0xff] }
 0x20c   : > { %6422 = vmatprep.mubr.bf16.mxu0 %v12639_v56  ;;  %v12646_v56 = vld [vmem:[#allocation88_spill] sm:$0xff] }
 0x20f   : > { %8270 = vmatmul.mubr.msk.bf16.gmra.mrb[96].mxu1 %vm10029_vm5, %v12640_v21 }
 0x210   : > { %8273 = vmatprep.mubr.msk.bf16.mxu1 %vm9986_vm3, %v12641_v59  ;;  %v12648_v59 = vld [vmem:[#allocation84_spill] sm:$0xff] }
 0x213   : > { %6423 = vmatmul.mubr.bf16.gmra.mrb[96].mxu0 %v12642_v43  ;;  %v12650_v43 = vld [vmem:[#allocation93_spill] sm:$0xff] }
 0x214   : > { %6432 = vmatprep.mubr.bf16.mxu0 %v12643_v54  ;;  %v12649_v54 = vld [vmem:[#allocation91_spill] sm:$0xff] }
 0x217   : > { %8277 = vmatmul.mubr.msk.bf16.gmra.mrb[100].mxu1 %vm10029_vm5, %v12644_v3  ;;  %v12651_v3 = vld [vmem:[#allocation86_spill] sm:$0xff] }
 0x218   : > { %8280 = vmatprep.mubr.msk.bf16.mxu1 %vm9986_vm3, %v12645_v28  ;;  %v12652_v28 = vld [vmem:[#allocation89_spill] sm:$0xff] }
 0x21b   : > { %6433 = vmatmul.mubr.bf16.gmra.mrb[100].mxu0 %v11175_v42  ;;  %v12654_v42 = vld [vmem:[#allocation92_spill] sm:$0xff] }
 0x21c   : > { %6442 = vmatprep.mubr.bf16.mxu0 %v12646_v56  ;;  %v12653_v56 = vld [vmem:[#allocation90_spill] sm:$0xff] }
 0x21f   : > { %8284 = vmatmul.mubr.msk.bf16.gmra.mrb[104].mxu1 %vm10029_vm5, %v12647_v14 }
 0x220   : > { %8287 = vmatprep.mubr.msk.bf16.mxu1 %vm9986_vm3, %v12648_v59 }
 0x223   : > { %6443 = vmatmul.mubr.bf16.gmra.mrb[104].mxu0 %v12649_v54  ;;  %v12655_v54 = vld [vmem:[#allocation94_spill] sm:$0xff] }
 0x224   : > { %6452 = vmatprep.mubr.bf16.mxu0 %v12650_v43  ;;  %v11721_v43 = vpack.c.bf16 %v11277_v34, %v11275_v60  ;;  %v12656_v60 = vld [vmem:[#allocation5_spill] sm:$0xff]  ;;  %v12681_v34 = vld [vmem:[#allocation46_spill] sm:$0xff] }
 0x227   : > { %8291 = vmatmul.mubr.msk.bf16.gmra.mrb[108].mxu1 %vm10029_vm5, %v12651_v3 }
 0x228   : > { %8294 = vmatprep.mubr.msk.bf16.mxu1 %vm9986_vm3, %v12652_v28 }
 0x22b   : > { %6453 = vmatmul.mubr.bf16.gmra.mrb[108].mxu0 %v11206_v52 }
 0x22c   : > { %6462 = vmatprep.mubr.bf16.mxu0 %v11233_v10 }
 0x22f   : > { %8298 = vmatmul.mubr.msk.bf16.gmra.mrb[112].mxu1 %vm10029_vm5, %v12653_v56 }
 0x230   : > { %8301 = vmatprep.mubr.msk.bf16.mxu1 %vm9986_vm3, %v12654_v42 }
 0x233   : > { %6463 = vmatmul.mubr.bf16.gmra.mrb[112].mxu0 %v11259_v23  ;;  %v11733_v23 = vpack.c.bf16 %v11271_v48, %v11267_v61  ;;  %v12657_v61 = vld [vmem:[#allocation4_spill] sm:$0xff]  ;;  %v12680_v48 = vld [vmem:[#allocation47_spill] sm:$0xff] }
 0x234   : > { %6472 = vmatprep.mubr.bf16.mxu0 %v11262_v45 }
 0x237   : > { %8305 = vmatmul.mubr.msk.bf16.gmra.mrb[116].mxu1 %vm10029_vm5, %v12655_v54 }
 0x238   : > { %8308 = vmatprep.mubr.msk.bf16.mxu1 %vm9986_vm3, %v11239_v18 }
 0x23b   : > { %6473 = vmatmul.mubr.bf16.gmra.mrb[116].mxu0 %v11289_v20 }
 0x23c   : > { %6482 = vmatprep.mubr.bf16.mxu0 %v11721_v43 }
 0x23f   : > { %8312 = vmatmul.mubr.msk.bf16.gmra.mrb[120].mxu1 %vm10029_vm5, %v11241_v36 }
 0x240   : > { %8315 = vmatprep.mubr.msk.bf16.mxu1 %vm9986_vm3, %v11253_v39 }
 0x243   : > { %6483 = vmatmul.mubr.bf16.gmra.mrb[120].mxu0 %v11733_v23 }
 0x244   : > { %6492 = vmatprep.mubr.bf16.mxu0 %v12570_v2 }
 0x247   : > { %8319 = vmatmul.mubr.msk.bf16.gmra.mrb[124].mxu1 %vm10029_vm5, %v11269_v57 }
 0x248   : > { %4322 = vmatprep.mubr.bf16.mxu1 %v12656_v60  ;;  %v12699_v60 = vld [vmem:[#allocation60_spill] sm:$0xff] }
 0x24b   : > { %6493 = vmatmul.mubr.bf16.gmra.mrb[124].mxu0 %v12570_v2 }
 0x24c   : > { %8546 = vmatprep.mubr.msk.bf16.mxu0 %vm9986_vm3, %v10016_v11  ;;  %v12658_v11 = vld [vmem:[#allocation18_spill] sm:$0xff] }
 0x24f   : > { %4323 = vmatmul.mubr.bf16.vlgmr.msra.gmra.mrb[0].mxu1 %v12657_v61  ;;  %v12700_v61 = vld [vmem:[#allocation64_spill] sm:$0xff] }
 0x250   : > { %4332 = vmatprep.mubr.bf16.mxu1 %v10038_v38  ;;  %v12660_v38 = vld [vmem:[#allocation22_spill] sm:$0xff] }
 0x253   : > { %8550 = vmatmul.mubr.msk.bf16.vlgmr.msra.gmra.mrb[0].mxu0 %vm10029_vm5, %v10060_v51  ;;  %v12661_v51 = vld [vmem:[#allocation25_spill] sm:$0xff] }
 0x254   : > { %8553 = vmatprep.mubr.msk.bf16.mxu0 %vm9986_vm3, %v10081_v5  ;;  %v12663_v5 = vld [vmem:[#allocation24_spill] sm:$0xff] }
 0x257   : > { %4333 = vmatmul.mubr.bf16.gmra.mrb[4].mxu1 %v10024_v29  ;;  %v12659_v29 = vld [vmem:[#allocation21_spill] sm:$0xff] }
 0x258   : > { %4342 = vmatprep.mubr.bf16.mxu1 %v10089_v15  ;;  %v12664_v15 = vld [vmem:[#allocation27_spill] sm:$0xff] }
 0x25b   : > { %8557 = vmatmul.mubr.msk.bf16.gmra.mrb[4].mxu0 %vm10029_vm5, %v10106_v24  ;;  %v12665_v24 = vld [vmem:[#allocation29_spill] sm:$0xff] }
 0x25c   : > { %8560 = vmatprep.mubr.msk.bf16.mxu0 %vm9986_vm3, %v10168_v25  ;;  %v12668_v25 = vld [vmem:[#allocation31_spill] sm:$0xff] }
 0x25f   : > { %4343 = vmatmul.mubr.bf16.gmra.mrb[8].mxu1 %v10066_v55  ;;  %v12662_v55 = vld [vmem:[#allocation23_spill] sm:$0xff] }
 0x260   : > { %4352 = vmatprep.mubr.bf16.mxu1 %v10154_v17  ;;  %v12667_v17 = vld [vmem:[#allocation30_spill] sm:$0xff] }
 0x263   : > { %8564 = vmatmul.mubr.msk.bf16.gmra.mrb[8].mxu0 %vm10029_vm5, %v10175_v0  ;;  %v12669_v0 = vld [vmem:[#allocation33_spill] sm:$0xff] }
 0x264   : > { %8567 = vmatprep.mubr.msk.bf16.mxu0 %vm9986_vm3, %v10204_v44  ;;  %v12671_v44 = vld [vmem:[#allocation32_spill] sm:$0xff] }
 0x267   : > { %4353 = vmatmul.mubr.bf16.gmra.mrb[12].mxu1 %v10146_v4  ;;  %v12666_v4 = vld [vmem:[#allocation26_spill] sm:$0xff] }
 0x268   : > { %4362 = vmatprep.mubr.bf16.mxu1 %v10223_v9  ;;  %v12672_v9 = vld [vmem:[#allocation34_spill] sm:$0xff] }
 0x26b   : > { %8571 = vmatmul.mubr.msk.bf16.gmra.mrb[12].mxu0 %vm10029_vm5, %v10242_v63  ;;  %v12673_v63 = vld [vmem:[#allocation36_spill] sm:$0xff] }
 0x26c   : > { %8574 = vmatprep.mubr.msk.bf16.mxu0 %vm9986_vm3, %v10308_v40  ;;  %v12676_v40 = vld [vmem:[#allocation39_spill] sm:$0xff] }
 0x26f   : > { %4363 = vmatmul.mubr.bf16.gmra.mrb[16].mxu1 %v10196_v41  ;;  %v12670_v41 = vld [vmem:[#allocation28_spill] sm:$0xff] }
 0x270   : > { %4372 = vmatprep.mubr.bf16.mxu1 %v10282_v26  ;;  %v12674_v26 = vld [vmem:[#allocation35_spill] sm:$0xff] }
 0x273   : > { %8578 = vmatmul.mubr.msk.bf16.gmra.mrb[16].mxu0 %vm10029_vm5, %v12571_v62  ;;  %v12682_v62 = vld [vmem:[#allocation49_spill] sm:$0xff] }
 0x274   : > { %8581 = vmatprep.mubr.msk.bf16.mxu0 %vm9986_vm3, %v12572_v35  ;;  %v12683_v35 = vld [vmem:[#allocation45_spill] sm:$0xff] }
 0x277   : > { %4373 = vmatmul.mubr.bf16.gmra.mrb[20].mxu1 %v10284_v32  ;;  %v12675_v32 = vld [vmem:[#allocation37_spill] sm:$0xff] }
 0x278   : > { %4382 = vmatprep.mubr.bf16.mxu1 %v10361_v27  ;;  %v12678_v27 = vld [vmem:[#allocation44_spill] sm:$0xff] }
 0x27b   : > { %8585 = vmatmul.mubr.msk.bf16.gmra.mrb[20].mxu0 %vm10029_vm5, %v12575_v50  ;;  %v12686_v50 = vld [vmem:[#allocation52_spill] sm:$0xff] }
 0x27c   : > { %8588 = vmatprep.mubr.msk.bf16.mxu0 %vm9986_vm3, %v12576_v58  ;;  %v12687_v58 = vld [vmem:[#allocation50_spill] sm:$0xff] }
 0x27f   : > { %4383 = vmatmul.mubr.bf16.gmra.mrb[24].mxu1 %v10330_v53  ;;  %v12677_v53 = vld [vmem:[#allocation43_spill] sm:$0xff] }
 0x280   : > { %4392 = vmatprep.mubr.bf16.mxu1 %v10388_v47  ;;  %v12679_v47 = vld [vmem:[#allocation40_spill] sm:$0xff] }
 0x283   : > { %8592 = vmatmul.mubr.msk.bf16.gmra.mrb[24].mxu0 %vm10029_vm5, %v12579_v31  ;;  %v12690_v31 = vld [vmem:[#allocation57_spill] sm:$0xff] }
 0x284   : > { %8595 = vmatprep.mubr.msk.bf16.mxu0 %vm9986_vm3, %v12580_v46  ;;  %v12691_v46 = vld [vmem:[#allocation55_spill] sm:$0xff] }
 0x287   : > { %4393 = vmatmul.mubr.bf16.gmra.mrb[28].mxu1 %v12573_v22  ;;  %v12684_v22 = vld [vmem:[#allocation48_spill] sm:$0xff] }
 0x288   : > { %4402 = vmatprep.mubr.bf16.mxu1 %v12574_v37  ;;  %v12685_v37 = vld [vmem:[#allocation51_spill] sm:$0xff] }
 0x28b   : > { %8599 = vmatmul.mubr.msk.bf16.gmra.mrb[28].mxu0 %vm10029_vm5, %v12582_v8  ;;  %v12693_v8 = vld [vmem:[#allocation58_spill] sm:$0xff] }
 0x28c   : > { %8602 = vmatprep.mubr.msk.bf16.mxu0 %vm9986_vm3, %v12583_v6  ;;  %v12694_v6 = vld [vmem:[#allocation61_spill] sm:$0xff] }
 0x28f   : > { %4403 = vmatmul.mubr.bf16.gmra.mrb[32].mxu1 %v12577_v16  ;;  %v12688_v16 = vld [vmem:[#allocation53_spill] sm:$0xff] }
 0x290   : > { %4412 = vmatprep.mubr.bf16.mxu1 %v12578_v12  ;;  %v12689_v12 = vld [vmem:[#allocation54_spill] sm:$0xff] }
 0x293   : > { %8606 = vmatmul.mubr.msk.bf16.gmra.mrb[32].mxu0 %vm10029_vm5, %v12586_v33  ;;  %v12695_v33 = vld [vmem:[#allocation59_spill] sm:$0xff] }
 0x294   : > { %8609 = vmatprep.mubr.msk.bf16.mxu0 %vm9986_vm3, %v12587_v13  ;;  %v12696_v13 = vld [vmem:[#allocation62_spill] sm:$0xff] }
 0x297   : > { %4413 = vmatmul.mubr.bf16.gmra.mrb[36].mxu1 %v12658_v11  ;;  %v12701_v11 = vld [vmem:[#allocation66_spill] sm:$0xff] }
 0x298   : > { %4422 = vmatprep.mubr.bf16.mxu1 %v12659_v29  ;;  %v12702_v29 = vld [vmem:[#allocation68_spill] sm:$0xff] }
 0x29b   : > { %8613 = vmatmul.mubr.msk.bf16.gmra.mrb[36].mxu0 %vm10029_vm5, %v12660_v38  ;;  %v12703_v38 = vld [vmem:[#allocation67_spill] sm:$0xff] }
 0x29c   : > { %8616 = vmatprep.mubr.msk.bf16.mxu0 %vm9986_vm3, %v12661_v51  ;;  %v12704_v51 = vld [vmem:[#allocation69_spill] sm:$0xff] }
 0x29f   : > { %4423 = vmatmul.mubr.bf16.gmra.mrb[40].mxu1 %v12662_v55  ;;  %v12705_v55 = vld [vmem:[#allocation70_spill] sm:$0xff] }
 0x2a0   : > { %4432 = vmatprep.mubr.bf16.mxu1 %v12663_v5  ;;  %v12706_v5 = vld [vmem:[#allocation73_spill] sm:$0xff] }
 0x2a3   : > { %8620 = vmatmul.mubr.msk.bf16.gmra.mrb[40].mxu0 %vm10029_vm5, %v12664_v15  ;;  %v12707_v15 = vld [vmem:[#allocation71_spill] sm:$0xff] }
 0x2a4   : > { %8623 = vmatprep.mubr.msk.bf16.mxu0 %vm9986_vm3, %v12665_v24  ;;  %v12708_v24 = vld [vmem:[#allocation72_spill] sm:$0xff] }
 0x2a7   : > { %4433 = vmatmul.mubr.bf16.gmra.mrb[44].mxu1 %v12666_v4  ;;  %v12709_v4 = vld [vmem:[#allocation76_spill] sm:$0xff] }
 0x2a8   : > { %4442 = vmatprep.mubr.bf16.mxu1 %v12667_v17  ;;  %v12710_v17 = vld [vmem:[#allocation75_spill] sm:$0xff] }
 0x2ab   : > { %8627 = vmatmul.mubr.msk.bf16.gmra.mrb[44].mxu0 %vm10029_vm5, %v12668_v25  ;;  %v12711_v25 = vld [vmem:[#allocation77_spill] sm:$0xff] }
 0x2ac   : > { %8630 = vmatprep.mubr.msk.bf16.mxu0 %vm9986_vm3, %v12669_v0  ;;  %v12712_v0 = vld [vmem:[#allocation78_spill] sm:$0xff] }
 0x2af   : > { %4443 = vmatmul.mubr.bf16.gmra.mrb[48].mxu1 %v12670_v41  ;;  %v12713_v41 = vld [vmem:[#allocation81_spill] sm:$0xff] }
 0x2b0   : > { %4452 = vmatprep.mubr.bf16.mxu1 %v12671_v44  ;;  %v12714_v44 = vld [vmem:[#allocation79_spill] sm:$0xff] }
 0x2b3   : > { %8634 = vmatmul.mubr.msk.bf16.gmra.mrb[48].mxu0 %vm10029_vm5, %v12672_v9  ;;  %v12715_v9 = vld [vmem:[#allocation80_spill] sm:$0xff] }
 0x2b4   : > { %8637 = vmatprep.mubr.msk.bf16.mxu0 %vm9986_vm3, %v12673_v63  ;;  %v7370_v63 = vlaneseq }
 0x2b7   : > { %4453 = vmatmul.mubr.bf16.gmra.mrb[52].mxu1 %v12674_v26  ;;  %v12717_v26 = vld [vmem:[#allocation85_spill] sm:$0xff] }
 0x2b8   : > { %4462 = vmatprep.mubr.bf16.mxu1 %v12675_v32  ;;  %v7371_v32 = vshrl.u32 %v7370_v63, 7 }
 0x2bb   : > { %8641 = vmatmul.mubr.msk.bf16.gmra.mrb[52].mxu0 %vm10029_vm5, %v12606_v49  ;;  %v12697_v49 = vld [vmem:[#allocation63_spill] sm:$0xff] }
 0x2bc   : > { %8644 = vmatprep.mubr.msk.bf16.mxu0 %vm9986_vm3, %v12607_v19  ;;  %v12698_v19 = vld [vmem:[#allocation65_spill] sm:$0xff] }
 0x2bf   : > { %4463 = vmatmul.mubr.bf16.gmra.mrb[56].mxu1 %v12676_v40  ;;  %v7372_v40 = vsub.s32 0, %v7371_v32 }
 0x2c0   : > { %4472 = vmatprep.mubr.bf16.mxu1 %v12677_v53  ;;  %v7376_v53 = vsub.s32 1, %v7371_v32 }
 0x2c3   : > { %8648 = vmatmul.mubr.msk.bf16.gmra.mrb[56].mxu0 %vm10029_vm5, %v12610_v7  ;;  %v12692_v7 = vld [vmem:[#allocation56_spill] sm:$0xff] }
 0x2c4   : > { %8651 = vmatprep.mubr.msk.bf16.mxu0 %vm9986_vm3, %v12678_v27  ;;  %v12719_v27 = vld [vmem:[#allocation88_spill] sm:$0xff] }
 0x2c7   : > { %4473 = vmatmul.mubr.bf16.gmra.mrb[60].mxu1 %v12679_v47 }
 0x2c8   : > { %4482 = vmatprep.mubr.bf16.mxu1 %v12680_v48 }
 0x2cb   : > { %8655 = vmatmul.mubr.msk.bf16.gmra.mrb[60].mxu0 %vm10029_vm5, %v12681_v34 }
 0x2cc   : > { %8658 = vmatprep.mubr.msk.bf16.mxu0 %vm9986_vm3, %v12682_v62 }
 0x2cf   : > { %4483 = vmatmul.mubr.bf16.gmra.mrb[64].mxu1 %v12683_v35 }
 0x2d0   : > { %4492 = vmatprep.mubr.bf16.mxu1 %v12684_v22 }
 0x2d3   : > { %8662 = vmatmul.mubr.msk.bf16.gmra.mrb[64].mxu0 %vm10029_vm5, %v12685_v37 }
 0x2d4   : > { %8665 = vmatprep.mubr.msk.bf16.mxu0 %vm9986_vm3, %v12686_v50 }
 0x2d7   : > { %4493 = vmatmul.mubr.bf16.gmra.mrb[68].mxu1 %v12687_v58 }
 0x2d8   : > { %4502 = vmatprep.mubr.bf16.mxu1 %v12688_v16 }
 0x2db   : > { %8669 = vmatmul.mubr.msk.bf16.gmra.mrb[68].mxu0 %vm10029_vm5, %v12689_v12  ;;  %v12720_v12 = vld [vmem:[#allocation91_spill] sm:$0xff] }
 0x2dc   : > { %8672 = vmatprep.mubr.msk.bf16.mxu0 %vm9986_vm3, %v12690_v31 }
 0x2df   : > { %4503 = vmatmul.mubr.bf16.gmra.mrb[72].mxu1 %v12691_v46 }
 0x2e0   : > { %4512 = vmatprep.mubr.bf16.mxu1 %v12692_v7  ;;  %v12721_v7 = vld [vmem:[#allocation93_spill] sm:$0xff] }
 0x2e3   : > { %8676 = vmatmul.mubr.msk.bf16.gmra.mrb[72].mxu0 %vm10029_vm5, %v12693_v8 }
 0x2e4   : > { %8679 = vmatprep.mubr.msk.bf16.mxu0 %vm9986_vm3, %v12694_v6 }
 0x2e7   : > { %4513 = vmatmul.mubr.bf16.gmra.mrb[76].mxu1 %v12695_v33 }
 0x2e8   : > { %4522 = vmatprep.mubr.bf16.mxu1 %v12696_v13 }
 0x2eb   : > { %8683 = vmatmul.mubr.msk.bf16.gmra.mrb[76].mxu0 %vm10029_vm5, %v12697_v49 }
 0x2ec   : > { %8686 = vmatprep.mubr.msk.bf16.mxu0 %vm9986_vm3, %v12698_v19 }
 0x2ef   : > { %4523 = vmatmul.mubr.bf16.gmra.mrb[80].mxu1 %v12699_v60 }
 0x2f0   : > { %4532 = vmatprep.mubr.bf16.mxu1 %v12700_v61 }
 0x2f3   : > { %8690 = vmatmul.mubr.msk.bf16.gmra.mrb[80].mxu0 %vm10029_vm5, %v12701_v11 }
 0x2f4   : > { %8693 = vmatprep.mubr.msk.bf16.mxu0 %vm9986_vm3, %v12702_v29 }
 0x2f7   : > { %4533 = vmatmul.mubr.bf16.gmra.mrb[84].mxu1 %v12703_v38 }
 0x2f8   : > { %4542 = vmatprep.mubr.bf16.mxu1 %v12704_v51 }
 0x2fb   : > { %8697 = vmatmul.mubr.msk.bf16.gmra.mrb[84].mxu0 %vm10029_vm5, %v12705_v55 }
 0x2fc   : > { %8700 = vmatprep.mubr.msk.bf16.mxu0 %vm9986_vm3, %v12706_v5 }
 0x2ff   : > { %4543 = vmatmul.mubr.bf16.gmra.mrb[88].mxu1 %v12707_v15 }
 0x300   : > { %4552 = vmatprep.mubr.bf16.mxu1 %v12708_v24 }
 0x303   : > { %8704 = vmatmul.mubr.msk.bf16.gmra.mrb[88].mxu0 %vm10029_vm5, %v12640_v21  ;;  %v12716_v21 = vld [vmem:[#allocation83_spill] sm:$0xff] }
 0x304   : > { %8707 = vmatprep.mubr.msk.bf16.mxu0 %vm9986_vm3, %v12709_v4 }
 0x307   : > { %4553 = vmatmul.mubr.bf16.gmra.mrb[92].mxu1 %v12710_v17 }
 0x308   : > { %4562 = vmatprep.mubr.bf16.mxu1 %v12711_v25 }
 0x30b   : > { %8711 = vmatmul.mubr.msk.bf16.gmra.mrb[92].mxu0 %vm10029_vm5, %v12712_v0 }
 0x30c   : > { %8714 = vmatprep.mubr.msk.bf16.mxu0 %vm9986_vm3, %v12713_v41 }
 0x30f   : > { %4563 = vmatmul.mubr.bf16.gmra.mrb[96].mxu1 %v12714_v44 }
 0x310   : > { %4572 = vmatprep.mubr.bf16.mxu1 %v12715_v9 }
 0x313   : > { %8718 = vmatmul.mubr.msk.bf16.gmra.mrb[96].mxu0 %vm10029_vm5, %v12647_v14  ;;  %v12718_v14 = vld [vmem:[#allocation87_spill] sm:$0xff] }
 0x314   : > { %8721 = vmatprep.mubr.msk.bf16.mxu0 %vm9986_vm3, %v12648_v59  ;;  %v7368_v59 = vld [vmem:[%s12273_s2] sm:$0x3] }
 0x315   : > { %v11973_v34 = vrot.slane %v7368_v59, %v7376_v53  ;;  %v12723_v53 = vld [vmem:[#allocation96_spill] sm:$0xff] }
 0x317   : > { %4573 = vmatmul.mubr.bf16.gmra.mrb[100].mxu1 %v12716_v21 }
 0x318   : > { %4582 = vmatprep.mubr.bf16.mxu1 %v12717_v26  ;;  %v12722_v26 = vld [vmem:[#allocation95_spill] sm:$0xff] }
 0x31b   : > { %8725 = vmatmul.mubr.msk.bf16.gmra.mrb[100].mxu0 %vm10029_vm5, %v12651_v3 }
 0x31c   : > { %8728 = vmatprep.mubr.msk.bf16.mxu0 %vm9986_vm3, %v12652_v28  ;;  %v11971_v28 = vrot.slane %v7368_v59, %v7372_v40 }
 0x31f   : > { %4583 = vmatmul.mubr.bf16.gmra.mrb[104].mxu1 %v12718_v14 }
 0x320   : > { %4592 = vmatprep.mubr.bf16.mxu1 %v12719_v27 }
 0x322   : > { %v4324_v3 = vpop.f32.mrb[0].mxu1 }
 0x323   : > { %8732 = vmatmul.mubr.msk.bf16.gmra.mrb[104].mxu0 %vm10029_vm5, %v12653_v56  ;;  %v4326_v47 = vpop.f32.mrb[1].mxu1 }
 0x324   : > { %8735 = vmatprep.mubr.msk.bf16.mxu0 %vm9986_vm3, %v12654_v42  ;;  %v4328_v62 = vpop.f32.mrb[2].mxu1 }
 0x325   : > { %v4330_v37 = vpop.f32.mrb[3].mxu1 }
 0x326   : > { %v6537_v48 = vpop.f32.mrb[0].mxu0 }
 0x327   : > { %v8761_v35 = vadd.f32 %v6537_v48, %v4324_v3  ;;  %v6539_v22 = vpop.f32.mrb[1].mxu0  ;;  %4593 = vmatmul.mubr.bf16.gmra.mrb[108].mxu1 %v12720_v12 }
 0x328   : > { %v8762_v56 = vadd.f32 %v6539_v22, %v4326_v47  ;;  %v6541_v42 = vpop.f32.mrb[2].mxu0  ;;  %4602 = vmatprep.mubr.bf16.mxu1 %v12721_v7 }
 0x329   : > { %v7380_v50 = vadd.f32 %v8761_v35, %v11971_v28  ;;  %v8763_v58 = vadd.f32 %v6541_v42, %v4328_v62  ;;  %v6543_v16 = vpop.f32.mrb[3].mxu0 }
 0x32a   : > { %v7381_v31 = vadd.f32 %v8762_v56, %v11973_v34  ;;  %v8764_v46 = vadd.f32 %v6543_v16, %v4330_v37  ;;  %v4334_v33 = vpop.f32.mrb[4].mxu1 }
 0x32b   : > { %7508 = vst [vmem:[%s11978_s11] sm:$0xff] %v7380_v50  ;;  %v7382_v8 = vadd.f32 %v8763_v58, %v11971_v28  ;;  %8739 = vmatmul.mubr.msk.bf16.gmra.mrb[108].mxu0 %vm10029_vm5, %v12655_v54  ;;  %v4336_v13 = vpop.f32.mrb[5].mxu1  ;;  %v12724_v58 = vld [vmem:[#allocation97_spill] sm:$0xff] }
 0x32c   : > { %7509 = vst [vmem:[%s11978_s11 + $0x8] sm:$0xff] %v7381_v31  ;;  %v7383_v6 = vadd.f32 %v8764_v46, %v11973_v34  ;;  %8742 = vmatprep.mubr.msk.bf16.mxu0 %vm9986_vm3, %v11239_v18  ;;  %v4338_v19 = vpop.f32.mrb[6].mxu1 }
 0x32d   : > { %7510 = vst [vmem:[%s11978_s11 + $0x10] sm:$0xff] %v7382_v8  ;;  %v4340_v11 = vpop.f32.mrb[7].mxu1 }
 0x32e   : > { %7511 = vst [vmem:[%s11978_s11 + $0x18] sm:$0xff] %v7383_v6  ;;  %v6547_v49 = vpop.f32.mrb[4].mxu0 }
 0x32f   : > { %v8765_v60 = vadd.f32 %v6547_v49, %v4334_v33  ;;  %v6549_v61 = vpop.f32.mrb[5].mxu0  ;;  %4603 = vmatmul.mubr.bf16.gmra.mrb[112].mxu1 %v11206_v52 }
 0x330   : > { %v8766_v29 = vadd.f32 %v6549_v61, %v4336_v13  ;;  %v6551_v54 = vpop.f32.mrb[6].mxu0  ;;  %4612 = vmatprep.mubr.bf16.mxu1 %v11233_v10 }
 0x331   : > { %v7384_v38 = vadd.f32 %v8765_v60, %v11971_v28  ;;  %v8767_v51 = vadd.f32 %v6551_v54, %v4338_v19  ;;  %v6553_v55 = vpop.f32.mrb[7].mxu0 }
 0x332   : > { %v7385_v18 = vadd.f32 %v8766_v29, %v11973_v34  ;;  %v8768_v5 = vadd.f32 %v6553_v55, %v4340_v11  ;;  %v4344_v4 = vpop.f32.mrb[8].mxu1 }
 0x333   : > { %7512 = vst [vmem:[%s11978_s11 + $0x20] sm:$0xff] %v7384_v38  ;;  %v7386_v15 = vadd.f32 %v8767_v51, %v11971_v28  ;;  %8746 = vmatmul.mubr.msk.bf16.gmra.mrb[112].mxu0 %vm10029_vm5, %v11241_v36  ;;  %v4346_v52 = vpop.f32.mrb[9].mxu1 }
 0x334   : > { %7513 = vst [vmem:[%s11978_s11 + $0x28] sm:$0xff] %v7385_v18  ;;  %v7387_v24 = vadd.f32 %v8768_v5, %v11973_v34  ;;  %8749 = vmatprep.mubr.msk.bf16.mxu0 %vm9986_vm3, %v11253_v39  ;;  %v4348_v17 = vpop.f32.mrb[10].mxu1 }
 0x335   : > { %7514 = vst [vmem:[%s11978_s11 + $0x30] sm:$0xff] %v7386_v15  ;;  %v4350_v41 = vpop.f32.mrb[11].mxu1 }
 0x336   : > { %7515 = vst [vmem:[%s11978_s11 + $0x38] sm:$0xff] %v7387_v24  ;;  %v6557_v10 = vpop.f32.mrb[8].mxu0 }
 0x337   : > { %v8769_v25 = vadd.f32 %v6557_v10, %v4344_v4  ;;  %v6559_v0 = vpop.f32.mrb[9].mxu0  ;;  %4613 = vmatmul.mubr.bf16.gmra.mrb[116].mxu1 %v12722_v26 }
 0x338   : > { %v8770_v44 = vadd.f32 %v6559_v0, %v4346_v52  ;;  %v6561_v36 = vpop.f32.mrb[10].mxu0  ;;  %4622 = vmatprep.mubr.bf16.mxu1 %v11262_v45 }
 0x339   : > { %v7388_v9 = vadd.f32 %v8769_v25, %v11971_v28  ;;  %v8771_v21 = vadd.f32 %v6561_v36, %v4348_v17  ;;  %v6563_v63 = vpop.f32.mrb[11].mxu0 }
 0x33a   : > { %v7389_v39 = vadd.f32 %v8770_v44, %v11973_v34  ;;  %v8772_v32 = vadd.f32 %v6563_v63, %v4350_v41  ;;  %v4354_v59 = vpop.f32.mrb[12].mxu1 }
 0x33b   : > { %7516 = vst [vmem:[%s11978_s11 + $0x40] sm:$0xff] %v7388_v9  ;;  %v7390_v14 = vadd.f32 %v8771_v21, %v11971_v28  ;;  %8753 = vmatmul.mubr.msk.bf16.gmra.mrb[116].mxu0 %vm10029_vm5, %v11269_v57  ;;  %v4356_v27 = vpop.f32.mrb[13].mxu1 }
 0x33c   : > { %7517 = vst [vmem:[%s11978_s11 + $0x48] sm:$0xff] %v7389_v39  ;;  %v7391_v40 = vadd.f32 %v8772_v32, %v11973_v34  ;;  %8756 = vmatprep.mubr.msk.bf16.mxu0 %vm9986_vm3, %v12723_v53  ;;  %v4358_v3 = vpop.f32.mrb[14].mxu1 }
 0x33d   : > { %7518 = vst [vmem:[%s11978_s11 + $0x50] sm:$0xff] %v7390_v14  ;;  %v4360_v62 = vpop.f32.mrb[15].mxu1 }
 0x33e   : > { %7519 = vst [vmem:[%s11978_s11 + $0x58] sm:$0xff] %v7391_v40  ;;  %v6567_v45 = vpop.f32.mrb[12].mxu0 }
 0x33f   : > { %v8773_v47 = vadd.f32 %v6567_v45, %v4354_v59  ;;  %v6569_v48 = vpop.f32.mrb[13].mxu0  ;;  %4623 = vmatmul.mubr.bf16.gmra.mrb[120].mxu1 %v11289_v20 }
 0x340   : > { %v8774_v35 = vadd.f32 %v6569_v48, %v4356_v27  ;;  %v6571_v57 = vpop.f32.mrb[14].mxu0  ;;  %4632 = vmatprep.mubr.bf16.mxu1 %v11721_v43 }
 0x341   : > { %v7392_v22 = vadd.f32 %v8773_v47, %v11971_v28  ;;  %v8775_v37 = vadd.f32 %v6571_v57, %v4358_v3  ;;  %v6573_v56 = vpop.f32.mrb[15].mxu0 }
 0x342   : > { %v7393_v1 = vadd.f32 %v8774_v35, %v11973_v34  ;;  %v8776_v42 = vadd.f32 %v6573_v56, %v4360_v62  ;;  %v4364_v12 = vpop.f32.mrb[16].mxu1 }
 0x343   : > { %7520 = vst [vmem:[%s11978_s11 + $0x60] sm:$0xff] %v7392_v22  ;;  %v7394_v50 = vadd.f32 %v8775_v37, %v11971_v28  ;;  %8760 = vmatmul.mubr.msk.bf16.gmra.mrb[120].mxu0 %vm10029_vm5, %v12724_v58  ;;  %v4366_v20 = vpop.f32.mrb[17].mxu1 }
 0x344   : > { %7521 = vst [vmem:[%s11978_s11 + $0x68] sm:$0xff] %v7393_v1  ;;  %v7395_v16 = vadd.f32 %v8776_v42, %v11973_v34  ;;  %6845 = vmatprep.mubr.bf16.mxu0 %v12570_v2  ;;  %v4368_v43 = vpop.f32.mrb[18].mxu1 }
 0x345   : > { %7522 = vst [vmem:[%s11978_s11 + $0x70] sm:$0xff] %v7394_v50  ;;  %v4370_v8 = vpop.f32.mrb[19].mxu1 }
 0x346   : > { %7523 = vst [vmem:[%s11978_s11 + $0x78] sm:$0xff] %v7395_v16  ;;  %v6577_v31 = vpop.f32.mrb[16].mxu0 }
 0x347   : > { %v8777_v46 = vadd.f32 %v6577_v31, %v4364_v12  ;;  %v6579_v7 = vpop.f32.mrb[17].mxu0  ;;  %4633 = vmatmul.mubr.bf16.gmra.mrb[124].mxu1 %v11733_v23 }
 0x348   : > { %v8778_v6 = vadd.f32 %v6579_v7, %v4366_v20  ;;  %v6581_v30 = vpop.f32.mrb[18].mxu0 }
 0x349   : > { %v7396_v33 = vadd.f32 %v8777_v46, %v11971_v28  ;;  %v8779_v13 = vadd.f32 %v6581_v30, %v4368_v43  ;;  %v6583_v49 = vpop.f32.mrb[19].mxu0 }
 0x34a   : > { %v7397_v19 = vadd.f32 %v8778_v6, %v11973_v34  ;;  %v8780_v60 = vadd.f32 %v6583_v49, %v4370_v8  ;;  %v4374_v29 = vpop.f32.mrb[20].mxu1 }
 0x34b   : > { %7524 = vst [vmem:[%s11978_s11 + $0x80] sm:$0xff] %v7396_v33  ;;  %v7398_v61 = vadd.f32 %v8779_v13, %v11971_v28  ;;  %6846 = vmatmul.mubr.bf16.gmra.mrb[124].mxu0 %v12570_v2  ;;  %v4376_v54 = vpop.f32.mrb[21].mxu1 }
 0x34c   : > { %7525 = vst [vmem:[%s11978_s11 + $0x88] sm:$0xff] %v7397_v19  ;;  %v7399_v11 = vadd.f32 %v8780_v60, %v11973_v34  ;;  %v4378_v51 = vpop.f32.mrb[22].mxu1 }
 0x34d   : > { %7526 = vst [vmem:[%s11978_s11 + $0x90] sm:$0xff] %v7398_v61  ;;  %v4380_v18 = vpop.f32.mrb[23].mxu1 }
 0x34e   : > { %7527 = vst [vmem:[%s11978_s11 + $0x98] sm:$0xff] %v7399_v11  ;;  %v6587_v38 = vpop.f32.mrb[20].mxu0 }
 0x34f   : > { %v8781_v23 = vadd.f32 %v6587_v38, %v4374_v29  ;;  %v6589_v55 = vpop.f32.mrb[21].mxu0 }
 0x350   : > { %v8782_v5 = vadd.f32 %v6589_v55, %v4376_v54  ;;  %v6591_v15 = vpop.f32.mrb[22].mxu0 }
 0x351   : > { %v7400_v2 = vadd.f32 %v8781_v23, %v11971_v28  ;;  %v8783_v24 = vadd.f32 %v6591_v15, %v4378_v51  ;;  %v6593_v4 = vpop.f32.mrb[23].mxu0 }
 0x352   : > { %v7401_v52 = vadd.f32 %v8782_v5, %v11973_v34  ;;  %v8784_v10 = vadd.f32 %v6593_v4, %v4380_v18  ;;  %v4384_v0 = vpop.f32.mrb[24].mxu1 }
 0x353   : > { %7528 = vst [vmem:[%s11978_s11 + $0xa0] sm:$0xff] %v7400_v2  ;;  %v7402_v17 = vadd.f32 %v8783_v24, %v11971_v28  ;;  %v4386_v41 = vpop.f32.mrb[25].mxu1 }
 0x354   : > { %7529 = vst [vmem:[%s11978_s11 + $0xa8] sm:$0xff] %v7401_v52  ;;  %v7403_v25 = vadd.f32 %v8784_v10, %v11973_v34  ;;  %v4388_v36 = vpop.f32.mrb[26].mxu1 }
 0x355   : > { %7530 = vst [vmem:[%s11978_s11 + $0xb0] sm:$0xff] %v7402_v17  ;;  %v4390_v63 = vpop.f32.mrb[27].mxu1 }
 0x356   : > { %7531 = vst [vmem:[%s11978_s11 + $0xb8] sm:$0xff] %v7403_v25  ;;  %v6597_v44 = vpop.f32.mrb[24].mxu0 }
 0x357   : > { %v8785_v9 = vadd.f32 %v6597_v44, %v4384_v0  ;;  %v6599_v21 = vpop.f32.mrb[25].mxu0 }
 0x358   : > { %v8786_v26 = vadd.f32 %v6599_v21, %v4386_v41  ;;  %v6601_v39 = vpop.f32.mrb[26].mxu0 }
 0x359   : > { %v7404_v32 = vadd.f32 %v8785_v9, %v11971_v28  ;;  %v8787_v14 = vadd.f32 %v6601_v39, %v4388_v36  ;;  %v6603_v40 = vpop.f32.mrb[27].mxu0 }
 0x35a   : > { %v7405_v59 = vadd.f32 %v8786_v26, %v11973_v34  ;;  %v8788_v53 = vadd.f32 %v6603_v40, %v4390_v63  ;;  %v4394_v3 = vpop.f32.mrb[28].mxu1 }
 0x35b   : > { %7532 = vst [vmem:[%s11978_s11 + $0xc0] sm:$0xff] %v7404_v32  ;;  %v7406_v27 = vadd.f32 %v8787_v14, %v11971_v28  ;;  %v4396_v47 = vpop.f32.mrb[29].mxu1 }
 0x35c   : > { %7533 = vst [vmem:[%s11978_s11 + $0xc8] sm:$0xff] %v7405_v59  ;;  %v7407_v45 = vadd.f32 %v8788_v53, %v11973_v34  ;;  %v4398_v62 = vpop.f32.mrb[30].mxu1 }
 0x35d   : > { %7534 = vst [vmem:[%s11978_s11 + $0xd0] sm:$0xff] %v7406_v27  ;;  %v4400_v22 = vpop.f32.mrb[31].mxu1 }
 0x35e   : > { %7535 = vst [vmem:[%s11978_s11 + $0xd8] sm:$0xff] %v7407_v45  ;;  %v6607_v48 = vpop.f32.mrb[28].mxu0 }
 0x35f   : > { %v8789_v35 = vadd.f32 %v6607_v48, %v4394_v3  ;;  %v6609_v57 = vpop.f32.mrb[29].mxu0 }
 0x360   : > { %v8790_v37 = vadd.f32 %v6609_v57, %v4396_v47  ;;  %v6611_v56 = vpop.f32.mrb[30].mxu0 }
 0x361   : > { %v7408_v1 = vadd.f32 %v8789_v35, %v11971_v28  ;;  %v8791_v42 = vadd.f32 %v6611_v56, %v4398_v62  ;;  %v6613_v50 = vpop.f32.mrb[31].mxu0 }
 0x362   : > { %v7409_v58 = vadd.f32 %v8790_v37, %v11973_v34  ;;  %v8792_v16 = vadd.f32 %v6613_v50, %v4400_v22  ;;  %v4404_v31 = vpop.f32.mrb[32].mxu1 }
 0x363   : > { %7536 = vst [vmem:[%s11978_s11 + $0xe0] sm:$0xff] %v7408_v1  ;;  %v7410_v12 = vadd.f32 %v8791_v42, %v11971_v28  ;;  %v4406_v43 = vpop.f32.mrb[33].mxu1 }
 0x364   : > { %7537 = vst [vmem:[%s11978_s11 + $0xe8] sm:$0xff] %v7409_v58  ;;  %v7411_v20 = vadd.f32 %v8792_v16, %v11973_v34  ;;  %v4408_v7 = vpop.f32.mrb[34].mxu1 }
 0x365   : > { %7538 = vst [vmem:[%s11978_s11 + $0xf0] sm:$0xff] %v7410_v12  ;;  %v4410_v30 = vpop.f32.mrb[35].mxu1 }
 0x366   : > { %7539 = vst [vmem:[%s11978_s11 + $0xf8] sm:$0xff] %v7411_v20  ;;  %v6617_v46 = vpop.f32.mrb[32].mxu0 }
 0x367   : > { %v8793_v8 = vadd.f32 %v6617_v46, %v4404_v31  ;;  %v6619_v6 = vpop.f32.mrb[33].mxu0 }
 0x368   : > { %v8794_v33 = vadd.f32 %v6619_v6, %v4406_v43  ;;  %v6621_v13 = vpop.f32.mrb[34].mxu0 }
 0x369   : > { %v7412_v49 = vadd.f32 %v8793_v8, %v11971_v28  ;;  %v8795_v19 = vadd.f32 %v6621_v13, %v4408_v7  ;;  %v6623_v60 = vpop.f32.mrb[35].mxu0 }
 0x36a   : > { %v7413_v61 = vadd.f32 %v8794_v33, %v11973_v34  ;;  %v8796_v11 = vadd.f32 %v6623_v60, %v4410_v30  ;;  %v4414_v38 = vpop.f32.mrb[36].mxu1 }
 0x36b   : > { %7540 = vst [vmem:[%s11978_s11 + $0x100] sm:$0xff] %v7412_v49  ;;  %v7414_v29 = vadd.f32 %v8795_v19, %v11971_v28  ;;  %v4416_v51 = vpop.f32.mrb[37].mxu1 }
 0x36c   : > { %7541 = vst [vmem:[%s11978_s11 + $0x108] sm:$0xff] %v7413_v61  ;;  %v7415_v54 = vadd.f32 %v8796_v11, %v11973_v34  ;;  %v4418_v55 = vpop.f32.mrb[38].mxu1 }
 0x36d   : > { %7542 = vst [vmem:[%s11978_s11 + $0x110] sm:$0xff] %v7414_v29  ;;  %v4420_v15 = vpop.f32.mrb[39].mxu1 }
 0x36e   : > { %7543 = vst [vmem:[%s11978_s11 + $0x118] sm:$0xff] %v7415_v54  ;;  %v6627_v23 = vpop.f32.mrb[36].mxu0 }
 0x36f   : > { %v8797_v18 = vadd.f32 %v6627_v23, %v4414_v38  ;;  %v6629_v5 = vpop.f32.mrb[37].mxu0 }
 0x370   : > { %v8798_v2 = vadd.f32 %v6629_v5, %v4416_v51  ;;  %v6631_v24 = vpop.f32.mrb[38].mxu0 }
 0x371   : > { %v7416_v4 = vadd.f32 %v8797_v18, %v11971_v28  ;;  %v8799_v52 = vadd.f32 %v6631_v24, %v4418_v55  ;;  %v6633_v10 = vpop.f32.mrb[39].mxu0 }
 0x372   : > { %v7417_v17 = vadd.f32 %v8798_v2, %v11973_v34  ;;  %v8800_v25 = vadd.f32 %v6633_v10, %v4420_v15  ;;  %v4424_v44 = vpop.f32.mrb[40].mxu1 }
 0x373   : > { %7544 = vst [vmem:[%s11978_s11 + $0x120] sm:$0xff] %v7416_v4  ;;  %v7418_v0 = vadd.f32 %v8799_v52, %v11971_v28  ;;  %v4426_v36 = vpop.f32.mrb[41].mxu1 }
 0x374   : > { %7545 = vst [vmem:[%s11978_s11 + $0x128] sm:$0xff] %v7417_v17  ;;  %v7419_v41 = vadd.f32 %v8800_v25, %v11973_v34  ;;  %v4428_v21 = vpop.f32.mrb[42].mxu1 }
 0x375   : > { %7546 = vst [vmem:[%s11978_s11 + $0x130] sm:$0xff] %v7418_v0  ;;  %v4430_v39 = vpop.f32.mrb[43].mxu1 }
 0x376   : > { %7547 = vst [vmem:[%s11978_s11 + $0x138] sm:$0xff] %v7419_v41  ;;  %v6637_v9 = vpop.f32.mrb[40].mxu0 }
 0x377   : > { %v8801_v63 = vadd.f32 %v6637_v9, %v4424_v44  ;;  %v6639_v26 = vpop.f32.mrb[41].mxu0 }
 0x378   : > { %v8802_v32 = vadd.f32 %v6639_v26, %v4426_v36  ;;  %v6641_v14 = vpop.f32.mrb[42].mxu0 }
 0x379   : > { %v7420_v40 = vadd.f32 %v8801_v63, %v11971_v28  ;;  %v8803_v59 = vadd.f32 %v6641_v14, %v4428_v21  ;;  %v6643_v53 = vpop.f32.mrb[43].mxu0 }
 0x37a   : > { %v7421_v27 = vadd.f32 %v8802_v32, %v11973_v34  ;;  %v8804_v45 = vadd.f32 %v6643_v53, %v4430_v39  ;;  %v4434_v48 = vpop.f32.mrb[44].mxu1 }
 0x37b   : > { %7548 = vst [vmem:[%s11978_s11 + $0x140] sm:$0xff] %v7420_v40  ;;  %v7422_v3 = vadd.f32 %v8803_v59, %v11971_v28  ;;  %v4436_v62 = vpop.f32.mrb[45].mxu1 }
 0x37c   : > { %7549 = vst [vmem:[%s11978_s11 + $0x148] sm:$0xff] %v7421_v27  ;;  %v7423_v47 = vadd.f32 %v8804_v45, %v11973_v34  ;;  %v4438_v57 = vpop.f32.mrb[46].mxu1 }
 0x37d   : > { %7550 = vst [vmem:[%s11978_s11 + $0x150] sm:$0xff] %v7422_v3  ;;  %v4440_v56 = vpop.f32.mrb[47].mxu1 }
 0x37e   : > { %7551 = vst [vmem:[%s11978_s11 + $0x158] sm:$0xff] %v7423_v47  ;;  %v6647_v35 = vpop.f32.mrb[44].mxu0 }
 0x37f   : > { %v8805_v22 = vadd.f32 %v6647_v35, %v4434_v48  ;;  %v6649_v37 = vpop.f32.mrb[45].mxu0 }
 0x380   : > { %v8806_v1 = vadd.f32 %v6649_v37, %v4436_v62  ;;  %v6651_v42 = vpop.f32.mrb[46].mxu0 }
 0x381   : > { %v7424_v50 = vadd.f32 %v8805_v22, %v11971_v28  ;;  %v8807_v58 = vadd.f32 %v6651_v42, %v4438_v57  ;;  %v6653_v16 = vpop.f32.mrb[47].mxu0 }
 0x382   : > { %v7425_v12 = vadd.f32 %v8806_v1, %v11973_v34  ;;  %v8808_v20 = vadd.f32 %v6653_v16, %v4440_v56  ;;  %v4444_v46 = vpop.f32.mrb[48].mxu1 }
 0x383   : > { %7552 = vst [vmem:[%s11978_s11 + $0x160] sm:$0xff] %v7424_v50  ;;  %v7426_v31 = vadd.f32 %v8807_v58, %v11971_v28  ;;  %v4446_v7 = vpop.f32.mrb[49].mxu1 }
 0x384   : > { %7553 = vst [vmem:[%s11978_s11 + $0x168] sm:$0xff] %v7425_v12  ;;  %v7427_v43 = vadd.f32 %v8808_v20, %v11973_v34  ;;  %v4448_v6 = vpop.f32.mrb[50].mxu1 }
 0x385   : > { %7554 = vst [vmem:[%s11978_s11 + $0x170] sm:$0xff] %v7426_v31  ;;  %v4450_v13 = vpop.f32.mrb[51].mxu1 }
 0x386   : > { %7555 = vst [vmem:[%s11978_s11 + $0x178] sm:$0xff] %v7427_v43  ;;  %v6657_v8 = vpop.f32.mrb[48].mxu0 }
 0x387   : > { %v8809_v30 = vadd.f32 %v6657_v8, %v4444_v46  ;;  %v6659_v33 = vpop.f32.mrb[49].mxu0 }
 0x388   : > { %v8810_v49 = vadd.f32 %v6659_v33, %v4446_v7  ;;  %v6661_v19 = vpop.f32.mrb[50].mxu0 }
 0x389   : > { %v7428_v60 = vadd.f32 %v8809_v30, %v11971_v28  ;;  %v8811_v61 = vadd.f32 %v6661_v19, %v4448_v6  ;;  %v6663_v11 = vpop.f32.mrb[51].mxu0 }
 0x38a   : > { %v7429_v29 = vadd.f32 %v8810_v49, %v11973_v34  ;;  %v8812_v54 = vadd.f32 %v6663_v11, %v4450_v13  ;;  %v4454_v23 = vpop.f32.mrb[52].mxu1 }
 0x38b   : > { %7556 = vst [vmem:[%s11978_s11 + $0x180] sm:$0xff] %v7428_v60  ;;  %v7430_v38 = vadd.f32 %v8811_v61, %v11971_v28  ;;  %v4456_v55 = vpop.f32.mrb[53].mxu1 }
 0x38c   : > { %7557 = vst [vmem:[%s11978_s11 + $0x188] sm:$0xff] %v7429_v29  ;;  %v7431_v51 = vadd.f32 %v8812_v54, %v11973_v34  ;;  %v4458_v5 = vpop.f32.mrb[54].mxu1 }
 0x38d   : > { %7558 = vst [vmem:[%s11978_s11 + $0x190] sm:$0xff] %v7430_v38  ;;  %v4460_v24 = vpop.f32.mrb[55].mxu1 }
 0x38e   : > { %7559 = vst [vmem:[%s11978_s11 + $0x198] sm:$0xff] %v7431_v51  ;;  %v6667_v18 = vpop.f32.mrb[52].mxu0 }
 0x38f   : > { %v8813_v15 = vadd.f32 %v6667_v18, %v4454_v23  ;;  %v6669_v2 = vpop.f32.mrb[53].mxu0 }
 0x390   : > { %v8814_v4 = vadd.f32 %v6669_v2, %v4456_v55  ;;  %v6671_v52 = vpop.f32.mrb[54].mxu0 }
 0x391   : > { %v7432_v10 = vadd.f32 %v8813_v15, %v11971_v28  ;;  %v8815_v17 = vadd.f32 %v6671_v52, %v4458_v5  ;;  %v6673_v25 = vpop.f32.mrb[55].mxu0 }
 0x392   : > { %v7433_v0 = vadd.f32 %v8814_v4, %v11973_v34  ;;  %v8816_v41 = vadd.f32 %v6673_v25, %v4460_v24  ;;  %v4464_v9 = vpop.f32.mrb[56].mxu1 }
 0x393   : > { %7560 = vst [vmem:[%s11978_s11 + $0x1a0] sm:$0xff] %v7432_v10  ;;  %v7434_v44 = vadd.f32 %v8815_v17, %v11971_v28  ;;  %v4466_v21 = vpop.f32.mrb[57].mxu1 }
 0x394   : > { %7561 = vst [vmem:[%s11978_s11 + $0x1a8] sm:$0xff] %v7433_v0  ;;  %v7435_v36 = vadd.f32 %v8816_v41, %v11973_v34  ;;  %v4468_v26 = vpop.f32.mrb[58].mxu1 }
 0x395   : > { %7562 = vst [vmem:[%s11978_s11 + $0x1b0] sm:$0xff] %v7434_v44  ;;  %v4470_v14 = vpop.f32.mrb[59].mxu1 }
 0x396   : > { %7563 = vst [vmem:[%s11978_s11 + $0x1b8] sm:$0xff] %v7435_v36  ;;  %v6677_v63 = vpop.f32.mrb[56].mxu0 }
 0x397   : > { %v8817_v39 = vadd.f32 %v6677_v63, %v4464_v9  ;;  %v6679_v32 = vpop.f32.mrb[57].mxu0 }
 0x398   : > { %v8818_v40 = vadd.f32 %v6679_v32, %v4466_v21  ;;  %v6681_v59 = vpop.f32.mrb[58].mxu0 }
 0x399   : > { %v7436_v53 = vadd.f32 %v8817_v39, %v11971_v28  ;;  %v8819_v27 = vadd.f32 %v6681_v59, %v4468_v26  ;;  %v6683_v45 = vpop.f32.mrb[59].mxu0 }
 0x39a   : > { %v7437_v3 = vadd.f32 %v8818_v40, %v11973_v34  ;;  %v8820_v47 = vadd.f32 %v6683_v45, %v4470_v14  ;;  %v4474_v35 = vpop.f32.mrb[60].mxu1 }
 0x39b   : > { %7564 = vst [vmem:[%s11978_s11 + $0x1c0] sm:$0xff] %v7436_v53  ;;  %v7438_v48 = vadd.f32 %v8819_v27, %v11971_v28  ;;  %v4476_v57 = vpop.f32.mrb[61].mxu1 }
 0x39c   : > { %7565 = vst [vmem:[%s11978_s11 + $0x1c8] sm:$0xff] %v7437_v3  ;;  %v7439_v62 = vadd.f32 %v8820_v47, %v11973_v34  ;;  %v4478_v37 = vpop.f32.mrb[62].mxu1 }
 0x39d   : > { %7566 = vst [vmem:[%s11978_s11 + $0x1d0] sm:$0xff] %v7438_v48  ;;  %v4480_v42 = vpop.f32.mrb[63].mxu1 }
 0x39e   : > { %7567 = vst [vmem:[%s11978_s11 + $0x1d8] sm:$0xff] %v7439_v62  ;;  %v6687_v22 = vpop.f32.mrb[60].mxu0 }
 0x39f   : > { %v8821_v56 = vadd.f32 %v6687_v22, %v4474_v35  ;;  %v6689_v1 = vpop.f32.mrb[61].mxu0 }
 0x3a0   : > { %v8822_v50 = vadd.f32 %v6689_v1, %v4476_v57  ;;  %v6691_v58 = vpop.f32.mrb[62].mxu0 }
 0x3a1   : > { %v7440_v16 = vadd.f32 %v8821_v56, %v11971_v28  ;;  %v8823_v12 = vadd.f32 %v6691_v58, %v4478_v37  ;;  %v6693_v20 = vpop.f32.mrb[63].mxu0 }
 0x3a2   : > { %v7441_v31 = vadd.f32 %v8822_v50, %v11973_v34  ;;  %v8824_v43 = vadd.f32 %v6693_v20, %v4480_v42  ;;  %v4484_v8 = vpop.f32.mrb[64].mxu1 }
 0x3a3   : > { %7568 = vst [vmem:[%s11978_s11 + $0x1e0] sm:$0xff] %v7440_v16  ;;  %v7442_v46 = vadd.f32 %v8823_v12, %v11971_v28  ;;  %v4486_v6 = vpop.f32.mrb[65].mxu1 }
 0x3a4   : > { %7569 = vst [vmem:[%s11978_s11 + $0x1e8] sm:$0xff] %v7441_v31  ;;  %v7443_v7 = vadd.f32 %v8824_v43, %v11973_v34  ;;  %v4488_v33 = vpop.f32.mrb[66].mxu1 }
 0x3a5   : > { %7570 = vst [vmem:[%s11978_s11 + $0x1f0] sm:$0xff] %v7442_v46  ;;  %v4490_v19 = vpop.f32.mrb[67].mxu1 }
 0x3a6   : > { %7571 = vst [vmem:[%s11978_s11 + $0x1f8] sm:$0xff] %v7443_v7  ;;  %v6697_v30 = vpop.f32.mrb[64].mxu0 }
 0x3a7   : > { %v8825_v13 = vadd.f32 %v6697_v30, %v4484_v8  ;;  %v6699_v49 = vpop.f32.mrb[65].mxu0 }
 0x3a8   : > { %v8826_v60 = vadd.f32 %v6699_v49, %v4486_v6  ;;  %v6701_v61 = vpop.f32.mrb[66].mxu0 }
 0x3a9   : > { %v7444_v11 = vadd.f32 %v8825_v13, %v11971_v28  ;;  %v8827_v29 = vadd.f32 %v6701_v61, %v4488_v33  ;;  %v6703_v54 = vpop.f32.mrb[67].mxu0 }
 0x3aa   : > { %v7445_v38 = vadd.f32 %v8826_v60, %v11973_v34  ;;  %v8828_v51 = vadd.f32 %v6703_v54, %v4490_v19  ;;  %v4494_v18 = vpop.f32.mrb[68].mxu1 }
 0x3ab   : > { %7572 = vst [vmem:[%s11978_s11 + $0x200] sm:$0xff] %v7444_v11  ;;  %v7446_v23 = vadd.f32 %v8827_v29, %v11971_v28  ;;  %v4496_v5 = vpop.f32.mrb[69].mxu1 }
 0x3ac   : > { %7573 = vst [vmem:[%s11978_s11 + $0x208] sm:$0xff] %v7445_v38  ;;  %v7447_v55 = vadd.f32 %v8828_v51, %v11973_v34  ;;  %v4498_v2 = vpop.f32.mrb[70].mxu1 }
 0x3ad   : > { %7574 = vst [vmem:[%s11978_s11 + $0x210] sm:$0xff] %v7446_v23  ;;  %v4500_v52 = vpop.f32.mrb[71].mxu1 }
 0x3ae   : > { %7575 = vst [vmem:[%s11978_s11 + $0x218] sm:$0xff] %v7447_v55  ;;  %v6707_v15 = vpop.f32.mrb[68].mxu0 }
 0x3af   : > { %v8829_v24 = vadd.f32 %v6707_v15, %v4494_v18  ;;  %v6709_v4 = vpop.f32.mrb[69].mxu0 }
 0x3b0   : > { %v8830_v10 = vadd.f32 %v6709_v4, %v4496_v5  ;;  %v6711_v17 = vpop.f32.mrb[70].mxu0 }
 0x3b1   : > { %v7448_v25 = vadd.f32 %v8829_v24, %v11971_v28  ;;  %v8831_v0 = vadd.f32 %v6711_v17, %v4498_v2  ;;  %v6713_v41 = vpop.f32.mrb[71].mxu0 }
 0x3b2   : > { %v7449_v44 = vadd.f32 %v8830_v10, %v11973_v34  ;;  %v8832_v36 = vadd.f32 %v6713_v41, %v4500_v52  ;;  %v4504_v63 = vpop.f32.mrb[72].mxu1 }
 0x3b3   : > { %7576 = vst [vmem:[%s11978_s11 + $0x220] sm:$0xff] %v7448_v25  ;;  %v7450_v9 = vadd.f32 %v8831_v0, %v11971_v28  ;;  %v4506_v26 = vpop.f32.mrb[73].mxu1 }
 0x3b4   : > { %7577 = vst [vmem:[%s11978_s11 + $0x228] sm:$0xff] %v7449_v44  ;;  %v7451_v21 = vadd.f32 %v8832_v36, %v11973_v34  ;;  %v4508_v32 = vpop.f32.mrb[74].mxu1 }
 0x3b5   : > { %7578 = vst [vmem:[%s11978_s11 + $0x230] sm:$0xff] %v7450_v9  ;;  %v4510_v59 = vpop.f32.mrb[75].mxu1 }
 0x3b6   : > { %7579 = vst [vmem:[%s11978_s11 + $0x238] sm:$0xff] %v7451_v21  ;;  %v6717_v39 = vpop.f32.mrb[72].mxu0 }
 0x3b7   : > { %v8833_v14 = vadd.f32 %v6717_v39, %v4504_v63  ;;  %v6719_v40 = vpop.f32.mrb[73].mxu0 }
 0x3b8   : > { %v8834_v53 = vadd.f32 %v6719_v40, %v4506_v26  ;;  %v6721_v27 = vpop.f32.mrb[74].mxu0 }
 0x3b9   : > { %v7452_v45 = vadd.f32 %v8833_v14, %v11971_v28  ;;  %v8835_v3 = vadd.f32 %v6721_v27, %v4508_v32  ;;  %v6723_v47 = vpop.f32.mrb[75].mxu0 }
 0x3ba   : > { %v7453_v48 = vadd.f32 %v8834_v53, %v11973_v34  ;;  %v8836_v62 = vadd.f32 %v6723_v47, %v4510_v59  ;;  %v4514_v22 = vpop.f32.mrb[76].mxu1 }
 0x3bb   : > { %7580 = vst [vmem:[%s11978_s11 + $0x240] sm:$0xff] %v7452_v45  ;;  %v7454_v35 = vadd.f32 %v8835_v3, %v11971_v28  ;;  %v4516_v37 = vpop.f32.mrb[77].mxu1 }
 0x3bc   : > { %7581 = vst [vmem:[%s11978_s11 + $0x248] sm:$0xff] %v7453_v48  ;;  %v7455_v57 = vadd.f32 %v8836_v62, %v11973_v34  ;;  %v4518_v1 = vpop.f32.mrb[78].mxu1 }
 0x3bd   : > { %7582 = vst [vmem:[%s11978_s11 + $0x250] sm:$0xff] %v7454_v35  ;;  %v4520_v58 = vpop.f32.mrb[79].mxu1 }
 0x3be   : > { %7583 = vst [vmem:[%s11978_s11 + $0x258] sm:$0xff] %v7455_v57  ;;  %v6727_v56 = vpop.f32.mrb[76].mxu0 }
 0x3bf   : > { %v8837_v42 = vadd.f32 %v6727_v56, %v4514_v22  ;;  %v6729_v50 = vpop.f32.mrb[77].mxu0 }
 0x3c0   : > { %v8838_v16 = vadd.f32 %v6729_v50, %v4516_v37  ;;  %v6731_v12 = vpop.f32.mrb[78].mxu0 }
 0x3c1   : > { %v7456_v20 = vadd.f32 %v8837_v42, %v11971_v28  ;;  %v8839_v31 = vadd.f32 %v6731_v12, %v4518_v1  ;;  %v6733_v43 = vpop.f32.mrb[79].mxu0 }
 0x3c2   : > { %v7457_v46 = vadd.f32 %v8838_v16, %v11973_v34  ;;  %v8840_v7 = vadd.f32 %v6733_v43, %v4520_v58  ;;  %v4524_v30 = vpop.f32.mrb[80].mxu1 }
 0x3c3   : > { %7584 = vst [vmem:[%s11978_s11 + $0x260] sm:$0xff] %v7456_v20  ;;  %v7458_v8 = vadd.f32 %v8839_v31, %v11971_v28  ;;  %v4526_v33 = vpop.f32.mrb[81].mxu1 }
 0x3c4   : > { %7585 = vst [vmem:[%s11978_s11 + $0x268] sm:$0xff] %v7457_v46  ;;  %v7459_v6 = vadd.f32 %v8840_v7, %v11973_v34  ;;  %v4528_v49 = vpop.f32.mrb[82].mxu1 }
 0x3c5   : > { %7586 = vst [vmem:[%s11978_s11 + $0x270] sm:$0xff] %v7458_v8  ;;  %v4530_v61 = vpop.f32.mrb[83].mxu1 }
 0x3c6   : > { %7587 = vst [vmem:[%s11978_s11 + $0x278] sm:$0xff] %v7459_v6  ;;  %v6737_v13 = vpop.f32.mrb[80].mxu0 }
 0x3c7   : > { %v8841_v19 = vadd.f32 %v6737_v13, %v4524_v30  ;;  %v6739_v60 = vpop.f32.mrb[81].mxu0 }
 0x3c8   : > { %v8842_v11 = vadd.f32 %v6739_v60, %v4526_v33  ;;  %v6741_v29 = vpop.f32.mrb[82].mxu0 }
 0x3c9   : > { %v7460_v54 = vadd.f32 %v8841_v19, %v11971_v28  ;;  %v8843_v38 = vadd.f32 %v6741_v29, %v4528_v49  ;;  %v6743_v51 = vpop.f32.mrb[83].mxu0 }
 0x3ca   : > { %v7461_v23 = vadd.f32 %v8842_v11, %v11973_v34  ;;  %v8844_v55 = vadd.f32 %v6743_v51, %v4530_v61  ;;  %v4534_v15 = vpop.f32.mrb[84].mxu1 }
 0x3cb   : > { %7588 = vst [vmem:[%s11978_s11 + $0x280] sm:$0xff] %v7460_v54  ;;  %v7462_v18 = vadd.f32 %v8843_v38, %v11971_v28  ;;  %v4536_v2 = vpop.f32.mrb[85].mxu1 }
 0x3cc   : > { %7589 = vst [vmem:[%s11978_s11 + $0x288] sm:$0xff] %v7461_v23  ;;  %v7463_v5 = vadd.f32 %v8844_v55, %v11973_v34  ;;  %v4538_v4 = vpop.f32.mrb[86].mxu1 }
 0x3cd   : > { %7590 = vst [vmem:[%s11978_s11 + $0x290] sm:$0xff] %v7462_v18  ;;  %v4540_v17 = vpop.f32.mrb[87].mxu1 }
 0x3ce   : > { %7591 = vst [vmem:[%s11978_s11 + $0x298] sm:$0xff] %v7463_v5  ;;  %v6747_v24 = vpop.f32.mrb[84].mxu0 }
 0x3cf   : > { %v8845_v52 = vadd.f32 %v6747_v24, %v4534_v15  ;;  %v6749_v10 = vpop.f32.mrb[85].mxu0 }
 0x3d0   : > { %v8846_v25 = vadd.f32 %v6749_v10, %v4536_v2  ;;  %v6751_v0 = vpop.f32.mrb[86].mxu0 }
 0x3d1   : > { %v7464_v41 = vadd.f32 %v8845_v52, %v11971_v28  ;;  %v8847_v44 = vadd.f32 %v6751_v0, %v4538_v4  ;;  %v6753_v36 = vpop.f32.mrb[87].mxu0 }
 0x3d2   : > { %v7465_v9 = vadd.f32 %v8846_v25, %v11973_v34  ;;  %v8848_v21 = vadd.f32 %v6753_v36, %v4540_v17  ;;  %v4544_v39 = vpop.f32.mrb[88].mxu1 }
 0x3d3   : > { %7592 = vst [vmem:[%s11978_s11 + $0x2a0] sm:$0xff] %v7464_v41  ;;  %v7466_v63 = vadd.f32 %v8847_v44, %v11971_v28  ;;  %v4546_v32 = vpop.f32.mrb[89].mxu1 }
 0x3d4   : > { %7593 = vst [vmem:[%s11978_s11 + $0x2a8] sm:$0xff] %v7465_v9  ;;  %v7467_v26 = vadd.f32 %v8848_v21, %v11973_v34  ;;  %v4548_v40 = vpop.f32.mrb[90].mxu1 }
 0x3d5   : > { %7594 = vst [vmem:[%s11978_s11 + $0x2b0] sm:$0xff] %v7466_v63  ;;  %v4550_v27 = vpop.f32.mrb[91].mxu1 }
 0x3d6   : > { %7595 = vst [vmem:[%s11978_s11 + $0x2b8] sm:$0xff] %v7467_v26  ;;  %v6757_v14 = vpop.f32.mrb[88].mxu0 }
 0x3d7   : > { %v8849_v59 = vadd.f32 %v6757_v14, %v4544_v39  ;;  %v6759_v53 = vpop.f32.mrb[89].mxu0 }
 0x3d8   : > { %v8850_v45 = vadd.f32 %v6759_v53, %v4546_v32  ;;  %v6761_v3 = vpop.f32.mrb[90].mxu0 }
 0x3d9   : > { %v7468_v47 = vadd.f32 %v8849_v59, %v11971_v28  ;;  %v8851_v48 = vadd.f32 %v6761_v3, %v4548_v40  ;;  %v6763_v62 = vpop.f32.mrb[91].mxu0 }
 0x3da   : > { %v7469_v35 = vadd.f32 %v8850_v45, %v11973_v34  ;;  %v8852_v57 = vadd.f32 %v6763_v62, %v4550_v27  ;;  %v4554_v56 = vpop.f32.mrb[92].mxu1 }
 0x3db   : > { %7596 = vst [vmem:[%s11978_s11 + $0x2c0] sm:$0xff] %v7468_v47  ;;  %v7470_v22 = vadd.f32 %v8851_v48, %v11971_v28  ;;  %v4556_v1 = vpop.f32.mrb[93].mxu1 }
 0x3dc   : > { %7597 = vst [vmem:[%s11978_s11 + $0x2c8] sm:$0xff] %v7469_v35  ;;  %v7471_v37 = vadd.f32 %v8852_v57, %v11973_v34  ;;  %v4558_v50 = vpop.f32.mrb[94].mxu1 }
 0x3dd   : > { %7598 = vst [vmem:[%s11978_s11 + $0x2d0] sm:$0xff] %v7470_v22  ;;  %v4560_v12 = vpop.f32.mrb[95].mxu1 }
 0x3de   : > { %7599 = vst [vmem:[%s11978_s11 + $0x2d8] sm:$0xff] %v7471_v37  ;;  %v6767_v42 = vpop.f32.mrb[92].mxu0 }
 0x3df   : > { %v8853_v58 = vadd.f32 %v6767_v42, %v4554_v56  ;;  %v6769_v16 = vpop.f32.mrb[93].mxu0 }
 0x3e0   : > { %v8854_v20 = vadd.f32 %v6769_v16, %v4556_v1  ;;  %v6771_v31 = vpop.f32.mrb[94].mxu0 }
 0x3e1   : > { %v7472_v43 = vadd.f32 %v8853_v58, %v11971_v28  ;;  %v8855_v46 = vadd.f32 %v6771_v31, %v4558_v50  ;;  %v6773_v7 = vpop.f32.mrb[95].mxu0 }
 0x3e2   : > { %v7473_v8 = vadd.f32 %v8854_v20, %v11973_v34  ;;  %v8856_v6 = vadd.f32 %v6773_v7, %v4560_v12  ;;  %v4564_v13 = vpop.f32.mrb[96].mxu1 }
 0x3e3   : > { %7600 = vst [vmem:[%s11978_s11 + $0x2e0] sm:$0xff] %v7472_v43  ;;  %v7474_v30 = vadd.f32 %v8855_v46, %v11971_v28  ;;  %v4566_v49 = vpop.f32.mrb[97].mxu1 }
 0x3e4   : > { %7601 = vst [vmem:[%s11978_s11 + $0x2e8] sm:$0xff] %v7473_v8  ;;  %v7475_v33 = vadd.f32 %v8856_v6, %v11973_v34  ;;  %v4568_v60 = vpop.f32.mrb[98].mxu1 }
 0x3e5   : > { %7602 = vst [vmem:[%s11978_s11 + $0x2f0] sm:$0xff] %v7474_v30  ;;  %v4570_v29 = vpop.f32.mrb[99].mxu1 }
 0x3e6   : > { %7603 = vst [vmem:[%s11978_s11 + $0x2f8] sm:$0xff] %v7475_v33  ;;  %v6777_v19 = vpop.f32.mrb[96].mxu0 }
 0x3e7   : > { %v8857_v61 = vadd.f32 %v6777_v19, %v4564_v13  ;;  %v6779_v11 = vpop.f32.mrb[97].mxu0 }
 0x3e8   : > { %v8858_v54 = vadd.f32 %v6779_v11, %v4566_v49  ;;  %v6781_v38 = vpop.f32.mrb[98].mxu0 }
 0x3e9   : > { %v7476_v51 = vadd.f32 %v8857_v61, %v11971_v28  ;;  %v8859_v23 = vadd.f32 %v6781_v38, %v4568_v60  ;;  %v6783_v55 = vpop.f32.mrb[99].mxu0 }
 0x3ea   : > { %v7477_v18 = vadd.f32 %v8858_v54, %v11973_v34  ;;  %v8860_v5 = vadd.f32 %v6783_v55, %v4570_v29  ;;  %v4574_v24 = vpop.f32.mrb[100].mxu1 }
 0x3eb   : > { %7604 = vst [vmem:[%s11978_s11 + $0x300] sm:$0xff] %v7476_v51  ;;  %v7478_v15 = vadd.f32 %v8859_v23, %v11971_v28  ;;  %v4576_v4 = vpop.f32.mrb[101].mxu1 }
 0x3ec   : > { %7605 = vst [vmem:[%s11978_s11 + $0x308] sm:$0xff] %v7477_v18  ;;  %v7479_v2 = vadd.f32 %v8860_v5, %v11973_v34  ;;  %v4578_v10 = vpop.f32.mrb[102].mxu1 }
 0x3ed   : > { %7606 = vst [vmem:[%s11978_s11 + $0x310] sm:$0xff] %v7478_v15  ;;  %v4580_v0 = vpop.f32.mrb[103].mxu1 }
 0x3ee   : > { %7607 = vst [vmem:[%s11978_s11 + $0x318] sm:$0xff] %v7479_v2  ;;  %v6787_v52 = vpop.f32.mrb[100].mxu0 }
 0x3ef   : > { %v8861_v17 = vadd.f32 %v6787_v52, %v4574_v24  ;;  %v6789_v25 = vpop.f32.mrb[101].mxu0 }
 0x3f0   : > { %v8862_v41 = vadd.f32 %v6789_v25, %v4576_v4  ;;  %v6791_v44 = vpop.f32.mrb[102].mxu0 }
 0x3f1   : > { %v7480_v36 = vadd.f32 %v8861_v17, %v11971_v28  ;;  %v8863_v9 = vadd.f32 %v6791_v44, %v4578_v10  ;;  %v6793_v21 = vpop.f32.mrb[103].mxu0 }
 0x3f2   : > { %v7481_v63 = vadd.f32 %v8862_v41, %v11973_v34  ;;  %v8864_v26 = vadd.f32 %v6793_v21, %v4580_v0  ;;  %v4584_v14 = vpop.f32.mrb[104].mxu1 }
 0x3f3   : > { %7608 = vst [vmem:[%s11978_s11 + $0x320] sm:$0xff] %v7480_v36  ;;  %v7482_v39 = vadd.f32 %v8863_v9, %v11971_v28  ;;  %v4586_v40 = vpop.f32.mrb[105].mxu1 }
 0x3f4   : > { %7609 = vst [vmem:[%s11978_s11 + $0x328] sm:$0xff] %v7481_v63  ;;  %v7483_v32 = vadd.f32 %v8864_v26, %v11973_v34  ;;  %v4588_v53 = vpop.f32.mrb[106].mxu1 }
 0x3f5   : > { %7610 = vst [vmem:[%s11978_s11 + $0x330] sm:$0xff] %v7482_v39  ;;  %v4590_v3 = vpop.f32.mrb[107].mxu1 }
 0x3f6   : > { %7611 = vst [vmem:[%s11978_s11 + $0x338] sm:$0xff] %v7483_v32  ;;  %v6797_v59 = vpop.f32.mrb[104].mxu0 }
 0x3f7   : > { %v8865_v27 = vadd.f32 %v6797_v59, %v4584_v14  ;;  %v6799_v45 = vpop.f32.mrb[105].mxu0 }
 0x3f8   : > { %v8866_v47 = vadd.f32 %v6799_v45, %v4586_v40  ;;  %v6801_v48 = vpop.f32.mrb[106].mxu0 }
 0x3f9   : > { %v7484_v62 = vadd.f32 %v8865_v27, %v11971_v28  ;;  %v8867_v35 = vadd.f32 %v6801_v48, %v4588_v53  ;;  %v6803_v57 = vpop.f32.mrb[107].mxu0 }
 0x3fa   : > { %v7485_v22 = vadd.f32 %v8866_v47, %v11973_v34  ;;  %v8868_v37 = vadd.f32 %v6803_v57, %v4590_v3  ;;  %v4594_v42 = vpop.f32.mrb[108].mxu1 }
 0x3fb   : > { %7612 = vst [vmem:[%s11978_s11 + $0x340] sm:$0xff] %v7484_v62  ;;  %v7486_v56 = vadd.f32 %v8867_v35, %v11971_v28  ;;  %v4596_v50 = vpop.f32.mrb[109].mxu1 }
 0x3fc   : > { %7613 = vst [vmem:[%s11978_s11 + $0x348] sm:$0xff] %v7485_v22  ;;  %v7487_v1 = vadd.f32 %v8868_v37, %v11973_v34  ;;  %v4598_v16 = vpop.f32.mrb[110].mxu1 }
 0x3fd   : > { %7614 = vst [vmem:[%s11978_s11 + $0x350] sm:$0xff] %v7486_v56  ;;  %v4600_v31 = vpop.f32.mrb[111].mxu1 }
 0x3fe   : > { %7615 = vst [vmem:[%s11978_s11 + $0x358] sm:$0xff] %v7487_v1  ;;  %v6807_v58 = vpop.f32.mrb[108].mxu0 }
 0x3ff   : > { %v8869_v12 = vadd.f32 %v6807_v58, %v4594_v42  ;;  %v6809_v20 = vpop.f32.mrb[109].mxu0 }
 0x400   : > { %v8870_v43 = vadd.f32 %v6809_v20, %v4596_v50  ;;  %v6811_v46 = vpop.f32.mrb[110].mxu0 }
 0x401   : > { %v7488_v7 = vadd.f32 %v8869_v12, %v11971_v28  ;;  %v8871_v8 = vadd.f32 %v6811_v46, %v4598_v16  ;;  %v6813_v6 = vpop.f32.mrb[111].mxu0 }
 0x402   : > { %v7489_v30 = vadd.f32 %v8870_v43, %v11973_v34  ;;  %v8872_v33 = vadd.f32 %v6813_v6, %v4600_v31  ;;  %v4604_v19 = vpop.f32.mrb[112].mxu1 }
 0x403   : > { %7616 = vst [vmem:[%s11978_s11 + $0x360] sm:$0xff] %v7488_v7  ;;  %v7490_v13 = vadd.f32 %v8871_v8, %v11971_v28  ;;  %v4606_v60 = vpop.f32.mrb[113].mxu1 }
 0x404   : > { %7617 = vst [vmem:[%s11978_s11 + $0x368] sm:$0xff] %v7489_v30  ;;  %v7491_v49 = vadd.f32 %v8872_v33, %v11973_v34  ;;  %v4608_v11 = vpop.f32.mrb[114].mxu1 }
 0x405   : > { %7618 = vst [vmem:[%s11978_s11 + $0x370] sm:$0xff] %v7490_v13  ;;  %v4610_v38 = vpop.f32.mrb[115].mxu1 }
 0x406   : > { %7619 = vst [vmem:[%s11978_s11 + $0x378] sm:$0xff] %v7491_v49  ;;  %v6817_v61 = vpop.f32.mrb[112].mxu0 }
 0x407   : > { %v8873_v29 = vadd.f32 %v6817_v61, %v4604_v19  ;;  %v6819_v54 = vpop.f32.mrb[113].mxu0 }
 0x408   : > { %v8874_v51 = vadd.f32 %v6819_v54, %v4606_v60  ;;  %v6821_v23 = vpop.f32.mrb[114].mxu0 }
 0x409   : > { %v7492_v55 = vadd.f32 %v8873_v29, %v11971_v28  ;;  %v8875_v18 = vadd.f32 %v6821_v23, %v4608_v11  ;;  %v6823_v5 = vpop.f32.mrb[115].mxu0 }
 0x40a   : > { %v7493_v15 = vadd.f32 %v8874_v51, %v11973_v34  ;;  %v8876_v2 = vadd.f32 %v6823_v5, %v4610_v38  ;;  %v4614_v52 = vpop.f32.mrb[116].mxu1 }
 0x40b   : > { %7620 = vst [vmem:[%s11978_s11 + $0x380] sm:$0xff] %v7492_v55  ;;  %v7494_v24 = vadd.f32 %v8875_v18, %v11971_v28  ;;  %v4616_v10 = vpop.f32.mrb[117].mxu1 }
 0x40c   : > { %7621 = vst [vmem:[%s11978_s11 + $0x388] sm:$0xff] %v7493_v15  ;;  %v7495_v4 = vadd.f32 %v8876_v2, %v11973_v34  ;;  %v4618_v25 = vpop.f32.mrb[118].mxu1 }
 0x40d   : > { %7622 = vst [vmem:[%s11978_s11 + $0x390] sm:$0xff] %v7494_v24  ;;  %v4620_v44 = vpop.f32.mrb[119].mxu1 }
 0x40e   : > { %7623 = vst [vmem:[%s11978_s11 + $0x398] sm:$0xff] %v7495_v4  ;;  %v6827_v17 = vpop.f32.mrb[116].mxu0 }
 0x40f   : > { %v8877_v0 = vadd.f32 %v6827_v17, %v4614_v52  ;;  %v6829_v41 = vpop.f32.mrb[117].mxu0 }
 0x410   : > { %v8878_v36 = vadd.f32 %v6829_v41, %v4616_v10  ;;  %v6831_v9 = vpop.f32.mrb[118].mxu0 }
 0x411   : > { %v7496_v21 = vadd.f32 %v8877_v0, %v11971_v28  ;;  %v8879_v63 = vadd.f32 %v6831_v9, %v4618_v25  ;;  %v6833_v26 = vpop.f32.mrb[119].mxu0 }
 0x412   : > { %v7497_v39 = vadd.f32 %v8878_v36, %v11973_v34  ;;  %v8880_v32 = vadd.f32 %v6833_v26, %v4620_v44  ;;  %v4624_v59 = vpop.f32.mrb[120].mxu1 }
 0x413   : > { %7624 = vst [vmem:[%s11978_s11 + $0x3a0] sm:$0xff] %v7496_v21  ;;  %v7498_v14 = vadd.f32 %v8879_v63, %v11971_v28  ;;  %v4626_v53 = vpop.f32.mrb[121].mxu1 }
 0x414   : > { %7625 = vst [vmem:[%s11978_s11 + $0x3a8] sm:$0xff] %v7497_v39  ;;  %v7499_v40 = vadd.f32 %v8880_v32, %v11973_v34  ;;  %v4628_v45 = vpop.f32.mrb[122].mxu1 }
 0x415   : > { %7626 = vst [vmem:[%s11978_s11 + $0x3b0] sm:$0xff] %v7498_v14  ;;  %v4630_v48 = vpop.f32.mrb[123].mxu1 }
 0x416   : > { %7627 = vst [vmem:[%s11978_s11 + $0x3b8] sm:$0xff] %v7499_v40  ;;  %v6837_v27 = vpop.f32.mrb[120].mxu0 }
 0x417   : > { %v8881_v3 = vadd.f32 %v6837_v27, %v4624_v59  ;;  %v6839_v47 = vpop.f32.mrb[121].mxu0 }
 0x418   : > { %v8882_v62 = vadd.f32 %v6839_v47, %v4626_v53  ;;  %v6841_v35 = vpop.f32.mrb[122].mxu0 }
 0x419   : > { %v7500_v57 = vadd.f32 %v8881_v3, %v11971_v28  ;;  %v8883_v22 = vadd.f32 %v6841_v35, %v4628_v45  ;;  %v6843_v37 = vpop.f32.mrb[123].mxu0 }
 0x41a   : > { %v7501_v56 = vadd.f32 %v8882_v62, %v11973_v34  ;;  %v8884_v1 = vadd.f32 %v6843_v37, %v4630_v48  ;;  %v4634_v58 = vpop.f32.mrb[124].mxu1 }
 0x41b   : > { %7628 = vst [vmem:[%s11978_s11 + $0x3c0] sm:$0xff] %v7500_v57  ;;  %v7502_v42 = vadd.f32 %v8883_v22, %v11971_v28  ;;  %v4636_v16 = vpop.f32.mrb[125].mxu1 }
 0x41c   : > { %7629 = vst [vmem:[%s11978_s11 + $0x3c8] sm:$0xff] %v7501_v56  ;;  %v7503_v50 = vadd.f32 %v8884_v1, %v11973_v34  ;;  %v4638_v20 = vpop.f32.mrb[126].mxu1 }
 0x41d   : > { %7630 = vst [vmem:[%s11978_s11 + $0x3d0] sm:$0xff] %v7502_v42  ;;  %v4640_v46 = vpop.f32.mrb[127].mxu1 }
 0x41e   : > { %7631 = vst [vmem:[%s11978_s11 + $0x3d8] sm:$0xff] %v7503_v50  ;;  %v6847_v12 = vpop.f32.mrb[124].mxu0 }
 0x41f   : > { %v8885_v31 = vadd.f32 %v6847_v12, %v4634_v58  ;;  %v6849_v43 = vpop.f32.mrb[125].mxu0 }
 0x420   : > { %v8886_v7 = vadd.f32 %v6849_v43, %v4636_v16  ;;  %v6851_v8 = vpop.f32.mrb[126].mxu0 }
 0x421   : > { %v7504_v6 = vadd.f32 %v8885_v31, %v11971_v28  ;;  %v8887_v30 = vadd.f32 %v6851_v8, %v4638_v20  ;;  %v6853_v33 = vpop.f32.mrb[127].mxu0 }
 0x422   : > { %v7505_v13 = vadd.f32 %v8886_v7, %v11973_v34  ;;  %v8888_v49 = vadd.f32 %v6853_v33, %v4640_v46 }
 0x423   : > { %7632 = vst [vmem:[%s11978_s11 + $0x3e0] sm:$0xff] %v7504_v6  ;;  %v7506_v19 = vadd.f32 %v8887_v30, %v11971_v28 }
 0x424   : > { %7633 = vst [vmem:[%s11978_s11 + $0x3e8] sm:$0xff] %v7505_v13  ;;  %v7507_v60 = vadd.f32 %v8888_v49, %v11973_v34 }
 0x425   : > { %7634 = vst [vmem:[%s11978_s11 + $0x3f0] sm:$0xff] %v7506_v19 }
 0x426   : > { %7635 = vst [vmem:[%s11978_s11 + $0x3f8] sm:$0xff] %v7507_v60 }
 0x427 PF: > { %s13_s12 = sadd.s32 1, %s9705_s12  }
 0x428   : > { %p10_p4 = scmp.ge.s32.totalorder %s13_s12, 4  }
 0x42a   :  { %12 = sbr.rel (!%p10_p4) target bundleno = 1 (0x1), region = 67 }

</bundles_post_ra>
